<compile_context>
chip_gen: v7x
topology: tpu7x:2x2x1
jax: 0.10.0
libtpu: 0.0.40
codegen_flags: <defaults>
</compile_context>

<pallas_src>
import functools
import math

import jax
import jax.numpy as jnp
from jax.experimental import pallas as pl
from jax.experimental.pallas import tpu as pltpu


# ---------------------------------------------------------------------------
# Helpers
# ---------------------------------------------------------------------------
def _round_up(x, m):
    return ((x + m - 1) // m) * m


def _largest_divisor(n, cap):
    cap = max(1, min(cap, n))
    for d in range(cap, 0, -1):
        if n % d == 0:
            return d
    return 1


def _pick_tile(dim, cap, align):
    """Tile for `dim`: full extent if small; else an `align`-multiple divisor;
    else an `align`-multiple cap (padding fallback, unused in the normal flow)."""
    if dim <= cap:
        return dim
    t = (cap // align) * align
    while t >= align:
        if dim % t == 0:
            return t
        t -= align
    return (cap // align) * align


def _pick_lane_tile(b, cap):
    if b <= cap:
        return b
    t = (cap // 128) * 128
    while t >= 128:
        if b % t == 0:
            return t
        t -= 128
    return b  # full extent fallback keeps the (8,128) rule satisfied


def _fold_bn(bn, eps=1e-5):
    gamma, beta, mean, var = bn
    scale = gamma / jnp.sqrt(var + eps)
    bias = beta - mean * scale
    return scale.astype(jnp.float32), bias.astype(jnp.float32)


# ---------------------------------------------------------------------------
# Generic tiled matmul kernel: (A @ B) * scale + bias [+ residual] [+ ReLU]
# ---------------------------------------------------------------------------
def _mm_kernel(a_ref, b_ref, s_ref, c_ref, *rest, relu, has_residual):
    if has_residual:
        r_ref, o_ref, acc_ref = rest
    else:
        r_ref = None
        o_ref, acc_ref = rest

    @pl.when(pl.program_id(2) == 0)
    def _init():
        acc_ref[...] = jnp.zeros_like(acc_ref)

    acc_ref[...] += jnp.dot(a_ref[...], b_ref[...],
                            preferred_element_type=jnp.float32)

    @pl.when(pl.program_id(2) == pl.num_programs(2) - 1)
    def _finalize():
        out = acc_ref[...] * s_ref[...] + c_ref[...]
        if has_residual:
            out = out + r_ref[...].astype(jnp.float32)
        if relu:
            out = jnp.maximum(out, 0.0)
        o_ref[...] = out.astype(o_ref.dtype)


def pallas_matmul_fused(a, b, scale=None, bias=None, residual=None, *,
                        relu=False, out_dtype=None,
                        tm_cap=512, tn_cap=512, tk_cap=512):
    """out = maybe_relu((a @ b) * scale + bias + residual); per-column scale/bias."""
    m, k = a.shape
    k2, n = b.shape
    assert k == k2
    out_dtype = out_dtype or a.dtype
    if scale is None:
        scale = jnp.ones((n,), jnp.float32)
    if bias is None:
        bias = jnp.zeros((n,), jnp.float32)

    tm = _pick_tile(m, tm_cap, 8)
    tn = _pick_tile(n, tn_cap, 128)
    tk = _pick_tile(k, tk_cap, 128)
    mp, np_, kp = _round_up(m, tm), _round_up(n, tn), _round_up(k, tk)

    # v7x has two TensorCores: make sure at least two parallel blocks exist.
    if (mp // tm) * (np_ // tn) < 2 and tm == m and m >= 16 and m % 16 == 0:
        tm = m // 2

    a_p = a if (mp == m and kp == k) else jnp.pad(a, ((0, mp - m), (0, kp - k)))
    b_p = b if (kp == k and np_ == n) else jnp.pad(b, ((0, kp - k), (0, np_ - n)))
    s_p = scale.astype(jnp.float32).reshape(1, n)
    c_p = bias.astype(jnp.float32).reshape(1, n)
    if np_ != n:
        s_p = jnp.pad(s_p, ((0, 0), (0, np_ - n)))
        c_p = jnp.pad(c_p, ((0, 0), (0, np_ - n)))

    has_residual = residual is not None
    operands = [a_p, b_p, s_p, c_p]
    in_specs = [
        pl.BlockSpec((tm, tk), lambda i, j, l: (i, l)),
        pl.BlockSpec((tk, tn), lambda i, j, l: (l, j)),
        pl.BlockSpec((1, tn), lambda i, j, l: (0, j)),
        pl.BlockSpec((1, tn), lambda i, j, l: (0, j)),
    ]
    if has_residual:
        r_p = residual
        if mp != m or np_ != n:
            r_p = jnp.pad(residual, ((0, mp - m), (0, np_ - n)))
        operands.append(r_p)
        in_specs.append(pl.BlockSpec((tm, tn), lambda i, j, l: (i, j)))

    grid = (mp // tm, np_ // tn, kp // tk)
    a_bytes = jnp.dtype(a.dtype).itemsize
    b_bytes = jnp.dtype(b.dtype).itemsize
    o_bytes = jnp.dtype(out_dtype).itemsize
    cost = pl.CostEstimate(
        flops=2 * mp * np_ * kp,
        transcendentals=0,
        bytes_accessed=(a_bytes * mp * kp * grid[1]      # A re-read per N block
                        + b_bytes * kp * np_ * grid[0]   # B re-read per M block
                        + o_bytes * mp * np_),
    )

    out = pl.pallas_call(
        functools.partial(_mm_kernel, relu=relu, has_residual=has_residual),
        out_shape=jax.ShapeDtypeStruct((mp, np_), out_dtype),
        grid_spec=pltpu.PrefetchScalarGridSpec(
            num_scalar_prefetch=0,
            grid=grid,
            in_specs=in_specs,
            out_specs=pl.BlockSpec((tm, tn), lambda i, j, l: (i, j)),
            scratch_shapes=[pltpu.VMEM((tm, tn), jnp.float32)],
        ),
        compiler_params=pltpu.CompilerParams(
            dimension_semantics=("parallel", "parallel", "arbitrary")),
        cost_estimate=cost,
    )(*operands)
    if mp != m or np_ != n:
        out = out[:m, :n]
    return out


# ---------------------------------------------------------------------------
# Per-axis linear interpolation (integer scale): pure-VPU 2-tap lerp kernel.
# Input viewed as (A, L, B); outputs one array per phase, interleaved by XLA.
# ---------------------------------------------------------------------------
def _axis_lerp_kernel(x_ref, *o_refs, scale):
    x = x_ref[...].astype(jnp.float32)            # (ta, L, tb) — f32 blend math
    if x.shape[1] > 1:
        xp = jnp.concatenate([x[:, :1], x[:, :-1]], axis=1)   # x[max(m-1, 0)]
        xn = jnp.concatenate([x[:, 1:], x[:, -1:]], axis=1)   # x[min(m+1, L-1)]
    else:
        xp = x
        xn = x
    for p in range(scale):
        delta = (p + 0.5) / scale - 0.5           # PyTorch half-pixel centres
        if delta >= 0.0:
            ph = x + delta * (xn - x)
        else:
            lam = 1.0 + delta
            ph = xp + lam * (x - xp)
        o_refs[p][...] = ph.astype(o_refs[p].dtype)


def _interp_axis_pallas(x3, s):
    """x3: (A, L, B) -> (A, L*s, B), PyTorch trilinear/half-pixel along axis 1."""
    if s == 1:
        return x3
    a, l, b = x3.shape
    tb = _pick_lane_tile(b, 4096)
    ta = _largest_divisor(a, max(1, (128 * 1024) // (l * tb)))
    if (a // ta) * (b // tb) < 2 and ta % 2 == 0:   # keep both v7x cores busy
        ta //= 2
    grid = (a // ta, b // tb)

    outs = pl.pallas_call(
        functools.partial(_axis_lerp_kernel, scale=s),
        out_shape=tuple(jax.ShapeDtypeStruct((a, l, b), x3.dtype)
                        for _ in range(s)),
        grid_spec=pltpu.PrefetchScalarGridSpec(
            num_scalar_prefetch=0,
            grid=grid,
            in_specs=[pl.BlockSpec((ta, l, tb), lambda i, j: (i, 0, j))],
            out_specs=tuple(pl.BlockSpec((ta, l, tb), lambda i, j: (i, 0, j))
                            for _ in range(s)),
        ),
        compiler_params=pltpu.CompilerParams(
            dimension_semantics=("parallel", "parallel")),
    )(x3)
    # Interleave the s phases along the axis (single XLA copy).
    return jnp.stack(outs, axis=2).reshape(a, l * s, b)


def interp_trilinear_cl(x5, s):
    """Channels-last trilinear upsample: (N, D, H, W, C) -> (N, sD, sH, sW, C)."""
    n, d, h, w, c = x5.shape
    y = _interp_axis_pallas(x5.reshape(n * d * h, w, c), s)            # W axis
    w2 = w * s
    y = _interp_axis_pallas(y.reshape(n * d, h, w2 * c), s)            # H axis
    h2 = h * s
    y = _interp_axis_pallas(y.reshape(n, d, h2 * w2 * c), s)           # D axis
    return y.reshape(n, d * s, h2, w2, c)


# ---------------------------------------------------------------------------
# Fused 3x3x3 conv + BN + ReLU kernel (channels-last, no im2col).
# Grid = (N, D, 3); the D-tap is a reduction axis (shifted index_map + pl.when
# edge masking); the 9 H/W taps are in-register sublane shifts + masks.
# ---------------------------------------------------------------------------
def _conv3x3_kernel(x_ref, w_ref, s_ref, b_ref, o_ref, acc_ref, *,
                    dd, hh, ww, cin, cout):
    di = pl.program_id(1)
    kd = pl.program_id(2)

    @pl.when(kd == 0)
    def _init():
        acc_ref[...] = jnp.zeros_like(acc_ref)

    src_d = di + kd - 1

    @pl.when(jnp.logical_and(src_d >= 0, src_d < dd))
    def _accumulate():
        x2 = x_ref[0, 0]                                     # (hh*ww, cin)
        rows = hh * ww
        wpos = jax.lax.broadcasted_iota(jnp.int32, (rows, cin), 0) % ww
        acc = jnp.zeros((rows, cout), jnp.float32)
        for kh in range(3):
            for kw in range(3):
                off = (kh - 1) * ww + (kw - 1)
                if off > 0:
                    xs = jnp.concatenate(
                        [x2[off:], jnp.zeros((off, cin), x2.dtype)], axis=0)
                elif off < 0:
                    xs = jnp.concatenate(
                        [jnp.zeros((-off, cin), x2.dtype), x2[:off]], axis=0)
                else:
                    xs = x2
                if kw == 2:        # w + 1 out of range at the right edge
                    xs = jnp.where(wpos == ww - 1, jnp.zeros_like(xs), xs)
                elif kw == 0:      # w - 1 out of range at the left edge
                    xs = jnp.where(wpos == 0, jnp.zeros_like(xs), xs)
                acc += jnp.dot(xs, w_ref[0, kh, kw],
                               preferred_element_type=jnp.float32)
        acc_ref[...] += acc

    @pl.when(kd == pl.num_programs(2) - 1)
    def _finalize():
        out = acc_ref[...] * s_ref[...] + b_ref[...]
        out = jnp.maximum(out, 0.0)
        o_ref[0, 0] = out.astype(o_ref.dtype)


def conv3x3_bn_relu(x5, w, bn):
    """x5: (N, D, H, W, Cin) channels-last; w: (Cout, Cin, 3, 3, 3).
    Returns (N*D*H*W, Cout) flattened channels-last."""
    n, d, h, wsp, cin = x5.shape
    cout = w.shape[0]
    dtype = x5.dtype
    scale, bias = _fold_bn(bn)
    wt = jnp.transpose(w, (2, 3, 4, 1, 0)).astype(dtype)     # (3, 3, 3, Cin, Cout)
    rows = h * wsp
    x4 = x5.reshape(n, d, rows, cin)

    itemsize = jnp.dtype(dtype).itemsize
    cost = pl.CostEstimate(
        flops=2 * n * d * rows * 27 * cin * cout,
        transcendentals=0,
        bytes_accessed=itemsize * (3 * n * d * rows * cin + 27 * cin * cout
                                   + n * d * rows * cout),
    )

    out = pl.pallas_call(
        functools.partial(_conv3x3_kernel, dd=d, hh=h, ww=wsp,
                          cin=cin, cout=cout),
        out_shape=jax.ShapeDtypeStruct((n, d, rows, cout), dtype),
        grid_spec=pltpu.PrefetchScalarGridSpec(
            num_scalar_prefetch=0,
            grid=(n, d, 3),
            in_specs=[
                pl.BlockSpec((1, 1, rows, cin),
                             lambda ni, di, kd: (ni, jnp.clip(di + kd - 1, 0, d - 1),
                                                 0, 0)),
                pl.BlockSpec((1, 3, 3, cin, cout),
                             lambda ni, di, kd: (kd, 0, 0, 0, 0)),
                pl.BlockSpec((1, cout), lambda ni, di, kd: (0, 0)),
                pl.BlockSpec((1, cout), lambda ni, di, kd: (0, 0)),
            ],
            out_specs=pl.BlockSpec((1, 1, rows, cout),
                                   lambda ni, di, kd: (ni, di, 0, 0)),
            scratch_shapes=[pltpu.VMEM((rows, cout), jnp.float32)],
        ),
        compiler_params=pltpu.CompilerParams(
            dimension_semantics=("parallel", "parallel", "arbitrary")),
        cost_estimate=cost,
    )(x4, wt, scale.reshape(1, cout), bias.reshape(1, cout))
    return out.reshape(n * d * rows, cout)


# ---------------------------------------------------------------------------
# DecoderBottleneck forward.
# ---------------------------------------------------------------------------
def decoder_bottleneck_forward(x, conv1_w, bn1, conv2_w, bn2, conv3_w, bn3,
                               up_conv_w, up_bn, *, scale=1,
                               compute_dtype=jnp.bfloat16):
    n, cin, d, h, w = x.shape
    width = conv1_w.shape[0]
    cexp = conv3_w.shape[0]
    s = int(scale)
    assert s == scale, "only integer scale factors are supported"  # TODO(synk)
    d2, h2, w2 = (d * s, h * s, w * s) if s != 1 else (d, h, w)

    # One transpose to channels-last at block entry; bf16 compute dtype.
    x_cl = jnp.transpose(x, (0, 2, 3, 4, 1)).astype(compute_dtype)   # (N,D,H,W,Cin)

    # conv1 (1x1) + bn1 + relu on flattened rows.
    h1 = pallas_matmul_fused(x_cl.reshape(-1, cin),
                             jnp.transpose(conv1_w).astype(compute_dtype),
                             *_fold_bn(bn1), relu=True)              # (rows, width)

    # resize_conv3x3: trilinear upsample (per-axis VPU lerp), then 3x3x3 conv.
    h1 = h1.reshape(n, d, h, w, width)
    if s != 1:
        h1 = interp_trilinear_cl(h1, s)                              # (N,D2,H2,W2,width)
    h2r = conv3x3_bn_relu(h1, conv2_w, bn2)                          # (rows2, width)

    # identity / upsample path (interp commutes with 1x1 conv, keep original order).
    if up_conv_w is not None:
        idn = x_cl
        if s != 1:
            idn = interp_trilinear_cl(idn, s)                        # (N,D2,H2,W2,Cin)
        idn = pallas_matmul_fused(idn.reshape(-1, cin),
                                  jnp.transpose(up_conv_w).astype(compute_dtype),
                                  *_fold_bn(up_bn), relu=False)      # (rows2, cexp)
    else:
        idn = x_cl.reshape(-1, cin)   # requires scale == 1 and cin == cexp

    # conv3 (1x1) + bn3 with fused residual add + final ReLU in the epilogue.
    out = pallas_matmul_fused(h2r,
                              jnp.transpose(conv3_w).astype(compute_dtype),
                              *_fold_bn(bn3), residual=idn, relu=True,
                              out_dtype=jnp.float32)                 # (rows2, cexp)

    out = out.reshape(n, d2, h2, w2, cexp)
    return jnp.transpose(out, (0, 4, 1, 2, 3))                       # NCDHW out


# ---------------------------------------------------------------------------
# Pure-JAX reference (f32, high precision) for correctness checking.
# ---------------------------------------------------------------------------
def _linear_interp_matrix(in_size, out_size):
    if out_size == in_size:
        return jnp.eye(out_size, dtype=jnp.float32)
    scale = in_size / out_size
    o = jnp.arange(out_size, dtype=jnp.float32)
    src = jnp.maximum((o + 0.5) * scale - 0.5, 0.0)
    i0 = jnp.clip(jnp.floor(src).astype(jnp.int32), 0, in_size - 1)
    i1 = jnp.minimum(i0 + 1, in_size - 1)
    lam = jnp.clip(src - i0.astype(jnp.float32), 0.0, 1.0)
    rows = jnp.arange(out_size)
    m = jnp.zeros((out_size, in_size), jnp.float32)
    m = m.at[rows, i0].add(1.0 - lam)
    m = m.at[rows, i1].add(lam)
    return m


def _reference_forward(x, conv1_w, bn1, conv2_w, bn2, conv3_w, bn3,
                       up_conv_w, up_bn, scale):
    hi = jax.lax.Precision.HIGHEST

    def bn(y, p):
        g, b, m, v = p
        inv = g / jnp.sqrt(v + 1e-5)
        return (y * inv[None, :, None, None, None]
                + (b - m * inv)[None, :, None, None, None])

    def interp(y, s):
        _, _, dd, hh, ww_ = y.shape
        md = _linear_interp_matrix(dd, int(dd * s))
        mh = _linear_interp_matrix(hh, int(hh * s))
        mw = _linear_interp_matrix(ww_, int(ww_ * s))
        return jnp.einsum('rd,qh,pw,ncdhw->ncrqp', md, mh, mw, y, precision=hi)

    out = jnp.einsum('ncdhw,oc->nodhw', x, conv1_w, precision=hi)
    out = jnp.maximum(bn(out, bn1), 0.0)
    if scale != 1:
        out = interp(out, scale)
    out = jax.lax.conv_general_dilated(
        out, conv2_w, (1, 1, 1), ((1, 1), (1, 1), (1, 1)),
        dimension_numbers=('NCDHW', 'OIDHW', 'NCDHW'), precision=hi)
    out = jnp.maximum(bn(out, bn2), 0.0)
    out = jnp.einsum('ncdhw,oc->nodhw', out, conv3_w, precision=hi)
    out = bn(out, bn3)
    identity = x
    if scale != 1:
        identity = interp(identity, scale)
    identity = jnp.einsum('ncdhw,oc->nodhw', identity, up_conv_w, precision=hi)
    identity = bn(identity, up_bn)
    return jnp.maximum(out + identity, 0.0)


if __name__ == "__main__":
    key = jax.random.PRNGKey(0)
    keys = jax.random.split(key, 9)

    # Small shapes consistent with DecoderBottleneck(inplanes=16, planes=8, scale=2).
    n, inplanes, planes, scale = 2, 16, 8, 2
    expansion = 4
    width = planes
    cexp = planes * expansion
    d, h, w = 4, 8, 8

    x = jax.random.normal(keys[0], (n, inplanes, d, h, w), jnp.float32)

    def rand_w(k, shape, fan_in):
        return jax.random.normal(k, shape, jnp.float32) / math.sqrt(fan_in)

    conv1_w = rand_w(keys[1], (width, inplanes), inplanes)          # 1x1
    conv2_w = rand_w(keys[2], (width, width, 3, 3, 3), width * 27)  # 3x3x3
    conv3_w = rand_w(keys[3], (cexp, width), width)                 # 1x1
    up_w = rand_w(keys[4], (cexp, inplanes), inplanes)              # upsample 1x1

    def rand_bn(k, ch):
        k1, k2, k3, k4 = jax.random.split(k, 4)
        return (jax.random.uniform(k1, (ch,), jnp.float32, 0.5, 1.5),
                jax.random.normal(k2, (ch,), jnp.float32) * 0.1,
                jax.random.normal(k3, (ch,), jnp.float32) * 0.1,
                jax.random.uniform(k4, (ch,), jnp.float32, 0.5, 1.5))

    bn1 = rand_bn(keys[5], width)
    bn2 = rand_bn(keys[6], width)
    bn3 = rand_bn(keys[7], cexp)
    up_bn = rand_bn(keys[8], cexp)

    fwd = jax.jit(functools.partial(decoder_bottleneck_forward, scale=scale))
    out = fwd(x, conv1_w, bn1, conv2_w, bn2, conv3_w, bn3, up_w, up_bn)
    out = jax.block_until_ready(out)

    ref = _reference_forward(x, conv1_w, bn1, conv2_w, bn2, conv3_w, bn3,
                             up_w, up_bn, scale)

    assert out.shape == (n, cexp, d * scale, h * scale, w * scale), out.shape
    # bf16 activations/weights with f32 accumulation: relaxed tolerance.
    assert jnp.allclose(out, ref, atol=5e-2, rtol=5e-2), (
        "mismatch vs reference: max abs err "
        f"{float(jnp.max(jnp.abs(out - ref)))}")

    print("KERNEL_OK")
</pallas_src>

<mosaic_0001>
module attributes {stable_mosaic.version = 11 : i64} {
  func.func @_axis_lerp_kernel(%arg0: i32, %arg1: i32, %arg2: memref<32x8x8xbf16, #tpu.memory_space<vmem>>, %arg3: memref<32x8x8xbf16, #tpu.memory_space<vmem>>, %arg4: memref<32x8x8xbf16, #tpu.memory_space<vmem>>) attributes {dimension_semantics = [#tpu.dimension_semantics<parallel>, #tpu.dimension_semantics<parallel>], iteration_bounds = array<i64: 2, 1>, scalar_prefetch = 0 : i64, scratch_operands = 0 : i64, tpu.core_type = #tpu.core_type<tc>, window_params = [{transform_indices = @transform_0, window_bounds = array<i64: 32, 8, 8>}, {transform_indices = @transform_1, window_bounds = array<i64: 32, 8, 8>}, {transform_indices = @transform_2, window_bounds = array<i64: 32, 8, 8>}]} {
    %c0 = arith.constant 0 : index
    %c0_0 = arith.constant 0 : index
    %c0_1 = arith.constant 0 : index
    %0 = vector.load %arg2[%c0, %c0_0, %c0_1] : memref<32x8x8xbf16, #tpu.memory_space<vmem>>, vector<32x8x8xbf16>
    %1 = arith.extf %0 : vector<32x8x8xbf16> to vector<32x8x8xf32>
    %2 = vector.extract_strided_slice %1 {offsets = [0, 0, 0], sizes = [32, 1, 8], strides = [1, 1, 1]} : vector<32x8x8xf32> to vector<32x1x8xf32>
    %3 = vector.extract_strided_slice %1 {offsets = [0, 0, 0], sizes = [32, 7, 8], strides = [1, 1, 1]} : vector<32x8x8xf32> to vector<32x7x8xf32>
    %4 = tpu.concatenate %2, %3 in 1 : vector<32x1x8xf32>, vector<32x7x8xf32> -> vector<32x8x8xf32>
    %5 = vector.extract_strided_slice %1 {offsets = [0, 1, 0], sizes = [32, 7, 8], strides = [1, 1, 1]} : vector<32x8x8xf32> to vector<32x7x8xf32>
    %6 = vector.extract_strided_slice %1 {offsets = [0, 7, 0], sizes = [32, 1, 8], strides = [1, 1, 1]} : vector<32x8x8xf32> to vector<32x1x8xf32>
    %7 = tpu.concatenate %5, %6 in 1 : vector<32x7x8xf32>, vector<32x1x8xf32> -> vector<32x8x8xf32>
    %8 = arith.subf %1, %4 : vector<32x8x8xf32>
    %cst = arith.constant 7.500000e-01 : f32
    %9 = vector.broadcast %cst : f32 to vector<32x8x8xf32>
    %10 = arith.mulf %9, %8 : vector<32x8x8xf32>
    %11 = arith.addf %4, %10 : vector<32x8x8xf32>
    %12 = arith.truncf %11 : vector<32x8x8xf32> to vector<32x8x8xbf16>
    %c0_2 = arith.constant 0 : index
    %c0_3 = arith.constant 0 : index
    %c0_4 = arith.constant 0 : index
    %13 = vector.load %arg3[%c0_2, %c0_3, %c0_4] : memref<32x8x8xbf16, #tpu.memory_space<vmem>>, vector<32x8x8xbf16>
    tpu.vector_store %arg3[%c0_2, %c0_3, %c0_4], %12 {strides = array<i32>} : memref<32x8x8xbf16, #tpu.memory_space<vmem>>, vector<32x8x8xbf16>,
    %14 = arith.subf %7, %1 : vector<32x8x8xf32>
    %cst_5 = arith.constant 2.500000e-01 : f32
    %15 = vector.broadcast %cst_5 : f32 to vector<32x8x8xf32>
    %16 = arith.mulf %15, %14 : vector<32x8x8xf32>
    %17 = arith.addf %1, %16 : vector<32x8x8xf32>
    %18 = arith.truncf %17 : vector<32x8x8xf32> to vector<32x8x8xbf16>
    %c0_6 = arith.constant 0 : index
    %c0_7 = arith.constant 0 : index
    %c0_8 = arith.constant 0 : index
    %19 = vector.load %arg4[%c0_6, %c0_7, %c0_8] : memref<32x8x8xbf16, #tpu.memory_space<vmem>>, vector<32x8x8xbf16>
    tpu.vector_store %arg4[%c0_6, %c0_7, %c0_8], %18 {strides = array<i32>} : memref<32x8x8xbf16, #tpu.memory_space<vmem>>, vector<32x8x8xbf16>,
    return
  }
  func.func @transform_0(%arg0: i32, %arg1: i32) -> (i32, i32, i32) {
    %c0_i32 = arith.constant 0 : i32
    %c0_i32_0 = arith.constant 0 : i32
    return %arg0, %c0_i32, %arg1 : i32, i32, i32
  }
  func.func @transform_1(%arg0: i32, %arg1: i32) -> (i32, i32, i32) {
    %c0_i32 = arith.constant 0 : i32
    %c0_i32_0 = arith.constant 0 : i32
    return %arg0, %c0_i32, %arg1 : i32, i32, i32
  }
  func.func @transform_2(%arg0: i32, %arg1: i32) -> (i32, i32, i32) {
    %c0_i32 = arith.constant 0 : i32
    %c0_i32_0 = arith.constant 0 : i32
    return %arg0, %c0_i32, %arg1 : i32, i32, i32
  }
}

module attributes {stable_mosaic.version = 11 : i64} {
  func.func @_mm_kernel(%arg0: i32, %arg1: i32, %arg2: i32, %arg3: memref<256x16xbf16, #tpu.memory_space<vmem>>, %arg4: memref<16x8xbf16, #tpu.memory_space<vmem>>, %arg5: memref<1x8xf32, #tpu.memory_space<vmem>>, %arg6: memref<1x8xf32, #tpu.memory_space<vmem>>, %arg7: memref<256x8xbf16, #tpu.memory_space<vmem>>, %arg8: memref<256x8xf32, #tpu.memory_space<vmem>>) attributes {dimension_semantics = [#tpu.dimension_semantics<parallel>, #tpu.dimension_semantics<parallel>, #tpu.dimension_semantics<arbitrary>], iteration_bounds = array<i64: 2, 1, 1>, scalar_prefetch = 0 : i64, scratch_operands = 1 : i64, tpu.core_type = #tpu.core_type<tc>, window_params = [{transform_indices = @transform_0, window_bounds = array<i64: 256, 16>}, {transform_indices = @transform_1, window_bounds = array<i64: 16, 8>}, {transform_indices = @transform_2, window_bounds = array<i64: 1, 8>}, {transform_indices = @transform_3, window_bounds = array<i64: 1, 8>}, {transform_indices = @transform_4, window_bounds = array<i64: 256, 8>}]} {
    %c0_i32 = arith.constant 0 : i32
    %0 = arith.cmpi eq, %arg2, %c0_i32 : i32
    %1 = arith.extui %0 : i1 to i32
    %c0_i32_0 = arith.constant 0 : i32
    %2 = arith.cmpi ne, %1, %c0_i32_0 : i32
    scf.if %2 {
      %cst_10 = arith.constant 0.000000e+00 : f32
      %12 = vector.broadcast %cst_10 : f32 to vector<256x8xf32>
      %c0_11 = arith.constant 0 : index
      %c0_12 = arith.constant 0 : index
      %13 = vector.load %arg8[%c0_11, %c0_12] : memref<256x8xf32, #tpu.memory_space<vmem>>, vector<256x8xf32>
      tpu.vector_store %arg8[%c0_11, %c0_12], %12 {strides = array<i32>} : memref<256x8xf32, #tpu.memory_space<vmem>>, vector<256x8xf32>,
    } else {
    }
    %c0 = arith.constant 0 : index
    %c0_1 = arith.constant 0 : index
    %3 = vector.load %arg8[%c0, %c0_1] : memref<256x8xf32, #tpu.memory_space<vmem>>, vector<256x8xf32>
    %c0_2 = arith.constant 0 : index
    %c0_3 = arith.constant 0 : index
    %4 = vector.load %arg3[%c0_2, %c0_3] : memref<256x16xbf16, #tpu.memory_space<vmem>>, vector<256x16xbf16>
    %c0_4 = arith.constant 0 : index
    %c0_5 = arith.constant 0 : index
    %5 = vector.load %arg4[%c0_4, %c0_5] : memref<16x8xbf16, #tpu.memory_space<vmem>>, vector<16x8xbf16>
    %cst = arith.constant dense<0.000000e+00> : vector<256x8xf32>
    %6 = tpu.matmul %4, %5, %cst {dimension_numbers = #tpu.dot_dimension_numbers<[1], [0], [0], [1], [0, 0, 1, 1], [], []>} : vector<256x16xbf16>, vector<16x8xbf16>, vector<256x8xf32> -> vector<256x8xf32>
    %7 = arith.addf %3, %6 : vector<256x8xf32>
    %c0_6 = arith.constant 0 : index
    %c0_7 = arith.constant 0 : index
    %8 = vector.load %arg8[%c0_6, %c0_7] : memref<256x8xf32, #tpu.memory_space<vmem>>, vector<256x8xf32>
    tpu.vector_store %arg8[%c0_6, %c0_7], %7 {strides = array<i32>} : memref<256x8xf32, #tpu.memory_space<vmem>>, vector<256x8xf32>,
    %c0_i32_8 = arith.constant 0 : i32
    %9 = arith.cmpi eq, %arg2, %c0_i32_8 : i32
    %10 = arith.extui %9 : i1 to i32
    %c0_i32_9 = arith.constant 0 : i32
    %11 = arith.cmpi ne, %10, %c0_i32_9 : i32
    scf.if %11 {
      %c0_10 = arith.constant 0 : index
      %c0_11 = arith.constant 0 : index
      %12 = vector.load %arg8[%c0_10, %c0_11] : memref<256x8xf32, #tpu.memory_space<vmem>>, vector<256x8xf32>
      %c0_12 = arith.constant 0 : index
      %c0_13 = arith.constant 0 : index
      %13 = vector.load %arg5[%c0_12, %c0_13] : memref<1x8xf32, #tpu.memory_space<vmem>>, vector<1x8xf32>
      %14 = vector.broadcast %13 : vector<1x8xf32> to vector<256x8xf32>
      %15 = arith.mulf %12, %14 : vector<256x8xf32>
      %c0_14 = arith.constant 0 : index
      %c0_15 = arith.constant 0 : index
      %16 = vector.load %arg6[%c0_14, %c0_15] : memref<1x8xf32, #tpu.memory_space<vmem>>, vector<1x8xf32>
      %17 = vector.broadcast %16 : vector<1x8xf32> to vector<256x8xf32>
      %18 = arith.addf %15, %17 : vector<256x8xf32>
      %cst_16 = arith.constant 0.000000e+00 : f32
      %19 = vector.broadcast %cst_16 : f32 to vector<256x8xf32>
      %20 = arith.maximumf %18, %19 : vector<256x8xf32>
      %21 = arith.truncf %20 : vector<256x8xf32> to vector<256x8xbf16>
      %c0_17 = arith.constant 0 : index
      %c0_18 = arith.constant 0 : index
      %22 = vector.load %arg7[%c0_17, %c0_18] : memref<256x8xbf16, #tpu.memory_space<vmem>>, vector<256x8xbf16>
      tpu.vector_store %arg7[%c0_17, %c0_18], %21 {strides = array<i32>} : memref<256x8xbf16, #tpu.memory_space<vmem>>, vector<256x8xbf16>,
    } else {
    }
    return
  }
  func.func @transform_0(%arg0: i32, %arg1: i32, %arg2: i32) -> (i32, i32) {
    %c0_i32 = arith.constant 0 : i32
    return %arg0, %arg2 : i32, i32
  }
  func.func @transform_1(%arg0: i32, %arg1: i32, %arg2: i32) -> (i32, i32) {
    %c0_i32 = arith.constant 0 : i32
    return %arg2, %arg1 : i32, i32
  }
  func.func @transform_2(%arg0: i32, %arg1: i32, %arg2: i32) -> (i32, i32) {
    %c0_i32 = arith.constant 0 : i32
    %c0_i32_0 = arith.constant 0 : i32
    return %c0_i32, %arg1 : i32, i32
  }
  func.func @transform_3(%arg0: i32, %arg1: i32, %arg2: i32) -> (i32, i32) {
    %c0_i32 = arith.constant 0 : i32
    %c0_i32_0 = arith.constant 0 : i32
    return %c0_i32, %arg1 : i32, i32
  }
  func.func @transform_4(%arg0: i32, %arg1: i32, %arg2: i32) -> (i32, i32) {
    %c0_i32 = arith.constant 0 : i32
    return %arg0, %arg1 : i32, i32
  }
}

module attributes {stable_mosaic.version = 11 : i64} {
  func.func @_axis_lerp_kernel(%arg0: i32, %arg1: i32, %arg2: memref<4x8x128xbf16, #tpu.memory_space<vmem>>, %arg3: memref<4x8x128xbf16, #tpu.memory_space<vmem>>, %arg4: memref<4x8x128xbf16, #tpu.memory_space<vmem>>) attributes {dimension_semantics = [#tpu.dimension_semantics<parallel>, #tpu.dimension_semantics<parallel>], iteration_bounds = array<i64: 2, 1>, scalar_prefetch = 0 : i64, scratch_operands = 0 : i64, tpu.core_type = #tpu.core_type<tc>, window_params = [{transform_indices = @transform_0, window_bounds = array<i64: 4, 8, 128>}, {transform_indices = @transform_1, window_bounds = array<i64: 4, 8, 128>}, {transform_indices = @transform_2, window_bounds = array<i64: 4, 8, 128>}]} {
    %c0 = arith.constant 0 : index
    %c0_0 = arith.constant 0 : index
    %c0_1 = arith.constant 0 : index
    %0 = vector.load %arg2[%c0, %c0_0, %c0_1] : memref<4x8x128xbf16, #tpu.memory_space<vmem>>, vector<4x8x128xbf16>
    %1 = arith.extf %0 : vector<4x8x128xbf16> to vector<4x8x128xf32>
    %2 = vector.extract_strided_slice %1 {offsets = [0, 0, 0], sizes = [4, 1, 128], strides = [1, 1, 1]} : vector<4x8x128xf32> to vector<4x1x128xf32>
    %3 = vector.extract_strided_slice %1 {offsets = [0, 0, 0], sizes = [4, 7, 128], strides = [1, 1, 1]} : vector<4x8x128xf32> to vector<4x7x128xf32>
    %4 = tpu.concatenate %2, %3 in 1 : vector<4x1x128xf32>, vector<4x7x128xf32> -> vector<4x8x128xf32>
    %5 = vector.extract_strided_slice %1 {offsets = [0, 1, 0], sizes = [4, 7, 128], strides = [1, 1, 1]} : vector<4x8x128xf32> to vector<4x7x128xf32>
    %6 = vector.extract_strided_slice %1 {offsets = [0, 7, 0], sizes = [4, 1, 128], strides = [1, 1, 1]} : vector<4x8x128xf32> to vector<4x1x128xf32>
    %7 = tpu.concatenate %5, %6 in 1 : vector<4x7x128xf32>, vector<4x1x128xf32> -> vector<4x8x128xf32>
    %8 = arith.subf %1, %4 : vector<4x8x128xf32>
    %cst = arith.constant 7.500000e-01 : f32
    %9 = vector.broadcast %cst : f32 to vector<4x8x128xf32>
    %10 = arith.mulf %9, %8 : vector<4x8x128xf32>
    %11 = arith.addf %4, %10 : vector<4x8x128xf32>
    %12 = arith.truncf %11 : vector<4x8x128xf32> to vector<4x8x128xbf16>
    %c0_2 = arith.constant 0 : index
    %c0_3 = arith.constant 0 : index
    %c0_4 = arith.constant 0 : index
    %13 = vector.load %arg3[%c0_2, %c0_3, %c0_4] : memref<4x8x128xbf16, #tpu.memory_space<vmem>>, vector<4x8x128xbf16>
    tpu.vector_store %arg3[%c0_2, %c0_3, %c0_4], %12 {strides = array<i32>} : memref<4x8x128xbf16, #tpu.memory_space<vmem>>, vector<4x8x128xbf16>,
    %14 = arith.subf %7, %1 : vector<4x8x128xf32>
    %cst_5 = arith.constant 2.500000e-01 : f32
    %15 = vector.broadcast %cst_5 : f32 to vector<4x8x128xf32>
    %16 = arith.mulf %15, %14 : vector<4x8x128xf32>
    %17 = arith.addf %1, %16 : vector<4x8x128xf32>
    %18 = arith.truncf %17 : vector<4x8x128xf32> to vector<4x8x128xbf16>
    %c0_6 = arith.constant 0 : index
    %c0_7 = arith.constant 0 : index
    %c0_8 = arith.constant 0 : index
    %19 = vector.load %arg4[%c0_6, %c0_7, %c0_8] : memref<4x8x128xbf16, #tpu.memory_space<vmem>>, vector<4x8x128xbf16>
    tpu.vector_store %arg4[%c0_6, %c0_7, %c0_8], %18 {strides = array<i32>} : memref<4x8x128xbf16, #tpu.memory_space<vmem>>, vector<4x8x128xbf16>,
    return
  }
  func.func @transform_0(%arg0: i32, %arg1: i32) -> (i32, i32, i32) {
    %c0_i32 = arith.constant 0 : i32
    %c0_i32_0 = arith.constant 0 : i32
    return %arg0, %c0_i32, %arg1 : i32, i32, i32
  }
  func.func @transform_1(%arg0: i32, %arg1: i32) -> (i32, i32, i32) {
    %c0_i32 = arith.constant 0 : i32
    %c0_i32_0 = arith.constant 0 : i32
    return %arg0, %c0_i32, %arg1 : i32, i32, i32
  }
  func.func @transform_2(%arg0: i32, %arg1: i32) -> (i32, i32, i32) {
    %c0_i32 = arith.constant 0 : i32
    %c0_i32_0 = arith.constant 0 : i32
    return %arg0, %c0_i32, %arg1 : i32, i32, i32
  }
}

module attributes {stable_mosaic.version = 11 : i64} {
  func.func @_axis_lerp_kernel(%arg0: i32, %arg1: i32, %arg2: memref<1x4x2048xbf16, #tpu.memory_space<vmem>>, %arg3: memref<1x4x2048xbf16, #tpu.memory_space<vmem>>, %arg4: memref<1x4x2048xbf16, #tpu.memory_space<vmem>>) attributes {dimension_semantics = [#tpu.dimension_semantics<parallel>, #tpu.dimension_semantics<parallel>], iteration_bounds = array<i64: 2, 1>, scalar_prefetch = 0 : i64, scratch_operands = 0 : i64, tpu.core_type = #tpu.core_type<tc>, window_params = [{transform_indices = @transform_0, window_bounds = array<i64: 1, 4, 2048>}, {transform_indices = @transform_1, window_bounds = array<i64: 1, 4, 2048>}, {transform_indices = @transform_2, window_bounds = array<i64: 1, 4, 2048>}]} {
    %c0 = arith.constant 0 : index
    %c0_0 = arith.constant 0 : index
    %c0_1 = arith.constant 0 : index
    %0 = vector.load %arg2[%c0, %c0_0, %c0_1] : memref<1x4x2048xbf16, #tpu.memory_space<vmem>>, vector<1x4x2048xbf16>
    %1 = arith.extf %0 : vector<1x4x2048xbf16> to vector<1x4x2048xf32>
    %2 = vector.extract_strided_slice %1 {offsets = [0, 0, 0], sizes = [1, 1, 2048], strides = [1, 1, 1]} : vector<1x4x2048xf32> to vector<1x1x2048xf32>
    %3 = vector.extract_strided_slice %1 {offsets = [0, 0, 0], sizes = [1, 3, 2048], strides = [1, 1, 1]} : vector<1x4x2048xf32> to vector<1x3x2048xf32>
    %4 = tpu.concatenate %2, %3 in 1 : vector<1x1x2048xf32>, vector<1x3x2048xf32> -> vector<1x4x2048xf32>
    %5 = vector.extract_strided_slice %1 {offsets = [0, 1, 0], sizes = [1, 3, 2048], strides = [1, 1, 1]} : vector<1x4x2048xf32> to vector<1x3x2048xf32>
    %6 = vector.extract_strided_slice %1 {offsets = [0, 3, 0], sizes = [1, 1, 2048], strides = [1, 1, 1]} : vector<1x4x2048xf32> to vector<1x1x2048xf32>
    %7 = tpu.concatenate %5, %6 in 1 : vector<1x3x2048xf32>, vector<1x1x2048xf32> -> vector<1x4x2048xf32>
    %8 = arith.subf %1, %4 : vector<1x4x2048xf32>
    %cst = arith.constant 7.500000e-01 : f32
    %9 = vector.broadcast %cst : f32 to vector<1x4x2048xf32>
    %10 = arith.mulf %9, %8 : vector<1x4x2048xf32>
    %11 = arith.addf %4, %10 : vector<1x4x2048xf32>
    %12 = arith.truncf %11 : vector<1x4x2048xf32> to vector<1x4x2048xbf16>
    %c0_2 = arith.constant 0 : index
    %c0_3 = arith.constant 0 : index
    %c0_4 = arith.constant 0 : index
    %13 = vector.load %arg3[%c0_2, %c0_3, %c0_4] : memref<1x4x2048xbf16, #tpu.memory_space<vmem>>, vector<1x4x2048xbf16>
    tpu.vector_store %arg3[%c0_2, %c0_3, %c0_4], %12 {strides = array<i32>} : memref<1x4x2048xbf16, #tpu.memory_space<vmem>>, vector<1x4x2048xbf16>,
    %14 = arith.subf %7, %1 : vector<1x4x2048xf32>
    %cst_5 = arith.constant 2.500000e-01 : f32
    %15 = vector.broadcast %cst_5 : f32 to vector<1x4x2048xf32>
    %16 = arith.mulf %15, %14 : vector<1x4x2048xf32>
    %17 = arith.addf %1, %16 : vector<1x4x2048xf32>
    %18 = arith.truncf %17 : vector<1x4x2048xf32> to vector<1x4x2048xbf16>
    %c0_6 = arith.constant 0 : index
    %c0_7 = arith.constant 0 : index
    %c0_8 = arith.constant 0 : index
    %19 = vector.load %arg4[%c0_6, %c0_7, %c0_8] : memref<1x4x2048xbf16, #tpu.memory_space<vmem>>, vector<1x4x2048xbf16>
    tpu.vector_store %arg4[%c0_6, %c0_7, %c0_8], %18 {strides = array<i32>} : memref<1x4x2048xbf16, #tpu.memory_space<vmem>>, vector<1x4x2048xbf16>,
    return
  }
  func.func @transform_0(%arg0: i32, %arg1: i32) -> (i32, i32, i32) {
    %c0_i32 = arith.constant 0 : i32
    %c0_i32_0 = arith.constant 0 : i32
    return %arg0, %c0_i32, %arg1 : i32, i32, i32
  }
  func.func @transform_1(%arg0: i32, %arg1: i32) -> (i32, i32, i32) {
    %c0_i32 = arith.constant 0 : i32
    %c0_i32_0 = arith.constant 0 : i32
    return %arg0, %c0_i32, %arg1 : i32, i32, i32
  }
  func.func @transform_2(%arg0: i32, %arg1: i32) -> (i32, i32, i32) {
    %c0_i32 = arith.constant 0 : i32
    %c0_i32_0 = arith.constant 0 : i32
    return %arg0, %c0_i32, %arg1 : i32, i32, i32
  }
}

module attributes {stable_mosaic.version = 11 : i64} {
  func.func @_axis_lerp_kernel(%arg0: i32, %arg1: i32, %arg2: memref<32x8x16xbf16, #tpu.memory_space<vmem>>, %arg3: memref<32x8x16xbf16, #tpu.memory_space<vmem>>, %arg4: memref<32x8x16xbf16, #tpu.memory_space<vmem>>) attributes {dimension_semantics = [#tpu.dimension_semantics<parallel>, #tpu.dimension_semantics<parallel>], iteration_bounds = array<i64: 2, 1>, scalar_prefetch = 0 : i64, scratch_operands = 0 : i64, tpu.core_type = #tpu.core_type<tc>, window_params = [{transform_indices = @transform_0, window_bounds = array<i64: 32, 8, 16>}, {transform_indices = @transform_1, window_bounds = array<i64: 32, 8, 16>}, {transform_indices = @transform_2, window_bounds = array<i64: 32, 8, 16>}]} {
    %c0 = arith.constant 0 : index
    %c0_0 = arith.constant 0 : index
    %c0_1 = arith.constant 0 : index
    %0 = vector.load %arg2[%c0, %c0_0, %c0_1] : memref<32x8x16xbf16, #tpu.memory_space<vmem>>, vector<32x8x16xbf16>
    %1 = arith.extf %0 : vector<32x8x16xbf16> to vector<32x8x16xf32>
    %2 = vector.extract_strided_slice %1 {offsets = [0, 0, 0], sizes = [32, 1, 16], strides = [1, 1, 1]} : vector<32x8x16xf32> to vector<32x1x16xf32>
    %3 = vector.extract_strided_slice %1 {offsets = [0, 0, 0], sizes = [32, 7, 16], strides = [1, 1, 1]} : vector<32x8x16xf32> to vector<32x7x16xf32>
    %4 = tpu.concatenate %2, %3 in 1 : vector<32x1x16xf32>, vector<32x7x16xf32> -> vector<32x8x16xf32>
    %5 = vector.extract_strided_slice %1 {offsets = [0, 1, 0], sizes = [32, 7, 16], strides = [1, 1, 1]} : vector<32x8x16xf32> to vector<32x7x16xf32>
    %6 = vector.extract_strided_slice %1 {offsets = [0, 7, 0], sizes = [32, 1, 16], strides = [1, 1, 1]} : vector<32x8x16xf32> to vector<32x1x16xf32>
    %7 = tpu.concatenate %5, %6 in 1 : vector<32x7x16xf32>, vector<32x1x16xf32> -> vector<32x8x16xf32>
    %8 = arith.subf %1, %4 : vector<32x8x16xf32>
    %cst = arith.constant 7.500000e-01 : f32
    %9 = vector.broadcast %cst : f32 to vector<32x8x16xf32>
    %10 = arith.mulf %9, %8 : vector<32x8x16xf32>
    %11 = arith.addf %4, %10 : vector<32x8x16xf32>
    %12 = arith.truncf %11 : vector<32x8x16xf32> to vector<32x8x16xbf16>
    %c0_2 = arith.constant 0 : index
    %c0_3 = arith.constant 0 : index
    %c0_4 = arith.constant 0 : index
    %13 = vector.load %arg3[%c0_2, %c0_3, %c0_4] : memref<32x8x16xbf16, #tpu.memory_space<vmem>>, vector<32x8x16xbf16>
    tpu.vector_store %arg3[%c0_2, %c0_3, %c0_4], %12 {strides = array<i32>} : memref<32x8x16xbf16, #tpu.memory_space<vmem>>, vector<32x8x16xbf16>,
    %14 = arith.subf %7, %1 : vector<32x8x16xf32>
    %cst_5 = arith.constant 2.500000e-01 : f32
    %15 = vector.broadcast %cst_5 : f32 to vector<32x8x16xf32>
    %16 = arith.mulf %15, %14 : vector<32x8x16xf32>
    %17 = arith.addf %1, %16 : vector<32x8x16xf32>
    %18 = arith.truncf %17 : vector<32x8x16xf32> to vector<32x8x16xbf16>
    %c0_6 = arith.constant 0 : index
    %c0_7 = arith.constant 0 : index
    %c0_8 = arith.constant 0 : index
    %19 = vector.load %arg4[%c0_6, %c0_7, %c0_8] : memref<32x8x16xbf16, #tpu.memory_space<vmem>>, vector<32x8x16xbf16>
    tpu.vector_store %arg4[%c0_6, %c0_7, %c0_8], %18 {strides = array<i32>} : memref<32x8x16xbf16, #tpu.memory_space<vmem>>, vector<32x8x16xbf16>,
    return
  }
  func.func @transform_0(%arg0: i32, %arg1: i32) -> (i32, i32, i32) {
    %c0_i32 = arith.constant 0 : i32
    %c0_i32_0 = arith.constant 0 : i32
    return %arg0, %c0_i32, %arg1 : i32, i32, i32
  }
  func.func @transform_1(%arg0: i32, %arg1: i32) -> (i32, i32, i32) {
    %c0_i32 = arith.constant 0 : i32
    %c0_i32_0 = arith.constant 0 : i32
    return %arg0, %c0_i32, %arg1 : i32, i32, i32
  }
  func.func @transform_2(%arg0: i32, %arg1: i32) -> (i32, i32, i32) {
    %c0_i32 = arith.constant 0 : i32
    %c0_i32_0 = arith.constant 0 : i32
    return %arg0, %c0_i32, %arg1 : i32, i32, i32
  }
}

module attributes {stable_mosaic.version = 11 : i64} {
  func.func @_axis_lerp_kernel(%arg0: i32, %arg1: i32, %arg2: memref<4x8x256xbf16, #tpu.memory_space<vmem>>, %arg3: memref<4x8x256xbf16, #tpu.memory_space<vmem>>, %arg4: memref<4x8x256xbf16, #tpu.memory_space<vmem>>) attributes {dimension_semantics = [#tpu.dimension_semantics<parallel>, #tpu.dimension_semantics<parallel>], iteration_bounds = array<i64: 2, 1>, scalar_prefetch = 0 : i64, scratch_operands = 0 : i64, tpu.core_type = #tpu.core_type<tc>, window_params = [{transform_indices = @transform_0, window_bounds = array<i64: 4, 8, 256>}, {transform_indices = @transform_1, window_bounds = array<i64: 4, 8, 256>}, {transform_indices = @transform_2, window_bounds = array<i64: 4, 8, 256>}]} {
    %c0 = arith.constant 0 : index
    %c0_0 = arith.constant 0 : index
    %c0_1 = arith.constant 0 : index
    %0 = vector.load %arg2[%c0, %c0_0, %c0_1] : memref<4x8x256xbf16, #tpu.memory_space<vmem>>, vector<4x8x256xbf16>
    %1 = arith.extf %0 : vector<4x8x256xbf16> to vector<4x8x256xf32>
    %2 = vector.extract_strided_slice %1 {offsets = [0, 0, 0], sizes = [4, 1, 256], strides = [1, 1, 1]} : vector<4x8x256xf32> to vector<4x1x256xf32>
    %3 = vector.extract_strided_slice %1 {offsets = [0, 0, 0], sizes = [4, 7, 256], strides = [1, 1, 1]} : vector<4x8x256xf32> to vector<4x7x256xf32>
    %4 = tpu.concatenate %2, %3 in 1 : vector<4x1x256xf32>, vector<4x7x256xf32> -> vector<4x8x256xf32>
    %5 = vector.extract_strided_slice %1 {offsets = [0, 1, 0], sizes = [4, 7, 256], strides = [1, 1, 1]} : vector<4x8x256xf32> to vector<4x7x256xf32>
    %6 = vector.extract_strided_slice %1 {offsets = [0, 7, 0], sizes = [4, 1, 256], strides = [1, 1, 1]} : vector<4x8x256xf32> to vector<4x1x256xf32>
    %7 = tpu.concatenate %5, %6 in 1 : vector<4x7x256xf32>, vector<4x1x256xf32> -> vector<4x8x256xf32>
    %8 = arith.subf %1, %4 : vector<4x8x256xf32>
    %cst = arith.constant 7.500000e-01 : f32
    %9 = vector.broadcast %cst : f32 to vector<4x8x256xf32>
    %10 = arith.mulf %9, %8 : vector<4x8x256xf32>
    %11 = arith.addf %4, %10 : vector<4x8x256xf32>
    %12 = arith.truncf %11 : vector<4x8x256xf32> to vector<4x8x256xbf16>
    %c0_2 = arith.constant 0 : index
    %c0_3 = arith.constant 0 : index
    %c0_4 = arith.constant 0 : index
    %13 = vector.load %arg3[%c0_2, %c0_3, %c0_4] : memref<4x8x256xbf16, #tpu.memory_space<vmem>>, vector<4x8x256xbf16>
    tpu.vector_store %arg3[%c0_2, %c0_3, %c0_4], %12 {strides = array<i32>} : memref<4x8x256xbf16, #tpu.memory_space<vmem>>, vector<4x8x256xbf16>,
    %14 = arith.subf %7, %1 : vector<4x8x256xf32>
    %cst_5 = arith.constant 2.500000e-01 : f32
    %15 = vector.broadcast %cst_5 : f32 to vector<4x8x256xf32>
    %16 = arith.mulf %15, %14 : vector<4x8x256xf32>
    %17 = arith.addf %1, %16 : vector<4x8x256xf32>
    %18 = arith.truncf %17 : vector<4x8x256xf32> to vector<4x8x256xbf16>
    %c0_6 = arith.constant 0 : index
    %c0_7 = arith.constant 0 : index
    %c0_8 = arith.constant 0 : index
    %19 = vector.load %arg4[%c0_6, %c0_7, %c0_8] : memref<4x8x256xbf16, #tpu.memory_space<vmem>>, vector<4x8x256xbf16>
    tpu.vector_store %arg4[%c0_6, %c0_7, %c0_8], %18 {strides = array<i32>} : memref<4x8x256xbf16, #tpu.memory_space<vmem>>, vector<4x8x256xbf16>,
    return
  }
  func.func @transform_0(%arg0: i32, %arg1: i32) -> (i32, i32, i32) {
    %c0_i32 = arith.constant 0 : i32
    %c0_i32_0 = arith.constant 0 : i32
    return %arg0, %c0_i32, %arg1 : i32, i32, i32
  }
  func.func @transform_1(%arg0: i32, %arg1: i32) -> (i32, i32, i32) {
    %c0_i32 = arith.constant 0 : i32
    %c0_i32_0 = arith.constant 0 : i32
    return %arg0, %c0_i32, %arg1 : i32, i32, i32
  }
  func.func @transform_2(%arg0: i32, %arg1: i32) -> (i32, i32, i32) {
    %c0_i32 = arith.constant 0 : i32
    %c0_i32_0 = arith.constant 0 : i32
    return %arg0, %c0_i32, %arg1 : i32, i32, i32
  }
}

module attributes {stable_mosaic.version = 11 : i64} {
  func.func @_axis_lerp_kernel(%arg0: i32, %arg1: i32, %arg2: memref<1x4x4096xbf16, #tpu.memory_space<vmem>>, %arg3: memref<1x4x4096xbf16, #tpu.memory_space<vmem>>, %arg4: memref<1x4x4096xbf16, #tpu.memory_space<vmem>>) attributes {dimension_semantics = [#tpu.dimension_semantics<parallel>, #tpu.dimension_semantics<parallel>], iteration_bounds = array<i64: 2, 1>, scalar_prefetch = 0 : i64, scratch_operands = 0 : i64, tpu.core_type = #tpu.core_type<tc>, window_params = [{transform_indices = @transform_0, window_bounds = array<i64: 1, 4, 4096>}, {transform_indices = @transform_1, window_bounds = array<i64: 1, 4, 4096>}, {transform_indices = @transform_2, window_bounds = array<i64: 1, 4, 4096>}]} {
    %c0 = arith.constant 0 : index
    %c0_0 = arith.constant 0 : index
    %c0_1 = arith.constant 0 : index
    %0 = vector.load %arg2[%c0, %c0_0, %c0_1] : memref<1x4x4096xbf16, #tpu.memory_space<vmem>>, vector<1x4x4096xbf16>
    %1 = arith.extf %0 : vector<1x4x4096xbf16> to vector<1x4x4096xf32>
    %2 = vector.extract_strided_slice %1 {offsets = [0, 0, 0], sizes = [1, 1, 4096], strides = [1, 1, 1]} : vector<1x4x4096xf32> to vector<1x1x4096xf32>
    %3 = vector.extract_strided_slice %1 {offsets = [0, 0, 0], sizes = [1, 3, 4096], strides = [1, 1, 1]} : vector<1x4x4096xf32> to vector<1x3x4096xf32>
    %4 = tpu.concatenate %2, %3 in 1 : vector<1x1x4096xf32>, vector<1x3x4096xf32> -> vector<1x4x4096xf32>
    %5 = vector.extract_strided_slice %1 {offsets = [0, 1, 0], sizes = [1, 3, 4096], strides = [1, 1, 1]} : vector<1x4x4096xf32> to vector<1x3x4096xf32>
    %6 = vector.extract_strided_slice %1 {offsets = [0, 3, 0], sizes = [1, 1, 4096], strides = [1, 1, 1]} : vector<1x4x4096xf32> to vector<1x1x4096xf32>
    %7 = tpu.concatenate %5, %6 in 1 : vector<1x3x4096xf32>, vector<1x1x4096xf32> -> vector<1x4x4096xf32>
    %8 = arith.subf %1, %4 : vector<1x4x4096xf32>
    %cst = arith.constant 7.500000e-01 : f32
    %9 = vector.broadcast %cst : f32 to vector<1x4x4096xf32>
    %10 = arith.mulf %9, %8 : vector<1x4x4096xf32>
    %11 = arith.addf %4, %10 : vector<1x4x4096xf32>
    %12 = arith.truncf %11 : vector<1x4x4096xf32> to vector<1x4x4096xbf16>
    %c0_2 = arith.constant 0 : index
    %c0_3 = arith.constant 0 : index
    %c0_4 = arith.constant 0 : index
    %13 = vector.load %arg3[%c0_2, %c0_3, %c0_4] : memref<1x4x4096xbf16, #tpu.memory_space<vmem>>, vector<1x4x4096xbf16>
    tpu.vector_store %arg3[%c0_2, %c0_3, %c0_4], %12 {strides = array<i32>} : memref<1x4x4096xbf16, #tpu.memory_space<vmem>>, vector<1x4x4096xbf16>,
    %14 = arith.subf %7, %1 : vector<1x4x4096xf32>
    %cst_5 = arith.constant 2.500000e-01 : f32
    %15 = vector.broadcast %cst_5 : f32 to vector<1x4x4096xf32>
    %16 = arith.mulf %15, %14 : vector<1x4x4096xf32>
    %17 = arith.addf %1, %16 : vector<1x4x4096xf32>
    %18 = arith.truncf %17 : vector<1x4x4096xf32> to vector<1x4x4096xbf16>
    %c0_6 = arith.constant 0 : index
    %c0_7 = arith.constant 0 : index
    %c0_8 = arith.constant 0 : index
    %19 = vector.load %arg4[%c0_6, %c0_7, %c0_8] : memref<1x4x4096xbf16, #tpu.memory_space<vmem>>, vector<1x4x4096xbf16>
    tpu.vector_store %arg4[%c0_6, %c0_7, %c0_8], %18 {strides = array<i32>} : memref<1x4x4096xbf16, #tpu.memory_space<vmem>>, vector<1x4x4096xbf16>,
    return
  }
  func.func @transform_0(%arg0: i32, %arg1: i32) -> (i32, i32, i32) {
    %c0_i32 = arith.constant 0 : i32
    %c0_i32_0 = arith.constant 0 : i32
    return %arg0, %c0_i32, %arg1 : i32, i32, i32
  }
  func.func @transform_1(%arg0: i32, %arg1: i32) -> (i32, i32, i32) {
    %c0_i32 = arith.constant 0 : i32
    %c0_i32_0 = arith.constant 0 : i32
    return %arg0, %c0_i32, %arg1 : i32, i32, i32
  }
  func.func @transform_2(%arg0: i32, %arg1: i32) -> (i32, i32, i32) {
    %c0_i32 = arith.constant 0 : i32
    %c0_i32_0 = arith.constant 0 : i32
    return %arg0, %c0_i32, %arg1 : i32, i32, i32
  }
}

module attributes {stable_mosaic.version = 11 : i64} {
  func.func @_mm_kernel(%arg0: i32, %arg1: i32, %arg2: i32, %arg3: memref<512x16xbf16, #tpu.memory_space<vmem>>, %arg4: memref<16x32xbf16, #tpu.memory_space<vmem>>, %arg5: memref<1x32xf32, #tpu.memory_space<vmem>>, %arg6: memref<1x32xf32, #tpu.memory_space<vmem>>, %arg7: memref<512x32xbf16, #tpu.memory_space<vmem>>, %arg8: memref<512x32xf32, #tpu.memory_space<vmem>>) attributes {dimension_semantics = [#tpu.dimension_semantics<parallel>, #tpu.dimension_semantics<parallel>, #tpu.dimension_semantics<arbitrary>], iteration_bounds = array<i64: 8, 1, 1>, scalar_prefetch = 0 : i64, scratch_operands = 1 : i64, tpu.core_type = #tpu.core_type<tc>, window_params = [{transform_indices = @transform_0, window_bounds = array<i64: 512, 16>}, {transform_indices = @transform_1, window_bounds = array<i64: 16, 32>}, {transform_indices = @transform_2, window_bounds = array<i64: 1, 32>}, {transform_indices = @transform_3, window_bounds = array<i64: 1, 32>}, {transform_indices = @transform_4, window_bounds = array<i64: 512, 32>}]} {
    %c0_i32 = arith.constant 0 : i32
    %0 = arith.cmpi eq, %arg2, %c0_i32 : i32
    %1 = arith.extui %0 : i1 to i32
    %c0_i32_0 = arith.constant 0 : i32
    %2 = arith.cmpi ne, %1, %c0_i32_0 : i32
    scf.if %2 {
      %cst_10 = arith.constant 0.000000e+00 : f32
      %12 = vector.broadcast %cst_10 : f32 to vector<512x32xf32>
      %c0_11 = arith.constant 0 : index
      %c0_12 = arith.constant 0 : index
      %13 = vector.load %arg8[%c0_11, %c0_12] : memref<512x32xf32, #tpu.memory_space<vmem>>, vector<512x32xf32>
      tpu.vector_store %arg8[%c0_11, %c0_12], %12 {strides = array<i32>} : memref<512x32xf32, #tpu.memory_space<vmem>>, vector<512x32xf32>,
    } else {
    }
    %c0 = arith.constant 0 : index
    %c0_1 = arith.constant 0 : index
    %3 = vector.load %arg8[%c0, %c0_1] : memref<512x32xf32, #tpu.memory_space<vmem>>, vector<512x32xf32>
    %c0_2 = arith.constant 0 : index
    %c0_3 = arith.constant 0 : index
    %4 = vector.load %arg3[%c0_2, %c0_3] : memref<512x16xbf16, #tpu.memory_space<vmem>>, vector<512x16xbf16>
    %c0_4 = arith.constant 0 : index
    %c0_5 = arith.constant 0 : index
    %5 = vector.load %arg4[%c0_4, %c0_5] : memref<16x32xbf16, #tpu.memory_space<vmem>>, vector<16x32xbf16>
    %cst = arith.constant dense<0.000000e+00> : vector<512x32xf32>
    %6 = tpu.matmul %4, %5, %cst {dimension_numbers = #tpu.dot_dimension_numbers<[1], [0], [0], [1], [0, 0, 1, 1], [], []>} : vector<512x16xbf16>, vector<16x32xbf16>, vector<512x32xf32> -> vector<512x32xf32>
    %7 = arith.addf %3, %6 : vector<512x32xf32>
    %c0_6 = arith.constant 0 : index
    %c0_7 = arith.constant 0 : index
    %8 = vector.load %arg8[%c0_6, %c0_7] : memref<512x32xf32, #tpu.memory_space<vmem>>, vector<512x32xf32>
    tpu.vector_store %arg8[%c0_6, %c0_7], %7 {strides = array<i32>} : memref<512x32xf32, #tpu.memory_space<vmem>>, vector<512x32xf32>,
    %c0_i32_8 = arith.constant 0 : i32
    %9 = arith.cmpi eq, %arg2, %c0_i32_8 : i32
    %10 = arith.extui %9 : i1 to i32
    %c0_i32_9 = arith.constant 0 : i32
    %11 = arith.cmpi ne, %10, %c0_i32_9 : i32
    scf.if %11 {
      %c0_10 = arith.constant 0 : index
      %c0_11 = arith.constant 0 : index
      %12 = vector.load %arg8[%c0_10, %c0_11] : memref<512x32xf32, #tpu.memory_space<vmem>>, vector<512x32xf32>
      %c0_12 = arith.constant 0 : index
      %c0_13 = arith.constant 0 : index
      %13 = vector.load %arg5[%c0_12, %c0_13] : memref<1x32xf32, #tpu.memory_space<vmem>>, vector<1x32xf32>
      %14 = vector.broadcast %13 : vector<1x32xf32> to vector<512x32xf32>
      %15 = arith.mulf %12, %14 : vector<512x32xf32>
      %c0_14 = arith.constant 0 : index
      %c0_15 = arith.constant 0 : index
      %16 = vector.load %arg6[%c0_14, %c0_15] : memref<1x32xf32, #tpu.memory_space<vmem>>, vector<1x32xf32>
      %17 = vector.broadcast %16 : vector<1x32xf32> to vector<512x32xf32>
      %18 = arith.addf %15, %17 : vector<512x32xf32>
      %19 = arith.truncf %18 : vector<512x32xf32> to vector<512x32xbf16>
      %c0_16 = arith.constant 0 : index
      %c0_17 = arith.constant 0 : index
      %20 = vector.load %arg7[%c0_16, %c0_17] : memref<512x32xbf16, #tpu.memory_space<vmem>>, vector<512x32xbf16>
      tpu.vector_store %arg7[%c0_16, %c0_17], %19 {strides = array<i32>} : memref<512x32xbf16, #tpu.memory_space<vmem>>, vector<512x32xbf16>,
    } else {
    }
    return
  }
  func.func @transform_0(%arg0: i32, %arg1: i32, %arg2: i32) -> (i32, i32) {
    %c0_i32 = arith.constant 0 : i32
    return %arg0, %arg2 : i32, i32
  }
  func.func @transform_1(%arg0: i32, %arg1: i32, %arg2: i32) -> (i32, i32) {
    %c0_i32 = arith.constant 0 : i32
    return %arg2, %arg1 : i32, i32
  }
  func.func @transform_2(%arg0: i32, %arg1: i32, %arg2: i32) -> (i32, i32) {
    %c0_i32 = arith.constant 0 : i32
    %c0_i32_0 = arith.constant 0 : i32
    return %c0_i32, %arg1 : i32, i32
  }
  func.func @transform_3(%arg0: i32, %arg1: i32, %arg2: i32) -> (i32, i32) {
    %c0_i32 = arith.constant 0 : i32
    %c0_i32_0 = arith.constant 0 : i32
    return %c0_i32, %arg1 : i32, i32
  }
  func.func @transform_4(%arg0: i32, %arg1: i32, %arg2: i32) -> (i32, i32) {
    %c0_i32 = arith.constant 0 : i32
    return %arg0, %arg1 : i32, i32
  }
}

module attributes {stable_mosaic.version = 11 : i64} {
  func.func @_conv3x3_kernel(%arg0: i32, %arg1: i32, %arg2: i32, %arg3: memref<1x1x256x8xbf16, #tpu.memory_space<vmem>>, %arg4: memref<1x3x3x8x8xbf16, #tpu.memory_space<vmem>>, %arg5: memref<1x8xf32, #tpu.memory_space<vmem>>, %arg6: memref<1x8xf32, #tpu.memory_space<vmem>>, %arg7: memref<1x1x256x8xbf16, #tpu.memory_space<vmem>>, %arg8: memref<256x8xf32, #tpu.memory_space<vmem>>) attributes {dimension_semantics = [#tpu.dimension_semantics<parallel>, #tpu.dimension_semantics<parallel>, #tpu.dimension_semantics<arbitrary>], iteration_bounds = array<i64: 2, 8, 3>, scalar_prefetch = 0 : i64, scratch_operands = 1 : i64, tpu.core_type = #tpu.core_type<tc>, window_params = [{transform_indices = @transform_0, window_bounds = array<i64: 1, 1, 256, 8>}, {transform_indices = @transform_1, window_bounds = array<i64: 1, 3, 3, 8, 8>}, {pipeline_mode = #tpu.pipeline_mode<synchronous>, transform_indices = @transform_2, window_bounds = array<i64: 1, 8>}, {pipeline_mode = #tpu.pipeline_mode<synchronous>, transform_indices = @transform_3, window_bounds = array<i64: 1, 8>}, {transform_indices = @transform_4, window_bounds = array<i64: 1, 1, 256, 8>}]} {
    %c0_i32 = arith.constant 0 : i32
    %0 = arith.cmpi eq, %arg2, %c0_i32 : i32
    %1 = arith.extui %0 : i1 to i32
    %c0_i32_0 = arith.constant 0 : i32
    %2 = arith.cmpi ne, %1, %c0_i32_0 : i32
    scf.if %2 {
      %cst = arith.constant 0.000000e+00 : f32
      %13 = vector.broadcast %cst : f32 to vector<256x8xf32>
      %c0 = arith.constant 0 : index
      %c0_4 = arith.constant 0 : index
      %14 = vector.load %arg8[%c0, %c0_4] : memref<256x8xf32, #tpu.memory_space<vmem>>, vector<256x8xf32>
      tpu.vector_store %arg8[%c0, %c0_4], %13 {strides = array<i32>} : memref<256x8xf32, #tpu.memory_space<vmem>>, vector<256x8xf32>,
    } else {
    }
    %3 = arith.addi %arg1, %arg2 : i32
    %c1_i32 = arith.constant 1 : i32
    %4 = arith.subi %3, %c1_i32 : i32
    %c0_i32_1 = arith.constant 0 : i32
    %5 = arith.cmpi sge, %4, %c0_i32_1 : i32
    %c8_i32 = arith.constant 8 : i32
    %6 = arith.cmpi slt, %4, %c8_i32 : i32
    %7 = arith.andi %5, %6 : i1
    %8 = arith.extui %7 : i1 to i32
    %c0_i32_2 = arith.constant 0 : i32
    %9 = arith.cmpi ne, %8, %c0_i32_2 : i32
    scf.if %9 {
      %c0 = arith.constant 0 : index
      %c0_4 = arith.constant 0 : index
      %c0_5 = arith.constant 0 : index
      %c0_6 = arith.constant 0 : index
      %13 = vector.load %arg3[%c0, %c0_4, %c0_5, %c0_6] : memref<1x1x256x8xbf16, #tpu.memory_space<vmem>>, vector<1x1x256x8xbf16>
      %14 = vector.shape_cast %13 : vector<1x1x256x8xbf16> to vector<256x8xbf16>
      %15 = tpu.iota {dimensions = array<i32: 0>} : vector<256x8xi32>
      %c16_i32 = arith.constant 16 : i32
      %c0_i32_7 = arith.constant 0 : i32
      %16 = arith.cmpi eq, %c16_i32, %c0_i32_7 : i32
      %c1_i32_8 = arith.constant 1 : i32
      %17 = arith.select %16, %c1_i32_8, %c16_i32 : i32
      %18 = vector.broadcast %17 : i32 to vector<256x8xi32>
      %19 = arith.remsi %15, %18 : vector<256x8xi32>
      %c0_i32_9 = arith.constant 0 : i32
      %20 = vector.broadcast %c0_i32_9 : i32 to vector<256x8xi32>
      %21 = arith.cmpi ne, %19, %20 : vector<256x8xi32>
      %c0_i32_10 = arith.constant 0 : i32
      %22 = vector.broadcast %c0_i32_10 : i32 to vector<256x8xi32>
      %23 = arith.cmpi slt, %19, %22 : vector<256x8xi32>
      %c0_i32_11 = arith.constant 0 : i32
      %24 = arith.cmpi slt, %17, %c0_i32_11 : i32
      %25 = vector.broadcast %24 : i1 to vector<256x8xi1>
      %26 = vector.broadcast %25 : vector<256x8xi1> to vector<256x8xi1>
      %27 = arith.xori %23, %26 : vector<256x8xi1>
      %28 = arith.andi %27, %21 : vector<256x8xi1>
      %29 = vector.broadcast %17 : i32 to vector<256x8xi32>
      %30 = arith.addi %19, %29 : vector<256x8xi32>
      %31 = arith.select %28, %30, %19 : vector<256x8xi1>, vector<256x8xi32>
      %cst = arith.constant 0.000000e+00 : f32
      %32 = vector.broadcast %cst : f32 to vector<256x8xf32>
      %cst_12 = arith.constant 0.000000e+00 : bf16
      %33 = vector.broadcast %cst_12 : bf16 to vector<17x8xbf16>
      %34 = vector.extract_strided_slice %14 {offsets = [0, 0], sizes = [239, 8], strides = [1, 1]} : vector<256x8xbf16> to vector<239x8xbf16>
      %35 = tpu.concatenate %33, %34 in 0 : vector<17x8xbf16>, vector<239x8xbf16> -> vector<256x8xbf16>
      %c0_i32_13 = arith.constant 0 : i32
      %36 = vector.broadcast %c0_i32_13 : i32 to vector<256x8xi32>
      %37 = arith.cmpi eq, %31, %36 : vector<256x8xi32>
      %cst_14 = arith.constant 0.000000e+00 : bf16
      %38 = vector.broadcast %cst_14 : bf16 to vector<256x8xbf16>
      %39 = arith.select %37, %38, %35 : vector<256x8xi1>, vector<256x8xbf16>
      %c0_15 = arith.constant 0 : index
      %c0_16 = arith.constant 0 : index
      %c0_17 = arith.constant 0 : index
      %c0_18 = arith.constant 0 : index
      %c0_19 = arith.constant 0 : index
      %40 = vector.load %arg4[%c0_15, %c0_16, %c0_17, %c0_18, %c0_19] : memref<1x3x3x8x8xbf16, #tpu.memory_space<vmem>>, vector<1x1x1x8x8xbf16>
      %41 = vector.shape_cast %40 : vector<1x1x1x8x8xbf16> to vector<8x8xbf16>
      %cst_20 = arith.constant dense<0.000000e+00> : vector<256x8xf32>
      %42 = tpu.matmul %39, %41, %cst_20 {dimension_numbers = #tpu.dot_dimension_numbers<[1], [0], [0], [1], [0, 0, 1, 1], [], []>} : vector<256x8xbf16>, vector<8x8xbf16>, vector<256x8xf32> -> vector<256x8xf32>
      %43 = arith.addf %32, %42 : vector<256x8xf32>
      %cst_21 = arith.constant 0.000000e+00 : bf16
      %44 = vector.broadcast %cst_21 : bf16 to vector<16x8xbf16>
      %45 = vector.extract_strided_slice %14 {offsets = [0, 0], sizes = [240, 8], strides = [1, 1]} : vector<256x8xbf16> to vector<240x8xbf16>
      %46 = tpu.concatenate %44, %45 in 0 : vector<16x8xbf16>, vector<240x8xbf16> -> vector<256x8xbf16>
      %c0_22 = arith.constant 0 : index
      %c0_23 = arith.constant 0 : index
      %c1 = arith.constant 1 : index
      %c0_24 = arith.constant 0 : index
      %c0_25 = arith.constant 0 : index
      %47 = vector.load %arg4[%c0_22, %c0_23, %c1, %c0_24, %c0_25] : memref<1x3x3x8x8xbf16, #tpu.memory_space<vmem>>, vector<1x1x1x8x8xbf16>
      %48 = vector.shape_cast %47 : vector<1x1x1x8x8xbf16> to vector<8x8xbf16>
      %cst_26 = arith.constant dense<0.000000e+00> : vector<256x8xf32>
      %49 = tpu.matmul %46, %48, %cst_26 {dimension_numbers = #tpu.dot_dimension_numbers<[1], [0], [0], [1], [0, 0, 1, 1], [], []>} : vector<256x8xbf16>, vector<8x8xbf16>, vector<256x8xf32> -> vector<256x8xf32>
      %50 = arith.addf %43, %49 : vector<256x8xf32>
      %cst_27 = arith.constant 0.000000e+00 : bf16
      %51 = vector.broadcast %cst_27 : bf16 to vector<15x8xbf16>
      %52 = vector.extract_strided_slice %14 {offsets = [0, 0], sizes = [241, 8], strides = [1, 1]} : vector<256x8xbf16> to vector<241x8xbf16>
      %53 = tpu.concatenate %51, %52 in 0 : vector<15x8xbf16>, vector<241x8xbf16> -> vector<256x8xbf16>
      %c15_i32 = arith.constant 15 : i32
      %54 = vector.broadcast %c15_i32 : i32 to vector<256x8xi32>
      %55 = arith.cmpi eq, %31, %54 : vector<256x8xi32>
      %cst_28 = arith.constant 0.000000e+00 : bf16
      %56 = vector.broadcast %cst_28 : bf16 to vector<256x8xbf16>
      %57 = arith.select %55, %56, %53 : vector<256x8xi1>, vector<256x8xbf16>
      %c0_29 = arith.constant 0 : index
      %c0_30 = arith.constant 0 : index
      %c2 = arith.constant 2 : index
      %c0_31 = arith.constant 0 : index
      %c0_32 = arith.constant 0 : index
      %58 = vector.load %arg4[%c0_29, %c0_30, %c2, %c0_31, %c0_32] : memref<1x3x3x8x8xbf16, #tpu.memory_space<vmem>>, vector<1x1x1x8x8xbf16>
      %59 = vector.shape_cast %58 : vector<1x1x1x8x8xbf16> to vector<8x8xbf16>
      %cst_33 = arith.constant dense<0.000000e+00> : vector<256x8xf32>
      %60 = tpu.matmul %57, %59, %cst_33 {dimension_numbers = #tpu.dot_dimension_numbers<[1], [0], [0], [1], [0, 0, 1, 1], [], []>} : vector<256x8xbf16>, vector<8x8xbf16>, vector<256x8xf32> -> vector<256x8xf32>
      %61 = arith.addf %50, %60 : vector<256x8xf32>
      %cst_34 = arith.constant 0.000000e+00 : bf16
      %62 = vector.broadcast %cst_34 : bf16 to vector<1x8xbf16>
      %63 = vector.extract_strided_slice %14 {offsets = [0, 0], sizes = [255, 8], strides = [1, 1]} : vector<256x8xbf16> to vector<255x8xbf16>
      %64 = tpu.concatenate %62, %63 in 0 : vector<1x8xbf16>, vector<255x8xbf16> -> vector<256x8xbf16>
      %c0_i32_35 = arith.constant 0 : i32
      %65 = vector.broadcast %c0_i32_35 : i32 to vector<256x8xi32>
      %66 = arith.cmpi eq, %31, %65 : vector<256x8xi32>
      %cst_36 = arith.constant 0.000000e+00 : bf16
      %67 = vector.broadcast %cst_36 : bf16 to vector<256x8xbf16>
      %68 = arith.select %66, %67, %64 : vector<256x8xi1>, vector<256x8xbf16>
      %c0_37 = arith.constant 0 : index
      %c1_38 = arith.constant 1 : index
      %c0_39 = arith.constant 0 : index
      %c0_40 = arith.constant 0 : index
      %c0_41 = arith.constant 0 : index
      %69 = vector.load %arg4[%c0_37, %c1_38, %c0_39, %c0_40, %c0_41] : memref<1x3x3x8x8xbf16, #tpu.memory_space<vmem>>, vector<1x1x1x8x8xbf16>
      %70 = vector.shape_cast %69 : vector<1x1x1x8x8xbf16> to vector<8x8xbf16>
      %cst_42 = arith.constant dense<0.000000e+00> : vector<256x8xf32>
      %71 = tpu.matmul %68, %70, %cst_42 {dimension_numbers = #tpu.dot_dimension_numbers<[1], [0], [0], [1], [0, 0, 1, 1], [], []>} : vector<256x8xbf16>, vector<8x8xbf16>, vector<256x8xf32> -> vector<256x8xf32>
      %72 = arith.addf %61, %71 : vector<256x8xf32>
      %c0_43 = arith.constant 0 : index
      %c1_44 = arith.constant 1 : index
      %c1_45 = arith.constant 1 : index
      %c0_46 = arith.constant 0 : index
      %c0_47 = arith.constant 0 : index
      %73 = vector.load %arg4[%c0_43, %c1_44, %c1_45, %c0_46, %c0_47] : memref<1x3x3x8x8xbf16, #tpu.memory_space<vmem>>, vector<1x1x1x8x8xbf16>
      %74 = vector.shape_cast %73 : vector<1x1x1x8x8xbf16> to vector<8x8xbf16>
      %cst_48 = arith.constant dense<0.000000e+00> : vector<256x8xf32>
      %75 = tpu.matmul %14, %74, %cst_48 {dimension_numbers = #tpu.dot_dimension_numbers<[1], [0], [0], [1], [0, 0, 1, 1], [], []>} : vector<256x8xbf16>, vector<8x8xbf16>, vector<256x8xf32> -> vector<256x8xf32>
      %76 = arith.addf %72, %75 : vector<256x8xf32>
      %77 = vector.extract_strided_slice %14 {offsets = [1, 0], sizes = [255, 8], strides = [1, 1]} : vector<256x8xbf16> to vector<255x8xbf16>
      %cst_49 = arith.constant 0.000000e+00 : bf16
      %78 = vector.broadcast %cst_49 : bf16 to vector<1x8xbf16>
      %79 = tpu.concatenate %77, %78 in 0 : vector<255x8xbf16>, vector<1x8xbf16> -> vector<256x8xbf16>
      %c15_i32_50 = arith.constant 15 : i32
      %80 = vector.broadcast %c15_i32_50 : i32 to vector<256x8xi32>
      %81 = arith.cmpi eq, %31, %80 : vector<256x8xi32>
      %cst_51 = arith.constant 0.000000e+00 : bf16
      %82 = vector.broadcast %cst_51 : bf16 to vector<256x8xbf16>
      %83 = arith.select %81, %82, %79 : vector<256x8xi1>, vector<256x8xbf16>
      %c0_52 = arith.constant 0 : index
      %c1_53 = arith.constant 1 : index
      %c2_54 = arith.constant 2 : index
      %c0_55 = arith.constant 0 : index
      %c0_56 = arith.constant 0 : index
      %84 = vector.load %arg4[%c0_52, %c1_53, %c2_54, %c0_55, %c0_56] : memref<1x3x3x8x8xbf16, #tpu.memory_space<vmem>>, vector<1x1x1x8x8xbf16>
      %85 = vector.shape_cast %84 : vector<1x1x1x8x8xbf16> to vector<8x8xbf16>
      %cst_57 = arith.constant dense<0.000000e+00> : vector<256x8xf32>
      %86 = tpu.matmul %83, %85, %cst_57 {dimension_numbers = #tpu.dot_dimension_numbers<[1], [0], [0], [1], [0, 0, 1, 1], [], []>} : vector<256x8xbf16>, vector<8x8xbf16>, vector<256x8xf32> -> vector<256x8xf32>
      %87 = arith.addf %76, %86 : vector<256x8xf32>
      %88 = vector.extract_strided_slice %14 {offsets = [15, 0], sizes = [241, 8], strides = [1, 1]} : vector<256x8xbf16> to vector<241x8xbf16>
      %cst_58 = arith.constant 0.000000e+00 : bf16
      %89 = vector.broadcast %cst_58 : bf16 to vector<15x8xbf16>
      %90 = tpu.concatenate %88, %89 in 0 : vector<241x8xbf16>, vector<15x8xbf16> -> vector<256x8xbf16>
      %c0_i32_59 = arith.constant 0 : i32
      %91 = vector.broadcast %c0_i32_59 : i32 to vector<256x8xi32>
      %92 = arith.cmpi eq, %31, %91 : vector<256x8xi32>
      %cst_60 = arith.constant 0.000000e+00 : bf16
      %93 = vector.broadcast %cst_60 : bf16 to vector<256x8xbf16>
      %94 = arith.select %92, %93, %90 : vector<256x8xi1>, vector<256x8xbf16>
      %c0_61 = arith.constant 0 : index
      %c2_62 = arith.constant 2 : index
      %c0_63 = arith.constant 0 : index
      %c0_64 = arith.constant 0 : index
      %c0_65 = arith.constant 0 : index
      %95 = vector.load %arg4[%c0_61, %c2_62, %c0_63, %c0_64, %c0_65] : memref<1x3x3x8x8xbf16, #tpu.memory_space<vmem>>, vector<1x1x1x8x8xbf16>
      %96 = vector.shape_cast %95 : vector<1x1x1x8x8xbf16> to vector<8x8xbf16>
      %cst_66 = arith.constant dense<0.000000e+00> : vector<256x8xf32>
      %97 = tpu.matmul %94, %96, %cst_66 {dimension_numbers = #tpu.dot_dimension_numbers<[1], [0], [0], [1], [0, 0, 1, 1], [], []>} : vector<256x8xbf16>, vector<8x8xbf16>, vector<256x8xf32> -> vector<256x8xf32>
      %98 = arith.addf %87, %97 : vector<256x8xf32>
      %99 = vector.extract_strided_slice %14 {offsets = [16, 0], sizes = [240, 8], strides = [1, 1]} : vector<256x8xbf16> to vector<240x8xbf16>
      %cst_67 = arith.constant 0.000000e+00 : bf16
      %100 = vector.broadcast %cst_67 : bf16 to vector<16x8xbf16>
      %101 = tpu.concatenate %99, %100 in 0 : vector<240x8xbf16>, vector<16x8xbf16> -> vector<256x8xbf16>
      %c0_68 = arith.constant 0 : index
      %c2_69 = arith.constant 2 : index
      %c1_70 = arith.constant 1 : index
      %c0_71 = arith.constant 0 : index
      %c0_72 = arith.constant 0 : index
      %102 = vector.load %arg4[%c0_68, %c2_69, %c1_70, %c0_71, %c0_72] : memref<1x3x3x8x8xbf16, #tpu.memory_space<vmem>>, vector<1x1x1x8x8xbf16>
      %103 = vector.shape_cast %102 : vector<1x1x1x8x8xbf16> to vector<8x8xbf16>
      %cst_73 = arith.constant dense<0.000000e+00> : vector<256x8xf32>
      %104 = tpu.matmul %101, %103, %cst_73 {dimension_numbers = #tpu.dot_dimension_numbers<[1], [0], [0], [1], [0, 0, 1, 1], [], []>} : vector<256x8xbf16>, vector<8x8xbf16>, vector<256x8xf32> -> vector<256x8xf32>
      %105 = arith.addf %98, %104 : vector<256x8xf32>
      %106 = vector.extract_strided_slice %14 {offsets = [17, 0], sizes = [239, 8], strides = [1, 1]} : vector<256x8xbf16> to vector<239x8xbf16>
      %cst_74 = arith.constant 0.000000e+00 : bf16
      %107 = vector.broadcast %cst_74 : bf16 to vector<17x8xbf16>
      %108 = tpu.concatenate %106, %107 in 0 : vector<239x8xbf16>, vector<17x8xbf16> -> vector<256x8xbf16>
      %c15_i32_75 = arith.constant 15 : i32
      %109 = vector.broadcast %c15_i32_75 : i32 to vector<256x8xi32>
      %110 = arith.cmpi eq, %31, %109 : vector<256x8xi32>
      %cst_76 = arith.constant 0.000000e+00 : bf16
      %111 = vector.broadcast %cst_76 : bf16 to vector<256x8xbf16>
      %112 = arith.select %110, %111, %108 : vector<256x8xi1>, vector<256x8xbf16>
      %c0_77 = arith.constant 0 : index
      %c2_78 = arith.constant 2 : index
      %c2_79 = arith.constant 2 : index
      %c0_80 = arith.constant 0 : index
      %c0_81 = arith.constant 0 : index
      %113 = vector.load %arg4[%c0_77, %c2_78, %c2_79, %c0_80, %c0_81] : memref<1x3x3x8x8xbf16, #tpu.memory_space<vmem>>, vector<1x1x1x8x8xbf16>
      %114 = vector.shape_cast %113 : vector<1x1x1x8x8xbf16> to vector<8x8xbf16>
      %cst_82 = arith.constant dense<0.000000e+00> : vector<256x8xf32>
      %115 = tpu.matmul %112, %114, %cst_82 {dimension_numbers = #tpu.dot_dimension_numbers<[1], [0], [0], [1], [0, 0, 1, 1], [], []>} : vector<256x8xbf16>, vector<8x8xbf16>, vector<256x8xf32> -> vector<256x8xf32>
      %116 = arith.addf %105, %115 : vector<256x8xf32>
      %c0_83 = arith.constant 0 : index
      %c0_84 = arith.constant 0 : index
      %117 = vector.load %arg8[%c0_83, %c0_84] : memref<256x8xf32, #tpu.memory_space<vmem>>, vector<256x8xf32>
      %118 = arith.addf %117, %116 : vector<256x8xf32>
      %c0_85 = arith.constant 0 : index
      %c0_86 = arith.constant 0 : index
      %119 = vector.load %arg8[%c0_85, %c0_86] : memref<256x8xf32, #tpu.memory_space<vmem>>, vector<256x8xf32>
      tpu.vector_store %arg8[%c0_85, %c0_86], %118 {strides = array<i32>} : memref<256x8xf32, #tpu.memory_space<vmem>>, vector<256x8xf32>,
    } else {
    }
    %c2_i32 = arith.constant 2 : i32
    %10 = arith.cmpi eq, %arg2, %c2_i32 : i32
    %11 = arith.extui %10 : i1 to i32
    %c0_i32_3 = arith.constant 0 : i32
    %12 = arith.cmpi ne, %11, %c0_i32_3 : i32
    scf.if %12 {
      %c0 = arith.constant 0 : index
      %c0_4 = arith.constant 0 : index
      %13 = vector.load %arg8[%c0, %c0_4] : memref<256x8xf32, #tpu.memory_space<vmem>>, vector<256x8xf32>
      %c0_5 = arith.constant 0 : index
      %c0_6 = arith.constant 0 : index
      %14 = vector.load %arg5[%c0_5, %c0_6] : memref<1x8xf32, #tpu.memory_space<vmem>>, vector<1x8xf32>
      %15 = vector.broadcast %14 : vector<1x8xf32> to vector<256x8xf32>
      %16 = arith.mulf %13, %15 : vector<256x8xf32>
      %c0_7 = arith.constant 0 : index
      %c0_8 = arith.constant 0 : index
      %17 = vector.load %arg6[%c0_7, %c0_8] : memref<1x8xf32, #tpu.memory_space<vmem>>, vector<1x8xf32>
      %18 = vector.broadcast %17 : vector<1x8xf32> to vector<256x8xf32>
      %19 = arith.addf %16, %18 : vector<256x8xf32>
      %cst = arith.constant 0.000000e+00 : f32
      %20 = vector.broadcast %cst : f32 to vector<256x8xf32>
      %21 = arith.maximumf %19, %20 : vector<256x8xf32>
      %22 = arith.truncf %21 : vector<256x8xf32> to vector<256x8xbf16>
      %c0_9 = arith.constant 0 : index
      %c0_10 = arith.constant 0 : index
      %c0_11 = arith.constant 0 : index
      %c0_12 = arith.constant 0 : index
      %23 = vector.load %arg7[%c0_9, %c0_10, %c0_11, %c0_12] : memref<1x1x256x8xbf16, #tpu.memory_space<vmem>>, vector<1x1x256x8xbf16>
      %24 = vector.shape_cast %23 : vector<1x1x256x8xbf16> to vector<256x8xbf16>
      %25 = vector.shape_cast %22 : vector<256x8xbf16> to vector<1x1x256x8xbf16>
      tpu.vector_store %arg7[%c0_9, %c0_10, %c0_11, %c0_12], %25 {strides = array<i32>} : memref<1x1x256x8xbf16, #tpu.memory_space<vmem>>, vector<1x1x256x8xbf16>,
    } else {
    }
    return
  }
  func.func @transform_0(%arg0: i32, %arg1: i32, %arg2: i32) -> (i32, i32, i32, i32) {
    %0 = arith.addi %arg1, %arg2 : i32
    %c1_i32 = arith.constant 1 : i32
    %1 = arith.subi %0, %c1_i32 : i32
    %c0_i32 = arith.constant 0 : i32
    %c7_i32 = arith.constant 7 : i32
    %2 = arith.maxsi %c0_i32, %1 : i32
    %3 = arith.minsi %c7_i32, %2 : i32
    %c0_i32_0 = arith.constant 0 : i32
    %c0_i32_1 = arith.constant 0 : i32
    %c0_i32_2 = arith.constant 0 : i32
    return %arg0, %3, %c0_i32_0, %c0_i32_1 : i32, i32, i32, i32
  }
  func.func @transform_1(%arg0: i32, %arg1: i32, %arg2: i32) -> (i32, i32, i32, i32, i32) {
    %c0_i32 = arith.constant 0 : i32
    %c0_i32_0 = arith.constant 0 : i32
    %c0_i32_1 = arith.constant 0 : i32
    %c0_i32_2 = arith.constant 0 : i32
    %c0_i32_3 = arith.constant 0 : i32
    return %arg2, %c0_i32, %c0_i32_0, %c0_i32_1, %c0_i32_2 : i32, i32, i32, i32, i32
  }
  func.func @transform_2(%arg0: i32, %arg1: i32, %arg2: i32) -> (i32, i32) {
    %c0_i32 = arith.constant 0 : i32
    %c0_i32_0 = arith.constant 0 : i32
    %c0_i32_1 = arith.constant 0 : i32
    return %c0_i32, %c0_i32_0 : i32, i32
  }
  func.func @transform_3(%arg0: i32, %arg1: i32, %arg2: i32) -> (i32, i32) {
    %c0_i32 = arith.constant 0 : i32
    %c0_i32_0 = arith.constant 0 : i32
    %c0_i32_1 = arith.constant 0 : i32
    return %c0_i32, %c0_i32_0 : i32, i32
  }
  func.func @transform_4(%arg0: i32, %arg1: i32, %arg2: i32) -> (i32, i32, i32, i32) {
    %c0_i32 = arith.constant 0 : i32
    %c0_i32_0 = arith.constant 0 : i32
    %c0_i32_1 = arith.constant 0 : i32
    return %arg0, %arg1, %c0_i32, %c0_i32_0 : i32, i32, i32, i32
  }
}

module attributes {stable_mosaic.version = 11 : i64} {
  func.func @_mm_kernel(%arg0: i32, %arg1: i32, %arg2: i32, %arg3: memref<512x8xbf16, #tpu.memory_space<vmem>>, %arg4: memref<8x32xbf16, #tpu.memory_space<vmem>>, %arg5: memref<1x32xf32, #tpu.memory_space<vmem>>, %arg6: memref<1x32xf32, #tpu.memory_space<vmem>>, %arg7: memref<512x32xbf16, #tpu.memory_space<vmem>>, %arg8: memref<512x32xf32, #tpu.memory_space<vmem>>, %arg9: memref<512x32xf32, #tpu.memory_space<vmem>>) attributes {dimension_semantics = [#tpu.dimension_semantics<parallel>, #tpu.dimension_semantics<parallel>, #tpu.dimension_semantics<arbitrary>], iteration_bounds = array<i64: 8, 1, 1>, scalar_prefetch = 0 : i64, scratch_operands = 1 : i64, tpu.core_type = #tpu.core_type<tc>, window_params = [{transform_indices = @transform_0, window_bounds = array<i64: 512, 8>}, {transform_indices = @transform_1, window_bounds = array<i64: 8, 32>}, {transform_indices = @transform_2, window_bounds = array<i64: 1, 32>}, {transform_indices = @transform_3, window_bounds = array<i64: 1, 32>}, {transform_indices = @transform_4, window_bounds = array<i64: 512, 32>}, {transform_indices = @transform_5, window_bounds = array<i64: 512, 32>}]} {
    %c0_i32 = arith.constant 0 : i32
    %0 = arith.cmpi eq, %arg2, %c0_i32 : i32
    %1 = arith.extui %0 : i1 to i32
    %c0_i32_0 = arith.constant 0 : i32
    %2 = arith.cmpi ne, %1, %c0_i32_0 : i32
    scf.if %2 {
      %cst_10 = arith.constant 0.000000e+00 : f32
      %12 = vector.broadcast %cst_10 : f32 to vector<512x32xf32>
      %c0_11 = arith.constant 0 : index
      %c0_12 = arith.constant 0 : index
      %13 = vector.load %arg9[%c0_11, %c0_12] : memref<512x32xf32, #tpu.memory_space<vmem>>, vector<512x32xf32>
      tpu.vector_store %arg9[%c0_11, %c0_12], %12 {strides = array<i32>} : memref<512x32xf32, #tpu.memory_space<vmem>>, vector<512x32xf32>,
    } else {
    }
    %c0 = arith.constant 0 : index
    %c0_1 = arith.constant 0 : index
    %3 = vector.load %arg9[%c0, %c0_1] : memref<512x32xf32, #tpu.memory_space<vmem>>, vector<512x32xf32>
    %c0_2 = arith.constant 0 : index
    %c0_3 = arith.constant 0 : index
    %4 = vector.load %arg3[%c0_2, %c0_3] : memref<512x8xbf16, #tpu.memory_space<vmem>>, vector<512x8xbf16>
    %c0_4 = arith.constant 0 : index
    %c0_5 = arith.constant 0 : index
    %5 = vector.load %arg4[%c0_4, %c0_5] : memref<8x32xbf16, #tpu.memory_space<vmem>>, vector<8x32xbf16>
    %cst = arith.constant dense<0.000000e+00> : vector<512x32xf32>
    %6 = tpu.matmul %4, %5, %cst {dimension_numbers = #tpu.dot_dimension_numbers<[1], [0], [0], [1], [0, 0, 1, 1], [], []>} : vector<512x8xbf16>, vector<8x32xbf16>, vector<512x32xf32> -> vector<512x32xf32>
    %7 = arith.addf %3, %6 : vector<512x32xf32>
    %c0_6 = arith.constant 0 : index
    %c0_7 = arith.constant 0 : index
    %8 = vector.load %arg9[%c0_6, %c0_7] : memref<512x32xf32, #tpu.memory_space<vmem>>, vector<512x32xf32>
    tpu.vector_store %arg9[%c0_6, %c0_7], %7 {strides = array<i32>} : memref<512x32xf32, #tpu.memory_space<vmem>>, vector<512x32xf32>,
    %c0_i32_8 = arith.constant 0 : i32
    %9 = arith.cmpi eq, %arg2, %c0_i32_8 : i32
    %10 = arith.extui %9 : i1 to i32
    %c0_i32_9 = arith.constant 0 : i32
    %11 = arith.cmpi ne, %10, %c0_i32_9 : i32
    scf.if %11 {
      %c0_10 = arith.constant 0 : index
      %c0_11 = arith.constant 0 : index
      %12 = vector.load %arg9[%c0_10, %c0_11] : memref<512x32xf32, #tpu.memory_space<vmem>>, vector<512x32xf32>
      %c0_12 = arith.constant 0 : index
      %c0_13 = arith.constant 0 : index
      %13 = vector.load %arg5[%c0_12, %c0_13] : memref<1x32xf32, #tpu.memory_space<vmem>>, vector<1x32xf32>
      %14 = vector.broadcast %13 : vector<1x32xf32> to vector<512x32xf32>
      %15 = arith.mulf %12, %14 : vector<512x32xf32>
      %c0_14 = arith.constant 0 : index
      %c0_15 = arith.constant 0 : index
      %16 = vector.load %arg6[%c0_14, %c0_15] : memref<1x32xf32, #tpu.memory_space<vmem>>, vector<1x32xf32>
      %17 = vector.broadcast %16 : vector<1x32xf32> to vector<512x32xf32>
      %18 = arith.addf %15, %17 : vector<512x32xf32>
      %c0_16 = arith.constant 0 : index
      %c0_17 = arith.constant 0 : index
      %19 = vector.load %arg7[%c0_16, %c0_17] : memref<512x32xbf16, #tpu.memory_space<vmem>>, vector<512x32xbf16>
      %20 = arith.extf %19 : vector<512x32xbf16> to vector<512x32xf32>
      %21 = arith.addf %18, %20 : vector<512x32xf32>
      %cst_18 = arith.constant 0.000000e+00 : f32
      %22 = vector.broadcast %cst_18 : f32 to vector<512x32xf32>
      %23 = arith.maximumf %21, %22 : vector<512x32xf32>
      %c0_19 = arith.constant 0 : index
      %c0_20 = arith.constant 0 : index
      %24 = vector.load %arg8[%c0_19, %c0_20] : memref<512x32xf32, #tpu.memory_space<vmem>>, vector<512x32xf32>
      tpu.vector_store %arg8[%c0_19, %c0_20], %23 {strides = array<i32>} : memref<512x32xf32, #tpu.memory_space<vmem>>, vector<512x32xf32>,
    } else {
    }
    return
  }
  func.func @transform_0(%arg0: i32, %arg1: i32, %arg2: i32) -> (i32, i32) {
    %c0_i32 = arith.constant 0 : i32
    return %arg0, %arg2 : i32, i32
  }
  func.func @transform_1(%arg0: i32, %arg1: i32, %arg2: i32) -> (i32, i32) {
    %c0_i32 = arith.constant 0 : i32
    return %arg2, %arg1 : i32, i32
  }
  func.func @transform_2(%arg0: i32, %arg1: i32, %arg2: i32) -> (i32, i32) {
    %c0_i32 = arith.constant 0 : i32
    %c0_i32_0 = arith.constant 0 : i32
    return %c0_i32, %arg1 : i32, i32
  }
  func.func @transform_3(%arg0: i32, %arg1: i32, %arg2: i32) -> (i32, i32) {
    %c0_i32 = arith.constant 0 : i32
    %c0_i32_0 = arith.constant 0 : i32
    return %c0_i32, %arg1 : i32, i32
  }
  func.func @transform_4(%arg0: i32, %arg1: i32, %arg2: i32) -> (i32, i32) {
    %c0_i32 = arith.constant 0 : i32
    return %arg0, %arg1 : i32, i32
  }
  func.func @transform_5(%arg0: i32, %arg1: i32, %arg2: i32) -> (i32, i32) {
    %c0_i32 = arith.constant 0 : i32
    return %arg0, %arg1 : i32, i32
  }
}

</mosaic_0001>

<bundles_post_ra>
// kernel: decoder_bottleneck_forward.11
= control target key start
LH: loop header
LB: loop body
LE: loop exit
PB: predicated region body
PF: predicated region fallthrough
CT: control target
= control target key end

     0   :  { %s1088_s9 = smov 0   ;;  %s1090_s10 = smov 0   ;;  %s1631_s0 = inlined_call_operand.vmem [shape: bf16[64,8,8], index: 0, kind: input, shape index: {}]   ;;  %s1632_s1 = inlined_call_operand.vmem [shape: bf16[64,8,8], index: 1, kind: output, shape index: {0}]   ;;  %s1633_s2 = inlined_call_operand.vmem [shape: bf16[64,8,8], index: 2, kind: output, shape index: {1}]  }
   0x1   :  { %s1092_s11 = smov 0  }
   0x2 LB: > { %s25_s12 = sadd.s32 1, %s1067_s10  ;;  %p937_p0 = scmp.ge.s32.totalorder %s1071_s11, 1  ;;  %s1071_s11 = sphi %s1092_s11, %s13_s11   ;;  %s1067_s10 = sphi %s1090_s10, %s1635_s10   ;;  %s1063_s9 = sphi %s1088_s9, %s1634_s9  }
   0x3   : > { %p27_p1 = scmp.ge.s32.totalorder %s25_s12, 2  ;;  %p137_p2 = scmp.lt.s32.totalorder %s1071_s11, 3 }
   0x5   : > { %s1637_s12 = smov (%p27_p1, %s25_s12), 0  ;;  %p138_p3 = pnand %p937_p0, %p137_p2 }
   0x6   : > { %s938_s13 = sshll.u32 (!%p138_p3), %s1063_s9, 5  ;;  %vm360_vm0 = vcmask (!%p138_p3), 1040384   ;;  %vm618_vm1 = vcmask (!%p138_p3), 60416   ;;  %vm457_vm2 = vcmask (!%p138_p3), 1046528  }
   0x7   : > { %141 = sbr.rel (%p138_p3) target bundleno = 132 (0x84), region = 24  ;;  %p174_p4 = scmp.lt.s32.totalorder (!%p138_p3), %s938_s13, 63 }
   0xe   : > { %s1639_s13 = smov (!%p174_p4, %s938_s13), 63 }
   0xf   : > { %s1106_s14 = sshll.u32 %s1639_s13, 2 }
  0x10   : > { %s1112_s17 = scalar_lea.vmem %s1631_s0, %s1106_s14  ;;  %s1170_s20 = scalar_lea.vmem %s1632_s1, %s1106_s14 }
  0x11   : > { %v947_v0 = vld [vmem:[%s1112_s17] sm:$0xff]   ;;  %v1010_v1 = vld [vmem:[%s1112_s17 + $0x8] sm:$0xff]   ;;  %v1011_v2 = vld [vmem:[%s1112_s17 + $0x10] sm:$0xff]   ;;  %s1420_s23 = scalar_lea.vmem %s1633_s2, %s1106_s14 }
  0x12   : > { %v1117_v3 = vunpack.c.l.bf16 %v947_v0  ;;  %v1119_v4 = vunpack.c.h.bf16 %v947_v0  ;;  %v1121_v5 = vunpack.c.l.bf16 %v1010_v1  ;;  %v1123_v6 = vunpack.c.h.bf16 %v1010_v1  ;;  %v1012_v7 = vld [vmem:[%s1112_s17 + $0x18] sm:$0xff]   ;;  %v1013_v48 = vld [vmem:[%s1112_s17 + $0x20] sm:$0xff]   ;;  %v1014_v49 = vld [vmem:[%s1112_s17 + $0x28] sm:$0xff]  }
  0x13   : > { %v1126_v8 = vunpack.c.l.bf16 %v1011_v2  ;;  %v1128_v9 = vunpack.c.h.bf16 %v1011_v2  ;;  %v1130_v10 = vunpack.c.l.bf16 %v1012_v7  ;;  %v1132_v11 = vunpack.c.h.bf16 %v1012_v7  ;;  %v1015_v62 = vld [vmem:[%s1112_s17 + $0x30] sm:$0xff]   ;;  %v1016_v63 = vld [vmem:[%s1112_s17 + $0x38] sm:$0xff]  }
  0x14   : > { %v296_v12 = vrot.slane %v1117_v3, 7  ;;  %v297_v13 = vrot.slane %v1119_v4, 7  ;;  %v298_v14 = vrot.slane %v1121_v5, 7  ;;  %v299_v15 = vrot.slane %v1123_v6, 7 }
  0x15   : > { %v300_v16 = vrot.slane %v1126_v8, 7  ;;  %v301_v17 = vrot.slane %v1128_v9, 7  ;;  %v302_v18 = vrot.slane %v1130_v10, 7  ;;  %v303_v19 = vrot.slane %v1132_v11, 7 }
  0x16   : > { %v361_v20 = vsel %vm360_vm0, %v1117_v3, %v296_v12  ;;  %v362_v21 = vsel %vm360_vm0, %v1119_v4, %v297_v13  ;;  %v363_v22 = vsel %vm360_vm0, %v1121_v5, %v298_v14  ;;  %v364_v23 = vsel %vm360_vm0, %v1123_v6, %v299_v15 }
  0x17   : > { %v490_v24 = vsub.f32 %v1117_v3, %v361_v20  ;;  %v491_v25 = vsub.f32 %v1119_v4, %v362_v21  ;;  %v492_v26 = vsub.f32 %v1121_v5, %v363_v22  ;;  %v493_v27 = vsub.f32 %v1123_v6, %v364_v23 }
  0x18   : > { %v365_v28 = vsel %vm360_vm0, %v1126_v8, %v300_v16  ;;  %v366_v29 = vsel %vm360_vm0, %v1128_v9, %v301_v17  ;;  %v367_v30 = vsel %vm360_vm0, %v1130_v10, %v302_v18  ;;  %v368_v31 = vsel %vm360_vm0, %v1132_v11, %v303_v19 }
  0x19   : > { %v522_v32 = vmul.f32 0.75, %v490_v24  ;;  %v523_v33 = vmul.f32 0.75, %v491_v25  ;;  %v524_v34 = vmul.f32 0.75, %v492_v26  ;;  %v525_v35 = vmul.f32 0.75, %v493_v27 }
  0x1a   : > { %v494_v36 = vsub.f32 %v1126_v8, %v365_v28  ;;  %v495_v37 = vsub.f32 %v1128_v9, %v366_v29  ;;  %v496_v38 = vsub.f32 %v1130_v10, %v367_v30  ;;  %v497_v39 = vsub.f32 %v1132_v11, %v368_v31 }
  0x1b   : > { %v554_v40 = vadd.f32 %v522_v32, %v361_v20  ;;  %v555_v41 = vadd.f32 %v523_v33, %v362_v21  ;;  %v556_v42 = vadd.f32 %v524_v34, %v363_v22  ;;  %v557_v43 = vadd.f32 %v525_v35, %v364_v23 }
  0x1c   : > { %v526_v44 = vmul.f32 0.75, %v494_v36  ;;  %v527_v45 = vmul.f32 0.75, %v495_v37  ;;  %v528_v46 = vmul.f32 0.75, %v496_v38  ;;  %v529_v47 = vmul.f32 0.75, %v497_v39 }
  0x1d   : > { %v586_v50 = vpack.c.bf16 %v554_v40, %v554_v40  ;;  %v587_v51 = vpack.c.bf16 %v555_v41, %v555_v41  ;;  %v588_v52 = vpack.c.bf16 %v556_v42, %v556_v42  ;;  %v589_v53 = vpack.c.bf16 %v557_v43, %v557_v43 }
  0x1e   : > { %v558_v54 = vadd.f32 %v526_v44, %v365_v28  ;;  %v559_v55 = vadd.f32 %v527_v45, %v366_v29  ;;  %v560_v56 = vadd.f32 %v528_v46, %v367_v30  ;;  %v561_v57 = vadd.f32 %v529_v47, %v368_v31 }
  0x1f   : > { %619 = vst.msk [vmem:[%s1170_s20] sm:$0xf] %vm618_vm1, %v586_v50  ;;  %620 = vst.msk [vmem:[%s1170_s20 + $0x4] sm:$0xf] %vm618_vm1, %v587_v51  ;;  %v1182_v58 = vunpack.c.l.bf16 %v1013_v48  ;;  %v1184_v59 = vunpack.c.h.bf16 %v1013_v48  ;;  %v1186_v60 = vunpack.c.l.bf16 %v1014_v49  ;;  %v1188_v61 = vunpack.c.h.bf16 %v1014_v49  ;;  %v1017_v48 = vld [vmem:[%s1112_s17 + $0x40] sm:$0xff]   ;;  %v1018_v49 = vld [vmem:[%s1112_s17 + $0x48] sm:$0xff]  }
  0x20   : > { %621 = vst.msk [vmem:[%s1170_s20 + $0x8] sm:$0xf] %vm618_vm1, %v588_v52  ;;  %622 = vst.msk [vmem:[%s1170_s20 + $0xc] sm:$0xf] %vm618_vm1, %v589_v53  ;;  %v590_v0 = vpack.c.bf16 %v558_v54, %v558_v54  ;;  %v591_v1 = vpack.c.bf16 %v559_v55, %v559_v55  ;;  %v592_v2 = vpack.c.bf16 %v560_v56, %v560_v56  ;;  %v1204_v16 = vunpack.c.l.bf16 %v1015_v62 }
  0x21   : > { %v593_v7 = vpack.c.bf16 %v561_v57, %v561_v57  ;;  %v304_v12 = vrot.slane %v1182_v58, 7  ;;  %v305_v13 = vrot.slane %v1184_v59, 7  ;;  %v306_v14 = vrot.slane %v1186_v60, 7 }
  0x22   : > { %v307_v15 = vrot.slane %v1188_v61, 7  ;;  %623 = vst.msk [vmem:[%s1170_s20 + $0x10] sm:$0xf] %vm618_vm1, %v590_v0  ;;  %624 = vst.msk [vmem:[%s1170_s20 + $0x14] sm:$0xf] %vm618_vm1, %v591_v1  ;;  %v1206_v17 = vunpack.c.h.bf16 %v1015_v62  ;;  %v1208_v18 = vunpack.c.l.bf16 %v1016_v63  ;;  %v1210_v19 = vunpack.c.h.bf16 %v1016_v63 }
  0x23   : > { %625 = vst.msk [vmem:[%s1170_s20 + $0x18] sm:$0xf] %vm618_vm1, %v592_v2  ;;  %626 = vst.msk [vmem:[%s1170_s20 + $0x1c] sm:$0xf] %vm618_vm1, %v593_v7  ;;  %v369_v20 = vsel %vm360_vm0, %v1182_v58, %v304_v12  ;;  %v370_v21 = vsel %vm360_vm0, %v1184_v59, %v305_v13  ;;  %v371_v22 = vsel %vm360_vm0, %v1186_v60, %v306_v14  ;;  %v308_v28 = vrot.slane %v1204_v16, 7 }
  0x24   : > { %v372_v23 = vsel %vm360_vm0, %v1188_v61, %v307_v15  ;;  %v498_v24 = vsub.f32 %v1182_v58, %v369_v20  ;;  %v499_v25 = vsub.f32 %v1184_v59, %v370_v21  ;;  %v500_v26 = vsub.f32 %v1186_v60, %v371_v22 }
  0x25   : > { %v501_v27 = vsub.f32 %v1188_v61, %v372_v23  ;;  %v309_v29 = vrot.slane %v1206_v17, 7  ;;  %v310_v30 = vrot.slane %v1208_v18, 7  ;;  %v311_v31 = vrot.slane %v1210_v19, 7 }
  0x26   : > { %v530_v32 = vmul.f32 0.75, %v498_v24  ;;  %v531_v33 = vmul.f32 0.75, %v499_v25  ;;  %v532_v34 = vmul.f32 0.75, %v500_v26  ;;  %v373_v36 = vsel %vm360_vm0, %v1204_v16, %v308_v28  ;;  %v1019_v26 = vld [vmem:[%s1112_s17 + $0x50] sm:$0xff]  }
  0x27   : > { %v533_v35 = vmul.f32 0.75, %v501_v27  ;;  %v374_v37 = vsel %vm360_vm0, %v1206_v17, %v309_v29  ;;  %v375_v38 = vsel %vm360_vm0, %v1208_v18, %v310_v30  ;;  %v376_v39 = vsel %vm360_vm0, %v1210_v19, %v311_v31  ;;  %v1020_v27 = vld [vmem:[%s1112_s17 + $0x58] sm:$0xff]  }
  0x28   : > { %v562_v40 = vadd.f32 %v530_v32, %v369_v20  ;;  %v563_v41 = vadd.f32 %v531_v33, %v370_v21  ;;  %v564_v42 = vadd.f32 %v532_v34, %v371_v22  ;;  %v502_v44 = vsub.f32 %v1204_v16, %v373_v36 }
  0x29   : > { %v565_v43 = vadd.f32 %v533_v35, %v372_v23  ;;  %v503_v45 = vsub.f32 %v1206_v17, %v374_v37  ;;  %v504_v46 = vsub.f32 %v1208_v18, %v375_v38  ;;  %v505_v47 = vsub.f32 %v1210_v19, %v376_v39 }
  0x2a   : > { %v594_v50 = vpack.c.bf16 %v562_v40, %v562_v40  ;;  %v595_v51 = vpack.c.bf16 %v563_v41, %v563_v41  ;;  %v596_v52 = vpack.c.bf16 %v564_v42, %v564_v42  ;;  %v534_v54 = vmul.f32 0.75, %v502_v44 }
  0x2b   : > { %v597_v53 = vpack.c.bf16 %v565_v43, %v565_v43  ;;  %v535_v55 = vmul.f32 0.75, %v503_v45  ;;  %v536_v56 = vmul.f32 0.75, %v504_v46  ;;  %v537_v57 = vmul.f32 0.75, %v505_v47 }
  0x2c   : > { %627 = vst.msk [vmem:[%s1170_s20 + $0x20] sm:$0xf] %vm618_vm1, %v594_v50  ;;  %628 = vst.msk [vmem:[%s1170_s20 + $0x24] sm:$0xf] %vm618_vm1, %v595_v51  ;;  %v1250_v62 = vunpack.c.l.bf16 %v1017_v48  ;;  %v1252_v63 = vunpack.c.h.bf16 %v1017_v48  ;;  %v1254_v0 = vunpack.c.l.bf16 %v1018_v49  ;;  %v1256_v1 = vunpack.c.h.bf16 %v1018_v49 }
  0x2d   : > { %629 = vst.msk [vmem:[%s1170_s20 + $0x28] sm:$0xf] %vm618_vm1, %v596_v52  ;;  %630 = vst.msk [vmem:[%s1170_s20 + $0x2c] sm:$0xf] %vm618_vm1, %v597_v53  ;;  %v566_v2 = vadd.f32 %v534_v54, %v373_v36  ;;  %v567_v7 = vadd.f32 %v535_v55, %v374_v37  ;;  %v568_v12 = vadd.f32 %v536_v56, %v375_v38  ;;  %v1284_v36 = vunpack.c.l.bf16 %v1019_v26  ;;  %v1021_v56 = vld [vmem:[%s1112_s17 + $0x60] sm:$0xff]  }
  0x2e   : > { %v569_v13 = vadd.f32 %v537_v57, %v376_v39  ;;  %v312_v14 = vrot.slane %v1250_v62, 7  ;;  %v313_v15 = vrot.slane %v1252_v63, 7  ;;  %v314_v20 = vrot.slane %v1254_v0, 7  ;;  %v1022_v57 = vld [vmem:[%s1112_s17 + $0x68] sm:$0xff]  }
  0x2f   : > { %v315_v21 = vrot.slane %v1256_v1, 7  ;;  %v598_v22 = vpack.c.bf16 %v566_v2, %v566_v2  ;;  %v599_v23 = vpack.c.bf16 %v567_v7, %v567_v7  ;;  %v600_v24 = vpack.c.bf16 %v568_v12, %v568_v12 }
  0x30   : > { %v601_v25 = vpack.c.bf16 %v569_v13, %v569_v13  ;;  %v377_v28 = vsel %vm360_vm0, %v1250_v62, %v312_v14  ;;  %v378_v29 = vsel %vm360_vm0, %v1252_v63, %v313_v15  ;;  %v379_v30 = vsel %vm360_vm0, %v1254_v0, %v314_v20 }
  0x31   : > { %v380_v31 = vsel %vm360_vm0, %v1256_v1, %v315_v21  ;;  %631 = vst.msk [vmem:[%s1170_s20 + $0x30] sm:$0xf] %vm618_vm1, %v598_v22  ;;  %632 = vst.msk [vmem:[%s1170_s20 + $0x34] sm:$0xf] %vm618_vm1, %v599_v23  ;;  %v506_v32 = vsub.f32 %v1250_v62, %v377_v28  ;;  %v507_v33 = vsub.f32 %v1252_v63, %v378_v29  ;;  %v1286_v37 = vunpack.c.h.bf16 %v1019_v26 }
  0x32   : > { %633 = vst.msk [vmem:[%s1170_s20 + $0x38] sm:$0xf] %vm618_vm1, %v600_v24  ;;  %634 = vst.msk [vmem:[%s1170_s20 + $0x3c] sm:$0xf] %vm618_vm1, %v601_v25  ;;  %v508_v34 = vsub.f32 %v1254_v0, %v379_v30  ;;  %v509_v35 = vsub.f32 %v1256_v1, %v380_v31  ;;  %v1288_v38 = vunpack.c.l.bf16 %v1020_v27  ;;  %v1290_v39 = vunpack.c.h.bf16 %v1020_v27 }
  0x33   : > { %v538_v40 = vmul.f32 0.75, %v506_v32  ;;  %v539_v41 = vmul.f32 0.75, %v507_v33  ;;  %v316_v44 = vrot.slane %v1284_v36, 7  ;;  %v317_v45 = vrot.slane %v1286_v37, 7 }
  0x34   : > { %v540_v42 = vmul.f32 0.75, %v508_v34  ;;  %v541_v43 = vmul.f32 0.75, %v509_v35  ;;  %v318_v46 = vrot.slane %v1288_v38, 7  ;;  %v319_v47 = vrot.slane %v1290_v39, 7 }
  0x35   : > { %v570_v48 = vadd.f32 %v538_v40, %v377_v28  ;;  %v571_v49 = vadd.f32 %v539_v41, %v378_v29  ;;  %v381_v52 = vsel %vm360_vm0, %v1284_v36, %v316_v44  ;;  %v382_v53 = vsel %vm360_vm0, %v1286_v37, %v317_v45 }
  0x36   : > { %v572_v50 = vadd.f32 %v540_v42, %v379_v30  ;;  %v573_v51 = vadd.f32 %v541_v43, %v380_v31  ;;  %v383_v54 = vsel %vm360_vm0, %v1288_v38, %v318_v46  ;;  %v384_v55 = vsel %vm360_vm0, %v1290_v39, %v319_v47  ;;  %v1023_v46 = vld [vmem:[%s1112_s17 + $0x70] sm:$0xff]   ;;  %v1024_v47 = vld [vmem:[%s1112_s17 + $0x78] sm:$0xff]  }
  0x37   : > { %v602_v2 = vpack.c.bf16 %v570_v48, %v570_v48  ;;  %v603_v7 = vpack.c.bf16 %v571_v49, %v571_v49  ;;  %v510_v14 = vsub.f32 %v1284_v36, %v381_v52  ;;  %v511_v15 = vsub.f32 %v1286_v37, %v382_v53 }
  0x38   : > { %v604_v12 = vpack.c.bf16 %v572_v50, %v572_v50  ;;  %v605_v13 = vpack.c.bf16 %v573_v51, %v573_v51  ;;  %v512_v20 = vsub.f32 %v1288_v38, %v383_v54  ;;  %v513_v21 = vsub.f32 %v1290_v39, %v384_v55 }
  0x39   : > { %635 = vst.msk [vmem:[%s1170_s20 + $0x40] sm:$0xf] %vm618_vm1, %v602_v2  ;;  %636 = vst.msk [vmem:[%s1170_s20 + $0x44] sm:$0xf] %vm618_vm1, %v603_v7  ;;  %v1318_v22 = vunpack.c.l.bf16 %v1021_v56  ;;  %v1320_v23 = vunpack.c.h.bf16 %v1021_v56  ;;  %v1322_v24 = vunpack.c.l.bf16 %v1022_v57  ;;  %v1324_v25 = vunpack.c.h.bf16 %v1022_v57 }
  0x3a   : > { %637 = vst.msk [vmem:[%s1170_s20 + $0x48] sm:$0xf] %vm618_vm1, %v604_v12  ;;  %638 = vst.msk [vmem:[%s1170_s20 + $0x4c] sm:$0xf] %vm618_vm1, %v605_v13  ;;  %v542_v26 = vmul.f32 0.75, %v510_v14  ;;  %v543_v27 = vmul.f32 0.75, %v511_v15  ;;  %v1352_v56 = vunpack.c.l.bf16 %v1023_v46  ;;  %v1354_v57 = vunpack.c.h.bf16 %v1023_v46 }
  0x3b   : > { %v544_v28 = vmul.f32 0.75, %v512_v20  ;;  %v545_v29 = vmul.f32 0.75, %v513_v21  ;;  %v320_v30 = vrot.slane %v1318_v22, 7  ;;  %v321_v31 = vrot.slane %v1320_v23, 7 }
  0x3c   : > { %v322_v32 = vrot.slane %v1322_v24, 7  ;;  %v323_v33 = vrot.slane %v1324_v25, 7  ;;  %v574_v34 = vadd.f32 %v542_v26, %v381_v52  ;;  %v575_v35 = vadd.f32 %v543_v27, %v382_v53 }
  0x3d   : > { %v576_v40 = vadd.f32 %v544_v28, %v383_v54  ;;  %v577_v41 = vadd.f32 %v545_v29, %v384_v55  ;;  %v385_v42 = vsel %vm360_vm0, %v1318_v22, %v320_v30  ;;  %v386_v43 = vsel %vm360_vm0, %v1320_v23, %v321_v31 }
  0x3e   : > { %v387_v44 = vsel %vm360_vm0, %v1322_v24, %v322_v32  ;;  %v388_v45 = vsel %vm360_vm0, %v1324_v25, %v323_v33  ;;  %v606_v48 = vpack.c.bf16 %v574_v34, %v574_v34  ;;  %v607_v49 = vpack.c.bf16 %v575_v35, %v575_v35 }
  0x3f   : > { %v608_v50 = vpack.c.bf16 %v576_v40, %v576_v40  ;;  %v609_v51 = vpack.c.bf16 %v577_v41, %v577_v41  ;;  %v514_v52 = vsub.f32 %v1318_v22, %v385_v42  ;;  %v515_v53 = vsub.f32 %v1320_v23, %v386_v43 }
  0x40   : > { %v516_v54 = vsub.f32 %v1322_v24, %v387_v44  ;;  %v517_v55 = vsub.f32 %v1324_v25, %v388_v45  ;;  %639 = vst.msk [vmem:[%s1170_s20 + $0x50] sm:$0xf] %vm618_vm1, %v606_v48  ;;  %640 = vst.msk [vmem:[%s1170_s20 + $0x54] sm:$0xf] %vm618_vm1, %v607_v49  ;;  %v1356_v2 = vunpack.c.l.bf16 %v1024_v47  ;;  %v1358_v7 = vunpack.c.h.bf16 %v1024_v47 }
  0x41   : > { %641 = vst.msk [vmem:[%s1170_s20 + $0x58] sm:$0xf] %vm618_vm1, %v608_v50  ;;  %642 = vst.msk [vmem:[%s1170_s20 + $0x5c] sm:$0xf] %vm618_vm1, %v609_v51  ;;  %v546_v12 = vmul.f32 0.75, %v514_v52  ;;  %v547_v13 = vmul.f32 0.75, %v515_v53 }
  0x42   : > { %v548_v14 = vmul.f32 0.75, %v516_v54  ;;  %v549_v15 = vmul.f32 0.75, %v517_v55  ;;  %v324_v20 = vrot.slane %v1352_v56, 7  ;;  %v325_v21 = vrot.slane %v1354_v57, 7 }
  0x43   : > { %v326_v26 = vrot.slane %v1356_v2, 7  ;;  %v327_v27 = vrot.slane %v1358_v7, 7  ;;  %v578_v28 = vadd.f32 %v546_v12, %v385_v42  ;;  %v579_v29 = vadd.f32 %v547_v13, %v386_v43 }
  0x44   : > { %v580_v30 = vadd.f32 %v548_v14, %v387_v44  ;;  %v581_v31 = vadd.f32 %v549_v15, %v388_v45  ;;  %v389_v32 = vsel %vm360_vm0, %v1352_v56, %v324_v20  ;;  %v390_v33 = vsel %vm360_vm0, %v1354_v57, %v325_v21 }
  0x45   : > { %v391_v34 = vsel %vm360_vm0, %v1356_v2, %v326_v26  ;;  %v392_v35 = vsel %vm360_vm0, %v1358_v7, %v327_v27  ;;  %v610_v40 = vpack.c.bf16 %v578_v28, %v578_v28  ;;  %v611_v41 = vpack.c.bf16 %v579_v29, %v579_v29 }
  0x46   : > { %v612_v42 = vpack.c.bf16 %v580_v30, %v580_v30  ;;  %v613_v43 = vpack.c.bf16 %v581_v31, %v581_v31  ;;  %v518_v44 = vsub.f32 %v1352_v56, %v389_v32  ;;  %v519_v45 = vsub.f32 %v1354_v57, %v390_v33 }
  0x47   : > { %v520_v46 = vsub.f32 %v1356_v2, %v391_v34  ;;  %v521_v47 = vsub.f32 %v1358_v7, %v392_v35  ;;  %643 = vst.msk [vmem:[%s1170_s20 + $0x60] sm:$0xf] %vm618_vm1, %v610_v40  ;;  %644 = vst.msk [vmem:[%s1170_s20 + $0x64] sm:$0xf] %vm618_vm1, %v611_v41  ;;  %v393_v48 = vrot.slane %v1117_v3, 1  ;;  %v394_v49 = vrot.slane %v1119_v4, 1 }
  0x48   : > { %645 = vst.msk [vmem:[%s1170_s20 + $0x68] sm:$0xf] %vm618_vm1, %v612_v42  ;;  %646 = vst.msk [vmem:[%s1170_s20 + $0x6c] sm:$0xf] %vm618_vm1, %v613_v43  ;;  %v395_v50 = vrot.slane %v1121_v5, 1  ;;  %v396_v51 = vrot.slane %v1123_v6, 1 }
  0x49   : > { %v550_v52 = vmul.f32 0.75, %v518_v44  ;;  %v551_v53 = vmul.f32 0.75, %v519_v45  ;;  %v552_v54 = vmul.f32 0.75, %v520_v46  ;;  %v553_v55 = vmul.f32 0.75, %v521_v47 }
  0x4a   : > { %v458_v12 = vsel %vm457_vm2, %v393_v48, %v1117_v3  ;;  %v459_v13 = vsel %vm457_vm2, %v394_v49, %v1119_v4  ;;  %v460_v14 = vsel %vm457_vm2, %v395_v50, %v1121_v5  ;;  %v461_v15 = vsel %vm457_vm2, %v396_v51, %v1123_v6 }
  0x4b   : > { %v582_v20 = vadd.f32 %v550_v52, %v389_v32  ;;  %v583_v21 = vadd.f32 %v551_v53, %v390_v33  ;;  %v584_v26 = vadd.f32 %v552_v54, %v391_v34  ;;  %v585_v27 = vadd.f32 %v553_v55, %v392_v35 }
  0x4c   : > { %v651_v28 = vsub.f32 %v458_v12, %v1117_v3  ;;  %v652_v29 = vsub.f32 %v459_v13, %v1119_v4  ;;  %v653_v30 = vsub.f32 %v460_v14, %v1121_v5  ;;  %v654_v31 = vsub.f32 %v461_v15, %v1123_v6 }
  0x4d   : > { %v614_v40 = vpack.c.bf16 %v582_v20, %v582_v20  ;;  %v615_v41 = vpack.c.bf16 %v583_v21, %v583_v21  ;;  %v616_v42 = vpack.c.bf16 %v584_v26, %v584_v26  ;;  %v617_v43 = vpack.c.bf16 %v585_v27, %v585_v27 }
  0x4e   : > { %v683_v32 = vmul.f32 0.25, %v651_v28  ;;  %v684_v33 = vmul.f32 0.25, %v652_v29  ;;  %v685_v44 = vmul.f32 0.25, %v653_v30  ;;  %v686_v34 = vmul.f32 0.25, %v654_v31 }
  0x4f   : > { %647 = vst.msk [vmem:[%s1170_s20 + $0x70] sm:$0xf] %vm618_vm1, %v614_v40  ;;  %648 = vst.msk [vmem:[%s1170_s20 + $0x74] sm:$0xf] %vm618_vm1, %v615_v41  ;;  %v397_v35 = vrot.slane %v1126_v8, 1  ;;  %v398_v45 = vrot.slane %v1128_v9, 1 }
  0x50   : > { %649 = vst.msk [vmem:[%s1170_s20 + $0x78] sm:$0xf] %vm618_vm1, %v616_v42  ;;  %650 = vst.msk [vmem:[%s1170_s20 + $0x7c] sm:$0xf] %vm618_vm1, %v617_v43  ;;  %v399_v46 = vrot.slane %v1130_v10, 1  ;;  %v400_v47 = vrot.slane %v1132_v11, 1  ;;  %v715_v48 = vadd.f32 %v1117_v3, %v683_v32  ;;  %v716_v49 = vadd.f32 %v1119_v4, %v684_v33 }
  0x51   : > { %v717_v50 = vadd.f32 %v1121_v5, %v685_v44  ;;  %v718_v51 = vadd.f32 %v1123_v6, %v686_v34  ;;  %v462_v52 = vsel %vm457_vm2, %v397_v35, %v1126_v8  ;;  %v463_v3 = vsel %vm457_vm2, %v398_v45, %v1128_v9 }
  0x52   : > { %v464_v4 = vsel %vm457_vm2, %v399_v46, %v1130_v10  ;;  %v465_v5 = vsel %vm457_vm2, %v400_v47, %v1132_v11  ;;  %v747_v6 = vpack.c.bf16 %v715_v48, %v715_v48  ;;  %v748_v53 = vpack.c.bf16 %v716_v49, %v716_v49 }
  0x53   : > { %v749_v54 = vpack.c.bf16 %v717_v50, %v717_v50  ;;  %v750_v55 = vpack.c.bf16 %v718_v51, %v718_v51  ;;  %v655_v12 = vsub.f32 %v462_v52, %v1126_v8  ;;  %v656_v13 = vsub.f32 %v463_v3, %v1128_v9 }
  0x54   : > { %v657_v14 = vsub.f32 %v464_v4, %v1130_v10  ;;  %v658_v15 = vsub.f32 %v465_v5, %v1132_v11  ;;  %779 = vst.msk [vmem:[%s1420_s23] sm:$0xf] %vm618_vm1, %v747_v6  ;;  %780 = vst.msk [vmem:[%s1420_s23 + $0x4] sm:$0xf] %vm618_vm1, %v748_v53  ;;  %v401_v20 = vrot.slane %v1182_v58, 1  ;;  %v402_v21 = vrot.slane %v1184_v59, 1 }
  0x55   : > { %781 = vst.msk [vmem:[%s1420_s23 + $0x8] sm:$0xf] %vm618_vm1, %v749_v54  ;;  %782 = vst.msk [vmem:[%s1420_s23 + $0xc] sm:$0xf] %vm618_vm1, %v750_v55  ;;  %v403_v26 = vrot.slane %v1186_v60, 1  ;;  %v404_v27 = vrot.slane %v1188_v61, 1 }
  0x56   : > { %v687_v28 = vmul.f32 0.25, %v655_v12  ;;  %v688_v29 = vmul.f32 0.25, %v656_v13  ;;  %v689_v30 = vmul.f32 0.25, %v657_v14  ;;  %v690_v31 = vmul.f32 0.25, %v658_v15 }
  0x57   : > { %v466_v40 = vsel %vm457_vm2, %v401_v20, %v1182_v58  ;;  %v467_v41 = vsel %vm457_vm2, %v402_v21, %v1184_v59  ;;  %v468_v42 = vsel %vm457_vm2, %v403_v26, %v1186_v60  ;;  %v469_v43 = vsel %vm457_vm2, %v404_v27, %v1188_v61 }
  0x58   : > { %v719_v32 = vadd.f32 %v1126_v8, %v687_v28  ;;  %v720_v33 = vadd.f32 %v1128_v9, %v688_v29  ;;  %v721_v44 = vadd.f32 %v1130_v10, %v689_v30  ;;  %v722_v34 = vadd.f32 %v1132_v11, %v690_v31 }
  0x59   : > { %v659_v35 = vsub.f32 %v466_v40, %v1182_v58  ;;  %v660_v45 = vsub.f32 %v467_v41, %v1184_v59  ;;  %v661_v46 = vsub.f32 %v468_v42, %v1186_v60  ;;  %v662_v47 = vsub.f32 %v469_v43, %v1188_v61 }
  0x5a   : > { %v751_v48 = vpack.c.bf16 %v719_v32, %v719_v32  ;;  %v752_v8 = vpack.c.bf16 %v720_v33, %v720_v33  ;;  %v753_v49 = vpack.c.bf16 %v721_v44, %v721_v44  ;;  %v754_v50 = vpack.c.bf16 %v722_v34, %v722_v34 }
  0x5b   : > { %v691_v9 = vmul.f32 0.25, %v659_v35  ;;  %v692_v51 = vmul.f32 0.25, %v660_v45  ;;  %v693_v52 = vmul.f32 0.25, %v661_v46  ;;  %v694_v10 = vmul.f32 0.25, %v662_v47 }
  0x5c   : > { %783 = vst.msk [vmem:[%s1420_s23 + $0x10] sm:$0xf] %vm618_vm1, %v751_v48  ;;  %784 = vst.msk [vmem:[%s1420_s23 + $0x14] sm:$0xf] %vm618_vm1, %v752_v8  ;;  %v405_v11 = vrot.slane %v1204_v16, 1  ;;  %v406_v3 = vrot.slane %v1206_v17, 1 }
  0x5d   : > { %785 = vst.msk [vmem:[%s1420_s23 + $0x18] sm:$0xf] %vm618_vm1, %v753_v49  ;;  %786 = vst.msk [vmem:[%s1420_s23 + $0x1c] sm:$0xf] %vm618_vm1, %v754_v50  ;;  %v407_v4 = vrot.slane %v1208_v18, 1  ;;  %v408_v5 = vrot.slane %v1210_v19, 1  ;;  %v723_v6 = vadd.f32 %v1182_v58, %v691_v9  ;;  %v724_v53 = vadd.f32 %v1184_v59, %v692_v51 }
  0x5e   : > { %v725_v54 = vadd.f32 %v1186_v60, %v693_v52  ;;  %v726_v55 = vadd.f32 %v1188_v61, %v694_v10  ;;  %v470_v12 = vsel %vm457_vm2, %v405_v11, %v1204_v16  ;;  %v471_v13 = vsel %vm457_vm2, %v406_v3, %v1206_v17 }
  0x5f   : > { %v472_v14 = vsel %vm457_vm2, %v407_v4, %v1208_v18  ;;  %v473_v58 = vsel %vm457_vm2, %v408_v5, %v1210_v19  ;;  %v755_v59 = vpack.c.bf16 %v723_v6, %v723_v6  ;;  %v756_v15 = vpack.c.bf16 %v724_v53, %v724_v53 }
  0x60   : > { %v757_v20 = vpack.c.bf16 %v725_v54, %v725_v54  ;;  %v758_v60 = vpack.c.bf16 %v726_v55, %v726_v55  ;;  %v663_v21 = vsub.f32 %v470_v12, %v1204_v16  ;;  %v664_v61 = vsub.f32 %v471_v13, %v1206_v17 }
  0x61   : > { %v665_v26 = vsub.f32 %v472_v14, %v1208_v18  ;;  %v666_v27 = vsub.f32 %v473_v58, %v1210_v19  ;;  %787 = vst.msk [vmem:[%s1420_s23 + $0x20] sm:$0xf] %vm618_vm1, %v755_v59  ;;  %788 = vst.msk [vmem:[%s1420_s23 + $0x24] sm:$0xf] %vm618_vm1, %v756_v15  ;;  %v409_v28 = vrot.slane %v1250_v62, 1  ;;  %v410_v29 = vrot.slane %v1252_v63, 1 }
  0x62   : > { %789 = vst.msk [vmem:[%s1420_s23 + $0x28] sm:$0xf] %vm618_vm1, %v757_v20  ;;  %790 = vst.msk [vmem:[%s1420_s23 + $0x2c] sm:$0xf] %vm618_vm1, %v758_v60  ;;  %v411_v30 = vrot.slane %v1254_v0, 1  ;;  %v412_v31 = vrot.slane %v1256_v1, 1 }
  0x63   : > { %v695_v40 = vmul.f32 0.25, %v663_v21  ;;  %v696_v41 = vmul.f32 0.25, %v664_v61  ;;  %v697_v42 = vmul.f32 0.25, %v665_v26  ;;  %v698_v43 = vmul.f32 0.25, %v666_v27 }
  0x64   : > { %v474_v32 = vsel %vm457_vm2, %v409_v28, %v1250_v62  ;;  %v475_v33 = vsel %vm457_vm2, %v410_v29, %v1252_v63  ;;  %v476_v44 = vsel %vm457_vm2, %v411_v30, %v1254_v0  ;;  %v477_v34 = vsel %vm457_vm2, %v412_v31, %v1256_v1 }
  0x65   : > { %v727_v35 = vadd.f32 %v1204_v16, %v695_v40  ;;  %v728_v45 = vadd.f32 %v1206_v17, %v696_v41  ;;  %v729_v46 = vadd.f32 %v1208_v18, %v697_v42  ;;  %v730_v47 = vadd.f32 %v1210_v19, %v698_v43 }
  0x66   : > { %v667_v48 = vsub.f32 %v474_v32, %v1250_v62  ;;  %v668_v8 = vsub.f32 %v475_v33, %v1252_v63  ;;  %v669_v49 = vsub.f32 %v476_v44, %v1254_v0  ;;  %v670_v50 = vsub.f32 %v477_v34, %v1256_v1 }
  0x67   : > { %v759_v9 = vpack.c.bf16 %v727_v35, %v727_v35  ;;  %v760_v16 = vpack.c.bf16 %v728_v45, %v728_v45  ;;  %v761_v51 = vpack.c.bf16 %v729_v46, %v729_v46  ;;  %v762_v52 = vpack.c.bf16 %v730_v47, %v730_v47 }
  0x68   : > { %v699_v17 = vmul.f32 0.25, %v667_v48  ;;  %v700_v10 = vmul.f32 0.25, %v668_v8  ;;  %v701_v11 = vmul.f32 0.25, %v669_v49  ;;  %v702_v18 = vmul.f32 0.25, %v670_v50 }
  0x69   : > { %791 = vst.msk [vmem:[%s1420_s23 + $0x30] sm:$0xf] %vm618_vm1, %v759_v9  ;;  %792 = vst.msk [vmem:[%s1420_s23 + $0x34] sm:$0xf] %vm618_vm1, %v760_v16  ;;  %v413_v19 = vrot.slane %v1284_v36, 1  ;;  %v414_v3 = vrot.slane %v1286_v37, 1 }
  0x6a   : > { %793 = vst.msk [vmem:[%s1420_s23 + $0x38] sm:$0xf] %vm618_vm1, %v761_v51  ;;  %794 = vst.msk [vmem:[%s1420_s23 + $0x3c] sm:$0xf] %vm618_vm1, %v762_v52  ;;  %v415_v4 = vrot.slane %v1288_v38, 1  ;;  %v416_v5 = vrot.slane %v1290_v39, 1  ;;  %v731_v6 = vadd.f32 %v1250_v62, %v699_v17  ;;  %v732_v53 = vadd.f32 %v1252_v63, %v700_v10 }
  0x6b   : > { %v733_v54 = vadd.f32 %v1254_v0, %v701_v11  ;;  %v734_v55 = vadd.f32 %v1256_v1, %v702_v18  ;;  %v478_v12 = vsel %vm457_vm2, %v413_v19, %v1284_v36  ;;  %v479_v13 = vsel %vm457_vm2, %v414_v3, %v1286_v37 }
  0x6c   : > { %v480_v14 = vsel %vm457_vm2, %v415_v4, %v1288_v38  ;;  %v481_v62 = vsel %vm457_vm2, %v416_v5, %v1290_v39  ;;  %v763_v63 = vpack.c.bf16 %v731_v6, %v731_v6  ;;  %v764_v58 = vpack.c.bf16 %v732_v53, %v732_v53 }
  0x6d   : > { %v765_v59 = vpack.c.bf16 %v733_v54, %v733_v54  ;;  %v766_v0 = vpack.c.bf16 %v734_v55, %v734_v55  ;;  %v671_v15 = vsub.f32 %v478_v12, %v1284_v36  ;;  %v672_v1 = vsub.f32 %v479_v13, %v1286_v37 }
  0x6e   : > { %v673_v20 = vsub.f32 %v480_v14, %v1288_v38  ;;  %v674_v60 = vsub.f32 %v481_v62, %v1290_v39  ;;  %795 = vst.msk [vmem:[%s1420_s23 + $0x40] sm:$0xf] %vm618_vm1, %v763_v63  ;;  %796 = vst.msk [vmem:[%s1420_s23 + $0x44] sm:$0xf] %vm618_vm1, %v764_v58  ;;  %v417_v21 = vrot.slane %v1318_v22, 1  ;;  %v418_v61 = vrot.slane %v1320_v23, 1 }
  0x6f   : > { %797 = vst.msk [vmem:[%s1420_s23 + $0x48] sm:$0xf] %vm618_vm1, %v765_v59  ;;  %798 = vst.msk [vmem:[%s1420_s23 + $0x4c] sm:$0xf] %vm618_vm1, %v766_v0  ;;  %v419_v26 = vrot.slane %v1322_v24, 1  ;;  %v420_v27 = vrot.slane %v1324_v25, 1 }
  0x70   : > { %v703_v28 = vmul.f32 0.25, %v671_v15  ;;  %v704_v29 = vmul.f32 0.25, %v672_v1  ;;  %v705_v30 = vmul.f32 0.25, %v673_v20  ;;  %v706_v31 = vmul.f32 0.25, %v674_v60 }
  0x71   : > { %v482_v40 = vsel %vm457_vm2, %v417_v21, %v1318_v22  ;;  %v483_v41 = vsel %vm457_vm2, %v418_v61, %v1320_v23  ;;  %v484_v42 = vsel %vm457_vm2, %v419_v26, %v1322_v24  ;;  %v485_v43 = vsel %vm457_vm2, %v420_v27, %v1324_v25 }
  0x72   : > { %v735_v32 = vadd.f32 %v1284_v36, %v703_v28  ;;  %v736_v33 = vadd.f32 %v1286_v37, %v704_v29  ;;  %v737_v44 = vadd.f32 %v1288_v38, %v705_v30  ;;  %v738_v34 = vadd.f32 %v1290_v39, %v706_v31 }
  0x73   : > { %v675_v35 = vsub.f32 %v482_v40, %v1318_v22  ;;  %v676_v45 = vsub.f32 %v483_v41, %v1320_v23  ;;  %v677_v46 = vsub.f32 %v484_v42, %v1322_v24  ;;  %v678_v47 = vsub.f32 %v485_v43, %v1324_v25 }
  0x74   : > { %v767_v48 = vpack.c.bf16 %v735_v32, %v735_v32  ;;  %v768_v36 = vpack.c.bf16 %v736_v33, %v736_v33  ;;  %v769_v8 = vpack.c.bf16 %v737_v44, %v737_v44  ;;  %v770_v49 = vpack.c.bf16 %v738_v34, %v738_v34 }
  0x75   : > { %v707_v37 = vmul.f32 0.25, %v675_v35  ;;  %v708_v50 = vmul.f32 0.25, %v676_v45  ;;  %v709_v9 = vmul.f32 0.25, %v677_v46  ;;  %v710_v38 = vmul.f32 0.25, %v678_v47 }
  0x76   : > { %799 = vst.msk [vmem:[%s1420_s23 + $0x50] sm:$0xf] %vm618_vm1, %v767_v48  ;;  %800 = vst.msk [vmem:[%s1420_s23 + $0x54] sm:$0xf] %vm618_vm1, %v768_v36  ;;  %v421_v39 = vrot.slane %v1352_v56, 1  ;;  %v422_v16 = vrot.slane %v1354_v57, 1 }
  0x77   : > { %801 = vst.msk [vmem:[%s1420_s23 + $0x58] sm:$0xf] %vm618_vm1, %v769_v8  ;;  %802 = vst.msk [vmem:[%s1420_s23 + $0x5c] sm:$0xf] %vm618_vm1, %v770_v49  ;;  %v423_v51 = vrot.slane %v1356_v2, 1  ;;  %v424_v52 = vrot.slane %v1358_v7, 1  ;;  %v739_v17 = vadd.f32 %v1318_v22, %v707_v37  ;;  %v740_v10 = vadd.f32 %v1320_v23, %v708_v50 }
  0x78   : > { %v741_v11 = vadd.f32 %v1322_v24, %v709_v9  ;;  %v742_v18 = vadd.f32 %v1324_v25, %v710_v38  ;;  %v486_v19 = vsel %vm457_vm2, %v421_v39, %v1352_v56  ;;  %v487_v3 = vsel %vm457_vm2, %v422_v16, %v1354_v57 }
  0x79   : > { %v488_v4 = vsel %vm457_vm2, %v423_v51, %v1356_v2  ;;  %v489_v22 = vsel %vm457_vm2, %v424_v52, %v1358_v7  ;;  %v771_v23 = vpack.c.bf16 %v739_v17, %v739_v17  ;;  %v772_v5 = vpack.c.bf16 %v740_v10, %v740_v10 }
  0x7a   : > { %v773_v6 = vpack.c.bf16 %v741_v11, %v741_v11  ;;  %v774_v24 = vpack.c.bf16 %v742_v18, %v742_v18  ;;  %v679_v53 = vsub.f32 %v486_v19, %v1352_v56  ;;  %v680_v25 = vsub.f32 %v487_v3, %v1354_v57 }
  0x7b   : > { %v681_v54 = vsub.f32 %v488_v4, %v1356_v2  ;;  %v682_v55 = vsub.f32 %v489_v22, %v1358_v7  ;;  %803 = vst.msk [vmem:[%s1420_s23 + $0x60] sm:$0xf] %vm618_vm1, %v771_v23  ;;  %804 = vst.msk [vmem:[%s1420_s23 + $0x64] sm:$0xf] %vm618_vm1, %v772_v5 }
  0x7c   : > { %805 = vst.msk [vmem:[%s1420_s23 + $0x68] sm:$0xf] %vm618_vm1, %v773_v6  ;;  %806 = vst.msk [vmem:[%s1420_s23 + $0x6c] sm:$0xf] %vm618_vm1, %v774_v24  ;;  %v711_v12 = vmul.f32 0.25, %v679_v53  ;;  %v712_v13 = vmul.f32 0.25, %v680_v25 }
  0x7d   : > { %v713_v14 = vmul.f32 0.25, %v681_v54  ;;  %v714_v62 = vmul.f32 0.25, %v682_v55 }
  0x7e   : > { %v743_v63 = vadd.f32 %v1352_v56, %v711_v12  ;;  %v744_v58 = vadd.f32 %v1354_v57, %v712_v13 }
  0x7f   : > { %v745_v59 = vadd.f32 %v1356_v2, %v713_v14  ;;  %v746_v0 = vadd.f32 %v1358_v7, %v714_v62 }
  0x80   : > { %v775_v15 = vpack.c.bf16 %v743_v63, %v743_v63  ;;  %v776_v1 = vpack.c.bf16 %v744_v58, %v744_v58 }
  0x81   : > { %v777_v20 = vpack.c.bf16 %v745_v59, %v745_v59  ;;  %v778_v60 = vpack.c.bf16 %v746_v0, %v746_v0 }
  0x82   : > { %807 = vst.msk [vmem:[%s1420_s23 + $0x70] sm:$0xf] %vm618_vm1, %v775_v15  ;;  %808 = vst.msk [vmem:[%s1420_s23 + $0x74] sm:$0xf] %vm618_vm1, %v776_v1 }
  0x83   : > { %809 = vst.msk [vmem:[%s1420_s23 + $0x78] sm:$0xf] %vm618_vm1, %v777_v20  ;;  %810 = vst.msk [vmem:[%s1420_s23 + $0x7c] sm:$0xf] %vm618_vm1, %v778_v60 }
  0x84 PF: > { %s13_s11 = sadd.s32 1, %s1071_s11   ;;  %s1634_s9 = smov %s1067_s10 }
  0x85   : > { %p10_p5 = scmp.ge.s32.totalorder %s13_s11, 4   ;;  %s1635_s10 = smov %s1637_s12 }
  0x87   :  { %12 = sbr.rel (!%p10_p5) target bundleno = 2 (0x2), region = 66 }

// kernel: decoder_bottleneck_forward.10
= control target key start
LH: loop header
LB: loop body
LE: loop exit
PB: predicated region body
PF: predicated region fallthrough
CT: control target
= control target key end

     0   :  { %s1452_s15 = smov 0   ;;  %s1454_s16 = smov 0   ;;  %s1770_s0 = inlined_call_operand.vmem [shape: bf16[512,16], index: 0, kind: input, shape index: {}]   ;;  %s1771_s1 = inlined_call_operand.vmem [shape: bf16[16,8], index: 1, kind: input, shape index: {}]   ;;  %s1772_s2 = inlined_call_operand.vmem [shape: f32[1,8], index: 2, kind: input, shape index: {}]   ;;  %s1773_s3 = inlined_call_operand.vmem [shape: f32[1,8], index: 3, kind: input, shape index: {}]   ;;  %s1774_s4 = inlined_call_operand.vmem [shape: bf16[512,8], index: 4, kind: output, shape index: {}]  }
   0x1   :  { %s1456_s17 = smov 0  }
   0x2 LB: > { %s33_s18 = sadd.s32 1, %s1420_s16  ;;  %p1201_p0 = scmp.ge.s32.totalorder %s1424_s17, 1  ;;  %s1424_s17 = sphi %s1456_s17, %s14_s17   ;;  %s1420_s16 = sphi %s1454_s16, %s1777_s16   ;;  %s1416_s15 = sphi %s1452_s15, %s1776_s15  }
   0x3   : > { %p35_p1 = scmp.ge.s32.totalorder %s33_s18, 2  ;;  %p221_p2 = scmp.lt.s32.totalorder %s1424_s17, 3 }
   0x5   : > { %s1779_s18 = smov (%p35_p1, %s33_s18), 0  ;;  %p222_p3 = pnand %p1201_p0, %p221_p2 }
   0x6   : > { %v1385_v0 = vld [vmem:[%s1771_s1] sm:$0xff] (!%p222_p3)   ;;  %s1202_s21 = sshll.u32 (!%p222_p3), %s1416_s15, 5  ;;  %vm305_vm0 = vcmask (!%p222_p3), 64512   ;;  %v1426_v1 = vmov (!%p222_p3), 0.0   ;;  %vm490_vm1 = vcmask (!%p222_p3), 130048   ;;  %vm1038_vm2 = vcmask (!%p222_p3), 60416  }
   0x7   : > { %225 = sbr.rel (%p222_p3) target bundleno = 291 (0x123), region = 36  ;;  %p1478_p4 = scmp.lt.s32.totalorder (!%p222_p3), %s1202_s21, 63  ;;  %1324 = vmatprep.subr.bf16.mxu0 (!%p222_p3), %v1385_v0  ;;  %1358 = vmatprep.subr.bf16.mxu1 (!%p222_p3), %v1385_v0  ;;  %308 = vst.msk [vmem:[#allocation2 + $0x10] sm:$0xff] (!%p222_p3), %vm305_vm0, %v1426_v1  ;;  %306 = vst.msk [vmem:[#allocation2] sm:$0xff] (!%p222_p3), %vm305_vm0, %v1426_v1  ;;  %v1571_v45 = vld [vmem:[%s1772_s2] ss:$0 sm:$0xff] (!%p222_p3) }
   0x8   : > { %307 = vst.msk [vmem:[#allocation2 + $0x8] sm:$0xff] (!%p222_p3), %vm305_vm0, %v1426_v1  ;;  %309 = vst.msk [vmem:[#allocation2 + $0x18] sm:$0xff] (!%p222_p3), %vm305_vm0, %v1426_v1  ;;  %1325 = vmatpush3.bf16.msra.mxu0 (!%p222_p3), %v1385_v0  ;;  %1359 = vmatpush3.bf16.msra.mxu1 (!%p222_p3), %v1385_v0  ;;  %v1576_v55 = vld [vmem:[%s1773_s3] ss:$0 sm:$0xff] (!%p222_p3) }
   0x9   : > { %310 = vst.msk [vmem:[#allocation2 + $0x20] sm:$0xff] (!%p222_p3), %vm305_vm0, %v1426_v1  ;;  %311 = vst.msk [vmem:[#allocation2 + $0x28] sm:$0xff] (!%p222_p3), %vm305_vm0, %v1426_v1 }
   0xa   : > { %312 = vst.msk [vmem:[#allocation2 + $0x30] sm:$0xff] (!%p222_p3), %vm305_vm0, %v1426_v1  ;;  %313 = vst.msk [vmem:[#allocation2 + $0x38] sm:$0xff] (!%p222_p3), %vm305_vm0, %v1426_v1 }
   0xb   : > { %314 = vst.msk [vmem:[#allocation2 + $0x40] sm:$0xff] (!%p222_p3), %vm305_vm0, %v1426_v1  ;;  %315 = vst.msk [vmem:[#allocation2 + $0x48] sm:$0xff] (!%p222_p3), %vm305_vm0, %v1426_v1 }
   0xc   : > { %316 = vst.msk [vmem:[#allocation2 + $0x50] sm:$0xff] (!%p222_p3), %vm305_vm0, %v1426_v1  ;;  %317 = vst.msk [vmem:[#allocation2 + $0x58] sm:$0xff] (!%p222_p3), %vm305_vm0, %v1426_v1 }
   0xd   : > { %318 = vst.msk [vmem:[#allocation2 + $0x60] sm:$0xff] (!%p222_p3), %vm305_vm0, %v1426_v1  ;;  %319 = vst.msk [vmem:[#allocation2 + $0x68] sm:$0xff] (!%p222_p3), %vm305_vm0, %v1426_v1 }
   0xe   : > { %320 = vst.msk [vmem:[#allocation2 + $0x70] sm:$0xff] %vm305_vm0, %v1426_v1  ;;  %321 = vst.msk [vmem:[#allocation2 + $0x78] sm:$0xff] %vm305_vm0, %v1426_v1  ;;  %s1781_s21 = smov (!%p1478_p4, %s1202_s21), 63  ;;  %v340_v18 = vld [vmem:[#allocation2 + $0x10] sm:$0xff]  ;;  %v338_v20 = vld [vmem:[#allocation2] sm:$0xff] }
   0xf   : > { %322 = vst.msk [vmem:[#allocation2 + $0x80] sm:$0xff] %vm305_vm0, %v1426_v1  ;;  %323 = vst.msk [vmem:[#allocation2 + $0x88] sm:$0xff] %vm305_vm0, %v1426_v1  ;;  %s1203_s23 = sshll.u32 %s1781_s21, 2  ;;  %v341_v23 = vld [vmem:[#allocation2 + $0x18] sm:$0xff]  ;;  %v339_v28 = vld [vmem:[#allocation2 + $0x8] sm:$0xff] }
  0x10   : > { %324 = vst.msk [vmem:[#allocation2 + $0x90] sm:$0xff] %vm305_vm0, %v1426_v1  ;;  %325 = vst.msk [vmem:[#allocation2 + $0x98] sm:$0xff] %vm305_vm0, %v1426_v1  ;;  %s1526_s26 = scalar_lea.vmem %s1770_s0, %s1203_s23  ;;  %v342_v44 = vld [vmem:[#allocation2 + $0x20] sm:$0xff]  ;;  %v343_v53 = vld [vmem:[#allocation2 + $0x28] sm:$0xff]  ;;  %s1604_s7 = scalar_lea.vmem %s1774_s4, %s1203_s23 }
  0x11   : > { %326 = vst.msk [vmem:[#allocation2 + $0xa0] sm:$0xff] %vm305_vm0, %v1426_v1  ;;  %327 = vst.msk [vmem:[#allocation2 + $0xa8] sm:$0xff] %vm305_vm0, %v1426_v1  ;;  %v1386_v2 = vld [vmem:[%s1526_s26] sm:$0xff]   ;;  %v1388_v4 = vld [vmem:[%s1526_s26 + $0x8] sm:$0xff]  }
  0x12   : > { %328 = vst.msk [vmem:[#allocation2 + $0xb0] sm:$0xff] %vm305_vm0, %v1426_v1  ;;  %329 = vst.msk [vmem:[#allocation2 + $0xb8] sm:$0xff] %vm305_vm0, %v1426_v1  ;;  %v1387_v3 = vld [vmem:[%s1526_s26 + $0x40] sm:$0xff]   ;;  %1326 = vmatprep.mubr.msk.bf16.mxu0 %vm490_vm1, %v1386_v2  ;;  %v1389_v5 = vld [vmem:[%s1526_s26 + $0x48] sm:$0xff]  }
  0x13   : > { %330 = vst.msk [vmem:[#allocation2 + $0xc0] sm:$0xff] %vm305_vm0, %v1426_v1  ;;  %331 = vst.msk [vmem:[#allocation2 + $0xc8] sm:$0xff] %vm305_vm0, %v1426_v1  ;;  %1342 = vmatprep.mubr.msk.bf16.mxu1 %vm490_vm1, %v1387_v3  ;;  %1327 = vmatmul.mubr.msk.bf16.vlgmr.msra.gmra.mrb[0].mxu0 %vm490_vm1, %v1388_v4  ;;  %v1390_v6 = vld [vmem:[%s1526_s26 + $0x10] sm:$0xff]   ;;  %v1392_v8 = vld [vmem:[%s1526_s26 + $0x18] sm:$0xff]  }
  0x14   : > { %332 = vst.msk [vmem:[#allocation2 + $0xd0] sm:$0xff] %vm305_vm0, %v1426_v1  ;;  %333 = vst.msk [vmem:[#allocation2 + $0xd8] sm:$0xff] %vm305_vm0, %v1426_v1  ;;  %1343 = vmatmul.mubr.msk.bf16.vlgmr.msra.gmra.mrb[0].mxu1 %vm490_vm1, %v1389_v5  ;;  %v1391_v7 = vld [vmem:[%s1526_s26 + $0x50] sm:$0xff]   ;;  %1330 = vmatprep.mubr.msk.bf16.mxu0 %vm490_vm1, %v1390_v6  ;;  %v1393_v9 = vld [vmem:[%s1526_s26 + $0x58] sm:$0xff]  }
  0x15   : > { %334 = vst.msk [vmem:[#allocation2 + $0xe0] sm:$0xff] %vm305_vm0, %v1426_v1  ;;  %335 = vst.msk [vmem:[#allocation2 + $0xe8] sm:$0xff] %vm305_vm0, %v1426_v1  ;;  %1346 = vmatprep.mubr.msk.bf16.mxu1 %vm490_vm1, %v1391_v7  ;;  %v1394_v10 = vld [vmem:[%s1526_s26 + $0x20] sm:$0xff]   ;;  %v1396_v12 = vld [vmem:[%s1526_s26 + $0x28] sm:$0xff]  }
  0x16   : > { %336 = vst.msk [vmem:[#allocation2 + $0xf0] sm:$0xff] %vm305_vm0, %v1426_v1  ;;  %337 = vst.msk [vmem:[#allocation2 + $0xf8] sm:$0xff] %vm305_vm0, %v1426_v1  ;;  %v1395_v11 = vld [vmem:[%s1526_s26 + $0x60] sm:$0xff]   ;;  %v1397_v13 = vld [vmem:[%s1526_s26 + $0x68] sm:$0xff]  }
  0x17   : > { %v1398_v14 = vld [vmem:[%s1526_s26 + $0x30] sm:$0xff]   ;;  %v1400_v16 = vld [vmem:[%s1526_s26 + $0x38] sm:$0xff]   ;;  %v354_v22 = vld [vmem:[#allocation2 + $0x80] sm:$0xff] }
  0x18   : > { %v1399_v15 = vld [vmem:[%s1526_s26 + $0x70] sm:$0xff]   ;;  %v1401_v17 = vld [vmem:[%s1526_s26 + $0x78] sm:$0xff]   ;;  %v355_v33 = vld [vmem:[#allocation2 + $0x88] sm:$0xff] }
  0x19   : > { %v356_v19 = vld [vmem:[#allocation2 + $0x90] sm:$0xff]  ;;  %v357_v27 = vld [vmem:[#allocation2 + $0x98] sm:$0xff]  ;;  %v358_v47 = vld [vmem:[#allocation2 + $0xa0] sm:$0xff] }
  0x1a   : > { %v344_v42 = vld [vmem:[#allocation2 + $0x30] sm:$0xff]  ;;  %v345_v48 = vld [vmem:[#allocation2 + $0x38] sm:$0xff]  ;;  %v359_v60 = vld [vmem:[#allocation2 + $0xa8] sm:$0xff] }
  0x1b   : > { %1331 = vmatmul.mubr.msk.bf16.gmra.mrb[4].mxu0 %vm490_vm1, %v1392_v8  ;;  %v360_v43 = vld [vmem:[#allocation2 + $0xb0] sm:$0xff]  ;;  %v361_v52 = vld [vmem:[#allocation2 + $0xb8] sm:$0xff] }
  0x1c   : > { %1347 = vmatmul.mubr.msk.bf16.gmra.mrb[4].mxu1 %vm490_vm1, %v1393_v9  ;;  %1334 = vmatprep.mubr.msk.bf16.mxu0 %vm490_vm1, %v1394_v10 }
  0x1d   : > { %1350 = vmatprep.mubr.msk.bf16.mxu1 %vm490_vm1, %v1395_v11 }
  0x23   : > { %1335 = vmatmul.mubr.msk.bf16.gmra.mrb[8].mxu0 %vm490_vm1, %v1396_v12 }
  0x24   : > { %1351 = vmatmul.mubr.msk.bf16.gmra.mrb[8].mxu1 %vm490_vm1, %v1397_v13  ;;  %1338 = vmatprep.mubr.msk.bf16.mxu0 %vm490_vm1, %v1398_v14 }
  0x25   : > { %1354 = vmatprep.mubr.msk.bf16.mxu1 %vm490_vm1, %v1399_v15 }
  0x2b   : > { %1339 = vmatmul.mubr.msk.bf16.gmra.mrb[12].mxu0 %vm490_vm1, %v1400_v16 }
  0x2c   : > { %1355 = vmatmul.mubr.msk.bf16.gmra.mrb[12].mxu1 %vm490_vm1, %v1401_v17 }
  0xe6   : > { %v1328_v21 = vpop.f32.mrb[0].mxu0 }
  0xe7   : > { %v702_v24 = vadd.f32 %v1328_v21, %v340_v18  ;;  %v1344_v25 = vpop.f32.mrb[0].mxu1  ;;  %v573_v26 = vpop.f32.mrb[1].mxu0 }
  0xe8   : > { %v718_v29 = vadd.f32 %v1344_v25, %v356_v19  ;;  %v700_v30 = vadd.f32 %v573_v26, %v338_v20  ;;  %v637_v31 = vpop.f32.mrb[1].mxu1  ;;  %v1329_v32 = vpop.f32.mrb[2].mxu0 }
  0xe9   : > { %735 = vst.msk [vmem:[#allocation2 + $0x10] sm:$0xff] %vm305_vm0, %v702_v24  ;;  %v716_v34 = vadd.f32 %v637_v31, %v354_v22  ;;  %v703_v35 = vadd.f32 %v1329_v32, %v341_v23  ;;  %v1345_v36 = vpop.f32.mrb[2].mxu1  ;;  %v576_v37 = vpop.f32.mrb[3].mxu0 }
  0xea   : > { %751 = vst.msk [vmem:[#allocation2 + $0x90] sm:$0xff] %vm305_vm0, %v718_v29  ;;  %733 = vst.msk [vmem:[#allocation2] sm:$0xff] %vm305_vm0, %v700_v30  ;;  %v719_v38 = vadd.f32 %v1345_v36, %v357_v27  ;;  %v701_v39 = vadd.f32 %v576_v37, %v339_v28  ;;  %v640_v40 = vpop.f32.mrb[3].mxu1 }
  0xeb   : > { %749 = vst.msk [vmem:[#allocation2 + $0x80] sm:$0xff] %vm305_vm0, %v716_v34  ;;  %736 = vst.msk [vmem:[#allocation2 + $0x18] sm:$0xff] %vm305_vm0, %v703_v35  ;;  %v717_v41 = vadd.f32 %v640_v40, %v355_v33 }
  0xec   : > { %752 = vst.msk [vmem:[#allocation2 + $0x98] sm:$0xff] %vm305_vm0, %v719_v38  ;;  %734 = vst.msk [vmem:[#allocation2 + $0x8] sm:$0xff] %vm305_vm0, %v701_v39 }
  0xed   : > { %750 = vst.msk [vmem:[#allocation2 + $0x88] sm:$0xff] %vm305_vm0, %v717_v41 }
  0xee   : > { %v1332_v46 = vpop.f32.mrb[4].mxu0 }
  0xef   : > { %v706_v49 = vadd.f32 %v1332_v46, %v344_v42  ;;  %v1348_v50 = vpop.f32.mrb[4].mxu1  ;;  %v589_v51 = vpop.f32.mrb[5].mxu0 }
  0xf0   : > { %v770_v54 = vld [vmem:[#allocation2 + $0x10] sm:$0xff]  ;;  %v722_v56 = vadd.f32 %v1348_v50, %v360_v43  ;;  %v704_v57 = vadd.f32 %v589_v51, %v342_v44  ;;  %v653_v58 = vpop.f32.mrb[5].mxu1  ;;  %v1333_v59 = vpop.f32.mrb[6].mxu0 }
  0xf1   : > { %v809_v61 = vmul.f32 %v1571_v45, %v770_v54  ;;  %v786_v62 = vld [vmem:[#allocation2 + $0x90] sm:$0xff]  ;;  %v768_v63 = vld [vmem:[#allocation2] sm:$0xff]  ;;  %739 = vst.msk [vmem:[#allocation2 + $0x30] sm:$0xff] %vm305_vm0, %v706_v49  ;;  %v720_v0 = vadd.f32 %v653_v58, %v358_v47  ;;  %v707_v1 = vadd.f32 %v1333_v59, %v345_v48  ;;  %v1349_v2 = vpop.f32.mrb[6].mxu1  ;;  %v592_v3 = vpop.f32.mrb[7].mxu0 }
  0xf2   : > { %v825_v4 = vmul.f32 %v1571_v45, %v786_v62  ;;  %v807_v5 = vmul.f32 %v1571_v45, %v768_v63  ;;  %v784_v6 = vld [vmem:[#allocation2 + $0x80] sm:$0xff]  ;;  %v771_v7 = vld [vmem:[#allocation2 + $0x18] sm:$0xff]  ;;  %755 = vst.msk [vmem:[#allocation2 + $0xb0] sm:$0xff] %vm305_vm0, %v722_v56  ;;  %737 = vst.msk [vmem:[#allocation2 + $0x20] sm:$0xff] %vm305_vm0, %v704_v57  ;;  %v723_v8 = vadd.f32 %v1349_v2, %v361_v52  ;;  %v656_v10 = vpop.f32.mrb[7].mxu1 }
  0xf3   : > { %v705_v9 = vadd.f32 %v592_v3, %v343_v53  ;;  %v848_v11 = vadd.f32 %v1576_v55, %v809_v61  ;;  %v823_v12 = vmul.f32 %v1571_v45, %v784_v6  ;;  %v810_v13 = vmul.f32 %v1571_v45, %v771_v7  ;;  %v787_v14 = vld [vmem:[#allocation2 + $0x98] sm:$0xff]  ;;  %v769_v15 = vld [vmem:[#allocation2 + $0x8] sm:$0xff]  ;;  %753 = vst.msk [vmem:[#allocation2 + $0xa0] sm:$0xff] %vm305_vm0, %v720_v0 }
  0xf4   : > { %740 = vst.msk [vmem:[#allocation2 + $0x38] sm:$0xff] %vm305_vm0, %v707_v1  ;;  %v721_v16 = vadd.f32 %v656_v10, %v359_v60  ;;  %v864_v17 = vadd.f32 %v1576_v55, %v825_v4  ;;  %v846_v18 = vadd.f32 %v1576_v55, %v807_v5  ;;  %v826_v19 = vmul.f32 %v1571_v45, %v787_v14  ;;  %v785_v21 = vld [vmem:[#allocation2 + $0x88] sm:$0xff] }
  0xf5   : > { %v808_v20 = vmul.f32 %v1571_v45, %v769_v15  ;;  %756 = vst.msk [vmem:[#allocation2 + $0xb8] sm:$0xff] %vm305_vm0, %v723_v8  ;;  %738 = vst.msk [vmem:[#allocation2 + $0x28] sm:$0xff] %vm305_vm0, %v705_v9  ;;  %v880_v22 = vmax.f32 %v848_v11, 0.0  ;;  %v862_v23 = vadd.f32 %v1576_v55, %v823_v12  ;;  %v849_v24 = vadd.f32 %v1576_v55, %v810_v13  ;;  %v348_v12 = vld [vmem:[#allocation2 + $0x50] sm:$0xff] }
  0xf6   : > { %v824_v25 = vmul.f32 %v1571_v45, %v785_v21  ;;  %754 = vst.msk [vmem:[#allocation2 + $0xa8] sm:$0xff] %vm305_vm0, %v721_v16  ;;  %v896_v26 = vmax.f32 %v864_v17, 0.0  ;;  %v878_v27 = vmax.f32 %v846_v18, 0.0  ;;  %v865_v28 = vadd.f32 %v1576_v55, %v826_v19  ;;  %v1608_v30 = vpop.f32.mrb[8].mxu0  ;;  %v364_v17 = vld [vmem:[#allocation2 + $0xd0] sm:$0xff]  ;;  %v346_v18 = vld [vmem:[#allocation2 + $0x40] sm:$0xff] }
  0xf7   : > { %v847_v29 = vadd.f32 %v1576_v55, %v808_v20  ;;  %v1277_v31 = vpack.c.bf16 %v880_v22, %v880_v22  ;;  %v894_v32 = vmax.f32 %v862_v23, 0.0  ;;  %v881_v33 = vmax.f32 %v849_v24, 0.0  ;;  %v1611_v35 = vpop.f32.mrb[8].mxu1  ;;  %v1613_v36 = vpop.f32.mrb[9].mxu0  ;;  %v362_v19 = vld [vmem:[#allocation2 + $0xc0] sm:$0xff] }
  0xf8   : > { %v863_v34 = vadd.f32 %v1576_v55, %v824_v25  ;;  %v1293_v37 = vpack.c.bf16 %v896_v26, %v896_v26  ;;  %v1275_v38 = vpack.c.bf16 %v878_v27, %v878_v27  ;;  %v897_v39 = vmax.f32 %v865_v28, 0.0  ;;  %v774_v41 = vld [vmem:[#allocation2 + $0x30] sm:$0xff]  ;;  %v1615_v42 = vpop.f32.mrb[9].mxu1  ;;  %v1617_v43 = vpop.f32.mrb[10].mxu0  ;;  %v349_v25 = vld [vmem:[#allocation2 + $0x58] sm:$0xff] }
  0xf9   : > { %v879_v40 = vmax.f32 %v847_v29, 0.0  ;;  %1041 = vst.msk [vmem:[%s1604_s7 + $0x8] sm:$0xf] %vm1038_vm2, %v1277_v31  ;;  %v1291_v44 = vpack.c.bf16 %v894_v32, %v894_v32  ;;  %v1278_v46 = vpack.c.bf16 %v881_v33, %v881_v33  ;;  %v813_v48 = vmul.f32 %v1571_v45, %v774_v41  ;;  %v790_v49 = vld [vmem:[#allocation2 + $0xb0] sm:$0xff]  ;;  %v772_v50 = vld [vmem:[#allocation2 + $0x20] sm:$0xff]  ;;  %v1622_v51 = vpop.f32.mrb[10].mxu1 }
  0xfa   : > { %v895_v47 = vmax.f32 %v863_v34, 0.0  ;;  %v1624_v52 = vpop.f32.mrb[11].mxu0  ;;  %1057 = vst.msk [vmem:[%s1604_s7 + $0x48] sm:$0xf] %vm1038_vm2, %v1293_v37  ;;  %1039 = vst.msk [vmem:[%s1604_s7] sm:$0xf] %vm1038_vm2, %v1275_v38  ;;  %v1294_v53 = vpack.c.bf16 %v897_v39, %v897_v39  ;;  %v829_v56 = vmul.f32 %v1571_v45, %v790_v49  ;;  %v811_v57 = vmul.f32 %v1571_v45, %v772_v50 }
  0xfb   : > { %v1276_v54 = vpack.c.bf16 %v879_v40, %v879_v40  ;;  %v788_v58 = vld [vmem:[#allocation2 + $0xa0] sm:$0xff]  ;;  %v775_v59 = vld [vmem:[#allocation2 + $0x38] sm:$0xff]  ;;  %v1632_v60 = vpop.f32.mrb[11].mxu1  ;;  %1055 = vst.msk [vmem:[%s1604_s7 + $0x40] sm:$0xf] %vm1038_vm2, %v1291_v44  ;;  %v852_v62 = vadd.f32 %v1576_v55, %v813_v48  ;;  %v347_v34 = vld [vmem:[#allocation2 + $0x48] sm:$0xff] }
  0xfc   : > { %1042 = vst.msk [vmem:[%s1604_s7 + $0xc] sm:$0xf] %vm1038_vm2, %v1278_v46  ;;  %v1292_v61 = vpack.c.bf16 %v895_v47, %v895_v47  ;;  %v827_v63 = vmul.f32 %v1571_v45, %v788_v58  ;;  %v814_v0 = vmul.f32 %v1571_v45, %v775_v59  ;;  %v791_v1 = vld [vmem:[#allocation2 + $0xb8] sm:$0xff]  ;;  %v773_v2 = vld [vmem:[#allocation2 + $0x28] sm:$0xff]  ;;  %1058 = vst.msk [vmem:[%s1604_s7 + $0x4c] sm:$0xf] %vm1038_vm2, %v1294_v53 }
  0xfd   : > { %1040 = vst.msk [vmem:[%s1604_s7 + $0x4] sm:$0xf] %vm1038_vm2, %v1276_v54  ;;  %v868_v3 = vadd.f32 %v1576_v55, %v829_v56  ;;  %v850_v4 = vadd.f32 %v1576_v55, %v811_v57  ;;  %v830_v5 = vmul.f32 %v1571_v45, %v791_v1  ;;  %v812_v6 = vmul.f32 %v1571_v45, %v773_v2  ;;  %v789_v7 = vld [vmem:[#allocation2 + $0xa8] sm:$0xff]  ;;  %v365_v26 = vld [vmem:[#allocation2 + $0xd8] sm:$0xff]  ;;  %v352_v47 = vld [vmem:[#allocation2 + $0x70] sm:$0xff] }
  0xfe   : > { %1056 = vst.msk [vmem:[%s1604_s7 + $0x44] sm:$0xf] %vm1038_vm2, %v1292_v61  ;;  %v884_v8 = vmax.f32 %v852_v62, 0.0  ;;  %v866_v9 = vadd.f32 %v1576_v55, %v827_v63  ;;  %v853_v10 = vadd.f32 %v1576_v55, %v814_v0  ;;  %v828_v11 = vmul.f32 %v1571_v45, %v789_v7  ;;  %v1340_v20 = vpop.f32.mrb[12].mxu0  ;;  %v363_v37 = vld [vmem:[#allocation2 + $0xc8] sm:$0xff]  ;;  %v368_v48 = vld [vmem:[#allocation2 + $0xf0] sm:$0xff] }
  0xff   : > { %v900_v13 = vmax.f32 %v868_v3, 0.0  ;;  %v882_v14 = vmax.f32 %v850_v4, 0.0  ;;  %v869_v15 = vadd.f32 %v1576_v55, %v830_v5  ;;  %v851_v16 = vadd.f32 %v1576_v55, %v812_v6  ;;  %v1356_v27 = vpop.f32.mrb[12].mxu1  ;;  %v621_v28 = vpop.f32.mrb[13].mxu0  ;;  %v350_v49 = vld [vmem:[#allocation2 + $0x60] sm:$0xff]  ;;  %v353_v59 = vld [vmem:[#allocation2 + $0x78] sm:$0xff] }
 0x100   : > { %v1281_v21 = vpack.c.bf16 %v884_v8, %v884_v8  ;;  %v898_v22 = vmax.f32 %v866_v9, 0.0  ;;  %v885_v23 = vmax.f32 %v853_v10, 0.0  ;;  %v867_v24 = vadd.f32 %v1576_v55, %v828_v11  ;;  %v685_v38 = vpop.f32.mrb[13].mxu1  ;;  %v1341_v39 = vpop.f32.mrb[14].mxu0  ;;  %v369_v61 = vld [vmem:[#allocation2 + $0xf8] sm:$0xff]  ;;  %v351_v2 = vld [vmem:[#allocation2 + $0x68] sm:$0xff] }
 0x101   : > { %v1297_v29 = vpack.c.bf16 %v900_v13, %v900_v13  ;;  %v1279_v31 = vpack.c.bf16 %v882_v14, %v882_v14  ;;  %v901_v32 = vmax.f32 %v869_v15, 0.0  ;;  %v883_v33 = vmax.f32 %v851_v16, 0.0  ;;  %v1357_v50 = vpop.f32.mrb[14].mxu1  ;;  %v624_v53 = vpop.f32.mrb[15].mxu0 }
 0x102   : > { %1045 = vst.msk [vmem:[%s1604_s7 + $0x18] sm:$0xf] %vm1038_vm2, %v1281_v21  ;;  %v1295_v40 = vpack.c.bf16 %v898_v22, %v898_v22  ;;  %v1282_v41 = vpack.c.bf16 %v885_v23, %v885_v23  ;;  %v899_v44 = vmax.f32 %v867_v24, 0.0  ;;  %v710_v46 = vadd.f32 %v1608_v30, %v348_v12  ;;  %v366_v30 = vld [vmem:[#allocation2 + $0xe0] sm:$0xff]  ;;  %v688_v62 = vpop.f32.mrb[15].mxu1 }
 0x103   : > { %1061 = vst.msk [vmem:[%s1604_s7 + $0x58] sm:$0xf] %vm1038_vm2, %v1297_v29  ;;  %1043 = vst.msk [vmem:[%s1604_s7 + $0x10] sm:$0xf] %vm1038_vm2, %v1279_v31  ;;  %v1298_v54 = vpack.c.bf16 %v901_v32, %v901_v32  ;;  %v1280_v56 = vpack.c.bf16 %v883_v33, %v883_v33  ;;  %v726_v57 = vadd.f32 %v1611_v35, %v364_v17 }
 0x104   : > { %v708_v58 = vadd.f32 %v1613_v36, %v346_v18  ;;  %1059 = vst.msk [vmem:[%s1604_s7 + $0x50] sm:$0xf] %vm1038_vm2, %v1295_v40  ;;  %1046 = vst.msk [vmem:[%s1604_s7 + $0x1c] sm:$0xf] %vm1038_vm2, %v1282_v41  ;;  %v1296_v63 = vpack.c.bf16 %v899_v44, %v899_v44  ;;  %v724_v0 = vadd.f32 %v1615_v42, %v362_v19  ;;  %v367_v36 = vld [vmem:[#allocation2 + $0xe8] sm:$0xff] }
 0x105   : > { %743 = vst.msk [vmem:[#allocation2 + $0x50] sm:$0xff] %vm305_vm0, %v710_v46  ;;  %v711_v1 = vadd.f32 %v1617_v43, %v349_v25  ;;  %v727_v35 = vadd.f32 %v1622_v51, %v365_v26  ;;  %759 = vst.msk [vmem:[#allocation2 + $0xd0] sm:$0xff] %vm305_vm0, %v726_v57  ;;  %v709_v3 = vadd.f32 %v1624_v52, %v347_v34 }
 0x106   : > { %1062 = vst.msk [vmem:[%s1604_s7 + $0x5c] sm:$0xf] %vm1038_vm2, %v1298_v54  ;;  %1044 = vst.msk [vmem:[%s1604_s7 + $0x14] sm:$0xf] %vm1038_vm2, %v1280_v56  ;;  %v725_v4 = vadd.f32 %v1632_v60, %v363_v37  ;;  %v714_v5 = vadd.f32 %v1340_v20, %v352_v47  ;;  %v730_v42 = vadd.f32 %v1356_v27, %v368_v48 }
 0x107   : > { %741 = vst.msk [vmem:[#allocation2 + $0x40] sm:$0xff] %vm305_vm0, %v708_v58  ;;  %757 = vst.msk [vmem:[#allocation2 + $0xc0] sm:$0xff] %vm305_vm0, %v724_v0  ;;  %v712_v43 = vadd.f32 %v621_v28, %v350_v49  ;;  %v728_v51 = vadd.f32 %v685_v38, %v366_v30  ;;  %v715_v6 = vadd.f32 %v1341_v39, %v353_v59 }
 0x108   : > { %1060 = vst.msk [vmem:[%s1604_s7 + $0x54] sm:$0xf] %vm1038_vm2, %v1296_v63  ;;  %v731_v7 = vadd.f32 %v1357_v50, %v369_v61  ;;  %v713_v52 = vadd.f32 %v624_v53, %v351_v2  ;;  %v729_v60 = vadd.f32 %v688_v62, %v367_v36 }
 0x109   : > { %744 = vst.msk [vmem:[#allocation2 + $0x58] sm:$0xff] %vm305_vm0, %v711_v1  ;;  %760 = vst.msk [vmem:[#allocation2 + $0xd8] sm:$0xff] %vm305_vm0, %v727_v35 }
 0x10a   : > { %742 = vst.msk [vmem:[#allocation2 + $0x48] sm:$0xff] %vm305_vm0, %v709_v3  ;;  %758 = vst.msk [vmem:[#allocation2 + $0xc8] sm:$0xff] %vm305_vm0, %v725_v4 }
 0x10b   : > { %747 = vst.msk [vmem:[#allocation2 + $0x70] sm:$0xff] %vm305_vm0, %v714_v5  ;;  %763 = vst.msk [vmem:[#allocation2 + $0xf0] sm:$0xff] %vm305_vm0, %v730_v42 }
 0x10c   : > { %745 = vst.msk [vmem:[#allocation2 + $0x60] sm:$0xff] %vm305_vm0, %v712_v43  ;;  %761 = vst.msk [vmem:[#allocation2 + $0xe0] sm:$0xff] %vm305_vm0, %v728_v51  ;;  %v778_v8 = vld [vmem:[#allocation2 + $0x50] sm:$0xff] }
 0x10d   : > { %748 = vst.msk [vmem:[#allocation2 + $0x78] sm:$0xff] %vm305_vm0, %v715_v6  ;;  %764 = vst.msk [vmem:[#allocation2 + $0xf8] sm:$0xff] %vm305_vm0, %v731_v7  ;;  %v817_v9 = vmul.f32 %v1571_v45, %v778_v8  ;;  %v794_v10 = vld [vmem:[#allocation2 + $0xd0] sm:$0xff] }
 0x10e   : > { %746 = vst.msk [vmem:[#allocation2 + $0x68] sm:$0xff] %vm305_vm0, %v713_v52  ;;  %762 = vst.msk [vmem:[#allocation2 + $0xe8] sm:$0xff] %vm305_vm0, %v729_v60  ;;  %v776_v11 = vld [vmem:[#allocation2 + $0x40] sm:$0xff]  ;;  %v833_v12 = vmul.f32 %v1571_v45, %v794_v10 }
 0x10f   : > { %v815_v13 = vmul.f32 %v1571_v45, %v776_v11  ;;  %v792_v14 = vld [vmem:[#allocation2 + $0xc0] sm:$0xff]  ;;  %v856_v17 = vadd.f32 %v1576_v55, %v817_v9 }
 0x110   : > { %v779_v15 = vld [vmem:[#allocation2 + $0x58] sm:$0xff]  ;;  %v831_v18 = vmul.f32 %v1571_v45, %v792_v14  ;;  %v872_v23 = vadd.f32 %v1576_v55, %v833_v12 }
 0x111   : > { %v795_v16 = vld [vmem:[#allocation2 + $0xd8] sm:$0xff]  ;;  %v818_v19 = vmul.f32 %v1571_v45, %v779_v15  ;;  %v777_v21 = vld [vmem:[#allocation2 + $0x48] sm:$0xff]  ;;  %v854_v24 = vadd.f32 %v1576_v55, %v815_v13  ;;  %v888_v27 = vmax.f32 %v856_v17, 0.0 }
 0x112   : > { %v834_v20 = vmul.f32 %v1571_v45, %v795_v16  ;;  %v793_v22 = vld [vmem:[#allocation2 + $0xc8] sm:$0xff]  ;;  %v816_v25 = vmul.f32 %v1571_v45, %v777_v21  ;;  %v870_v28 = vadd.f32 %v1576_v55, %v831_v18  ;;  %v904_v32 = vmax.f32 %v872_v23, 0.0  ;;  %v782_v38 = vld [vmem:[#allocation2 + $0x70] sm:$0xff] }
 0x113   : > { %v832_v26 = vmul.f32 %v1571_v45, %v793_v22  ;;  %v857_v29 = vadd.f32 %v1576_v55, %v818_v19  ;;  %v886_v33 = vmax.f32 %v854_v24, 0.0  ;;  %v1285_v39 = vpack.c.bf16 %v888_v27, %v888_v27  ;;  %v798_v46 = vld [vmem:[#allocation2 + $0xf0] sm:$0xff]  ;;  %v780_v47 = vld [vmem:[#allocation2 + $0x60] sm:$0xff] }
 0x114   : > { %v873_v31 = vadd.f32 %v1576_v55, %v834_v20  ;;  %v855_v34 = vadd.f32 %v1576_v55, %v816_v25  ;;  %v902_v40 = vmax.f32 %v870_v28, 0.0  ;;  %v1301_v48 = vpack.c.bf16 %v904_v32, %v904_v32  ;;  %v796_v54 = vld [vmem:[#allocation2 + $0xe0] sm:$0xff]  ;;  %v783_v56 = vld [vmem:[#allocation2 + $0x78] sm:$0xff] }
 0x115   : > { %v871_v37 = vadd.f32 %v1576_v55, %v832_v26  ;;  %v889_v41 = vmax.f32 %v857_v29, 0.0  ;;  %v1283_v49 = vpack.c.bf16 %v886_v33, %v886_v33  ;;  %v799_v57 = vld [vmem:[#allocation2 + $0xf8] sm:$0xff]  ;;  %1049 = vst.msk [vmem:[%s1604_s7 + $0x28] sm:$0xf] %vm1038_vm2, %v1285_v39  ;;  %v821_v61 = vmul.f32 %v1571_v45, %v782_v38  ;;  %v781_v62 = vld [vmem:[#allocation2 + $0x68] sm:$0xff] }
 0x116   : > { %v905_v44 = vmax.f32 %v873_v31, 0.0  ;;  %v887_v50 = vmax.f32 %v855_v34, 0.0  ;;  %v1299_v58 = vpack.c.bf16 %v902_v40, %v902_v40  ;;  %v797_v63 = vld [vmem:[#allocation2 + $0xe8] sm:$0xff]  ;;  %1065 = vst.msk [vmem:[%s1604_s7 + $0x68] sm:$0xf] %vm1038_vm2, %v1301_v48  ;;  %v837_v35 = vmul.f32 %v1571_v45, %v798_v46 }
 0x117   : > { %v903_v53 = vmax.f32 %v871_v37, 0.0  ;;  %v1286_v30 = vpack.c.bf16 %v889_v41, %v889_v41  ;;  %1047 = vst.msk [vmem:[%s1604_s7 + $0x20] sm:$0xf] %vm1038_vm2, %v1283_v49  ;;  %v819_v2 = vmul.f32 %v1571_v45, %v780_v47  ;;  %v860_v36 = vadd.f32 %v1576_v55, %v821_v61 }
 0x118   : > { %v1302_v59 = vpack.c.bf16 %v905_v44, %v905_v44  ;;  %v1284_v0 = vpack.c.bf16 %v887_v50, %v887_v50  ;;  %1063 = vst.msk [vmem:[%s1604_s7 + $0x60] sm:$0xf] %vm1038_vm2, %v1299_v58  ;;  %v835_v3 = vmul.f32 %v1571_v45, %v796_v54  ;;  %v822_v4 = vmul.f32 %v1571_v45, %v783_v56 }
 0x119   : > { %v1300_v1 = vpack.c.bf16 %v903_v53, %v903_v53  ;;  %1050 = vst.msk [vmem:[%s1604_s7 + $0x2c] sm:$0xf] %vm1038_vm2, %v1286_v30  ;;  %v838_v5 = vmul.f32 %v1571_v45, %v799_v57  ;;  %v876_v42 = vadd.f32 %v1576_v55, %v837_v35  ;;  %v858_v43 = vadd.f32 %v1576_v55, %v819_v2 }
 0x11a   : > { %1066 = vst.msk [vmem:[%s1604_s7 + $0x6c] sm:$0xf] %vm1038_vm2, %v1302_v59  ;;  %1048 = vst.msk [vmem:[%s1604_s7 + $0x24] sm:$0xf] %vm1038_vm2, %v1284_v0  ;;  %v820_v51 = vmul.f32 %v1571_v45, %v781_v62  ;;  %v836_v6 = vmul.f32 %v1571_v45, %v797_v63  ;;  %v892_v7 = vmax.f32 %v860_v36, 0.0  ;;  %v874_v52 = vadd.f32 %v1576_v55, %v835_v3 }
 0x11b   : > { %1064 = vst.msk [vmem:[%s1604_s7 + $0x64] sm:$0xf] %vm1038_vm2, %v1300_v1  ;;  %v861_v60 = vadd.f32 %v1576_v55, %v822_v4  ;;  %v877_v8 = vadd.f32 %v1576_v55, %v838_v5  ;;  %v908_v9 = vmax.f32 %v876_v42, 0.0  ;;  %v890_v10 = vmax.f32 %v858_v43, 0.0 }
 0x11c   : > { %v859_v11 = vadd.f32 %v1576_v55, %v820_v51  ;;  %v875_v12 = vadd.f32 %v1576_v55, %v836_v6  ;;  %v1289_v13 = vpack.c.bf16 %v892_v7, %v892_v7  ;;  %v906_v14 = vmax.f32 %v874_v52, 0.0 }
 0x11d   : > { %v893_v45 = vmax.f32 %v861_v60, 0.0  ;;  %v909_v15 = vmax.f32 %v877_v8, 0.0  ;;  %v1305_v16 = vpack.c.bf16 %v908_v9, %v908_v9  ;;  %v1287_v17 = vpack.c.bf16 %v890_v10, %v890_v10 }
 0x11e   : > { %v891_v18 = vmax.f32 %v859_v11, 0.0  ;;  %v907_v19 = vmax.f32 %v875_v12, 0.0  ;;  %1053 = vst.msk [vmem:[%s1604_s7 + $0x38] sm:$0xf] %vm1038_vm2, %v1289_v13  ;;  %v1303_v20 = vpack.c.bf16 %v906_v14, %v906_v14 }
 0x11f   : > { %v1290_v21 = vpack.c.bf16 %v893_v45, %v893_v45  ;;  %v1306_v22 = vpack.c.bf16 %v909_v15, %v909_v15  ;;  %1069 = vst.msk [vmem:[%s1604_s7 + $0x78] sm:$0xf] %vm1038_vm2, %v1305_v16  ;;  %1051 = vst.msk [vmem:[%s1604_s7 + $0x30] sm:$0xf] %vm1038_vm2, %v1287_v17 }
 0x120   : > { %v1288_v55 = vpack.c.bf16 %v891_v18, %v891_v18  ;;  %v1304_v23 = vpack.c.bf16 %v907_v19, %v907_v19  ;;  %1067 = vst.msk [vmem:[%s1604_s7 + $0x70] sm:$0xf] %vm1038_vm2, %v1303_v20 }
 0x121   : > { %1054 = vst.msk [vmem:[%s1604_s7 + $0x3c] sm:$0xf] %vm1038_vm2, %v1290_v21  ;;  %1070 = vst.msk [vmem:[%s1604_s7 + $0x7c] sm:$0xf] %vm1038_vm2, %v1306_v22 }
 0x122   : > { %1052 = vst.msk [vmem:[%s1604_s7 + $0x34] sm:$0xf] %vm1038_vm2, %v1288_v55  ;;  %1068 = vst.msk [vmem:[%s1604_s7 + $0x74] sm:$0xf] %vm1038_vm2, %v1304_v23 }
 0x123 PF: > { %s14_s17 = sadd.s32 1, %s1424_s17   ;;  %s1776_s15 = smov %s1420_s16 }
 0x124   : > { %p11_p5 = scmp.ge.s32.totalorder %s14_s17, 4   ;;  %s1777_s16 = smov %s1779_s18 }
 0x126   :  { %13 = sbr.rel (!%p11_p5) target bundleno = 2 (0x2), region = 83 }

// kernel: decoder_bottleneck_forward.12
= control target key start
LH: loop header
LB: loop body
LE: loop exit
PB: predicated region body
PF: predicated region fallthrough
CT: control target
= control target key end

     0   :  { %s507_s9 = smov 0   ;;  %s509_s10 = smov 0   ;;  %s556_s0 = inlined_call_operand.vmem [shape: bf16[8,8,128], index: 0, kind: input, shape index: {}]   ;;  %s557_s1 = inlined_call_operand.vmem [shape: bf16[8,8,128], index: 1, kind: output, shape index: {0}]   ;;  %s558_s2 = inlined_call_operand.vmem [shape: bf16[8,8,128], index: 2, kind: output, shape index: {1}]  }
   0x1   :  { %s511_s11 = smov 0  }
   0x2 LB: > { %s25_s12 = sadd.s32 1, %s486_s10  ;;  %p404_p0 = scmp.ge.s32.totalorder %s490_s11, 1  ;;  %s490_s11 = sphi %s511_s11, %s13_s11   ;;  %s486_s10 = sphi %s509_s10, %s560_s10   ;;  %s482_s9 = sphi %s507_s9, %s559_s9  }
   0x3   : > { %p27_p1 = scmp.ge.s32.totalorder %s25_s12, 2  ;;  %p137_p2 = scmp.lt.s32.totalorder %s490_s11, 3 }
   0x5   : > { %s562_s12 = smov (%p27_p1, %s25_s12), 0  ;;  %p138_p3 = pnand %p404_p0, %p137_p2 }
   0x6   : > { %s405_s13 = sshll.u32 (!%p138_p3), %s482_s9, 2  ;;  %vm220_vm0 = vcmask (!%p138_p3), 1040384   ;;  %vm233_vm1 = vcmask (!%p138_p3), 1046528  }
   0x7   : > { %141 = sbr.rel (%p138_p3) target bundleno = 35 (0x23), region = 24  ;;  %p174_p4 = scmp.lt.s32.totalorder (!%p138_p3), %s405_s13, 7 }
   0xe   : > { %s564_s13 = smov (!%p174_p4, %s405_s13), 7 }
   0xf   : > { %s525_s14 = sshll.u32 %s564_s13, 2 }
  0x10   : > { %s180_s17 = scalar_lea.vmem %s556_s0, %s525_s14  ;;  %s189_s20 = scalar_lea.vmem %s557_s1, %s525_s14 }
  0x11   : > { %v414_v0 = vld [vmem:[%s180_s17] sm:$0xff]   ;;  %v441_v1 = vld [vmem:[%s180_s17 + $0x8] sm:$0xff]   ;;  %s198_s23 = scalar_lea.vmem %s558_s2, %s525_s14 }
  0x12   : > { %v415_v2 = vunpack.c.l.bf16 %v414_v0  ;;  %v416_v3 = vunpack.c.h.bf16 %v414_v0  ;;  %v419_v4 = vunpack.c.l.bf16 %v441_v1  ;;  %v420_v5 = vunpack.c.h.bf16 %v441_v1 }
  0x14   : > { %v212_v6 = vrot.slane %v415_v2, 7  ;;  %v213_v7 = vrot.slane %v416_v3, 7  ;;  %v225_v8 = vrot.slane %v415_v2, 1  ;;  %v226_v9 = vrot.slane %v416_v3, 1 }
  0x15   : > { %v214_v10 = vrot.slane %v419_v4, 7  ;;  %v215_v11 = vrot.slane %v420_v5, 7  ;;  %v227_v12 = vrot.slane %v419_v4, 1  ;;  %v228_v13 = vrot.slane %v420_v5, 1 }
  0x16   : > { %v221_v14 = vsel %vm220_vm0, %v415_v2, %v212_v6  ;;  %v222_v15 = vsel %vm220_vm0, %v416_v3, %v213_v7  ;;  %v234_v16 = vsel %vm233_vm1, %v225_v8, %v415_v2  ;;  %v235_v17 = vsel %vm233_vm1, %v226_v9, %v416_v3 }
  0x17   : > { %v238_v18 = vsub.f32 %v415_v2, %v221_v14  ;;  %v239_v19 = vsub.f32 %v416_v3, %v222_v15  ;;  %v258_v20 = vsub.f32 %v234_v16, %v415_v2  ;;  %v259_v21 = vsub.f32 %v235_v17, %v416_v3 }
  0x18   : > { %v223_v22 = vsel %vm220_vm0, %v419_v4, %v214_v10  ;;  %v224_v23 = vsel %vm220_vm0, %v420_v5, %v215_v11  ;;  %v236_v24 = vsel %vm233_vm1, %v227_v12, %v419_v4  ;;  %v237_v25 = vsel %vm233_vm1, %v228_v13, %v420_v5 }
  0x19   : > { %v242_v26 = vmul.f32 0.75, %v238_v18  ;;  %v243_v27 = vmul.f32 0.75, %v239_v19  ;;  %v262_v28 = vmul.f32 0.25, %v258_v20  ;;  %v263_v29 = vmul.f32 0.25, %v259_v21 }
  0x1a   : > { %v240_v30 = vsub.f32 %v419_v4, %v223_v22  ;;  %v241_v31 = vsub.f32 %v420_v5, %v224_v23  ;;  %v260_v32 = vsub.f32 %v236_v24, %v419_v4  ;;  %v261_v33 = vsub.f32 %v237_v25, %v420_v5 }
  0x1b   : > { %v246_v34 = vadd.f32 %v242_v26, %v221_v14  ;;  %v247_v35 = vadd.f32 %v243_v27, %v222_v15  ;;  %v266_v36 = vadd.f32 %v415_v2, %v262_v28  ;;  %v267_v37 = vadd.f32 %v416_v3, %v263_v29 }
  0x1c   : > { %v244_v38 = vmul.f32 0.75, %v240_v30  ;;  %v245_v39 = vmul.f32 0.75, %v241_v31  ;;  %v264_v40 = vmul.f32 0.25, %v260_v32  ;;  %v265_v41 = vmul.f32 0.25, %v261_v33 }
  0x1d   : > { %v424_v42 = vpack.c.bf16 %v247_v35, %v246_v34  ;;  %v434_v43 = vpack.c.bf16 %v267_v37, %v266_v36 }
  0x1e   : > { %v248_v44 = vadd.f32 %v244_v38, %v223_v22  ;;  %v249_v45 = vadd.f32 %v245_v39, %v224_v23  ;;  %v268_v46 = vadd.f32 %v419_v4, %v264_v40  ;;  %v269_v47 = vadd.f32 %v420_v5, %v265_v41 }
  0x1f   : > { %425 = vst [vmem:[%s189_s20] sm:$0xff] %v424_v42   ;;  %435 = vst [vmem:[%s198_s23] sm:$0xff] %v434_v43  }
  0x20   : > { %v429_v48 = vpack.c.bf16 %v249_v45, %v248_v44  ;;  %v439_v49 = vpack.c.bf16 %v269_v47, %v268_v46 }
  0x22   : > { %442 = vst [vmem:[%s189_s20 + $0x8] sm:$0xff] %v429_v48   ;;  %443 = vst [vmem:[%s198_s23 + $0x8] sm:$0xff] %v439_v49  }
  0x23 PF: > { %s13_s11 = sadd.s32 1, %s490_s11   ;;  %s559_s9 = smov %s486_s10 }
  0x24   : > { %p10_p5 = scmp.ge.s32.totalorder %s13_s11, 4   ;;  %s560_s10 = smov %s562_s12 }
  0x26   :  { %12 = sbr.rel (!%p10_p5) target bundleno = 2 (0x2), region = 66 }

// kernel: decoder_bottleneck_forward.13
= control target key start
LH: loop header
LB: loop body
LE: loop exit
PB: predicated region body
PF: predicated region fallthrough
CT: control target
= control target key end

     0   :  { %s1135_s9 = smov 0   ;;  %s1137_s10 = smov 0   ;;  %s1422_s0 = inlined_call_operand.vmem [shape: bf16[2,4,2048], index: 0, kind: input, shape index: {}]   ;;  %s1423_s1 = inlined_call_operand.vmem [shape: bf16[2,4,2048], index: 1, kind: output, shape index: {0}]   ;;  %s1424_s2 = inlined_call_operand.vmem [shape: bf16[2,4,2048], index: 2, kind: output, shape index: {1}]  }
   0x1   :  { %s1139_s11 = smov 0  }
   0x2 LB: > { %s25_s12 = sadd.s32 1, %s1113_s10  ;;  %p1042_p0 = scmp.ge.s32.totalorder %s1117_s11, 1  ;;  %s1117_s11 = sphi %s1139_s11, %s13_s11   ;;  %s1113_s10 = sphi %s1137_s10, %s1426_s10   ;;  %s1109_s9 = sphi %s1135_s9, %s1425_s9  }
   0x3   : > { %p27_p1 = scmp.ge.s32.totalorder %s25_s12, 2  ;;  %p138_p2 = scmp.lt.s32.totalorder %s1117_s11, 3 }
   0x5   : > { %s1428_s12 = smov (%p27_p1, %s25_s12), 0  ;;  %p139_p3 = pnand %p1042_p0, %p138_p2 }
   0x6   : > { %p178_p4 = scmp.lt.s32.totalorder (!%p139_p3), %s1109_s9, 1  ;;  %v227_v0 = vlaneseq (!%p139_p3)  ;;  %v1119_v1 = vmov (!%p139_p3), 1983009808   ;;  %vm347_vm0 = vcmask (!%p139_p3), 1040384   ;;  %vm476_vm1 = vcmask (!%p139_p3), 1042432  }
   0x7   : > { %142 = sbr.rel (%p139_p3) target bundleno = 93 (0x5d), region = 24  ;;  %v616_v2 = vunpack.c.l.s4 (!%p139_p3), %v1119_v1 }
   0x8   : > { %v228_v3 = vshrl.u32 (!%p139_p3), %v227_v0, 7 }
   0x9   : > { %v617_v4 = vunpack.c.0.s8 (!%p139_p3), %v616_v2 }
   0xa   : > { %v1159_v5 = vsub.s32 (!%p139_p3), 0, %v228_v3  ;;  %v1161_v6 = vsub.s32 (!%p139_p3), 4, %v228_v3  ;;  %v1165_v11 = vsub.s32 (!%p139_p3), 3, %v228_v3  ;;  %v1167_v12 = vsub.s32 (!%p139_p3), 7, %v228_v3 }
   0xb   : > { %v1163_v10 = vsub.s32 (!%p139_p3), %v617_v4, %v228_v3 }
   0xe   : > { %s1430_s9 = smov (!%p178_p4, %s1109_s9), 1 }
   0xf   : > { %s1153_s13 = sshll.u32 %s1430_s9, 5 }
  0x10   : > { %s185_s16 = scalar_lea.vmem %s1422_s0, %s1153_s13  ;;  %s1273_s19 = scalar_lea.vmem %s1423_s1, %s1153_s13 }
  0x11   : > { %v207_v7 = vld [vmem:[%s185_s16] sm:$0xff]  ;;  %v208_v8 = vld [vmem:[%s185_s16 + $0x8] sm:$0xff]  ;;  %v209_v9 = vld [vmem:[%s185_s16 + $0x10] sm:$0xff]  ;;  %s1367_s22 = scalar_lea.vmem %s1424_s2, %s1153_s13 }
  0x12   : > { %v210_v13 = vld [vmem:[%s185_s16 + $0x18] sm:$0xff]  ;;  %v1169_v14 = vunpack.c.l.bf16 %v207_v7  ;;  %v1171_v15 = vunpack.c.h.bf16 %v207_v7  ;;  %v1173_v16 = vunpack.c.l.bf16 %v208_v8  ;;  %v1175_v17 = vunpack.c.h.bf16 %v208_v8 }
  0x13   : > { %v1177_v18 = vunpack.c.l.bf16 %v209_v9  ;;  %v1179_v19 = vunpack.c.h.bf16 %v209_v9  ;;  %v1181_v20 = vunpack.c.l.bf16 %v210_v13  ;;  %v1183_v21 = vunpack.c.h.bf16 %v210_v13 }
  0x14   : > { %v230_v22 = vrot.slane %v1169_v14, %v1159_v5  ;;  %v234_v23 = vrot.slane %v1169_v14, %v1161_v6  ;;  %v238_v24 = vrot.slane %v1171_v15, %v1159_v5  ;;  %v242_v25 = vrot.slane %v1171_v15, %v1161_v6 }
  0x15   : > { %v1195_v26 = vcombine.high %v1169_v14, %v1169_v14  ;;  %v1199_v27 = vcombine.high %v1171_v15, %v1171_v15  ;;  %v315_v28 = vrot.slane %v1169_v14, 7  ;;  %v317_v29 = vrot.slane %v1171_v15, 7 }
  0x16   : > { %v246_v30 = vrot.slane %v1173_v16, %v1159_v5  ;;  %v250_v31 = vrot.slane %v1173_v16, %v1161_v6  ;;  %v254_v32 = vrot.slane %v1175_v17, %v1159_v5  ;;  %v258_v33 = vrot.slane %v1175_v17, %v1161_v6 }
  0x17   : > { %v316_v34 = vrot.slane %v1195_v26, 7  ;;  %v318_v35 = vrot.slane %v1199_v27, 7  ;;  %v348_v36 = vsel %vm347_vm0, %v230_v22, %v315_v28  ;;  %v350_v37 = vsel %vm347_vm0, %v238_v24, %v317_v29 }
  0x18   : > { %v1217_v38 = vcombine.high %v1173_v16, %v1173_v16  ;;  %v1221_v39 = vcombine.high %v1175_v17, %v1175_v17  ;;  %v319_v40 = vrot.slane %v1173_v16, 7  ;;  %v321_v41 = vrot.slane %v1175_v17, 7 }
  0x19   : > { %v349_v42 = vsel %vm347_vm0, %v234_v23, %v316_v34  ;;  %v351_v43 = vsel %vm347_vm0, %v242_v25, %v318_v35  ;;  %v262_v44 = vrot.slane %v1177_v18, %v1159_v5  ;;  %v266_v45 = vrot.slane %v1177_v18, %v1161_v6 }
  0x1a   : > { %v509_v46 = vcombine.low %v348_v36, %v349_v42  ;;  %v510_v47 = vcombine.low %v350_v37, %v351_v43  ;;  %v320_v48 = vrot.slane %v1217_v38, 7  ;;  %v322_v49 = vrot.slane %v1221_v39, 7 }
  0x1b   : > { %v352_v50 = vsel %vm347_vm0, %v246_v30, %v319_v40  ;;  %v354_v51 = vsel %vm347_vm0, %v254_v32, %v321_v41  ;;  %v270_v52 = vrot.slane %v1179_v19, %v1159_v5  ;;  %v274_v53 = vrot.slane %v1179_v19, %v1161_v6 }
  0x1c   : > { %v525_v54 = vsub.f32 %v1169_v14, %v509_v46  ;;  %v526_v55 = vsub.f32 %v1171_v15, %v510_v47  ;;  %v353_v56 = vsel %vm347_vm0, %v250_v31, %v320_v48  ;;  %v355_v57 = vsel %vm347_vm0, %v258_v33, %v322_v49 }
  0x1d   : > { %v511_v58 = vcombine.low %v352_v50, %v353_v56  ;;  %v512_v59 = vcombine.low %v354_v51, %v355_v57  ;;  %v1245_v60 = vcombine.high %v1177_v18, %v1177_v18  ;;  %v1249_v61 = vcombine.high %v1179_v19, %v1179_v19 }
  0x1e   : > { %v533_v62 = vmul.f32 0.75, %v525_v54  ;;  %v534_v63 = vmul.f32 0.75, %v526_v55  ;;  %v323_v0 = vrot.slane %v1177_v18, 7  ;;  %v325_v1 = vrot.slane %v1179_v19, 7 }
  0x1f   : > { %v527_v2 = vsub.f32 %v1173_v16, %v511_v58  ;;  %v528_v3 = vsub.f32 %v1175_v17, %v512_v59  ;;  %v324_v4 = vrot.slane %v1245_v60, 7  ;;  %v326_v7 = vrot.slane %v1249_v61, 7 }
  0x20   : > { %v549_v8 = vcombine.high %v533_v62, %v533_v62  ;;  %v550_v9 = vcombine.high %v534_v63, %v534_v63  ;;  %v565_v13 = vadd.f32 %v533_v62, %v348_v36  ;;  %v567_v22 = vadd.f32 %v534_v63, %v350_v37 }
  0x21   : > { %v535_v23 = vmul.f32 0.75, %v527_v2  ;;  %v536_v24 = vmul.f32 0.75, %v528_v3  ;;  %v356_v25 = vsel %vm347_vm0, %v262_v44, %v323_v0  ;;  %v357_v28 = vsel %vm347_vm0, %v266_v45, %v324_v4 }
  0x22   : > { %v566_v29 = vadd.f32 %v549_v8, %v349_v42  ;;  %v568_v30 = vadd.f32 %v550_v9, %v351_v43  ;;  %v358_v31 = vsel %vm347_vm0, %v270_v52, %v325_v1  ;;  %v359_v32 = vsel %vm347_vm0, %v274_v53, %v326_v7 }
  0x23   : > { %v551_v33 = vcombine.high %v535_v23, %v535_v23  ;;  %v552_v34 = vcombine.high %v536_v24, %v536_v24  ;;  %v569_v35 = vadd.f32 %v535_v23, %v352_v50  ;;  %v571_v40 = vadd.f32 %v536_v24, %v354_v51 }
  0x24   : > { %v1049_v41 = vpack.c.bf16 %v566_v29, %v565_v13  ;;  %v1050_v36 = vpack.c.bf16 %v568_v30, %v567_v22  ;;  %v513_v37 = vcombine.low %v356_v25, %v357_v28  ;;  %v514_v46 = vcombine.low %v358_v31, %v359_v32 }
  0x25   : > { %v570_v47 = vadd.f32 %v551_v33, %v353_v56  ;;  %v572_v48 = vadd.f32 %v552_v34, %v355_v57  ;;  %v278_v44 = vrot.slane %v1181_v20, %v1159_v5  ;;  %v282_v42 = vrot.slane %v1181_v20, %v1161_v6 }
  0x26   : > { %v621_v43 = vrot.slane %v1049_v41, %v1163_v10  ;;  %v628_v45 = vrot.slane %v1050_v36, %v1163_v10  ;;  %v529_v49 = vsub.f32 %v1177_v18, %v513_v37  ;;  %v530_v50 = vsub.f32 %v1179_v19, %v514_v46 }
  0x27   : > { %v1051_v51 = vpack.c.bf16 %v570_v47, %v569_v35  ;;  %v1052_v52 = vpack.c.bf16 %v572_v48, %v571_v40  ;;  %v286_v53 = vrot.slane %v1183_v21, %v1159_v5  ;;  %v290_v54 = vrot.slane %v1183_v21, %v1161_v6 }
  0x28   : > { %v629_v55 = vcombine.low %v621_v43, %v628_v45  ;;  %v537_v56 = vmul.f32 0.75, %v529_v49  ;;  %v538_v57 = vmul.f32 0.75, %v530_v50  ;;  %v1281_v58 = vcombine.high %v1181_v20, %v1181_v20 }
  0x29   : > { %v638_v59 = vrot.slane %v1051_v51, %v1163_v10  ;;  %v645_v62 = vrot.slane %v1052_v52, %v1163_v10  ;;  %v1287_v63 = vcombine.high %v1183_v21, %v1183_v21  ;;  %v327_v5 = vrot.slane %v1181_v20, 7 }
  0x2a   : > { %685 = vst [vmem:[%s1273_s19] sm:$0xff] %v629_v55  ;;  %v553_v6 = vcombine.high %v537_v56, %v537_v56  ;;  %v554_v0 = vcombine.high %v538_v57, %v538_v57  ;;  %v573_v1 = vadd.f32 %v537_v56, %v356_v25  ;;  %v575_v2 = vadd.f32 %v538_v57, %v358_v31 }
  0x2b   : > { %v646_v3 = vcombine.low %v638_v59, %v645_v62  ;;  %v328_v4 = vrot.slane %v1281_v58, 7  ;;  %v329_v7 = vrot.slane %v1183_v21, 7  ;;  %v330_v8 = vrot.slane %v1287_v63, 7 }
  0x2c   : > { %v574_v9 = vadd.f32 %v553_v6, %v357_v28  ;;  %v576_v13 = vadd.f32 %v554_v0, %v359_v32  ;;  %v360_v22 = vsel %vm347_vm0, %v278_v44, %v327_v5  ;;  %v364_v23 = vrot.slane %v1169_v14, 1 }
  0x2d   : > { %686 = vst [vmem:[%s1273_s19 + $0x8] sm:$0xff] %v646_v3  ;;  %v361_v24 = vsel %vm347_vm0, %v282_v42, %v328_v4  ;;  %v362_v29 = vsel %vm347_vm0, %v286_v53, %v329_v7  ;;  %v363_v25 = vsel %vm347_vm0, %v290_v54, %v330_v8  ;;  %v365_v30 = vrot.slane %v1195_v26, 1 }
  0x2e   : > { %v1053_v31 = vpack.c.bf16 %v574_v9, %v573_v1  ;;  %v1054_v33 = vpack.c.bf16 %v576_v13, %v575_v2  ;;  %v515_v34 = vcombine.low %v360_v22, %v361_v24  ;;  %v516_v35 = vcombine.low %v362_v29, %v363_v25 }
  0x2f   : > { %v366_v28 = vrot.slane %v1171_v15, 1  ;;  %v367_v32 = vrot.slane %v1199_v27, 1  ;;  %v399_v40 = vrot.slane %v1169_v14, %v1165_v11  ;;  %v403_v41 = vrot.slane %v1169_v14, %v1167_v12 }
  0x30   : > { %v655_v36 = vrot.slane %v1053_v31, %v1163_v10  ;;  %v662_v37 = vrot.slane %v1054_v33, %v1163_v10  ;;  %v531_v46 = vsub.f32 %v1181_v20, %v515_v34  ;;  %v532_v47 = vsub.f32 %v1183_v21, %v516_v35 }
  0x31   : > { %v407_v48 = vrot.slane %v1171_v15, %v1165_v11  ;;  %v411_v44 = vrot.slane %v1171_v15, %v1167_v12  ;;  %v477_v42 = vsel %vm476_vm1, %v364_v23, %v399_v40  ;;  %v478_v43 = vsel %vm476_vm1, %v365_v30, %v403_v41 }
  0x32   : > { %v663_v45 = vcombine.low %v655_v36, %v662_v37  ;;  %v539_v49 = vmul.f32 0.75, %v531_v46  ;;  %v540_v50 = vmul.f32 0.75, %v532_v47  ;;  %v697_v51 = vsub.f32 %v477_v42, %v1169_v14 }
  0x33   : > { %v479_v52 = vsel %vm476_vm1, %v366_v28, %v407_v48  ;;  %v480_v53 = vsel %vm476_vm1, %v367_v32, %v411_v44  ;;  %v698_v54 = vsub.f32 %v478_v43, %v1195_v26  ;;  %v368_v55 = vrot.slane %v1173_v16, 1 }
  0x34   : > { %687 = vst [vmem:[%s1273_s19 + $0x10] sm:$0xff] %v663_v45  ;;  %v555_v56 = vcombine.high %v539_v49, %v539_v49  ;;  %v556_v57 = vcombine.high %v540_v50, %v540_v50  ;;  %v577_v59 = vadd.f32 %v539_v49, %v360_v22  ;;  %v579_v62 = vadd.f32 %v540_v50, %v362_v29 }
  0x35   : > { %v699_v5 = vsub.f32 %v479_v52, %v1171_v15  ;;  %v700_v6 = vsub.f32 %v480_v53, %v1199_v27  ;;  %v713_v0 = vmul.f32 0.25, %v697_v51  ;;  %v714_v1 = vmul.f32 0.25, %v698_v54 }
  0x36   : > { %v578_v2 = vadd.f32 %v555_v56, %v361_v24  ;;  %v580_v3 = vadd.f32 %v556_v57, %v363_v25  ;;  %v369_v4 = vrot.slane %v1217_v38, 1  ;;  %v370_v7 = vrot.slane %v1175_v17, 1 }
  0x37   : > { %v715_v26 = vmul.f32 0.25, %v699_v5  ;;  %v716_v8 = vmul.f32 0.25, %v700_v6  ;;  %v745_v9 = vcombine.low %v713_v0, %v714_v1  ;;  %v371_v13 = vrot.slane %v1221_v39, 1 }
  0x38   : > { %v1055_v23 = vpack.c.bf16 %v578_v2, %v577_v59  ;;  %v1056_v22 = vpack.c.bf16 %v580_v3, %v579_v62  ;;  %v415_v29 = vrot.slane %v1173_v16, %v1165_v11  ;;  %v419_v27 = vrot.slane %v1173_v16, %v1167_v12 }
  0x39   : > { %v746_v30 = vcombine.low %v715_v26, %v716_v8  ;;  %v761_v24 = vadd.f32 %v745_v9, %v1169_v14  ;;  %v423_v25 = vrot.slane %v1175_v17, %v1165_v11  ;;  %v427_v31 = vrot.slane %v1175_v17, %v1167_v12 }
  0x3a   : > { %v672_v33 = vrot.slane %v1055_v23, %v1163_v10  ;;  %v679_v34 = vrot.slane %v1056_v22, %v1163_v10  ;;  %v481_v35 = vsel %vm476_vm1, %v368_v55, %v415_v29  ;;  %v482_v28 = vsel %vm476_vm1, %v369_v4, %v419_v27 }
  0x3b   : > { %v762_v32 = vadd.f32 %v746_v30, %v1171_v15  ;;  %v777_v40 = vcombine.high %v761_v24, %v761_v24  ;;  %v483_v14 = vsel %vm476_vm1, %v370_v7, %v423_v25  ;;  %v484_v41 = vsel %vm476_vm1, %v371_v13, %v427_v31 }
  0x3c   : > { %v680_v36 = vcombine.low %v672_v33, %v679_v34  ;;  %v701_v37 = vsub.f32 %v481_v35, %v1173_v16  ;;  %v702_v46 = vsub.f32 %v482_v28, %v1217_v38  ;;  %v703_v47 = vsub.f32 %v483_v14, %v1175_v17 }
  0x3d   : > { %v778_v48 = vcombine.high %v762_v32, %v762_v32  ;;  %v1057_v44 = vpack.c.bf16 %v777_v40, %v761_v24  ;;  %v704_v42 = vsub.f32 %v484_v41, %v1221_v39  ;;  %v372_v43 = vrot.slane %v1177_v18, 1 }
  0x3e   : > { %688 = vst [vmem:[%s1273_s19 + $0x18] sm:$0xff] %v680_v36  ;;  %v717_v15 = vmul.f32 0.25, %v701_v37  ;;  %v718_v45 = vmul.f32 0.25, %v702_v46  ;;  %v719_v49 = vmul.f32 0.25, %v703_v47  ;;  %v373_v50 = vrot.slane %v1245_v60, 1 }
  0x3f   : > { %v1058_v51 = vpack.c.bf16 %v778_v48, %v762_v32  ;;  %v833_v52 = vrot.slane %v1057_v44, %v1163_v10  ;;  %v720_v53 = vmul.f32 0.25, %v704_v42  ;;  %v374_v38 = vrot.slane %v1179_v19, 1 }
  0x40   : > { %v747_v54 = vcombine.low %v717_v15, %v718_v45  ;;  %v375_v55 = vrot.slane %v1249_v61, 1  ;;  %v431_v39 = vrot.slane %v1177_v18, %v1165_v11  ;;  %v435_v56 = vrot.slane %v1177_v18, %v1167_v12 }
  0x41   : > { %v840_v57 = vrot.slane %v1058_v51, %v1163_v10  ;;  %v748_v59 = vcombine.low %v719_v49, %v720_v53  ;;  %v439_v62 = vrot.slane %v1179_v19, %v1165_v11  ;;  %v443_v5 = vrot.slane %v1179_v19, %v1167_v12 }
  0x42   : > { %v763_v6 = vadd.f32 %v747_v54, %v1173_v16  ;;  %v485_v0 = vsel %vm476_vm1, %v372_v43, %v431_v39  ;;  %v486_v1 = vsel %vm476_vm1, %v373_v50, %v435_v56  ;;  %v376_v2 = vrot.slane %v1181_v20, 1 }
  0x43   : > { %v841_v3 = vcombine.low %v833_v52, %v840_v57  ;;  %v764_v4 = vadd.f32 %v748_v59, %v1175_v17  ;;  %v487_v7 = vsel %vm476_vm1, %v374_v38, %v439_v62  ;;  %v488_v26 = vsel %vm476_vm1, %v375_v55, %v443_v5 }
  0x44   : > { %v779_v8 = vcombine.high %v763_v6, %v763_v6  ;;  %v705_v9 = vsub.f32 %v485_v0, %v1177_v18  ;;  %v706_v13 = vsub.f32 %v486_v1, %v1245_v60  ;;  %v707_v16 = vsub.f32 %v487_v7, %v1179_v19 }
  0x45   : > { %897 = vst [vmem:[%s1367_s22] sm:$0xff] %v841_v3  ;;  %v780_v23 = vcombine.high %v764_v4, %v764_v4  ;;  %v708_v22 = vsub.f32 %v488_v26, %v1249_v61  ;;  %v377_v29 = vrot.slane %v1281_v58, 1  ;;  %v378_v27 = vrot.slane %v1183_v21, 1 }
  0x46   : > { %v1059_v17 = vpack.c.bf16 %v779_v8, %v763_v6  ;;  %v721_v30 = vmul.f32 0.25, %v705_v9  ;;  %v722_v24 = vmul.f32 0.25, %v706_v13  ;;  %v723_v25 = vmul.f32 0.25, %v707_v16 }
  0x47   : > { %v1060_v31 = vpack.c.bf16 %v780_v23, %v764_v4  ;;  %v724_v33 = vmul.f32 0.25, %v708_v22  ;;  %v379_v34 = vrot.slane %v1287_v63, 1  ;;  %v447_v60 = vrot.slane %v1181_v20, %v1165_v11 }
  0x48   : > { %v850_v35 = vrot.slane %v1059_v17, %v1163_v10  ;;  %v749_v28 = vcombine.low %v721_v30, %v722_v24  ;;  %v451_v61 = vrot.slane %v1181_v20, %v1167_v12  ;;  %v455_v32 = vrot.slane %v1183_v21, %v1165_v11 }
  0x49   : > { %v857_v40 = vrot.slane %v1060_v31, %v1163_v10  ;;  %v750_v14 = vcombine.low %v723_v25, %v724_v33  ;;  %v459_v41 = vrot.slane %v1183_v21, %v1167_v12  ;;  %v489_v36 = vsel %vm476_vm1, %v376_v2, %v447_v60 }
  0x4a   : > { %v765_v37 = vadd.f32 %v749_v28, %v1177_v18  ;;  %v490_v46 = vsel %vm476_vm1, %v377_v29, %v451_v61  ;;  %v491_v47 = vsel %vm476_vm1, %v378_v27, %v455_v32  ;;  %v709_v48 = vsub.f32 %v489_v36, %v1181_v20 }
  0x4b   : > { %v858_v44 = vcombine.low %v850_v35, %v857_v40  ;;  %v766_v11 = vadd.f32 %v750_v14, %v1179_v19  ;;  %v492_v42 = vsel %vm476_vm1, %v379_v34, %v459_v41  ;;  %v710_v43 = vsub.f32 %v490_v46, %v1281_v58 }
  0x4c   : > { %v781_v15 = vcombine.high %v765_v37, %v765_v37  ;;  %v711_v12 = vsub.f32 %v491_v47, %v1183_v21  ;;  %v712_v45 = vsub.f32 %v492_v42, %v1287_v63  ;;  %v725_v49 = vmul.f32 0.25, %v709_v48 }
  0x4d   : > { %898 = vst [vmem:[%s1367_s22 + $0x8] sm:$0xff] %v858_v44  ;;  %v782_v18 = vcombine.high %v766_v11, %v766_v11  ;;  %v726_v50 = vmul.f32 0.25, %v710_v43 }
  0x4e   : > { %v1061_v51 = vpack.c.bf16 %v781_v15, %v765_v37  ;;  %v727_v52 = vmul.f32 0.25, %v711_v12  ;;  %v728_v53 = vmul.f32 0.25, %v712_v45 }
  0x4f   : > { %v1062_v38 = vpack.c.bf16 %v782_v18, %v766_v11  ;;  %v751_v19 = vcombine.low %v725_v49, %v726_v50 }
  0x50   : > { %v867_v54 = vrot.slane %v1061_v51, %v1163_v10  ;;  %v752_v55 = vcombine.low %v727_v52, %v728_v53 }
  0x51   : > { %v874_v58 = vrot.slane %v1062_v38, %v1163_v10  ;;  %v767_v39 = vadd.f32 %v751_v19, %v1181_v20 }
  0x52   : > { %v768_v63 = vadd.f32 %v752_v55, %v1183_v21 }
  0x53   : > { %v875_v56 = vcombine.low %v867_v54, %v874_v58  ;;  %v783_v57 = vcombine.high %v767_v39, %v767_v39 }
  0x54   : > { %v784_v59 = vcombine.high %v768_v63, %v768_v63 }
  0x55   : > { %899 = vst [vmem:[%s1367_s22 + $0x10] sm:$0xff] %v875_v56  ;;  %v1063_v62 = vpack.c.bf16 %v783_v57, %v767_v39 }
  0x56   : > { %v1064_v5 = vpack.c.bf16 %v784_v59, %v768_v63 }
  0x57   : > { %v884_v6 = vrot.slane %v1063_v62, %v1163_v10 }
  0x58   : > { %v891_v0 = vrot.slane %v1064_v5, %v1163_v10 }
  0x5a   : > { %v892_v1 = vcombine.low %v884_v6, %v891_v0 }
  0x5c   : > { %900 = vst [vmem:[%s1367_s22 + $0x18] sm:$0xff] %v892_v1 }
  0x5d PF: > { %s13_s11 = sadd.s32 1, %s1117_s11   ;;  %s1425_s9 = smov %s1113_s10 }
  0x5e   : > { %p10_p5 = scmp.ge.s32.totalorder %s13_s11, 4   ;;  %s1426_s10 = smov %s1428_s12 }
  0x60   :  { %12 = sbr.rel (!%p10_p5) target bundleno = 2 (0x2), region = 66 }

// kernel: decoder_bottleneck_forward.15
= control target key start
LH: loop header
LB: loop body
LE: loop exit
PB: predicated region body
PF: predicated region fallthrough
CT: control target
= control target key end

     0   :  { %s1088_s9 = smov 0   ;;  %s1090_s10 = smov 0   ;;  %s1631_s0 = inlined_call_operand.vmem [shape: bf16[64,8,16], index: 0, kind: input, shape index: {}]   ;;  %s1632_s1 = inlined_call_operand.vmem [shape: bf16[64,8,16], index: 1, kind: output, shape index: {0}]   ;;  %s1633_s2 = inlined_call_operand.vmem [shape: bf16[64,8,16], index: 2, kind: output, shape index: {1}]  }
   0x1   :  { %s1092_s11 = smov 0  }
   0x2 LB: > { %s25_s12 = sadd.s32 1, %s1067_s10  ;;  %p937_p0 = scmp.ge.s32.totalorder %s1071_s11, 1  ;;  %s1071_s11 = sphi %s1092_s11, %s13_s11   ;;  %s1067_s10 = sphi %s1090_s10, %s1635_s10   ;;  %s1063_s9 = sphi %s1088_s9, %s1634_s9  }
   0x3   : > { %p27_p1 = scmp.ge.s32.totalorder %s25_s12, 2  ;;  %p137_p2 = scmp.lt.s32.totalorder %s1071_s11, 3 }
   0x5   : > { %s1637_s12 = smov (%p27_p1, %s25_s12), 0  ;;  %p138_p3 = pnand %p937_p0, %p137_p2 }
   0x6   : > { %s938_s13 = sshll.u32 (!%p138_p3), %s1063_s9, 5  ;;  %vm360_vm0 = vcmask (!%p138_p3), 1040384   ;;  %vm618_vm1 = vcmask (!%p138_p3), 125952   ;;  %vm457_vm2 = vcmask (!%p138_p3), 1046528  }
   0x7   : > { %141 = sbr.rel (%p138_p3) target bundleno = 132 (0x84), region = 24  ;;  %p174_p4 = scmp.lt.s32.totalorder (!%p138_p3), %s938_s13, 63 }
   0xe   : > { %s1639_s13 = smov (!%p174_p4, %s938_s13), 63 }
   0xf   : > { %s1106_s14 = sshll.u32 %s1639_s13, 2 }
  0x10   : > { %s1112_s17 = scalar_lea.vmem %s1631_s0, %s1106_s14  ;;  %s1170_s20 = scalar_lea.vmem %s1632_s1, %s1106_s14 }
  0x11   : > { %v947_v0 = vld [vmem:[%s1112_s17] sm:$0xff]   ;;  %v1010_v1 = vld [vmem:[%s1112_s17 + $0x8] sm:$0xff]   ;;  %v1011_v2 = vld [vmem:[%s1112_s17 + $0x10] sm:$0xff]   ;;  %s1420_s23 = scalar_lea.vmem %s1633_s2, %s1106_s14 }
  0x12   : > { %v1117_v3 = vunpack.c.l.bf16 %v947_v0  ;;  %v1119_v4 = vunpack.c.h.bf16 %v947_v0  ;;  %v1121_v5 = vunpack.c.l.bf16 %v1010_v1  ;;  %v1123_v6 = vunpack.c.h.bf16 %v1010_v1  ;;  %v1012_v7 = vld [vmem:[%s1112_s17 + $0x18] sm:$0xff]   ;;  %v1013_v48 = vld [vmem:[%s1112_s17 + $0x20] sm:$0xff]   ;;  %v1014_v49 = vld [vmem:[%s1112_s17 + $0x28] sm:$0xff]  }
  0x13   : > { %v1126_v8 = vunpack.c.l.bf16 %v1011_v2  ;;  %v1128_v9 = vunpack.c.h.bf16 %v1011_v2  ;;  %v1130_v10 = vunpack.c.l.bf16 %v1012_v7  ;;  %v1132_v11 = vunpack.c.h.bf16 %v1012_v7  ;;  %v1015_v62 = vld [vmem:[%s1112_s17 + $0x30] sm:$0xff]   ;;  %v1016_v63 = vld [vmem:[%s1112_s17 + $0x38] sm:$0xff]  }
  0x14   : > { %v296_v12 = vrot.slane %v1117_v3, 7  ;;  %v297_v13 = vrot.slane %v1119_v4, 7  ;;  %v298_v14 = vrot.slane %v1121_v5, 7  ;;  %v299_v15 = vrot.slane %v1123_v6, 7 }
  0x15   : > { %v300_v16 = vrot.slane %v1126_v8, 7  ;;  %v301_v17 = vrot.slane %v1128_v9, 7  ;;  %v302_v18 = vrot.slane %v1130_v10, 7  ;;  %v303_v19 = vrot.slane %v1132_v11, 7 }
  0x16   : > { %v361_v20 = vsel %vm360_vm0, %v1117_v3, %v296_v12  ;;  %v362_v21 = vsel %vm360_vm0, %v1119_v4, %v297_v13  ;;  %v363_v22 = vsel %vm360_vm0, %v1121_v5, %v298_v14  ;;  %v364_v23 = vsel %vm360_vm0, %v1123_v6, %v299_v15 }
  0x17   : > { %v490_v24 = vsub.f32 %v1117_v3, %v361_v20  ;;  %v491_v25 = vsub.f32 %v1119_v4, %v362_v21  ;;  %v492_v26 = vsub.f32 %v1121_v5, %v363_v22  ;;  %v493_v27 = vsub.f32 %v1123_v6, %v364_v23 }
  0x18   : > { %v365_v28 = vsel %vm360_vm0, %v1126_v8, %v300_v16  ;;  %v366_v29 = vsel %vm360_vm0, %v1128_v9, %v301_v17  ;;  %v367_v30 = vsel %vm360_vm0, %v1130_v10, %v302_v18  ;;  %v368_v31 = vsel %vm360_vm0, %v1132_v11, %v303_v19 }
  0x19   : > { %v522_v32 = vmul.f32 0.75, %v490_v24  ;;  %v523_v33 = vmul.f32 0.75, %v491_v25  ;;  %v524_v34 = vmul.f32 0.75, %v492_v26  ;;  %v525_v35 = vmul.f32 0.75, %v493_v27 }
  0x1a   : > { %v494_v36 = vsub.f32 %v1126_v8, %v365_v28  ;;  %v495_v37 = vsub.f32 %v1128_v9, %v366_v29  ;;  %v496_v38 = vsub.f32 %v1130_v10, %v367_v30  ;;  %v497_v39 = vsub.f32 %v1132_v11, %v368_v31 }
  0x1b   : > { %v554_v40 = vadd.f32 %v522_v32, %v361_v20  ;;  %v555_v41 = vadd.f32 %v523_v33, %v362_v21  ;;  %v556_v42 = vadd.f32 %v524_v34, %v363_v22  ;;  %v557_v43 = vadd.f32 %v525_v35, %v364_v23 }
  0x1c   : > { %v526_v44 = vmul.f32 0.75, %v494_v36  ;;  %v527_v45 = vmul.f32 0.75, %v495_v37  ;;  %v528_v46 = vmul.f32 0.75, %v496_v38  ;;  %v529_v47 = vmul.f32 0.75, %v497_v39 }
  0x1d   : > { %v586_v50 = vpack.c.bf16 %v554_v40, %v554_v40  ;;  %v587_v51 = vpack.c.bf16 %v555_v41, %v555_v41  ;;  %v588_v52 = vpack.c.bf16 %v556_v42, %v556_v42  ;;  %v589_v53 = vpack.c.bf16 %v557_v43, %v557_v43 }
  0x1e   : > { %v558_v54 = vadd.f32 %v526_v44, %v365_v28  ;;  %v559_v55 = vadd.f32 %v527_v45, %v366_v29  ;;  %v560_v56 = vadd.f32 %v528_v46, %v367_v30  ;;  %v561_v57 = vadd.f32 %v529_v47, %v368_v31 }
  0x1f   : > { %619 = vst.msk [vmem:[%s1170_s20] sm:$0xf] %vm618_vm1, %v586_v50  ;;  %620 = vst.msk [vmem:[%s1170_s20 + $0x4] sm:$0xf] %vm618_vm1, %v587_v51  ;;  %v1182_v58 = vunpack.c.l.bf16 %v1013_v48  ;;  %v1184_v59 = vunpack.c.h.bf16 %v1013_v48  ;;  %v1186_v60 = vunpack.c.l.bf16 %v1014_v49  ;;  %v1188_v61 = vunpack.c.h.bf16 %v1014_v49  ;;  %v1017_v48 = vld [vmem:[%s1112_s17 + $0x40] sm:$0xff]   ;;  %v1018_v49 = vld [vmem:[%s1112_s17 + $0x48] sm:$0xff]  }
  0x20   : > { %621 = vst.msk [vmem:[%s1170_s20 + $0x8] sm:$0xf] %vm618_vm1, %v588_v52  ;;  %622 = vst.msk [vmem:[%s1170_s20 + $0xc] sm:$0xf] %vm618_vm1, %v589_v53  ;;  %v590_v0 = vpack.c.bf16 %v558_v54, %v558_v54  ;;  %v591_v1 = vpack.c.bf16 %v559_v55, %v559_v55  ;;  %v592_v2 = vpack.c.bf16 %v560_v56, %v560_v56  ;;  %v1204_v16 = vunpack.c.l.bf16 %v1015_v62 }
  0x21   : > { %v593_v7 = vpack.c.bf16 %v561_v57, %v561_v57  ;;  %v304_v12 = vrot.slane %v1182_v58, 7  ;;  %v305_v13 = vrot.slane %v1184_v59, 7  ;;  %v306_v14 = vrot.slane %v1186_v60, 7 }
  0x22   : > { %v307_v15 = vrot.slane %v1188_v61, 7  ;;  %623 = vst.msk [vmem:[%s1170_s20 + $0x10] sm:$0xf] %vm618_vm1, %v590_v0  ;;  %624 = vst.msk [vmem:[%s1170_s20 + $0x14] sm:$0xf] %vm618_vm1, %v591_v1  ;;  %v1206_v17 = vunpack.c.h.bf16 %v1015_v62  ;;  %v1208_v18 = vunpack.c.l.bf16 %v1016_v63  ;;  %v1210_v19 = vunpack.c.h.bf16 %v1016_v63 }
  0x23   : > { %625 = vst.msk [vmem:[%s1170_s20 + $0x18] sm:$0xf] %vm618_vm1, %v592_v2  ;;  %626 = vst.msk [vmem:[%s1170_s20 + $0x1c] sm:$0xf] %vm618_vm1, %v593_v7  ;;  %v369_v20 = vsel %vm360_vm0, %v1182_v58, %v304_v12  ;;  %v370_v21 = vsel %vm360_vm0, %v1184_v59, %v305_v13  ;;  %v371_v22 = vsel %vm360_vm0, %v1186_v60, %v306_v14  ;;  %v308_v28 = vrot.slane %v1204_v16, 7 }
  0x24   : > { %v372_v23 = vsel %vm360_vm0, %v1188_v61, %v307_v15  ;;  %v498_v24 = vsub.f32 %v1182_v58, %v369_v20  ;;  %v499_v25 = vsub.f32 %v1184_v59, %v370_v21  ;;  %v500_v26 = vsub.f32 %v1186_v60, %v371_v22 }
  0x25   : > { %v501_v27 = vsub.f32 %v1188_v61, %v372_v23  ;;  %v309_v29 = vrot.slane %v1206_v17, 7  ;;  %v310_v30 = vrot.slane %v1208_v18, 7  ;;  %v311_v31 = vrot.slane %v1210_v19, 7 }
  0x26   : > { %v530_v32 = vmul.f32 0.75, %v498_v24  ;;  %v531_v33 = vmul.f32 0.75, %v499_v25  ;;  %v532_v34 = vmul.f32 0.75, %v500_v26  ;;  %v373_v36 = vsel %vm360_vm0, %v1204_v16, %v308_v28  ;;  %v1019_v26 = vld [vmem:[%s1112_s17 + $0x50] sm:$0xff]  }
  0x27   : > { %v533_v35 = vmul.f32 0.75, %v501_v27  ;;  %v374_v37 = vsel %vm360_vm0, %v1206_v17, %v309_v29  ;;  %v375_v38 = vsel %vm360_vm0, %v1208_v18, %v310_v30  ;;  %v376_v39 = vsel %vm360_vm0, %v1210_v19, %v311_v31  ;;  %v1020_v27 = vld [vmem:[%s1112_s17 + $0x58] sm:$0xff]  }
  0x28   : > { %v562_v40 = vadd.f32 %v530_v32, %v369_v20  ;;  %v563_v41 = vadd.f32 %v531_v33, %v370_v21  ;;  %v564_v42 = vadd.f32 %v532_v34, %v371_v22  ;;  %v502_v44 = vsub.f32 %v1204_v16, %v373_v36 }
  0x29   : > { %v565_v43 = vadd.f32 %v533_v35, %v372_v23  ;;  %v503_v45 = vsub.f32 %v1206_v17, %v374_v37  ;;  %v504_v46 = vsub.f32 %v1208_v18, %v375_v38  ;;  %v505_v47 = vsub.f32 %v1210_v19, %v376_v39 }
  0x2a   : > { %v594_v50 = vpack.c.bf16 %v562_v40, %v562_v40  ;;  %v595_v51 = vpack.c.bf16 %v563_v41, %v563_v41  ;;  %v596_v52 = vpack.c.bf16 %v564_v42, %v564_v42  ;;  %v534_v54 = vmul.f32 0.75, %v502_v44 }
  0x2b   : > { %v597_v53 = vpack.c.bf16 %v565_v43, %v565_v43  ;;  %v535_v55 = vmul.f32 0.75, %v503_v45  ;;  %v536_v56 = vmul.f32 0.75, %v504_v46  ;;  %v537_v57 = vmul.f32 0.75, %v505_v47 }
  0x2c   : > { %627 = vst.msk [vmem:[%s1170_s20 + $0x20] sm:$0xf] %vm618_vm1, %v594_v50  ;;  %628 = vst.msk [vmem:[%s1170_s20 + $0x24] sm:$0xf] %vm618_vm1, %v595_v51  ;;  %v1250_v62 = vunpack.c.l.bf16 %v1017_v48  ;;  %v1252_v63 = vunpack.c.h.bf16 %v1017_v48  ;;  %v1254_v0 = vunpack.c.l.bf16 %v1018_v49  ;;  %v1256_v1 = vunpack.c.h.bf16 %v1018_v49 }
  0x2d   : > { %629 = vst.msk [vmem:[%s1170_s20 + $0x28] sm:$0xf] %vm618_vm1, %v596_v52  ;;  %630 = vst.msk [vmem:[%s1170_s20 + $0x2c] sm:$0xf] %vm618_vm1, %v597_v53  ;;  %v566_v2 = vadd.f32 %v534_v54, %v373_v36  ;;  %v567_v7 = vadd.f32 %v535_v55, %v374_v37  ;;  %v568_v12 = vadd.f32 %v536_v56, %v375_v38  ;;  %v1284_v36 = vunpack.c.l.bf16 %v1019_v26  ;;  %v1021_v56 = vld [vmem:[%s1112_s17 + $0x60] sm:$0xff]  }
  0x2e   : > { %v569_v13 = vadd.f32 %v537_v57, %v376_v39  ;;  %v312_v14 = vrot.slane %v1250_v62, 7  ;;  %v313_v15 = vrot.slane %v1252_v63, 7  ;;  %v314_v20 = vrot.slane %v1254_v0, 7  ;;  %v1022_v57 = vld [vmem:[%s1112_s17 + $0x68] sm:$0xff]  }
  0x2f   : > { %v315_v21 = vrot.slane %v1256_v1, 7  ;;  %v598_v22 = vpack.c.bf16 %v566_v2, %v566_v2  ;;  %v599_v23 = vpack.c.bf16 %v567_v7, %v567_v7  ;;  %v600_v24 = vpack.c.bf16 %v568_v12, %v568_v12 }
  0x30   : > { %v601_v25 = vpack.c.bf16 %v569_v13, %v569_v13  ;;  %v377_v28 = vsel %vm360_vm0, %v1250_v62, %v312_v14  ;;  %v378_v29 = vsel %vm360_vm0, %v1252_v63, %v313_v15  ;;  %v379_v30 = vsel %vm360_vm0, %v1254_v0, %v314_v20 }
  0x31   : > { %v380_v31 = vsel %vm360_vm0, %v1256_v1, %v315_v21  ;;  %631 = vst.msk [vmem:[%s1170_s20 + $0x30] sm:$0xf] %vm618_vm1, %v598_v22  ;;  %632 = vst.msk [vmem:[%s1170_s20 + $0x34] sm:$0xf] %vm618_vm1, %v599_v23  ;;  %v506_v32 = vsub.f32 %v1250_v62, %v377_v28  ;;  %v507_v33 = vsub.f32 %v1252_v63, %v378_v29  ;;  %v1286_v37 = vunpack.c.h.bf16 %v1019_v26 }
  0x32   : > { %633 = vst.msk [vmem:[%s1170_s20 + $0x38] sm:$0xf] %vm618_vm1, %v600_v24  ;;  %634 = vst.msk [vmem:[%s1170_s20 + $0x3c] sm:$0xf] %vm618_vm1, %v601_v25  ;;  %v508_v34 = vsub.f32 %v1254_v0, %v379_v30  ;;  %v509_v35 = vsub.f32 %v1256_v1, %v380_v31  ;;  %v1288_v38 = vunpack.c.l.bf16 %v1020_v27  ;;  %v1290_v39 = vunpack.c.h.bf16 %v1020_v27 }
  0x33   : > { %v538_v40 = vmul.f32 0.75, %v506_v32  ;;  %v539_v41 = vmul.f32 0.75, %v507_v33  ;;  %v316_v44 = vrot.slane %v1284_v36, 7  ;;  %v317_v45 = vrot.slane %v1286_v37, 7 }
  0x34   : > { %v540_v42 = vmul.f32 0.75, %v508_v34  ;;  %v541_v43 = vmul.f32 0.75, %v509_v35  ;;  %v318_v46 = vrot.slane %v1288_v38, 7  ;;  %v319_v47 = vrot.slane %v1290_v39, 7 }
  0x35   : > { %v570_v48 = vadd.f32 %v538_v40, %v377_v28  ;;  %v571_v49 = vadd.f32 %v539_v41, %v378_v29  ;;  %v381_v52 = vsel %vm360_vm0, %v1284_v36, %v316_v44  ;;  %v382_v53 = vsel %vm360_vm0, %v1286_v37, %v317_v45 }
  0x36   : > { %v572_v50 = vadd.f32 %v540_v42, %v379_v30  ;;  %v573_v51 = vadd.f32 %v541_v43, %v380_v31  ;;  %v383_v54 = vsel %vm360_vm0, %v1288_v38, %v318_v46  ;;  %v384_v55 = vsel %vm360_vm0, %v1290_v39, %v319_v47  ;;  %v1023_v46 = vld [vmem:[%s1112_s17 + $0x70] sm:$0xff]   ;;  %v1024_v47 = vld [vmem:[%s1112_s17 + $0x78] sm:$0xff]  }
  0x37   : > { %v602_v2 = vpack.c.bf16 %v570_v48, %v570_v48  ;;  %v603_v7 = vpack.c.bf16 %v571_v49, %v571_v49  ;;  %v510_v14 = vsub.f32 %v1284_v36, %v381_v52  ;;  %v511_v15 = vsub.f32 %v1286_v37, %v382_v53 }
  0x38   : > { %v604_v12 = vpack.c.bf16 %v572_v50, %v572_v50  ;;  %v605_v13 = vpack.c.bf16 %v573_v51, %v573_v51  ;;  %v512_v20 = vsub.f32 %v1288_v38, %v383_v54  ;;  %v513_v21 = vsub.f32 %v1290_v39, %v384_v55 }
  0x39   : > { %635 = vst.msk [vmem:[%s1170_s20 + $0x40] sm:$0xf] %vm618_vm1, %v602_v2  ;;  %636 = vst.msk [vmem:[%s1170_s20 + $0x44] sm:$0xf] %vm618_vm1, %v603_v7  ;;  %v1318_v22 = vunpack.c.l.bf16 %v1021_v56  ;;  %v1320_v23 = vunpack.c.h.bf16 %v1021_v56  ;;  %v1322_v24 = vunpack.c.l.bf16 %v1022_v57  ;;  %v1324_v25 = vunpack.c.h.bf16 %v1022_v57 }
  0x3a   : > { %637 = vst.msk [vmem:[%s1170_s20 + $0x48] sm:$0xf] %vm618_vm1, %v604_v12  ;;  %638 = vst.msk [vmem:[%s1170_s20 + $0x4c] sm:$0xf] %vm618_vm1, %v605_v13  ;;  %v542_v26 = vmul.f32 0.75, %v510_v14  ;;  %v543_v27 = vmul.f32 0.75, %v511_v15  ;;  %v1352_v56 = vunpack.c.l.bf16 %v1023_v46  ;;  %v1354_v57 = vunpack.c.h.bf16 %v1023_v46 }
  0x3b   : > { %v544_v28 = vmul.f32 0.75, %v512_v20  ;;  %v545_v29 = vmul.f32 0.75, %v513_v21  ;;  %v320_v30 = vrot.slane %v1318_v22, 7  ;;  %v321_v31 = vrot.slane %v1320_v23, 7 }
  0x3c   : > { %v322_v32 = vrot.slane %v1322_v24, 7  ;;  %v323_v33 = vrot.slane %v1324_v25, 7  ;;  %v574_v34 = vadd.f32 %v542_v26, %v381_v52  ;;  %v575_v35 = vadd.f32 %v543_v27, %v382_v53 }
  0x3d   : > { %v576_v40 = vadd.f32 %v544_v28, %v383_v54  ;;  %v577_v41 = vadd.f32 %v545_v29, %v384_v55  ;;  %v385_v42 = vsel %vm360_vm0, %v1318_v22, %v320_v30  ;;  %v386_v43 = vsel %vm360_vm0, %v1320_v23, %v321_v31 }
  0x3e   : > { %v387_v44 = vsel %vm360_vm0, %v1322_v24, %v322_v32  ;;  %v388_v45 = vsel %vm360_vm0, %v1324_v25, %v323_v33  ;;  %v606_v48 = vpack.c.bf16 %v574_v34, %v574_v34  ;;  %v607_v49 = vpack.c.bf16 %v575_v35, %v575_v35 }
  0x3f   : > { %v608_v50 = vpack.c.bf16 %v576_v40, %v576_v40  ;;  %v609_v51 = vpack.c.bf16 %v577_v41, %v577_v41  ;;  %v514_v52 = vsub.f32 %v1318_v22, %v385_v42  ;;  %v515_v53 = vsub.f32 %v1320_v23, %v386_v43 }
  0x40   : > { %v516_v54 = vsub.f32 %v1322_v24, %v387_v44  ;;  %v517_v55 = vsub.f32 %v1324_v25, %v388_v45  ;;  %639 = vst.msk [vmem:[%s1170_s20 + $0x50] sm:$0xf] %vm618_vm1, %v606_v48  ;;  %640 = vst.msk [vmem:[%s1170_s20 + $0x54] sm:$0xf] %vm618_vm1, %v607_v49  ;;  %v1356_v2 = vunpack.c.l.bf16 %v1024_v47  ;;  %v1358_v7 = vunpack.c.h.bf16 %v1024_v47 }
  0x41   : > { %641 = vst.msk [vmem:[%s1170_s20 + $0x58] sm:$0xf] %vm618_vm1, %v608_v50  ;;  %642 = vst.msk [vmem:[%s1170_s20 + $0x5c] sm:$0xf] %vm618_vm1, %v609_v51  ;;  %v546_v12 = vmul.f32 0.75, %v514_v52  ;;  %v547_v13 = vmul.f32 0.75, %v515_v53 }
  0x42   : > { %v548_v14 = vmul.f32 0.75, %v516_v54  ;;  %v549_v15 = vmul.f32 0.75, %v517_v55  ;;  %v324_v20 = vrot.slane %v1352_v56, 7  ;;  %v325_v21 = vrot.slane %v1354_v57, 7 }
  0x43   : > { %v326_v26 = vrot.slane %v1356_v2, 7  ;;  %v327_v27 = vrot.slane %v1358_v7, 7  ;;  %v578_v28 = vadd.f32 %v546_v12, %v385_v42  ;;  %v579_v29 = vadd.f32 %v547_v13, %v386_v43 }
  0x44   : > { %v580_v30 = vadd.f32 %v548_v14, %v387_v44  ;;  %v581_v31 = vadd.f32 %v549_v15, %v388_v45  ;;  %v389_v32 = vsel %vm360_vm0, %v1352_v56, %v324_v20  ;;  %v390_v33 = vsel %vm360_vm0, %v1354_v57, %v325_v21 }
  0x45   : > { %v391_v34 = vsel %vm360_vm0, %v1356_v2, %v326_v26  ;;  %v392_v35 = vsel %vm360_vm0, %v1358_v7, %v327_v27  ;;  %v610_v40 = vpack.c.bf16 %v578_v28, %v578_v28  ;;  %v611_v41 = vpack.c.bf16 %v579_v29, %v579_v29 }
  0x46   : > { %v612_v42 = vpack.c.bf16 %v580_v30, %v580_v30  ;;  %v613_v43 = vpack.c.bf16 %v581_v31, %v581_v31  ;;  %v518_v44 = vsub.f32 %v1352_v56, %v389_v32  ;;  %v519_v45 = vsub.f32 %v1354_v57, %v390_v33 }
  0x47   : > { %v520_v46 = vsub.f32 %v1356_v2, %v391_v34  ;;  %v521_v47 = vsub.f32 %v1358_v7, %v392_v35  ;;  %643 = vst.msk [vmem:[%s1170_s20 + $0x60] sm:$0xf] %vm618_vm1, %v610_v40  ;;  %644 = vst.msk [vmem:[%s1170_s20 + $0x64] sm:$0xf] %vm618_vm1, %v611_v41  ;;  %v393_v48 = vrot.slane %v1117_v3, 1  ;;  %v394_v49 = vrot.slane %v1119_v4, 1 }
  0x48   : > { %645 = vst.msk [vmem:[%s1170_s20 + $0x68] sm:$0xf] %vm618_vm1, %v612_v42  ;;  %646 = vst.msk [vmem:[%s1170_s20 + $0x6c] sm:$0xf] %vm618_vm1, %v613_v43  ;;  %v395_v50 = vrot.slane %v1121_v5, 1  ;;  %v396_v51 = vrot.slane %v1123_v6, 1 }
  0x49   : > { %v550_v52 = vmul.f32 0.75, %v518_v44  ;;  %v551_v53 = vmul.f32 0.75, %v519_v45  ;;  %v552_v54 = vmul.f32 0.75, %v520_v46  ;;  %v553_v55 = vmul.f32 0.75, %v521_v47 }
  0x4a   : > { %v458_v12 = vsel %vm457_vm2, %v393_v48, %v1117_v3  ;;  %v459_v13 = vsel %vm457_vm2, %v394_v49, %v1119_v4  ;;  %v460_v14 = vsel %vm457_vm2, %v395_v50, %v1121_v5  ;;  %v461_v15 = vsel %vm457_vm2, %v396_v51, %v1123_v6 }
  0x4b   : > { %v582_v20 = vadd.f32 %v550_v52, %v389_v32  ;;  %v583_v21 = vadd.f32 %v551_v53, %v390_v33  ;;  %v584_v26 = vadd.f32 %v552_v54, %v391_v34  ;;  %v585_v27 = vadd.f32 %v553_v55, %v392_v35 }
  0x4c   : > { %v651_v28 = vsub.f32 %v458_v12, %v1117_v3  ;;  %v652_v29 = vsub.f32 %v459_v13, %v1119_v4  ;;  %v653_v30 = vsub.f32 %v460_v14, %v1121_v5  ;;  %v654_v31 = vsub.f32 %v461_v15, %v1123_v6 }
  0x4d   : > { %v614_v40 = vpack.c.bf16 %v582_v20, %v582_v20  ;;  %v615_v41 = vpack.c.bf16 %v583_v21, %v583_v21  ;;  %v616_v42 = vpack.c.bf16 %v584_v26, %v584_v26  ;;  %v617_v43 = vpack.c.bf16 %v585_v27, %v585_v27 }
  0x4e   : > { %v683_v32 = vmul.f32 0.25, %v651_v28  ;;  %v684_v33 = vmul.f32 0.25, %v652_v29  ;;  %v685_v44 = vmul.f32 0.25, %v653_v30  ;;  %v686_v34 = vmul.f32 0.25, %v654_v31 }
  0x4f   : > { %647 = vst.msk [vmem:[%s1170_s20 + $0x70] sm:$0xf] %vm618_vm1, %v614_v40  ;;  %648 = vst.msk [vmem:[%s1170_s20 + $0x74] sm:$0xf] %vm618_vm1, %v615_v41  ;;  %v397_v35 = vrot.slane %v1126_v8, 1  ;;  %v398_v45 = vrot.slane %v1128_v9, 1 }
  0x50   : > { %649 = vst.msk [vmem:[%s1170_s20 + $0x78] sm:$0xf] %vm618_vm1, %v616_v42  ;;  %650 = vst.msk [vmem:[%s1170_s20 + $0x7c] sm:$0xf] %vm618_vm1, %v617_v43  ;;  %v399_v46 = vrot.slane %v1130_v10, 1  ;;  %v400_v47 = vrot.slane %v1132_v11, 1  ;;  %v715_v48 = vadd.f32 %v1117_v3, %v683_v32  ;;  %v716_v49 = vadd.f32 %v1119_v4, %v684_v33 }
  0x51   : > { %v717_v50 = vadd.f32 %v1121_v5, %v685_v44  ;;  %v718_v51 = vadd.f32 %v1123_v6, %v686_v34  ;;  %v462_v52 = vsel %vm457_vm2, %v397_v35, %v1126_v8  ;;  %v463_v3 = vsel %vm457_vm2, %v398_v45, %v1128_v9 }
  0x52   : > { %v464_v4 = vsel %vm457_vm2, %v399_v46, %v1130_v10  ;;  %v465_v5 = vsel %vm457_vm2, %v400_v47, %v1132_v11  ;;  %v747_v6 = vpack.c.bf16 %v715_v48, %v715_v48  ;;  %v748_v53 = vpack.c.bf16 %v716_v49, %v716_v49 }
  0x53   : > { %v749_v54 = vpack.c.bf16 %v717_v50, %v717_v50  ;;  %v750_v55 = vpack.c.bf16 %v718_v51, %v718_v51  ;;  %v655_v12 = vsub.f32 %v462_v52, %v1126_v8  ;;  %v656_v13 = vsub.f32 %v463_v3, %v1128_v9 }
  0x54   : > { %v657_v14 = vsub.f32 %v464_v4, %v1130_v10  ;;  %v658_v15 = vsub.f32 %v465_v5, %v1132_v11  ;;  %779 = vst.msk [vmem:[%s1420_s23] sm:$0xf] %vm618_vm1, %v747_v6  ;;  %780 = vst.msk [vmem:[%s1420_s23 + $0x4] sm:$0xf] %vm618_vm1, %v748_v53  ;;  %v401_v20 = vrot.slane %v1182_v58, 1  ;;  %v402_v21 = vrot.slane %v1184_v59, 1 }
  0x55   : > { %781 = vst.msk [vmem:[%s1420_s23 + $0x8] sm:$0xf] %vm618_vm1, %v749_v54  ;;  %782 = vst.msk [vmem:[%s1420_s23 + $0xc] sm:$0xf] %vm618_vm1, %v750_v55  ;;  %v403_v26 = vrot.slane %v1186_v60, 1  ;;  %v404_v27 = vrot.slane %v1188_v61, 1 }
  0x56   : > { %v687_v28 = vmul.f32 0.25, %v655_v12  ;;  %v688_v29 = vmul.f32 0.25, %v656_v13  ;;  %v689_v30 = vmul.f32 0.25, %v657_v14  ;;  %v690_v31 = vmul.f32 0.25, %v658_v15 }
  0x57   : > { %v466_v40 = vsel %vm457_vm2, %v401_v20, %v1182_v58  ;;  %v467_v41 = vsel %vm457_vm2, %v402_v21, %v1184_v59  ;;  %v468_v42 = vsel %vm457_vm2, %v403_v26, %v1186_v60  ;;  %v469_v43 = vsel %vm457_vm2, %v404_v27, %v1188_v61 }
  0x58   : > { %v719_v32 = vadd.f32 %v1126_v8, %v687_v28  ;;  %v720_v33 = vadd.f32 %v1128_v9, %v688_v29  ;;  %v721_v44 = vadd.f32 %v1130_v10, %v689_v30  ;;  %v722_v34 = vadd.f32 %v1132_v11, %v690_v31 }
  0x59   : > { %v659_v35 = vsub.f32 %v466_v40, %v1182_v58  ;;  %v660_v45 = vsub.f32 %v467_v41, %v1184_v59  ;;  %v661_v46 = vsub.f32 %v468_v42, %v1186_v60  ;;  %v662_v47 = vsub.f32 %v469_v43, %v1188_v61 }
  0x5a   : > { %v751_v48 = vpack.c.bf16 %v719_v32, %v719_v32  ;;  %v752_v8 = vpack.c.bf16 %v720_v33, %v720_v33  ;;  %v753_v49 = vpack.c.bf16 %v721_v44, %v721_v44  ;;  %v754_v50 = vpack.c.bf16 %v722_v34, %v722_v34 }
  0x5b   : > { %v691_v9 = vmul.f32 0.25, %v659_v35  ;;  %v692_v51 = vmul.f32 0.25, %v660_v45  ;;  %v693_v52 = vmul.f32 0.25, %v661_v46  ;;  %v694_v10 = vmul.f32 0.25, %v662_v47 }
  0x5c   : > { %783 = vst.msk [vmem:[%s1420_s23 + $0x10] sm:$0xf] %vm618_vm1, %v751_v48  ;;  %784 = vst.msk [vmem:[%s1420_s23 + $0x14] sm:$0xf] %vm618_vm1, %v752_v8  ;;  %v405_v11 = vrot.slane %v1204_v16, 1  ;;  %v406_v3 = vrot.slane %v1206_v17, 1 }
  0x5d   : > { %785 = vst.msk [vmem:[%s1420_s23 + $0x18] sm:$0xf] %vm618_vm1, %v753_v49  ;;  %786 = vst.msk [vmem:[%s1420_s23 + $0x1c] sm:$0xf] %vm618_vm1, %v754_v50  ;;  %v407_v4 = vrot.slane %v1208_v18, 1  ;;  %v408_v5 = vrot.slane %v1210_v19, 1  ;;  %v723_v6 = vadd.f32 %v1182_v58, %v691_v9  ;;  %v724_v53 = vadd.f32 %v1184_v59, %v692_v51 }
  0x5e   : > { %v725_v54 = vadd.f32 %v1186_v60, %v693_v52  ;;  %v726_v55 = vadd.f32 %v1188_v61, %v694_v10  ;;  %v470_v12 = vsel %vm457_vm2, %v405_v11, %v1204_v16  ;;  %v471_v13 = vsel %vm457_vm2, %v406_v3, %v1206_v17 }
  0x5f   : > { %v472_v14 = vsel %vm457_vm2, %v407_v4, %v1208_v18  ;;  %v473_v58 = vsel %vm457_vm2, %v408_v5, %v1210_v19  ;;  %v755_v59 = vpack.c.bf16 %v723_v6, %v723_v6  ;;  %v756_v15 = vpack.c.bf16 %v724_v53, %v724_v53 }
  0x60   : > { %v757_v20 = vpack.c.bf16 %v725_v54, %v725_v54  ;;  %v758_v60 = vpack.c.bf16 %v726_v55, %v726_v55  ;;  %v663_v21 = vsub.f32 %v470_v12, %v1204_v16  ;;  %v664_v61 = vsub.f32 %v471_v13, %v1206_v17 }
  0x61   : > { %v665_v26 = vsub.f32 %v472_v14, %v1208_v18  ;;  %v666_v27 = vsub.f32 %v473_v58, %v1210_v19  ;;  %787 = vst.msk [vmem:[%s1420_s23 + $0x20] sm:$0xf] %vm618_vm1, %v755_v59  ;;  %788 = vst.msk [vmem:[%s1420_s23 + $0x24] sm:$0xf] %vm618_vm1, %v756_v15  ;;  %v409_v28 = vrot.slane %v1250_v62, 1  ;;  %v410_v29 = vrot.slane %v1252_v63, 1 }
  0x62   : > { %789 = vst.msk [vmem:[%s1420_s23 + $0x28] sm:$0xf] %vm618_vm1, %v757_v20  ;;  %790 = vst.msk [vmem:[%s1420_s23 + $0x2c] sm:$0xf] %vm618_vm1, %v758_v60  ;;  %v411_v30 = vrot.slane %v1254_v0, 1  ;;  %v412_v31 = vrot.slane %v1256_v1, 1 }
  0x63   : > { %v695_v40 = vmul.f32 0.25, %v663_v21  ;;  %v696_v41 = vmul.f32 0.25, %v664_v61  ;;  %v697_v42 = vmul.f32 0.25, %v665_v26  ;;  %v698_v43 = vmul.f32 0.25, %v666_v27 }
  0x64   : > { %v474_v32 = vsel %vm457_vm2, %v409_v28, %v1250_v62  ;;  %v475_v33 = vsel %vm457_vm2, %v410_v29, %v1252_v63  ;;  %v476_v44 = vsel %vm457_vm2, %v411_v30, %v1254_v0  ;;  %v477_v34 = vsel %vm457_vm2, %v412_v31, %v1256_v1 }
  0x65   : > { %v727_v35 = vadd.f32 %v1204_v16, %v695_v40  ;;  %v728_v45 = vadd.f32 %v1206_v17, %v696_v41  ;;  %v729_v46 = vadd.f32 %v1208_v18, %v697_v42  ;;  %v730_v47 = vadd.f32 %v1210_v19, %v698_v43 }
  0x66   : > { %v667_v48 = vsub.f32 %v474_v32, %v1250_v62  ;;  %v668_v8 = vsub.f32 %v475_v33, %v1252_v63  ;;  %v669_v49 = vsub.f32 %v476_v44, %v1254_v0  ;;  %v670_v50 = vsub.f32 %v477_v34, %v1256_v1 }
  0x67   : > { %v759_v9 = vpack.c.bf16 %v727_v35, %v727_v35  ;;  %v760_v16 = vpack.c.bf16 %v728_v45, %v728_v45  ;;  %v761_v51 = vpack.c.bf16 %v729_v46, %v729_v46  ;;  %v762_v52 = vpack.c.bf16 %v730_v47, %v730_v47 }
  0x68   : > { %v699_v17 = vmul.f32 0.25, %v667_v48  ;;  %v700_v10 = vmul.f32 0.25, %v668_v8  ;;  %v701_v11 = vmul.f32 0.25, %v669_v49  ;;  %v702_v18 = vmul.f32 0.25, %v670_v50 }
  0x69   : > { %791 = vst.msk [vmem:[%s1420_s23 + $0x30] sm:$0xf] %vm618_vm1, %v759_v9  ;;  %792 = vst.msk [vmem:[%s1420_s23 + $0x34] sm:$0xf] %vm618_vm1, %v760_v16  ;;  %v413_v19 = vrot.slane %v1284_v36, 1  ;;  %v414_v3 = vrot.slane %v1286_v37, 1 }
  0x6a   : > { %793 = vst.msk [vmem:[%s1420_s23 + $0x38] sm:$0xf] %vm618_vm1, %v761_v51  ;;  %794 = vst.msk [vmem:[%s1420_s23 + $0x3c] sm:$0xf] %vm618_vm1, %v762_v52  ;;  %v415_v4 = vrot.slane %v1288_v38, 1  ;;  %v416_v5 = vrot.slane %v1290_v39, 1  ;;  %v731_v6 = vadd.f32 %v1250_v62, %v699_v17  ;;  %v732_v53 = vadd.f32 %v1252_v63, %v700_v10 }
  0x6b   : > { %v733_v54 = vadd.f32 %v1254_v0, %v701_v11  ;;  %v734_v55 = vadd.f32 %v1256_v1, %v702_v18  ;;  %v478_v12 = vsel %vm457_vm2, %v413_v19, %v1284_v36  ;;  %v479_v13 = vsel %vm457_vm2, %v414_v3, %v1286_v37 }
  0x6c   : > { %v480_v14 = vsel %vm457_vm2, %v415_v4, %v1288_v38  ;;  %v481_v62 = vsel %vm457_vm2, %v416_v5, %v1290_v39  ;;  %v763_v63 = vpack.c.bf16 %v731_v6, %v731_v6  ;;  %v764_v58 = vpack.c.bf16 %v732_v53, %v732_v53 }
  0x6d   : > { %v765_v59 = vpack.c.bf16 %v733_v54, %v733_v54  ;;  %v766_v0 = vpack.c.bf16 %v734_v55, %v734_v55  ;;  %v671_v15 = vsub.f32 %v478_v12, %v1284_v36  ;;  %v672_v1 = vsub.f32 %v479_v13, %v1286_v37 }
  0x6e   : > { %v673_v20 = vsub.f32 %v480_v14, %v1288_v38  ;;  %v674_v60 = vsub.f32 %v481_v62, %v1290_v39  ;;  %795 = vst.msk [vmem:[%s1420_s23 + $0x40] sm:$0xf] %vm618_vm1, %v763_v63  ;;  %796 = vst.msk [vmem:[%s1420_s23 + $0x44] sm:$0xf] %vm618_vm1, %v764_v58  ;;  %v417_v21 = vrot.slane %v1318_v22, 1  ;;  %v418_v61 = vrot.slane %v1320_v23, 1 }
  0x6f   : > { %797 = vst.msk [vmem:[%s1420_s23 + $0x48] sm:$0xf] %vm618_vm1, %v765_v59  ;;  %798 = vst.msk [vmem:[%s1420_s23 + $0x4c] sm:$0xf] %vm618_vm1, %v766_v0  ;;  %v419_v26 = vrot.slane %v1322_v24, 1  ;;  %v420_v27 = vrot.slane %v1324_v25, 1 }
  0x70   : > { %v703_v28 = vmul.f32 0.25, %v671_v15  ;;  %v704_v29 = vmul.f32 0.25, %v672_v1  ;;  %v705_v30 = vmul.f32 0.25, %v673_v20  ;;  %v706_v31 = vmul.f32 0.25, %v674_v60 }
  0x71   : > { %v482_v40 = vsel %vm457_vm2, %v417_v21, %v1318_v22  ;;  %v483_v41 = vsel %vm457_vm2, %v418_v61, %v1320_v23  ;;  %v484_v42 = vsel %vm457_vm2, %v419_v26, %v1322_v24  ;;  %v485_v43 = vsel %vm457_vm2, %v420_v27, %v1324_v25 }
  0x72   : > { %v735_v32 = vadd.f32 %v1284_v36, %v703_v28  ;;  %v736_v33 = vadd.f32 %v1286_v37, %v704_v29  ;;  %v737_v44 = vadd.f32 %v1288_v38, %v705_v30  ;;  %v738_v34 = vadd.f32 %v1290_v39, %v706_v31 }
  0x73   : > { %v675_v35 = vsub.f32 %v482_v40, %v1318_v22  ;;  %v676_v45 = vsub.f32 %v483_v41, %v1320_v23  ;;  %v677_v46 = vsub.f32 %v484_v42, %v1322_v24  ;;  %v678_v47 = vsub.f32 %v485_v43, %v1324_v25 }
  0x74   : > { %v767_v48 = vpack.c.bf16 %v735_v32, %v735_v32  ;;  %v768_v36 = vpack.c.bf16 %v736_v33, %v736_v33  ;;  %v769_v8 = vpack.c.bf16 %v737_v44, %v737_v44  ;;  %v770_v49 = vpack.c.bf16 %v738_v34, %v738_v34 }
  0x75   : > { %v707_v37 = vmul.f32 0.25, %v675_v35  ;;  %v708_v50 = vmul.f32 0.25, %v676_v45  ;;  %v709_v9 = vmul.f32 0.25, %v677_v46  ;;  %v710_v38 = vmul.f32 0.25, %v678_v47 }
  0x76   : > { %799 = vst.msk [vmem:[%s1420_s23 + $0x50] sm:$0xf] %vm618_vm1, %v767_v48  ;;  %800 = vst.msk [vmem:[%s1420_s23 + $0x54] sm:$0xf] %vm618_vm1, %v768_v36  ;;  %v421_v39 = vrot.slane %v1352_v56, 1  ;;  %v422_v16 = vrot.slane %v1354_v57, 1 }
  0x77   : > { %801 = vst.msk [vmem:[%s1420_s23 + $0x58] sm:$0xf] %vm618_vm1, %v769_v8  ;;  %802 = vst.msk [vmem:[%s1420_s23 + $0x5c] sm:$0xf] %vm618_vm1, %v770_v49  ;;  %v423_v51 = vrot.slane %v1356_v2, 1  ;;  %v424_v52 = vrot.slane %v1358_v7, 1  ;;  %v739_v17 = vadd.f32 %v1318_v22, %v707_v37  ;;  %v740_v10 = vadd.f32 %v1320_v23, %v708_v50 }
  0x78   : > { %v741_v11 = vadd.f32 %v1322_v24, %v709_v9  ;;  %v742_v18 = vadd.f32 %v1324_v25, %v710_v38  ;;  %v486_v19 = vsel %vm457_vm2, %v421_v39, %v1352_v56  ;;  %v487_v3 = vsel %vm457_vm2, %v422_v16, %v1354_v57 }
  0x79   : > { %v488_v4 = vsel %vm457_vm2, %v423_v51, %v1356_v2  ;;  %v489_v22 = vsel %vm457_vm2, %v424_v52, %v1358_v7  ;;  %v771_v23 = vpack.c.bf16 %v739_v17, %v739_v17  ;;  %v772_v5 = vpack.c.bf16 %v740_v10, %v740_v10 }
  0x7a   : > { %v773_v6 = vpack.c.bf16 %v741_v11, %v741_v11  ;;  %v774_v24 = vpack.c.bf16 %v742_v18, %v742_v18  ;;  %v679_v53 = vsub.f32 %v486_v19, %v1352_v56  ;;  %v680_v25 = vsub.f32 %v487_v3, %v1354_v57 }
  0x7b   : > { %v681_v54 = vsub.f32 %v488_v4, %v1356_v2  ;;  %v682_v55 = vsub.f32 %v489_v22, %v1358_v7  ;;  %803 = vst.msk [vmem:[%s1420_s23 + $0x60] sm:$0xf] %vm618_vm1, %v771_v23  ;;  %804 = vst.msk [vmem:[%s1420_s23 + $0x64] sm:$0xf] %vm618_vm1, %v772_v5 }
  0x7c   : > { %805 = vst.msk [vmem:[%s1420_s23 + $0x68] sm:$0xf] %vm618_vm1, %v773_v6  ;;  %806 = vst.msk [vmem:[%s1420_s23 + $0x6c] sm:$0xf] %vm618_vm1, %v774_v24  ;;  %v711_v12 = vmul.f32 0.25, %v679_v53  ;;  %v712_v13 = vmul.f32 0.25, %v680_v25 }
  0x7d   : > { %v713_v14 = vmul.f32 0.25, %v681_v54  ;;  %v714_v62 = vmul.f32 0.25, %v682_v55 }
  0x7e   : > { %v743_v63 = vadd.f32 %v1352_v56, %v711_v12  ;;  %v744_v58 = vadd.f32 %v1354_v57, %v712_v13 }
  0x7f   : > { %v745_v59 = vadd.f32 %v1356_v2, %v713_v14  ;;  %v746_v0 = vadd.f32 %v1358_v7, %v714_v62 }
  0x80   : > { %v775_v15 = vpack.c.bf16 %v743_v63, %v743_v63  ;;  %v776_v1 = vpack.c.bf16 %v744_v58, %v744_v58 }
  0x81   : > { %v777_v20 = vpack.c.bf16 %v745_v59, %v745_v59  ;;  %v778_v60 = vpack.c.bf16 %v746_v0, %v746_v0 }
  0x82   : > { %807 = vst.msk [vmem:[%s1420_s23 + $0x70] sm:$0xf] %vm618_vm1, %v775_v15  ;;  %808 = vst.msk [vmem:[%s1420_s23 + $0x74] sm:$0xf] %vm618_vm1, %v776_v1 }
  0x83   : > { %809 = vst.msk [vmem:[%s1420_s23 + $0x78] sm:$0xf] %vm618_vm1, %v777_v20  ;;  %810 = vst.msk [vmem:[%s1420_s23 + $0x7c] sm:$0xf] %vm618_vm1, %v778_v60 }
  0x84 PF: > { %s13_s11 = sadd.s32 1, %s1071_s11   ;;  %s1634_s9 = smov %s1067_s10 }
  0x85   : > { %p10_p5 = scmp.ge.s32.totalorder %s13_s11, 4   ;;  %s1635_s10 = smov %s1637_s12 }
  0x87   :  { %12 = sbr.rel (!%p10_p5) target bundleno = 2 (0x2), region = 66 }

// kernel: decoder_bottleneck_forward.16
= control target key start
LH: loop header
LB: loop body
LE: loop exit
PB: predicated region body
PF: predicated region fallthrough
CT: control target
= control target key end

     0   :  { %s649_s9 = smov 0   ;;  %s651_s10 = smov 0   ;;  %s754_s0 = inlined_call_operand.vmem [shape: bf16[8,8,256], index: 0, kind: input, shape index: {}]   ;;  %s755_s1 = inlined_call_operand.vmem [shape: bf16[8,8,256], index: 1, kind: output, shape index: {0}]   ;;  %s756_s2 = inlined_call_operand.vmem [shape: bf16[8,8,256], index: 2, kind: output, shape index: {1}]  }
   0x1   :  { %s653_s11 = smov 0  }
   0x2 LB: > { %s25_s12 = sadd.s32 1, %s628_s10  ;;  %p555_p0 = scmp.ge.s32.totalorder %s632_s11, 1  ;;  %s632_s11 = sphi %s653_s11, %s13_s11   ;;  %s628_s10 = sphi %s651_s10, %s758_s10   ;;  %s624_s9 = sphi %s649_s9, %s757_s9  }
   0x3   : > { %p27_p1 = scmp.ge.s32.totalorder %s25_s12, 2  ;;  %p140_p2 = scmp.lt.s32.totalorder %s632_s11, 3 }
   0x5   : > { %s760_s12 = smov (%p27_p1, %s25_s12), 0  ;;  %p141_p3 = pnand %p555_p0, %p140_p2 }
   0x6   : > { %s556_s13 = sshll.u32 (!%p141_p3), %s624_s9, 2  ;;  %vm254_vm0 = vcmask (!%p141_p3), 1040384   ;;  %vm279_vm1 = vcmask (!%p141_p3), 1046528  }
   0x7   : > { %144 = sbr.rel (%p141_p3) target bundleno = 48 (0x30), region = 24  ;;  %p184_p4 = scmp.lt.s32.totalorder (!%p141_p3), %s556_s13, 7 }
   0xe   : > { %s762_s13 = smov (!%p184_p4, %s556_s13), 7 }
   0xf   : > { %s667_s14 = sshll.u32 %s762_s13, 3 }
  0x10   : > { %s191_s17 = scalar_lea.vmem %s754_s0, %s667_s14  ;;  %s693_s20 = scalar_lea.vmem %s755_s1, %s667_s14 }
  0x11   : > { %v218_v0 = vld [vmem:[%s191_s17] sm:$0xff]  ;;  %v219_v1 = vld [vmem:[%s191_s17 + $0x8] sm:$0xff]  ;;  %v220_v2 = vld [vmem:[%s191_s17 + $0x10] sm:$0xff]  ;;  %s699_s23 = scalar_lea.vmem %s756_s2, %s667_s14 }
  0x12   : > { %v221_v3 = vld [vmem:[%s191_s17 + $0x18] sm:$0xff]  ;;  %v222_v4 = vunpack.c.l.bf16 %v218_v0  ;;  %v223_v5 = vunpack.c.h.bf16 %v218_v0  ;;  %v224_v6 = vunpack.c.l.bf16 %v219_v1  ;;  %v225_v7 = vunpack.c.h.bf16 %v219_v1 }
  0x13   : > { %v673_v8 = vunpack.c.l.bf16 %v220_v2  ;;  %v675_v9 = vunpack.c.h.bf16 %v220_v2  ;;  %v677_v10 = vunpack.c.l.bf16 %v221_v3  ;;  %v679_v11 = vunpack.c.h.bf16 %v221_v3 }
  0x14   : > { %v238_v12 = vrot.slane %v222_v4, 7  ;;  %v239_v13 = vrot.slane %v223_v5, 7  ;;  %v263_v14 = vrot.slane %v222_v4, 1  ;;  %v264_v15 = vrot.slane %v223_v5, 1 }
  0x15   : > { %v240_v16 = vrot.slane %v224_v6, 7  ;;  %v241_v17 = vrot.slane %v225_v7, 7  ;;  %v265_v18 = vrot.slane %v224_v6, 1  ;;  %v266_v19 = vrot.slane %v225_v7, 1 }
  0x16   : > { %v255_v20 = vsel %vm254_vm0, %v222_v4, %v238_v12  ;;  %v256_v21 = vsel %vm254_vm0, %v223_v5, %v239_v13  ;;  %v280_v22 = vsel %vm279_vm1, %v263_v14, %v222_v4  ;;  %v281_v23 = vsel %vm279_vm1, %v264_v15, %v223_v5 }
  0x17   : > { %v288_v24 = vsub.f32 %v222_v4, %v255_v20  ;;  %v289_v25 = vsub.f32 %v223_v5, %v256_v21  ;;  %v348_v26 = vsub.f32 %v280_v22, %v222_v4  ;;  %v349_v27 = vsub.f32 %v281_v23, %v223_v5 }
  0x18   : > { %v257_v28 = vsel %vm254_vm0, %v224_v6, %v240_v16  ;;  %v258_v29 = vsel %vm254_vm0, %v225_v7, %v241_v17  ;;  %v282_v30 = vsel %vm279_vm1, %v265_v18, %v224_v6  ;;  %v283_v31 = vsel %vm279_vm1, %v266_v19, %v225_v7 }
  0x19   : > { %v296_v32 = vmul.f32 0.75, %v288_v24  ;;  %v297_v33 = vmul.f32 0.75, %v289_v25  ;;  %v356_v34 = vmul.f32 0.25, %v348_v26  ;;  %v357_v35 = vmul.f32 0.25, %v349_v27 }
  0x1a   : > { %v290_v36 = vsub.f32 %v224_v6, %v257_v28  ;;  %v291_v37 = vsub.f32 %v225_v7, %v258_v29  ;;  %v350_v38 = vsub.f32 %v282_v30, %v224_v6  ;;  %v351_v39 = vsub.f32 %v283_v31, %v225_v7 }
  0x1b   : > { %v304_v40 = vadd.f32 %v296_v32, %v255_v20  ;;  %v305_v41 = vadd.f32 %v297_v33, %v256_v21  ;;  %v364_v42 = vadd.f32 %v356_v34, %v222_v4  ;;  %v365_v43 = vadd.f32 %v357_v35, %v223_v5 }
  0x1c   : > { %v298_v44 = vmul.f32 0.75, %v290_v36  ;;  %v299_v45 = vmul.f32 0.75, %v291_v37  ;;  %v358_v46 = vmul.f32 0.25, %v350_v38  ;;  %v359_v47 = vmul.f32 0.25, %v351_v39 }
  0x1d   : > { %v578_v48 = vpack.c.bf16 %v305_v41, %v304_v40  ;;  %v582_v49 = vpack.c.bf16 %v365_v43, %v364_v42  ;;  %v242_v50 = vrot.slane %v673_v8, 7  ;;  %v243_v51 = vrot.slane %v675_v9, 7 }
  0x1e   : > { %v306_v52 = vadd.f32 %v298_v44, %v257_v28  ;;  %v307_v53 = vadd.f32 %v299_v45, %v258_v29  ;;  %v366_v54 = vadd.f32 %v358_v46, %v224_v6  ;;  %v367_v55 = vadd.f32 %v359_v47, %v225_v7 }
  0x1f   : > { %344 = vst [vmem:[%s693_s20] sm:$0xff] %v578_v48  ;;  %404 = vst [vmem:[%s699_s23] sm:$0xff] %v582_v49  ;;  %v259_v56 = vsel %vm254_vm0, %v673_v8, %v242_v50  ;;  %v260_v57 = vsel %vm254_vm0, %v675_v9, %v243_v51  ;;  %v267_v58 = vrot.slane %v673_v8, 1  ;;  %v268_v59 = vrot.slane %v675_v9, 1 }
  0x20   : > { %v579_v60 = vpack.c.bf16 %v307_v53, %v306_v52  ;;  %v583_v61 = vpack.c.bf16 %v367_v55, %v366_v54  ;;  %v292_v62 = vsub.f32 %v673_v8, %v259_v56  ;;  %v293_v63 = vsub.f32 %v675_v9, %v260_v57 }
  0x21   : > { %v284_v0 = vsel %vm279_vm1, %v267_v58, %v673_v8  ;;  %v285_v1 = vsel %vm279_vm1, %v268_v59, %v675_v9  ;;  %v244_v2 = vrot.slane %v677_v10, 7  ;;  %v245_v3 = vrot.slane %v679_v11, 7 }
  0x22   : > { %345 = vst [vmem:[%s693_s20 + $0x8] sm:$0xff] %v579_v60  ;;  %405 = vst [vmem:[%s699_s23 + $0x8] sm:$0xff] %v583_v61  ;;  %v300_v4 = vmul.f32 0.75, %v292_v62  ;;  %v301_v5 = vmul.f32 0.75, %v293_v63  ;;  %v352_v6 = vsub.f32 %v284_v0, %v673_v8  ;;  %v353_v7 = vsub.f32 %v285_v1, %v675_v9 }
  0x23   : > { %v261_v12 = vsel %vm254_vm0, %v677_v10, %v244_v2  ;;  %v262_v13 = vsel %vm254_vm0, %v679_v11, %v245_v3  ;;  %v269_v14 = vrot.slane %v677_v10, 1  ;;  %v270_v15 = vrot.slane %v679_v11, 1 }
  0x24   : > { %v308_v16 = vadd.f32 %v300_v4, %v259_v56  ;;  %v309_v17 = vadd.f32 %v301_v5, %v260_v57  ;;  %v360_v18 = vmul.f32 0.25, %v352_v6  ;;  %v361_v19 = vmul.f32 0.25, %v353_v7 }
  0x25   : > { %v294_v20 = vsub.f32 %v677_v10, %v261_v12  ;;  %v295_v21 = vsub.f32 %v679_v11, %v262_v13  ;;  %v286_v22 = vsel %vm279_vm1, %v269_v14, %v677_v10  ;;  %v287_v23 = vsel %vm279_vm1, %v270_v15, %v679_v11 }
  0x26   : > { %v580_v24 = vpack.c.bf16 %v309_v17, %v308_v16  ;;  %v368_v25 = vadd.f32 %v360_v18, %v673_v8  ;;  %v369_v26 = vadd.f32 %v361_v19, %v675_v9  ;;  %v354_v27 = vsub.f32 %v286_v22, %v677_v10 }
  0x27   : > { %v302_v28 = vmul.f32 0.75, %v294_v20  ;;  %v303_v29 = vmul.f32 0.75, %v295_v21  ;;  %v355_v30 = vsub.f32 %v287_v23, %v679_v11 }
  0x28   : > { %346 = vst [vmem:[%s693_s20 + $0x10] sm:$0xff] %v580_v24  ;;  %v584_v31 = vpack.c.bf16 %v369_v26, %v368_v25  ;;  %v362_v32 = vmul.f32 0.25, %v354_v27 }
  0x29   : > { %v310_v33 = vadd.f32 %v302_v28, %v261_v12  ;;  %v311_v34 = vadd.f32 %v303_v29, %v262_v13  ;;  %v363_v35 = vmul.f32 0.25, %v355_v30 }
  0x2a   : > { %406 = vst [vmem:[%s699_s23 + $0x10] sm:$0xff] %v584_v31  ;;  %v370_v36 = vadd.f32 %v362_v32, %v677_v10 }
  0x2b   : > { %v581_v8 = vpack.c.bf16 %v311_v34, %v310_v33  ;;  %v371_v37 = vadd.f32 %v363_v35, %v679_v11 }
  0x2d   : > { %347 = vst [vmem:[%s693_s20 + $0x18] sm:$0xff] %v581_v8  ;;  %v585_v9 = vpack.c.bf16 %v371_v37, %v370_v36 }
  0x2f   : > { %407 = vst [vmem:[%s699_s23 + $0x18] sm:$0xff] %v585_v9 }
  0x30 PF: > { %s13_s11 = sadd.s32 1, %s632_s11   ;;  %s757_s9 = smov %s628_s10 }
  0x31   : > { %p10_p5 = scmp.ge.s32.totalorder %s13_s11, 4   ;;  %s758_s10 = smov %s760_s12 }
  0x33   :  { %12 = sbr.rel (!%p10_p5) target bundleno = 2 (0x2), region = 66 }

// kernel: decoder_bottleneck_forward.17
= control target key start
LH: loop header
LB: loop body
LE: loop exit
PB: predicated region body
PF: predicated region fallthrough
CT: control target
= control target key end

     0   :  { %s1843_s9 = smov 0   ;;  %s1845_s10 = smov 0   ;;  %s2362_s0 = inlined_call_operand.vmem [shape: bf16[2,4,4096], index: 0, kind: input, shape index: {}]   ;;  %s2363_s1 = inlined_call_operand.vmem [shape: bf16[2,4,4096], index: 1, kind: output, shape index: {0}]   ;;  %s2364_s2 = inlined_call_operand.vmem [shape: bf16[2,4,4096], index: 2, kind: output, shape index: {1}]  }
   0x1   :  { %s1847_s11 = smov 0  }
   0x2 LB: > { %s25_s12 = sadd.s32 1, %s1821_s10  ;;  %p1734_p0 = scmp.ge.s32.totalorder %s1825_s11, 1  ;;  %s1825_s11 = sphi %s1847_s11, %s13_s11   ;;  %s1821_s10 = sphi %s1845_s10, %s2370_s10   ;;  %s1817_s9 = sphi %s1843_s9, %s2369_s9  }
   0x3   : > { %p27_p1 = scmp.ge.s32.totalorder %s25_s12, 2  ;;  %p138_p2 = scmp.lt.s32.totalorder %s1825_s11, 3 }
   0x5   : > { %s2372_s12 = smov (%p27_p1, %s25_s12), 0  ;;  %p139_p3 = pnand %p1734_p0, %p138_p2 }
   0x7   : > { %142 = sbr.rel (%p139_p3) target bundleno = 159 (0x9f), region = 24 }
   0xe   : > { %p178_p4 = scmp.lt.s32.totalorder %s1817_s9, 1  ;;  %v247_v0 = vlaneseq  ;;  %v1827_v1 = vmov 1983009808   ;;  %vm487_vm0 = vcmask 1040384   ;;  %vm744_vm1 = vcmask 1042432  }
   0xf   : > { %v1020_v2 = vunpack.c.l.s4 %v1827_v1 }
  0x10   : > { %s2374_s9 = smov (!%p178_p4, %s1817_s9), 1  ;;  %v248_v3 = vshrl.u32 %v247_v0, 7 }
  0x11   : > { %v1021_v4 = vunpack.c.0.s8 %v1020_v2  ;;  %s1861_s13 = sshll.u32 %s2374_s9, 6 }
  0x12   : > { %s185_s16 = scalar_lea.vmem %s2362_s0, %s1861_s13  ;;  %v1867_v5 = vsub.s32 0, %v248_v3  ;;  %v1869_v9 = vsub.s32 4, %v248_v3  ;;  %v1873_v11 = vsub.s32 3, %v248_v3  ;;  %v1875_v12 = vsub.s32 7, %v248_v3  ;;  %s1997_s19 = scalar_lea.vmem %s2363_s1, %s1861_s13 }
  0x13   : > { %v207_v6 = vld [vmem:[%s185_s16] sm:$0xff]  ;;  %v208_v7 = vld [vmem:[%s185_s16 + $0x8] sm:$0xff]  ;;  %v209_v8 = vld [vmem:[%s185_s16 + $0x10] sm:$0xff]  ;;  %v1871_v10 = vsub.s32 %v1021_v4, %v248_v3  ;;  %s2207_s22 = scalar_lea.vmem %s2364_s2, %s1861_s13 }
  0x14   : > { %v210_v13 = vld [vmem:[%s185_s16 + $0x18] sm:$0xff]  ;;  %v211_v14 = vld [vmem:[%s185_s16 + $0x20] sm:$0xff]  ;;  %v212_v15 = vld [vmem:[%s185_s16 + $0x28] sm:$0xff]  ;;  %v1877_v16 = vunpack.c.l.bf16 %v207_v6  ;;  %v1879_v17 = vunpack.c.h.bf16 %v207_v6  ;;  %v1881_v18 = vunpack.c.l.bf16 %v208_v7  ;;  %v1883_v19 = vunpack.c.h.bf16 %v208_v7 }
  0x15   : > { %v213_v20 = vld [vmem:[%s185_s16 + $0x30] sm:$0xff]  ;;  %v214_v21 = vld [vmem:[%s185_s16 + $0x38] sm:$0xff]  ;;  %v1885_v22 = vunpack.c.l.bf16 %v209_v8  ;;  %v1887_v23 = vunpack.c.h.bf16 %v209_v8  ;;  %v1889_v24 = vunpack.c.l.bf16 %v210_v13  ;;  %v1891_v25 = vunpack.c.h.bf16 %v210_v13 }
  0x16   : > { %v1893_v26 = vunpack.c.l.bf16 %v211_v14  ;;  %v1895_v27 = vunpack.c.h.bf16 %v211_v14  ;;  %v1897_v28 = vunpack.c.l.bf16 %v212_v15  ;;  %v1899_v29 = vunpack.c.h.bf16 %v212_v15 }
  0x17   : > { %v1901_v30 = vunpack.c.l.bf16 %v213_v20  ;;  %v1903_v31 = vunpack.c.h.bf16 %v213_v20  ;;  %v1905_v32 = vunpack.c.l.bf16 %v214_v21  ;;  %v1907_v33 = vunpack.c.h.bf16 %v214_v21 }
  0x18   : > { %v250_v34 = vrot.slane %v1877_v16, %v1867_v5  ;;  %v254_v35 = vrot.slane %v1877_v16, %v1869_v9  ;;  %v258_v36 = vrot.slane %v1879_v17, %v1867_v5  ;;  %v262_v37 = vrot.slane %v1879_v17, %v1869_v9 }
  0x19   : > { %v1919_v38 = vcombine.high %v1877_v16, %v1877_v16  ;;  %v1923_v39 = vcombine.high %v1879_v17, %v1879_v17  ;;  %v423_v40 = vrot.slane %v1877_v16, 7  ;;  %v425_v41 = vrot.slane %v1879_v17, 7 }
  0x1a   : > { %v266_v42 = vrot.slane %v1881_v18, %v1867_v5  ;;  %v270_v43 = vrot.slane %v1881_v18, %v1869_v9  ;;  %v274_v44 = vrot.slane %v1883_v19, %v1867_v5  ;;  %v278_v45 = vrot.slane %v1883_v19, %v1869_v9 }
  0x1b   : > { %v424_v46 = vrot.slane %v1919_v38, 7  ;;  %v426_v47 = vrot.slane %v1923_v39, 7  ;;  %v488_v48 = vsel %vm487_vm0, %v250_v34, %v423_v40  ;;  %v490_v49 = vsel %vm487_vm0, %v258_v36, %v425_v41 }
  0x1c   : > { %v1941_v50 = vcombine.high %v1881_v18, %v1881_v18  ;;  %v1945_v51 = vcombine.high %v1883_v19, %v1883_v19  ;;  %v427_v52 = vrot.slane %v1881_v18, 7  ;;  %v429_v53 = vrot.slane %v1883_v19, 7 }
  0x1d   : > { %v489_v54 = vsel %vm487_vm0, %v254_v35, %v424_v46  ;;  %v491_v55 = vsel %vm487_vm0, %v262_v37, %v426_v47  ;;  %v282_v56 = vrot.slane %v1885_v22, %v1867_v5  ;;  %v286_v57 = vrot.slane %v1885_v22, %v1869_v9 }
  0x1e   : > { %v809_v58 = vcombine.low %v488_v48, %v489_v54  ;;  %v810_v59 = vcombine.low %v490_v49, %v491_v55  ;;  %v428_v60 = vrot.slane %v1941_v50, 7  ;;  %v430_v61 = vrot.slane %v1945_v51, 7 }
  0x1f   : > { %v492_v62 = vsel %vm487_vm0, %v266_v42, %v427_v52  ;;  %v494_v63 = vsel %vm487_vm0, %v274_v44, %v429_v53  ;;  %v290_v0 = vrot.slane %v1887_v23, %v1867_v5  ;;  %v294_v1 = vrot.slane %v1887_v23, %v1869_v9 }
  0x20   : > { %v841_v2 = vsub.f32 %v1877_v16, %v809_v58  ;;  %v842_v3 = vsub.f32 %v1879_v17, %v810_v59  ;;  %v493_v4 = vsel %vm487_vm0, %v270_v43, %v428_v60  ;;  %v495_v6 = vsel %vm487_vm0, %v278_v45, %v430_v61 }
  0x21   : > { %v811_v7 = vcombine.low %v492_v62, %v493_v4  ;;  %v812_v8 = vcombine.low %v494_v63, %v495_v6  ;;  %v1969_v13 = vcombine.high %v1885_v22, %v1885_v22  ;;  %v1973_v14 = vcombine.high %v1887_v23, %v1887_v23 }
  0x22   : > { %v857_v15 = vmul.f32 0.75, %v841_v2  ;;  %v858_v20 = vmul.f32 0.75, %v842_v3  ;;  %v431_v21 = vrot.slane %v1885_v22, 7  ;;  %v433_v34 = vrot.slane %v1887_v23, 7 }
  0x23   : > { %v843_v35 = vsub.f32 %v1881_v18, %v811_v7  ;;  %v844_v36 = vsub.f32 %v1883_v19, %v812_v8  ;;  %v432_v37 = vrot.slane %v1969_v13, 7  ;;  %v434_v40 = vrot.slane %v1973_v14, 7 }
  0x24   : > { %v889_v41 = vcombine.high %v857_v15, %v857_v15  ;;  %v890_v42 = vcombine.high %v858_v20, %v858_v20  ;;  %v921_v43 = vadd.f32 %v857_v15, %v488_v48  ;;  %v923_v44 = vadd.f32 %v858_v20, %v490_v49 }
  0x25   : > { %v859_v45 = vmul.f32 0.75, %v843_v35  ;;  %v860_v46 = vmul.f32 0.75, %v844_v36  ;;  %v496_v47 = vsel %vm487_vm0, %v282_v56, %v431_v21  ;;  %v497_v52 = vsel %vm487_vm0, %v286_v57, %v432_v37 }
  0x26   : > { %v922_v53 = vadd.f32 %v889_v41, %v489_v54  ;;  %v924_v58 = vadd.f32 %v890_v42, %v491_v55  ;;  %v498_v59 = vsel %vm487_vm0, %v290_v0, %v433_v34  ;;  %v499_v60 = vsel %vm487_vm0, %v294_v1, %v434_v40 }
  0x27   : > { %v891_v61 = vcombine.high %v859_v45, %v859_v45  ;;  %v892_v2 = vcombine.high %v860_v46, %v860_v46  ;;  %v925_v3 = vadd.f32 %v859_v45, %v492_v62  ;;  %v927_v7 = vadd.f32 %v860_v46, %v494_v63 }
  0x28   : > { %v1741_v8 = vpack.c.bf16 %v922_v53, %v921_v43  ;;  %v1742_v48 = vpack.c.bf16 %v924_v58, %v923_v44  ;;  %v813_v49 = vcombine.low %v496_v47, %v497_v52  ;;  %v814_v15 = vcombine.low %v498_v59, %v499_v60 }
  0x29   : > { %v926_v20 = vadd.f32 %v891_v61, %v493_v4  ;;  %v928_v35 = vadd.f32 %v892_v2, %v495_v6  ;;  %v298_v56 = vrot.slane %v1889_v24, %v1867_v5  ;;  %v302_v54 = vrot.slane %v1889_v24, %v1869_v9 }
  0x2a   : > { %v1025_v55 = vrot.slane %v1741_v8, %v1871_v10  ;;  %v1032_v57 = vrot.slane %v1742_v48, %v1871_v10  ;;  %v845_v0 = vsub.f32 %v1885_v22, %v813_v49  ;;  %v846_v62 = vsub.f32 %v1887_v23, %v814_v15 }
  0x2b   : > { %v1743_v63 = vpack.c.bf16 %v926_v20, %v925_v3  ;;  %v1744_v1 = vpack.c.bf16 %v928_v35, %v927_v7  ;;  %v306_v4 = vrot.slane %v1891_v25, %v1867_v5  ;;  %v310_v6 = vrot.slane %v1891_v25, %v1869_v9 }
  0x2c   : > { %v1033_v21 = vcombine.low %v1025_v55, %v1032_v57  ;;  %v861_v34 = vmul.f32 0.75, %v845_v0  ;;  %v862_v36 = vmul.f32 0.75, %v846_v62  ;;  %v2005_v37 = vcombine.high %v1889_v24, %v1889_v24 }
  0x2d   : > { %v1042_v40 = vrot.slane %v1743_v63, %v1871_v10  ;;  %v1049_v41 = vrot.slane %v1744_v1, %v1871_v10  ;;  %v2011_v42 = vcombine.high %v1891_v25, %v1891_v25  ;;  %v435_v43 = vrot.slane %v1889_v24, 7 }
  0x2e   : > { %1161 = vst [vmem:[%s1997_s19] sm:$0xff] %v1033_v21  ;;  %v893_v44 = vcombine.high %v861_v34, %v861_v34  ;;  %v894_v45 = vcombine.high %v862_v36, %v862_v36  ;;  %v929_v46 = vadd.f32 %v861_v34, %v496_v47  ;;  %v931_v53 = vadd.f32 %v862_v36, %v498_v59 }
  0x2f   : > { %v1050_v58 = vcombine.low %v1042_v40, %v1049_v41  ;;  %v436_v61 = vrot.slane %v2005_v37, 7  ;;  %v437_v2 = vrot.slane %v1891_v25, 7  ;;  %v438_v3 = vrot.slane %v2011_v42, 7 }
  0x30   : > { %v930_v7 = vadd.f32 %v893_v44, %v497_v52  ;;  %v932_v8 = vadd.f32 %v894_v45, %v499_v60  ;;  %v500_v48 = vsel %vm487_vm0, %v298_v56, %v435_v43  ;;  %v314_v49 = vrot.slane %v1893_v26, %v1867_v5 }
  0x31   : > { %1162 = vst [vmem:[%s1997_s19 + $0x8] sm:$0xff] %v1050_v58  ;;  %v501_v15 = vsel %vm487_vm0, %v302_v54, %v436_v61  ;;  %v502_v47 = vsel %vm487_vm0, %v306_v4, %v437_v2  ;;  %v503_v59 = vsel %vm487_vm0, %v310_v6, %v438_v3  ;;  %v318_v20 = vrot.slane %v1893_v26, %v1869_v9 }
  0x32   : > { %v1745_v35 = vpack.c.bf16 %v930_v7, %v929_v46  ;;  %v1746_v55 = vpack.c.bf16 %v932_v8, %v931_v53  ;;  %v815_v57 = vcombine.low %v500_v48, %v501_v15  ;;  %v816_v52 = vcombine.low %v502_v47, %v503_v59 }
  0x33   : > { %v322_v60 = vrot.slane %v1895_v27, %v1867_v5  ;;  %v326_v56 = vrot.slane %v1895_v27, %v1869_v9  ;;  %v2033_v54 = vcombine.high %v1893_v26, %v1893_v26  ;;  %v2037_v0 = vcombine.high %v1895_v27, %v1895_v27 }
  0x34   : > { %v1059_v62 = vrot.slane %v1745_v35, %v1871_v10  ;;  %v1066_v63 = vrot.slane %v1746_v55, %v1871_v10  ;;  %v847_v1 = vsub.f32 %v1889_v24, %v815_v57  ;;  %v848_v4 = vsub.f32 %v1891_v25, %v816_v52 }
  0x35   : > { %v439_v6 = vrot.slane %v1893_v26, 7  ;;  %v440_v21 = vrot.slane %v2033_v54, 7  ;;  %v441_v34 = vrot.slane %v1895_v27, 7  ;;  %v442_v36 = vrot.slane %v2037_v0, 7 }
  0x36   : > { %v1067_v40 = vcombine.low %v1059_v62, %v1066_v63  ;;  %v863_v41 = vmul.f32 0.75, %v847_v1  ;;  %v864_v43 = vmul.f32 0.75, %v848_v4  ;;  %v330_v44 = vrot.slane %v1897_v28, %v1867_v5 }
  0x37   : > { %v504_v45 = vsel %vm487_vm0, %v314_v49, %v439_v6  ;;  %v505_v46 = vsel %vm487_vm0, %v318_v20, %v440_v21  ;;  %v506_v53 = vsel %vm487_vm0, %v322_v60, %v441_v34  ;;  %v507_v58 = vsel %vm487_vm0, %v326_v56, %v442_v36 }
  0x38   : > { %1163 = vst [vmem:[%s1997_s19 + $0x10] sm:$0xff] %v1067_v40  ;;  %v895_v61 = vcombine.high %v863_v41, %v863_v41  ;;  %v896_v2 = vcombine.high %v864_v43, %v864_v43  ;;  %v933_v3 = vadd.f32 %v863_v41, %v500_v48  ;;  %v935_v7 = vadd.f32 %v864_v43, %v502_v47 }
  0x39   : > { %v817_v8 = vcombine.low %v504_v45, %v505_v46  ;;  %v818_v35 = vcombine.low %v506_v53, %v507_v58  ;;  %v334_v55 = vrot.slane %v1897_v28, %v1869_v9  ;;  %v338_v57 = vrot.slane %v1899_v29, %v1867_v5 }
  0x3a   : > { %v934_v49 = vadd.f32 %v895_v61, %v501_v15  ;;  %v936_v52 = vadd.f32 %v896_v2, %v503_v59  ;;  %v342_v20 = vrot.slane %v1899_v29, %v1869_v9  ;;  %v2062_v60 = vcombine.high %v1897_v28, %v1897_v28 }
  0x3b   : > { %v849_v48 = vsub.f32 %v1893_v26, %v817_v8  ;;  %v850_v47 = vsub.f32 %v1895_v27, %v818_v35  ;;  %v2068_v56 = vcombine.high %v1899_v29, %v1899_v29  ;;  %v443_v62 = vrot.slane %v1897_v28, 7 }
  0x3c   : > { %v1747_v63 = vpack.c.bf16 %v934_v49, %v933_v3  ;;  %v1748_v15 = vpack.c.bf16 %v936_v52, %v935_v7  ;;  %v444_v59 = vrot.slane %v2062_v60, 7  ;;  %v445_v1 = vrot.slane %v1899_v29, 7 }
  0x3d   : > { %v865_v4 = vmul.f32 0.75, %v849_v48  ;;  %v866_v6 = vmul.f32 0.75, %v850_v47  ;;  %v446_v21 = vrot.slane %v2068_v56, 7  ;;  %v508_v34 = vsel %vm487_vm0, %v330_v44, %v443_v62 }
  0x3e   : > { %v1076_v36 = vrot.slane %v1747_v63, %v1871_v10  ;;  %v1083_v40 = vrot.slane %v1748_v15, %v1871_v10  ;;  %v509_v41 = vsel %vm487_vm0, %v334_v55, %v444_v59  ;;  %v510_v43 = vsel %vm487_vm0, %v338_v57, %v445_v1 }
  0x3f   : > { %v897_v61 = vcombine.high %v865_v4, %v865_v4  ;;  %v898_v2 = vcombine.high %v866_v6, %v866_v6  ;;  %v937_v3 = vadd.f32 %v865_v4, %v504_v45  ;;  %v939_v7 = vadd.f32 %v866_v6, %v506_v53 }
  0x40   : > { %v1084_v8 = vcombine.low %v1076_v36, %v1083_v40  ;;  %v511_v35 = vsel %vm487_vm0, %v342_v20, %v446_v21  ;;  %v819_v49 = vcombine.low %v508_v34, %v509_v41  ;;  %v346_v44 = vrot.slane %v1901_v30, %v1867_v5 }
  0x41   : > { %v938_v52 = vadd.f32 %v897_v61, %v505_v46  ;;  %v940_v48 = vadd.f32 %v898_v2, %v507_v58  ;;  %v820_v47 = vcombine.low %v510_v43, %v511_v35  ;;  %v350_v62 = vrot.slane %v1901_v30, %v1869_v9 }
  0x42   : > { %1164 = vst [vmem:[%s1997_s19 + $0x18] sm:$0xff] %v1084_v8  ;;  %v851_v55 = vsub.f32 %v1897_v28, %v819_v49  ;;  %v354_v45 = vrot.slane %v1903_v31, %v1867_v5  ;;  %v358_v53 = vrot.slane %v1903_v31, %v1869_v9  ;;  %v2092_v57 = vcombine.high %v1901_v30, %v1901_v30 }
  0x43   : > { %v1749_v20 = vpack.c.bf16 %v938_v52, %v937_v3  ;;  %v1750_v46 = vpack.c.bf16 %v940_v48, %v939_v7  ;;  %v852_v58 = vsub.f32 %v1899_v29, %v820_v47  ;;  %v2097_v63 = vcombine.high %v1903_v31, %v1903_v31 }
  0x44   : > { %v867_v15 = vmul.f32 0.75, %v851_v55  ;;  %v447_v59 = vrot.slane %v1901_v30, 7  ;;  %v448_v1 = vrot.slane %v2092_v57, 7  ;;  %v449_v4 = vrot.slane %v1903_v31, 7 }
  0x45   : > { %2367 = vst [vmem:[#allocation2_spill] sm:$0xff] %v2097_v63  ;;  %v1093_v6 = vrot.slane %v1749_v20, %v1871_v10  ;;  %v1100_v21 = vrot.slane %v1750_v46, %v1871_v10  ;;  %v868_v36 = vmul.f32 0.75, %v852_v58  ;;  %v450_v40 = vrot.slane %v2097_v63, 7 }
  0x46   : > { %v899_v61 = vcombine.high %v867_v15, %v867_v15  ;;  %v941_v2 = vadd.f32 %v867_v15, %v508_v34  ;;  %v512_v3 = vsel %vm487_vm0, %v346_v44, %v447_v59  ;;  %v513_v7 = vsel %vm487_vm0, %v350_v62, %v448_v1 }
  0x47   : > { %v1101_v8 = vcombine.low %v1093_v6, %v1100_v21  ;;  %v900_v49 = vcombine.high %v868_v36, %v868_v36  ;;  %v943_v52 = vadd.f32 %v868_v36, %v510_v43  ;;  %v514_v48 = vsel %vm487_vm0, %v354_v45, %v449_v4 }
  0x48   : > { %v942_v47 = vadd.f32 %v899_v61, %v509_v41  ;;  %v515_v55 = vsel %vm487_vm0, %v358_v53, %v450_v40  ;;  %v821_v20 = vcombine.low %v512_v3, %v513_v7  ;;  %v362_v46 = vrot.slane %v1905_v32, %v1867_v5 }
  0x49   : > { %1165 = vst [vmem:[%s1997_s19 + $0x20] sm:$0xff] %v1101_v8  ;;  %v944_v58 = vadd.f32 %v900_v49, %v511_v35  ;;  %v822_v63 = vcombine.low %v514_v48, %v515_v55  ;;  %v366_v34 = vrot.slane %v1905_v32, %v1869_v9  ;;  %v370_v44 = vrot.slane %v1907_v33, %v1867_v5 }
  0x4a   : > { %v1751_v43 = vpack.c.bf16 %v942_v47, %v941_v2  ;;  %v853_v62 = vsub.f32 %v1901_v30, %v821_v20  ;;  %v374_v41 = vrot.slane %v1907_v33, %v1869_v9  ;;  %v2121_v45 = vcombine.high %v1905_v32, %v1905_v32 }
  0x4b   : > { %v1752_v53 = vpack.c.bf16 %v944_v58, %v943_v52  ;;  %v854_v35 = vsub.f32 %v1903_v31, %v822_v63  ;;  %v2126_v15 = vcombine.high %v1907_v33, %v1907_v33  ;;  %v451_v5 = vrot.slane %v1905_v32, 7 }
  0x4c   : > { %v1110_v59 = vrot.slane %v1751_v43, %v1871_v10  ;;  %v869_v1 = vmul.f32 0.75, %v853_v62  ;;  %v452_v4 = vrot.slane %v2121_v45, 7  ;;  %v453_v9 = vrot.slane %v1907_v33, 7 }
  0x4d   : > { %v1117_v6 = vrot.slane %v1752_v53, %v1871_v10  ;;  %v870_v21 = vmul.f32 0.75, %v854_v35  ;;  %v454_v36 = vrot.slane %v2126_v15, 7  ;;  %v516_v63 = vsel %vm487_vm0, %v362_v46, %v451_v5 }
  0x4e   : > { %v901_v40 = vcombine.high %v869_v1, %v869_v1  ;;  %v945_v61 = vadd.f32 %v869_v1, %v512_v3  ;;  %v517_v2 = vsel %vm487_vm0, %v366_v34, %v452_v4  ;;  %v518_v8 = vsel %vm487_vm0, %v370_v44, %v453_v9 }
  0x4f   : > { %v1118_v49 = vcombine.low %v1110_v59, %v1117_v6  ;;  %v902_v52 = vcombine.high %v870_v21, %v870_v21  ;;  %v947_v47 = vadd.f32 %v870_v21, %v514_v48  ;;  %v519_v20 = vsel %vm487_vm0, %v374_v41, %v454_v36 }
  0x50   : > { %v946_v58 = vadd.f32 %v901_v40, %v513_v7  ;;  %v823_v43 = vcombine.low %v516_v63, %v517_v2  ;;  %v824_v62 = vcombine.low %v518_v8, %v519_v20  ;;  %v520_v53 = vrot.slane %v1877_v16, 1 }
  0x51   : > { %1166 = vst [vmem:[%s1997_s19 + $0x28] sm:$0xff] %v1118_v49  ;;  %v948_v35 = vadd.f32 %v902_v52, %v515_v55  ;;  %v521_v46 = vrot.slane %v1919_v38, 1  ;;  %v522_v3 = vrot.slane %v1879_v17, 1  ;;  %v523_v34 = vrot.slane %v1923_v39, 1 }
  0x52   : > { %v1753_v5 = vpack.c.bf16 %v946_v58, %v945_v61  ;;  %v855_v44 = vsub.f32 %v1905_v32, %v823_v43  ;;  %v856_v48 = vsub.f32 %v1907_v33, %v824_v62  ;;  %v587_v7 = vrot.slane %v1877_v16, %v1873_v11 }
  0x53   : > { %v1754_v41 = vpack.c.bf16 %v948_v35, %v947_v47  ;;  %v591_v59 = vrot.slane %v1877_v16, %v1875_v12  ;;  %v595_v55 = vrot.slane %v1879_v17, %v1873_v11  ;;  %v599_v1 = vrot.slane %v1879_v17, %v1875_v12 }
  0x54   : > { %v1127_v4 = vrot.slane %v1753_v5, %v1871_v10  ;;  %v871_v9 = vmul.f32 0.75, %v855_v44  ;;  %v872_v6 = vmul.f32 0.75, %v856_v48  ;;  %v745_v21 = vsel %vm744_vm1, %v520_v53, %v587_v7 }
  0x55   : > { %v1134_v36 = vrot.slane %v1754_v41, %v1871_v10  ;;  %v746_v40 = vsel %vm744_vm1, %v521_v46, %v591_v59  ;;  %v747_v61 = vsel %vm744_vm1, %v522_v3, %v595_v55  ;;  %v748_v49 = vsel %vm744_vm1, %v523_v34, %v599_v1 }
  0x56   : > { %v903_v52 = vcombine.high %v871_v9, %v871_v9  ;;  %v904_v47 = vcombine.high %v872_v6, %v872_v6  ;;  %v949_v58 = vadd.f32 %v871_v9, %v516_v63  ;;  %v951_v43 = vadd.f32 %v872_v6, %v518_v8 }
  0x57   : > { %v1135_v62 = vcombine.low %v1127_v4, %v1134_v36  ;;  %v1185_v35 = vsub.f32 %v745_v21, %v1877_v16  ;;  %v1186_v5 = vsub.f32 %v746_v40, %v1919_v38  ;;  %v1187_v53 = vsub.f32 %v747_v61, %v1879_v17 }
  0x58   : > { %v950_v44 = vadd.f32 %v903_v52, %v517_v2  ;;  %v952_v48 = vadd.f32 %v904_v47, %v519_v20  ;;  %v1188_v7 = vsub.f32 %v748_v49, %v1923_v39  ;;  %v524_v46 = vrot.slane %v1881_v18, 1 }
  0x59   : > { %1167 = vst [vmem:[%s1997_s19 + $0x30] sm:$0xff] %v1135_v62  ;;  %v1217_v3 = vmul.f32 0.25, %v1185_v35  ;;  %v1218_v34 = vmul.f32 0.25, %v1186_v5  ;;  %v1219_v41 = vmul.f32 0.25, %v1187_v53  ;;  %v525_v63 = vrot.slane %v1941_v50, 1 }
  0x5a   : > { %v1755_v8 = vpack.c.bf16 %v950_v44, %v949_v58  ;;  %v1756_v59 = vpack.c.bf16 %v952_v48, %v951_v43  ;;  %v1220_v55 = vmul.f32 0.25, %v1188_v7  ;;  %v526_v1 = vrot.slane %v1883_v19, 1 }
  0x5b   : > { %v1281_v38 = vcombine.low %v1217_v3, %v1218_v34  ;;  %v527_v4 = vrot.slane %v1945_v51, 1  ;;  %v603_v2 = vrot.slane %v1881_v18, %v1873_v11  ;;  %v607_v39 = vrot.slane %v1881_v18, %v1875_v12 }
  0x5c   : > { %v1144_v20 = vrot.slane %v1755_v8, %v1871_v10  ;;  %v1151_v9 = vrot.slane %v1756_v59, %v1871_v10  ;;  %v1282_v6 = vcombine.low %v1219_v41, %v1220_v55  ;;  %v611_v21 = vrot.slane %v1883_v19, %v1873_v11 }
  0x5d   : > { %v1313_v36 = vadd.f32 %v1281_v38, %v1877_v16  ;;  %v615_v40 = vrot.slane %v1883_v19, %v1875_v12  ;;  %v749_v61 = vsel %vm744_vm1, %v524_v46, %v603_v2  ;;  %v750_v49 = vsel %vm744_vm1, %v525_v63, %v607_v39 }
  0x5e   : > { %v1152_v52 = vcombine.low %v1144_v20, %v1151_v9  ;;  %v1314_v47 = vadd.f32 %v1282_v6, %v1879_v17  ;;  %v751_v58 = vsel %vm744_vm1, %v526_v1, %v611_v21  ;;  %v1189_v43 = vsub.f32 %v749_v61, %v1881_v18 }
  0x5f   : > { %v1345_v62 = vcombine.high %v1313_v36, %v1313_v36  ;;  %v752_v35 = vsel %vm744_vm1, %v527_v4, %v615_v40  ;;  %v1190_v5 = vsub.f32 %v750_v49, %v1941_v50  ;;  %v1191_v16 = vsub.f32 %v751_v58, %v1883_v19 }
  0x60   : > { %1168 = vst [vmem:[%s1997_s19 + $0x38] sm:$0xff] %v1152_v52  ;;  %v1346_v53 = vcombine.high %v1314_v47, %v1314_v47  ;;  %v1192_v44 = vsub.f32 %v752_v35, %v1945_v51  ;;  %v1221_v48 = vmul.f32 0.25, %v1189_v43  ;;  %v528_v7 = vrot.slane %v1885_v22, 1 }
  0x61   : > { %v1757_v46 = vpack.c.bf16 %v1345_v62, %v1313_v36  ;;  %v1222_v17 = vmul.f32 0.25, %v1190_v5  ;;  %v1223_v3 = vmul.f32 0.25, %v1191_v16  ;;  %v529_v34 = vrot.slane %v1969_v13, 1 }
  0x62   : > { %v1758_v41 = vpack.c.bf16 %v1346_v53, %v1314_v47  ;;  %v1224_v63 = vmul.f32 0.25, %v1192_v44  ;;  %v530_v8 = vrot.slane %v1887_v23, 1  ;;  %v531_v50 = vrot.slane %v1973_v14, 1 }
  0x63   : > { %v1449_v59 = vrot.slane %v1757_v46, %v1871_v10  ;;  %v1283_v55 = vcombine.low %v1221_v48, %v1222_v17  ;;  %v619_v51 = vrot.slane %v1885_v22, %v1873_v11  ;;  %v623_v1 = vrot.slane %v1885_v22, %v1875_v12 }
  0x64   : > { %v1456_v38 = vrot.slane %v1758_v41, %v1871_v10  ;;  %v1284_v4 = vcombine.low %v1223_v3, %v1224_v63  ;;  %v627_v2 = vrot.slane %v1887_v23, %v1873_v11  ;;  %v631_v39 = vrot.slane %v1887_v23, %v1875_v12 }
  0x65   : > { %v1315_v20 = vadd.f32 %v1283_v55, %v1881_v18  ;;  %v753_v9 = vsel %vm744_vm1, %v528_v7, %v619_v51  ;;  %v754_v6 = vsel %vm744_vm1, %v529_v34, %v623_v1  ;;  %v532_v21 = vrot.slane %v1889_v24, 1 }
  0x66   : > { %v1457_v36 = vcombine.low %v1449_v59, %v1456_v38  ;;  %v1316_v40 = vadd.f32 %v1284_v4, %v1883_v19  ;;  %v755_v61 = vsel %vm744_vm1, %v530_v8, %v627_v2  ;;  %v756_v49 = vsel %vm744_vm1, %v531_v50, %v631_v39 }
  0x67   : > { %v1347_v52 = vcombine.high %v1315_v20, %v1315_v20  ;;  %v1193_v47 = vsub.f32 %v753_v9, %v1885_v22  ;;  %v1194_v58 = vsub.f32 %v754_v6, %v1969_v13  ;;  %v1195_v18 = vsub.f32 %v755_v61, %v1887_v23 }
  0x68   : > { %1585 = vst [vmem:[%s2207_s22] sm:$0xff] %v1457_v36  ;;  %v1348_v43 = vcombine.high %v1316_v40, %v1316_v40  ;;  %v1196_v62 = vsub.f32 %v756_v49, %v1973_v14  ;;  %v533_v35 = vrot.slane %v2005_v37, 1  ;;  %v534_v5 = vrot.slane %v1891_v25, 1 }
  0x69   : > { %v1759_v19 = vpack.c.bf16 %v1347_v52, %v1315_v20  ;;  %v1225_v16 = vmul.f32 0.25, %v1193_v47  ;;  %v1226_v53 = vmul.f32 0.25, %v1194_v58  ;;  %v1227_v44 = vmul.f32 0.25, %v1195_v18 }
  0x6a   : > { %v1760_v48 = vpack.c.bf16 %v1348_v43, %v1316_v40  ;;  %v1228_v7 = vmul.f32 0.25, %v1196_v62  ;;  %v535_v46 = vrot.slane %v2011_v42, 1  ;;  %v635_v13 = vrot.slane %v1889_v24, %v1873_v11 }
  0x6b   : > { %v1466_v17 = vrot.slane %v1759_v19, %v1871_v10  ;;  %v1285_v3 = vcombine.low %v1225_v16, %v1226_v53  ;;  %v639_v14 = vrot.slane %v1889_v24, %v1875_v12  ;;  %v643_v34 = vrot.slane %v1891_v25, %v1873_v11 }
  0x6c   : > { %v1473_v41 = vrot.slane %v1760_v48, %v1871_v10  ;;  %v1286_v63 = vcombine.low %v1227_v44, %v1228_v7  ;;  %v647_v8 = vrot.slane %v1891_v25, %v1875_v12  ;;  %v757_v50 = vsel %vm744_vm1, %v532_v21, %v635_v13 }
  0x6d   : > { %v1317_v59 = vadd.f32 %v1285_v3, %v1885_v22  ;;  %v758_v55 = vsel %vm744_vm1, %v533_v35, %v639_v14  ;;  %v759_v51 = vsel %vm744_vm1, %v534_v5, %v643_v34  ;;  %v1197_v1 = vsub.f32 %v757_v50, %v1889_v24 }
  0x6e   : > { %v1474_v38 = vcombine.low %v1466_v17, %v1473_v41  ;;  %v1318_v4 = vadd.f32 %v1286_v63, %v1887_v23  ;;  %v760_v2 = vsel %vm744_vm1, %v535_v46, %v647_v8  ;;  %v1198_v39 = vsub.f32 %v758_v55, %v2005_v37 }
  0x6f   : > { %v1349_v20 = vcombine.high %v1317_v59, %v1317_v59  ;;  %v1199_v9 = vsub.f32 %v759_v51, %v1891_v25  ;;  %v1200_v6 = vsub.f32 %v760_v2, %v2011_v42  ;;  %v1229_v21 = vmul.f32 0.25, %v1197_v1 }
  0x70   : > { %1586 = vst [vmem:[%s2207_s22 + $0x8] sm:$0xff] %v1474_v38  ;;  %v1350_v22 = vcombine.high %v1318_v4, %v1318_v4  ;;  %v1230_v36 = vmul.f32 0.25, %v1198_v39  ;;  %v536_v40 = vrot.slane %v1893_v26, 1  ;;  %v537_v61 = vrot.slane %v2033_v54, 1 }
  0x71   : > { %v1761_v49 = vpack.c.bf16 %v1349_v20, %v1317_v59  ;;  %v1231_v52 = vmul.f32 0.25, %v1199_v9  ;;  %v1232_v23 = vmul.f32 0.25, %v1200_v6  ;;  %v538_v47 = vrot.slane %v1895_v27, 1 }
  0x72   : > { %v1762_v58 = vpack.c.bf16 %v1350_v22, %v1318_v4  ;;  %v1287_v37 = vcombine.low %v1229_v21, %v1230_v36  ;;  %v539_v18 = vrot.slane %v2037_v0, 1  ;;  %v651_v42 = vrot.slane %v1893_v26, %v1873_v11 }
  0x73   : > { %v1483_v43 = vrot.slane %v1761_v49, %v1871_v10  ;;  %v1288_v62 = vcombine.low %v1231_v52, %v1232_v23  ;;  %v655_v35 = vrot.slane %v1893_v26, %v1875_v12  ;;  %v659_v5 = vrot.slane %v1895_v27, %v1873_v11 }
  0x74   : > { %v1490_v19 = vrot.slane %v1762_v58, %v1871_v10  ;;  %v1319_v16 = vadd.f32 %v1287_v37, %v1889_v24  ;;  %v663_v53 = vrot.slane %v1895_v27, %v1875_v12  ;;  %v761_v44 = vsel %vm744_vm1, %v536_v40, %v651_v42 }
  0x75   : > { %v1320_v48 = vadd.f32 %v1288_v62, %v1891_v25  ;;  %v762_v7 = vsel %vm744_vm1, %v537_v61, %v655_v35  ;;  %v763_v46 = vsel %vm744_vm1, %v538_v47, %v659_v5  ;;  %v1201_v13 = vsub.f32 %v761_v44, %v1893_v26 }
  0x76   : > { %v1491_v17 = vcombine.low %v1483_v43, %v1490_v19  ;;  %v1351_v3 = vcombine.high %v1319_v16, %v1319_v16  ;;  %v764_v14 = vsel %vm744_vm1, %v539_v18, %v663_v53  ;;  %v1202_v34 = vsub.f32 %v762_v7, %v2033_v54  ;;  %v2368_v7 = vld [vmem:[#allocation2_spill] sm:$0xff] }
  0x77   : > { %v1352_v24 = vcombine.high %v1320_v48, %v1320_v48  ;;  %v1203_v41 = vsub.f32 %v763_v46, %v1895_v27  ;;  %v1204_v63 = vsub.f32 %v764_v14, %v2037_v0  ;;  %v1233_v8 = vmul.f32 0.25, %v1201_v13 }
  0x78   : > { %1587 = vst [vmem:[%s2207_s22 + $0x10] sm:$0xff] %v1491_v17  ;;  %v1763_v25 = vpack.c.bf16 %v1351_v3, %v1319_v16  ;;  %v1234_v50 = vmul.f32 0.25, %v1202_v34  ;;  %v540_v59 = vrot.slane %v1897_v28, 1  ;;  %v541_v55 = vrot.slane %v2062_v60, 1 }
  0x79   : > { %v1764_v51 = vpack.c.bf16 %v1352_v24, %v1320_v48  ;;  %v1235_v1 = vmul.f32 0.25, %v1203_v41  ;;  %v1236_v38 = vmul.f32 0.25, %v1204_v63  ;;  %v542_v4 = vrot.slane %v1899_v29, 1 }
  0x7a   : > { %v1500_v54 = vrot.slane %v1763_v25, %v1871_v10  ;;  %v1289_v2 = vcombine.low %v1233_v8, %v1234_v50  ;;  %v543_v39 = vrot.slane %v2068_v56, 1  ;;  %v667_v0 = vrot.slane %v1897_v28, %v1873_v11 }
  0x7b   : > { %v1507_v20 = vrot.slane %v1764_v51, %v1871_v10  ;;  %v1290_v9 = vcombine.low %v1235_v1, %v1236_v38  ;;  %v671_v6 = vrot.slane %v1897_v28, %v1875_v12  ;;  %v675_v21 = vrot.slane %v1899_v29, %v1873_v11 }
  0x7c   : > { %v1321_v22 = vadd.f32 %v1289_v2, %v1893_v26  ;;  %v679_v36 = vrot.slane %v1899_v29, %v1875_v12  ;;  %v765_v40 = vsel %vm744_vm1, %v540_v59, %v667_v0  ;;  %v544_v61 = vrot.slane %v1901_v30, 1 }
  0x7d   : > { %v1508_v49 = vcombine.low %v1500_v54, %v1507_v20  ;;  %v1322_v52 = vadd.f32 %v1290_v9, %v1895_v27  ;;  %v766_v23 = vsel %vm744_vm1, %v541_v55, %v671_v6  ;;  %v767_v47 = vsel %vm744_vm1, %v542_v4, %v675_v21 }
  0x7e   : > { %v1353_v58 = vcombine.high %v1321_v22, %v1321_v22  ;;  %v768_v37 = vsel %vm744_vm1, %v543_v39, %v679_v36  ;;  %v1205_v18 = vsub.f32 %v765_v40, %v1897_v28  ;;  %v1206_v26 = vsub.f32 %v766_v23, %v2062_v60 }
  0x7f   : > { %1588 = vst [vmem:[%s2207_s22 + $0x18] sm:$0xff] %v1508_v49  ;;  %v1354_v42 = vcombine.high %v1322_v52, %v1322_v52  ;;  %v1207_v43 = vsub.f32 %v767_v47, %v1899_v29  ;;  %v1208_v62 = vsub.f32 %v768_v37, %v2068_v56  ;;  %v545_v35 = vrot.slane %v2092_v57, 1 }
  0x80   : > { %v1765_v27 = vpack.c.bf16 %v1353_v58, %v1321_v22  ;;  %v1237_v5 = vmul.f32 0.25, %v1205_v18  ;;  %v1238_v19 = vmul.f32 0.25, %v1206_v26  ;;  %v546_v16 = vrot.slane %v1903_v31, 1 }
  0x81   : > { %v1766_v53 = vpack.c.bf16 %v1354_v42, %v1322_v52  ;;  %v1239_v44 = vmul.f32 0.25, %v1207_v43  ;;  %v1240_v48 = vmul.f32 0.25, %v1208_v62  ;;  %v547_v46 = vrot.slane %v2368_v7, 1 }
  0x82   : > { %v1517_v60 = vrot.slane %v1765_v27, %v1871_v10  ;;  %v1291_v13 = vcombine.low %v1237_v5, %v1238_v19  ;;  %v683_v17 = vrot.slane %v1901_v30, %v1873_v11  ;;  %v687_v56 = vrot.slane %v1901_v30, %v1875_v12 }
  0x83   : > { %v1524_v3 = vrot.slane %v1766_v53, %v1871_v10  ;;  %v1292_v14 = vcombine.low %v1239_v44, %v1240_v48  ;;  %v691_v34 = vrot.slane %v1903_v31, %v1873_v11  ;;  %v695_v24 = vrot.slane %v1903_v31, %v1875_v12 }
  0x84   : > { %v1323_v41 = vadd.f32 %v1291_v13, %v1897_v28  ;;  %v769_v63 = vsel %vm744_vm1, %v544_v61, %v683_v17  ;;  %v770_v8 = vsel %vm744_vm1, %v545_v35, %v687_v56  ;;  %v548_v25 = vrot.slane %v1905_v32, 1 }
  0x85   : > { %v1525_v50 = vcombine.low %v1517_v60, %v1524_v3  ;;  %v1324_v59 = vadd.f32 %v1292_v14, %v1899_v29  ;;  %v771_v55 = vsel %vm744_vm1, %v546_v16, %v691_v34  ;;  %v772_v51 = vsel %vm744_vm1, %v547_v46, %v695_v24 }
  0x86   : > { %v1355_v1 = vcombine.high %v1323_v41, %v1323_v41  ;;  %v1209_v38 = vsub.f32 %v769_v63, %v1901_v30  ;;  %v1210_v4 = vsub.f32 %v770_v8, %v2092_v57  ;;  %v1211_v28 = vsub.f32 %v771_v55, %v1903_v31 }
  0x87   : > { %1589 = vst [vmem:[%s2207_s22 + $0x20] sm:$0xff] %v1525_v50  ;;  %v1356_v54 = vcombine.high %v1324_v59, %v1324_v59  ;;  %v1212_v2 = vsub.f32 %v772_v51, %v2368_v7  ;;  %v549_v39 = vrot.slane %v2121_v45, 1  ;;  %v550_v0 = vrot.slane %v1907_v33, 1 }
  0x88   : > { %v1767_v29 = vpack.c.bf16 %v1355_v1, %v1323_v41  ;;  %v1241_v20 = vmul.f32 0.25, %v1209_v38  ;;  %v1242_v9 = vmul.f32 0.25, %v1210_v4  ;;  %v1243_v6 = vmul.f32 0.25, %v1211_v28 }
  0x89   : > { %v1768_v21 = vpack.c.bf16 %v1356_v54, %v1324_v59  ;;  %v1244_v22 = vmul.f32 0.25, %v1212_v2  ;;  %v551_v36 = vrot.slane %v2126_v15, 1  ;;  %v699_v57 = vrot.slane %v1905_v32, %v1873_v11 }
  0x8a   : > { %v1534_v40 = vrot.slane %v1767_v29, %v1871_v10  ;;  %v1293_v61 = vcombine.low %v1241_v20, %v1242_v9  ;;  %v703_v49 = vrot.slane %v1905_v32, %v1875_v12  ;;  %v707_v52 = vrot.slane %v1907_v33, %v1873_v11 }
  0x8b   : > { %v1541_v23 = vrot.slane %v1768_v21, %v1871_v10  ;;  %v1294_v47 = vcombine.low %v1243_v6, %v1244_v22  ;;  %v711_v58 = vrot.slane %v1907_v33, %v1875_v12  ;;  %v773_v37 = vsel %vm744_vm1, %v548_v25, %v699_v57 }
  0x8c   : > { %v1325_v18 = vadd.f32 %v1293_v61, %v1901_v30  ;;  %v774_v26 = vsel %vm744_vm1, %v549_v39, %v703_v49  ;;  %v775_v42 = vsel %vm744_vm1, %v550_v0, %v707_v52  ;;  %v1213_v43 = vsub.f32 %v773_v37, %v1905_v32 }
  0x8d   : > { %v1542_v62 = vcombine.low %v1534_v40, %v1541_v23  ;;  %v1326_v11 = vadd.f32 %v1294_v47, %v1903_v31  ;;  %v776_v35 = vsel %vm744_vm1, %v551_v36, %v711_v58  ;;  %v1214_v27 = vsub.f32 %v774_v26, %v2121_v45 }
  0x8e   : > { %v1357_v5 = vcombine.high %v1325_v18, %v1325_v18  ;;  %v1215_v12 = vsub.f32 %v775_v42, %v1907_v33  ;;  %v1216_v19 = vsub.f32 %v776_v35, %v2126_v15  ;;  %v1245_v16 = vmul.f32 0.25, %v1213_v43 }
  0x8f   : > { %1590 = vst [vmem:[%s2207_s22 + $0x28] sm:$0xff] %v1542_v62  ;;  %v1358_v30 = vcombine.high %v1326_v11, %v1326_v11  ;;  %v1246_v53 = vmul.f32 0.25, %v1214_v27 }
  0x90   : > { %v1769_v44 = vpack.c.bf16 %v1357_v5, %v1325_v18  ;;  %v1247_v48 = vmul.f32 0.25, %v1215_v12  ;;  %v1248_v7 = vmul.f32 0.25, %v1216_v19 }
  0x91   : > { %v1770_v46 = vpack.c.bf16 %v1358_v30, %v1326_v11  ;;  %v1295_v31 = vcombine.low %v1245_v16, %v1246_v53 }
  0x92   : > { %v1551_v60 = vrot.slane %v1769_v44, %v1871_v10  ;;  %v1296_v13 = vcombine.low %v1247_v48, %v1248_v7 }
  0x93   : > { %v1558_v45 = vrot.slane %v1770_v46, %v1871_v10  ;;  %v1327_v17 = vadd.f32 %v1295_v31, %v1905_v32 }
  0x94   : > { %v1328_v15 = vadd.f32 %v1296_v13, %v1907_v33 }
  0x95   : > { %v1559_v56 = vcombine.low %v1551_v60, %v1558_v45  ;;  %v1359_v3 = vcombine.high %v1327_v17, %v1327_v17 }
  0x96   : > { %v1360_v14 = vcombine.high %v1328_v15, %v1328_v15 }
  0x97   : > { %1591 = vst [vmem:[%s2207_s22 + $0x30] sm:$0xff] %v1559_v56  ;;  %v1771_v34 = vpack.c.bf16 %v1359_v3, %v1327_v17 }
  0x98   : > { %v1772_v24 = vpack.c.bf16 %v1360_v14, %v1328_v15 }
  0x99   : > { %v1568_v41 = vrot.slane %v1771_v34, %v1871_v10 }
  0x9a   : > { %v1575_v63 = vrot.slane %v1772_v24, %v1871_v10 }
  0x9c   : > { %v1576_v8 = vcombine.low %v1568_v41, %v1575_v63 }
  0x9e   : > { %1592 = vst [vmem:[%s2207_s22 + $0x38] sm:$0xff] %v1576_v8 }
  0x9f PF: > { %s13_s11 = sadd.s32 1, %s1825_s11   ;;  %s2369_s9 = smov %s1821_s10 }
  0xa0   : > { %p10_p5 = scmp.ge.s32.totalorder %s13_s11, 4   ;;  %s2370_s10 = smov %s2372_s12 }
  0xa2   :  { %12 = sbr.rel (!%p10_p5) target bundleno = 2 (0x2), region = 66 }

// kernel: decoder_bottleneck_forward.18
= control target key start
LH: loop header
LB: loop body
LE: loop exit
PB: predicated region body
PF: predicated region fallthrough
CT: control target
= control target key end

     0   :  { %s2254_s15 = smov 0   ;;  %s2256_s16 = smov 0   ;;  %s2838_s0 = inlined_call_operand.vmem [shape: bf16[4096,16], index: 0, kind: input, shape index: {}]   ;;  %s2839_s1 = inlined_call_operand.vmem [shape: bf16[16,32], index: 1, kind: input, shape index: {}]   ;;  %s2840_s2 = inlined_call_operand.vmem [shape: f32[1,32], index: 2, kind: input, shape index: {}]   ;;  %s2841_s3 = inlined_call_operand.vmem [shape: f32[1,32], index: 3, kind: input, shape index: {}]   ;;  %s2842_s4 = inlined_call_operand.vmem [shape: bf16[4096,32], index: 4, kind: output, shape index: {}]  }
   0x1   :  { %s2258_s17 = smov 0  }
   0x2 LB: > { %s33_s18 = sadd.s32 1, %s2222_s16  ;;  %p1841_p0 = scmp.ge.s32.totalorder %s2226_s17, 1  ;;  %s2226_s17 = sphi %s2258_s17, %s14_s17   ;;  %s2222_s16 = sphi %s2256_s16, %s2845_s16   ;;  %s2218_s15 = sphi %s2254_s15, %s2844_s15  }
   0x3   : > { %p35_p1 = scmp.ge.s32.totalorder %s33_s18, 8  ;;  %p221_p2 = scmp.lt.s32.totalorder %s2226_s17, 9 }
   0x5   : > { %s2847_s18 = smov (%p35_p1, %s33_s18), 0  ;;  %p222_p3 = pnand %p1841_p0, %p221_p2 }
   0x6   : > { %v2277_v0 = vld [vmem:[%s2839_s1] sm:$0xff] (!%p222_p3)   ;;  %s1842_s21 = sshll.u32 (!%p222_p3), %s2218_s15, 6  ;;  %vm305_vm0 = vcmask (!%p222_p3), 261120   ;;  %v2228_v1 = vmov (!%p222_p3), 0.0   ;;  %vm666_vm1 = vcmask (!%p222_p3), 130048   ;;  %vm1646_vm2 = vcmask (!%p222_p3), 257024  }
   0x7   : > { %225 = sbr.rel (%p222_p3) target bundleno = 319 (0x13f), region = 36  ;;  %p2282_p4 = scmp.lt.s32.totalorder (!%p222_p3), %s1842_s21, 511  ;;  %2076 = vmatprep.subr.bf16.mxu0 (!%p222_p3), %v2277_v0  ;;  %2142 = vmatprep.subr.bf16.mxu1 (!%p222_p3), %v2277_v0  ;;  %308 = vst.msk [vmem:[#allocation2 + $0x10] sm:$0xff] (!%p222_p3), %vm305_vm0, %v2228_v1  ;;  %306 = vst.msk [vmem:[#allocation2] sm:$0xff] (!%p222_p3), %vm305_vm0, %v2228_v1  ;;  %v2507_v61 = vld [vmem:[%s2840_s2] ss:$0 sm:$0xff] (!%p222_p3) }
   0x8   : > { %307 = vst.msk [vmem:[#allocation2 + $0x8] sm:$0xff] (!%p222_p3), %vm305_vm0, %v2228_v1  ;;  %309 = vst.msk [vmem:[#allocation2 + $0x18] sm:$0xff] (!%p222_p3), %vm305_vm0, %v2228_v1  ;;  %2077 = vmatpush3.bf16.msra.mxu0 (!%p222_p3), %v2277_v0  ;;  %2143 = vmatpush3.bf16.msra.mxu1 (!%p222_p3), %v2277_v0 }
   0x9   : > { %310 = vst.msk [vmem:[#allocation2 + $0x20] sm:$0xff] (!%p222_p3), %vm305_vm0, %v2228_v1  ;;  %311 = vst.msk [vmem:[#allocation2 + $0x28] sm:$0xff] (!%p222_p3), %vm305_vm0, %v2228_v1 }
   0xa   : > { %312 = vst.msk [vmem:[#allocation2 + $0x30] sm:$0xff] (!%p222_p3), %vm305_vm0, %v2228_v1  ;;  %313 = vst.msk [vmem:[#allocation2 + $0x38] sm:$0xff] (!%p222_p3), %vm305_vm0, %v2228_v1 }
   0xb   : > { %314 = vst.msk [vmem:[#allocation2 + $0x40] sm:$0xff] (!%p222_p3), %vm305_vm0, %v2228_v1  ;;  %315 = vst.msk [vmem:[#allocation2 + $0x48] sm:$0xff] (!%p222_p3), %vm305_vm0, %v2228_v1 }
   0xc   : > { %316 = vst.msk [vmem:[#allocation2 + $0x50] sm:$0xff] (!%p222_p3), %vm305_vm0, %v2228_v1  ;;  %317 = vst.msk [vmem:[#allocation2 + $0x58] sm:$0xff] (!%p222_p3), %vm305_vm0, %v2228_v1 }
   0xd   : > { %318 = vst.msk [vmem:[#allocation2 + $0x60] sm:$0xff] (!%p222_p3), %vm305_vm0, %v2228_v1  ;;  %319 = vst.msk [vmem:[#allocation2 + $0x68] sm:$0xff] (!%p222_p3), %vm305_vm0, %v2228_v1 }
   0xe   : > { %320 = vst.msk [vmem:[#allocation2 + $0x70] sm:$0xff] %vm305_vm0, %v2228_v1  ;;  %321 = vst.msk [vmem:[#allocation2 + $0x78] sm:$0xff] %vm305_vm0, %v2228_v1  ;;  %s2849_s21 = smov (!%p2282_p4, %s1842_s21), 511  ;;  %v372_v34 = vld [vmem:[#allocation2 + $0x10] sm:$0xff]  ;;  %v370_v36 = vld [vmem:[#allocation2] sm:$0xff] }
   0xf   : > { %322 = vst.msk [vmem:[#allocation2 + $0x80] sm:$0xff] %vm305_vm0, %v2228_v1  ;;  %323 = vst.msk [vmem:[#allocation2 + $0x88] sm:$0xff] %vm305_vm0, %v2228_v1  ;;  %s1843_s23 = sshll.u32 %s2849_s21, 2  ;;  %v373_v39 = vld [vmem:[#allocation2 + $0x18] sm:$0xff]  ;;  %v371_v44 = vld [vmem:[#allocation2 + $0x8] sm:$0xff] }
  0x10   : > { %324 = vst.msk [vmem:[#allocation2 + $0x90] sm:$0xff] %vm305_vm0, %v2228_v1  ;;  %325 = vst.msk [vmem:[#allocation2 + $0x98] sm:$0xff] %vm305_vm0, %v2228_v1  ;;  %s2430_s26 = scalar_lea.vmem %s2838_s0, %s1843_s23  ;;  %v374_v60 = vld [vmem:[#allocation2 + $0x20] sm:$0xff]  ;;  %s2530_s7 = scalar_lea.vmem %s2842_s4, %s1843_s23 }
  0x11   : > { %326 = vst.msk [vmem:[#allocation2 + $0xa0] sm:$0xff] %vm305_vm0, %v2228_v1  ;;  %327 = vst.msk [vmem:[#allocation2 + $0xa8] sm:$0xff] %vm305_vm0, %v2228_v1  ;;  %v2170_v2 = vld [vmem:[%s2430_s26] sm:$0xff]   ;;  %v2172_v4 = vld [vmem:[%s2430_s26 + $0x8] sm:$0xff]  }
  0x12   : > { %328 = vst.msk [vmem:[#allocation2 + $0xb0] sm:$0xff] %vm305_vm0, %v2228_v1  ;;  %329 = vst.msk [vmem:[#allocation2 + $0xb8] sm:$0xff] %vm305_vm0, %v2228_v1  ;;  %v2171_v3 = vld [vmem:[%s2430_s26 + $0x80] sm:$0xff]   ;;  %2078 = vmatprep.mubr.msk.bf16.mxu0 %vm666_vm1, %v2170_v2  ;;  %v2173_v5 = vld [vmem:[%s2430_s26 + $0x88] sm:$0xff]  }
  0x13   : > { %330 = vst.msk [vmem:[#allocation2 + $0xc0] sm:$0xff] %vm305_vm0, %v2228_v1  ;;  %331 = vst.msk [vmem:[#allocation2 + $0xc8] sm:$0xff] %vm305_vm0, %v2228_v1  ;;  %2110 = vmatprep.mubr.msk.bf16.mxu1 %vm666_vm1, %v2171_v3  ;;  %2079 = vmatmul.mubr.msk.bf16.vlgmr.msra.gmra.mrb[0].mxu0 %vm666_vm1, %v2172_v4  ;;  %v2174_v6 = vld [vmem:[%s2430_s26 + $0x10] sm:$0xff]   ;;  %v2176_v8 = vld [vmem:[%s2430_s26 + $0x18] sm:$0xff]  }
  0x14   : > { %332 = vst.msk [vmem:[#allocation2 + $0xd0] sm:$0xff] %vm305_vm0, %v2228_v1  ;;  %333 = vst.msk [vmem:[#allocation2 + $0xd8] sm:$0xff] %vm305_vm0, %v2228_v1  ;;  %2111 = vmatmul.mubr.msk.bf16.vlgmr.msra.gmra.mrb[0].mxu1 %vm666_vm1, %v2173_v5  ;;  %v2175_v7 = vld [vmem:[%s2430_s26 + $0x90] sm:$0xff]   ;;  %2082 = vmatprep.mubr.msk.bf16.mxu0 %vm666_vm1, %v2174_v6  ;;  %v2177_v9 = vld [vmem:[%s2430_s26 + $0x98] sm:$0xff]  }
  0x15   : > { %334 = vst.msk [vmem:[#allocation2 + $0xe0] sm:$0xff] %vm305_vm0, %v2228_v1  ;;  %335 = vst.msk [vmem:[#allocation2 + $0xe8] sm:$0xff] %vm305_vm0, %v2228_v1  ;;  %2114 = vmatprep.mubr.msk.bf16.mxu1 %vm666_vm1, %v2175_v7  ;;  %v2178_v10 = vld [vmem:[%s2430_s26 + $0x20] sm:$0xff]   ;;  %v2180_v12 = vld [vmem:[%s2430_s26 + $0x28] sm:$0xff]  }
  0x16   : > { %336 = vst.msk [vmem:[#allocation2 + $0xf0] sm:$0xff] %vm305_vm0, %v2228_v1  ;;  %337 = vst.msk [vmem:[#allocation2 + $0xf8] sm:$0xff] %vm305_vm0, %v2228_v1  ;;  %v2179_v11 = vld [vmem:[%s2430_s26 + $0xa0] sm:$0xff]   ;;  %v2181_v13 = vld [vmem:[%s2430_s26 + $0xa8] sm:$0xff]  }
  0x17   : > { %338 = vst.msk [vmem:[#allocation2 + $0x100] sm:$0xff] %vm305_vm0, %v2228_v1  ;;  %339 = vst.msk [vmem:[#allocation2 + $0x108] sm:$0xff] %vm305_vm0, %v2228_v1  ;;  %v2182_v14 = vld [vmem:[%s2430_s26 + $0x30] sm:$0xff]   ;;  %v2184_v16 = vld [vmem:[%s2430_s26 + $0x38] sm:$0xff]  }
  0x18   : > { %340 = vst.msk [vmem:[#allocation2 + $0x110] sm:$0xff] %vm305_vm0, %v2228_v1  ;;  %341 = vst.msk [vmem:[#allocation2 + $0x118] sm:$0xff] %vm305_vm0, %v2228_v1  ;;  %v2183_v15 = vld [vmem:[%s2430_s26 + $0xb0] sm:$0xff]   ;;  %v2185_v17 = vld [vmem:[%s2430_s26 + $0xb8] sm:$0xff]  }
  0x19   : > { %342 = vst.msk [vmem:[#allocation2 + $0x120] sm:$0xff] %vm305_vm0, %v2228_v1  ;;  %343 = vst.msk [vmem:[#allocation2 + $0x128] sm:$0xff] %vm305_vm0, %v2228_v1  ;;  %v2186_v18 = vld [vmem:[%s2430_s26 + $0x40] sm:$0xff]   ;;  %v2188_v20 = vld [vmem:[%s2430_s26 + $0x48] sm:$0xff]  }
  0x1a   : > { %344 = vst.msk [vmem:[#allocation2 + $0x130] sm:$0xff] %vm305_vm0, %v2228_v1  ;;  %345 = vst.msk [vmem:[#allocation2 + $0x138] sm:$0xff] %vm305_vm0, %v2228_v1  ;;  %v2187_v19 = vld [vmem:[%s2430_s26 + $0xc0] sm:$0xff]   ;;  %v2189_v21 = vld [vmem:[%s2430_s26 + $0xc8] sm:$0xff]  }
  0x1b   : > { %346 = vst.msk [vmem:[#allocation2 + $0x140] sm:$0xff] %vm305_vm0, %v2228_v1  ;;  %347 = vst.msk [vmem:[#allocation2 + $0x148] sm:$0xff] %vm305_vm0, %v2228_v1  ;;  %2083 = vmatmul.mubr.msk.bf16.gmra.mrb[4].mxu0 %vm666_vm1, %v2176_v8  ;;  %v2190_v22 = vld [vmem:[%s2430_s26 + $0x50] sm:$0xff]   ;;  %v2192_v24 = vld [vmem:[%s2430_s26 + $0x58] sm:$0xff]  }
  0x1c   : > { %348 = vst.msk [vmem:[#allocation2 + $0x150] sm:$0xff] %vm305_vm0, %v2228_v1  ;;  %349 = vst.msk [vmem:[#allocation2 + $0x158] sm:$0xff] %vm305_vm0, %v2228_v1  ;;  %2115 = vmatmul.mubr.msk.bf16.gmra.mrb[4].mxu1 %vm666_vm1, %v2177_v9  ;;  %2086 = vmatprep.mubr.msk.bf16.mxu0 %vm666_vm1, %v2178_v10  ;;  %v2191_v23 = vld [vmem:[%s2430_s26 + $0xd0] sm:$0xff]   ;;  %v2193_v25 = vld [vmem:[%s2430_s26 + $0xd8] sm:$0xff]  }
  0x1d   : > { %350 = vst.msk [vmem:[#allocation2 + $0x160] sm:$0xff] %vm305_vm0, %v2228_v1  ;;  %351 = vst.msk [vmem:[#allocation2 + $0x168] sm:$0xff] %vm305_vm0, %v2228_v1  ;;  %2118 = vmatprep.mubr.msk.bf16.mxu1 %vm666_vm1, %v2179_v11  ;;  %v2194_v26 = vld [vmem:[%s2430_s26 + $0x60] sm:$0xff]   ;;  %v2196_v28 = vld [vmem:[%s2430_s26 + $0x68] sm:$0xff]  }
  0x1e   : > { %352 = vst.msk [vmem:[#allocation2 + $0x170] sm:$0xff] %vm305_vm0, %v2228_v1  ;;  %353 = vst.msk [vmem:[#allocation2 + $0x178] sm:$0xff] %vm305_vm0, %v2228_v1  ;;  %v2195_v27 = vld [vmem:[%s2430_s26 + $0xe0] sm:$0xff]   ;;  %v2197_v29 = vld [vmem:[%s2430_s26 + $0xe8] sm:$0xff]  }
  0x1f   : > { %354 = vst.msk [vmem:[#allocation2 + $0x180] sm:$0xff] %vm305_vm0, %v2228_v1  ;;  %355 = vst.msk [vmem:[#allocation2 + $0x188] sm:$0xff] %vm305_vm0, %v2228_v1  ;;  %v2198_v30 = vld [vmem:[%s2430_s26 + $0x70] sm:$0xff]   ;;  %v2200_v32 = vld [vmem:[%s2430_s26 + $0x78] sm:$0xff]  }
  0x20   : > { %356 = vst.msk [vmem:[#allocation2 + $0x190] sm:$0xff] %vm305_vm0, %v2228_v1  ;;  %357 = vst.msk [vmem:[#allocation2 + $0x198] sm:$0xff] %vm305_vm0, %v2228_v1  ;;  %v2199_v31 = vld [vmem:[%s2430_s26 + $0xf0] sm:$0xff]   ;;  %v2201_v33 = vld [vmem:[%s2430_s26 + $0xf8] sm:$0xff]  }
  0x21   : > { %358 = vst.msk [vmem:[#allocation2 + $0x1a0] sm:$0xff] %vm305_vm0, %v2228_v1  ;;  %359 = vst.msk [vmem:[#allocation2 + $0x1a8] sm:$0xff] %vm305_vm0, %v2228_v1  ;;  %v404_v35 = vld [vmem:[#allocation2 + $0x110] sm:$0xff]  ;;  %v402_v38 = vld [vmem:[#allocation2 + $0x100] sm:$0xff] }
  0x22   : > { %360 = vst.msk [vmem:[#allocation2 + $0x1b0] sm:$0xff] %vm305_vm0, %v2228_v1  ;;  %361 = vst.msk [vmem:[#allocation2 + $0x1b8] sm:$0xff] %vm305_vm0, %v2228_v1  ;;  %v405_v43 = vld [vmem:[#allocation2 + $0x118] sm:$0xff]  ;;  %v403_v49 = vld [vmem:[#allocation2 + $0x108] sm:$0xff] }
  0x23   : > { %362 = vst.msk [vmem:[#allocation2 + $0x1c0] sm:$0xff] %vm305_vm0, %v2228_v1  ;;  %363 = vst.msk [vmem:[#allocation2 + $0x1c8] sm:$0xff] %vm305_vm0, %v2228_v1  ;;  %2087 = vmatmul.mubr.msk.bf16.gmra.mrb[8].mxu0 %vm666_vm1, %v2180_v12  ;;  %v376_v58 = vld [vmem:[#allocation2 + $0x30] sm:$0xff]  ;;  %v406_v63 = vld [vmem:[#allocation2 + $0x120] sm:$0xff] }
  0x24   : > { %364 = vst.msk [vmem:[#allocation2 + $0x1d0] sm:$0xff] %vm305_vm0, %v2228_v1  ;;  %365 = vst.msk [vmem:[#allocation2 + $0x1d8] sm:$0xff] %vm305_vm0, %v2228_v1  ;;  %2119 = vmatmul.mubr.msk.bf16.gmra.mrb[8].mxu1 %vm666_vm1, %v2181_v13  ;;  %2090 = vmatprep.mubr.msk.bf16.mxu0 %vm666_vm1, %v2182_v14  ;;  %v408_v59 = vld [vmem:[#allocation2 + $0x130] sm:$0xff]  ;;  %v377_v0 = vld [vmem:[#allocation2 + $0x38] sm:$0xff] }
  0x25   : > { %366 = vst.msk [vmem:[#allocation2 + $0x1e0] sm:$0xff] %vm305_vm0, %v2228_v1  ;;  %367 = vst.msk [vmem:[#allocation2 + $0x1e8] sm:$0xff] %vm305_vm0, %v2228_v1  ;;  %2122 = vmatprep.mubr.msk.bf16.mxu1 %vm666_vm1, %v2183_v15  ;;  %v409_v4 = vld [vmem:[#allocation2 + $0x138] sm:$0xff]  ;;  %v375_v5 = vld [vmem:[#allocation2 + $0x28] sm:$0xff] }
  0x26   : > { %368 = vst.msk [vmem:[#allocation2 + $0x1f0] sm:$0xff] %vm305_vm0, %v2228_v1  ;;  %369 = vst.msk [vmem:[#allocation2 + $0x1f8] sm:$0xff] %vm305_vm0, %v2228_v1  ;;  %v2512_v7 = vld [vmem:[%s2841_s3] ss:$0 sm:$0xff]  ;;  %v407_v12 = vld [vmem:[#allocation2 + $0x128] sm:$0xff] }
  0x2b   : > { %2091 = vmatmul.mubr.msk.bf16.gmra.mrb[12].mxu0 %vm666_vm1, %v2184_v16 }
  0x2c   : > { %2123 = vmatmul.mubr.msk.bf16.gmra.mrb[12].mxu1 %vm666_vm1, %v2185_v17  ;;  %2094 = vmatprep.mubr.msk.bf16.mxu0 %vm666_vm1, %v2186_v18 }
  0x2d   : > { %2126 = vmatprep.mubr.msk.bf16.mxu1 %vm666_vm1, %v2187_v19 }
  0x33   : > { %2095 = vmatmul.mubr.msk.bf16.gmra.mrb[16].mxu0 %vm666_vm1, %v2188_v20 }
  0x34   : > { %2127 = vmatmul.mubr.msk.bf16.gmra.mrb[16].mxu1 %vm666_vm1, %v2189_v21  ;;  %2098 = vmatprep.mubr.msk.bf16.mxu0 %vm666_vm1, %v2190_v22 }
  0x35   : > { %2130 = vmatprep.mubr.msk.bf16.mxu1 %vm666_vm1, %v2191_v23 }
  0x3b   : > { %2099 = vmatmul.mubr.msk.bf16.gmra.mrb[20].mxu0 %vm666_vm1, %v2192_v24 }
  0x3c   : > { %2131 = vmatmul.mubr.msk.bf16.gmra.mrb[20].mxu1 %vm666_vm1, %v2193_v25  ;;  %2102 = vmatprep.mubr.msk.bf16.mxu0 %vm666_vm1, %v2194_v26 }
  0x3d   : > { %2134 = vmatprep.mubr.msk.bf16.mxu1 %vm666_vm1, %v2195_v27 }
  0x43   : > { %2103 = vmatmul.mubr.msk.bf16.gmra.mrb[24].mxu0 %vm666_vm1, %v2196_v28 }
  0x44   : > { %2135 = vmatmul.mubr.msk.bf16.gmra.mrb[24].mxu1 %vm666_vm1, %v2197_v29  ;;  %2106 = vmatprep.mubr.msk.bf16.mxu0 %vm666_vm1, %v2198_v30 }
  0x45   : > { %2138 = vmatprep.mubr.msk.bf16.mxu1 %vm666_vm1, %v2199_v31 }
  0x4b   : > { %2107 = vmatmul.mubr.msk.bf16.gmra.mrb[28].mxu0 %vm666_vm1, %v2200_v32 }
  0x4c   : > { %2139 = vmatmul.mubr.msk.bf16.gmra.mrb[28].mxu1 %vm666_vm1, %v2201_v33 }
  0xe6   : > { %v2080_v37 = vpop.f32.mrb[0].mxu0 }
  0xe7   : > { %v1054_v40 = vadd.f32 %v2080_v37, %v372_v34  ;;  %v2112_v41 = vpop.f32.mrb[0].mxu1  ;;  %v797_v42 = vpop.f32.mrb[1].mxu0 }
  0xe8   : > { %v1086_v45 = vadd.f32 %v2112_v41, %v404_v35  ;;  %v1052_v46 = vadd.f32 %v797_v42, %v370_v36  ;;  %v925_v47 = vpop.f32.mrb[1].mxu1  ;;  %v2081_v48 = vpop.f32.mrb[2].mxu0 }
  0xe9   : > { %1119 = vst.msk [vmem:[#allocation2 + $0x10] sm:$0xff] %vm305_vm0, %v1054_v40  ;;  %v1084_v50 = vadd.f32 %v925_v47, %v402_v38  ;;  %v1055_v51 = vadd.f32 %v2081_v48, %v373_v39  ;;  %v2113_v52 = vpop.f32.mrb[2].mxu1  ;;  %v800_v53 = vpop.f32.mrb[3].mxu0  ;;  %v380_v38 = vld [vmem:[#allocation2 + $0x50] sm:$0xff] }
  0xea   : > { %1151 = vst.msk [vmem:[#allocation2 + $0x110] sm:$0xff] %vm305_vm0, %v1086_v45  ;;  %1117 = vst.msk [vmem:[#allocation2] sm:$0xff] %vm305_vm0, %v1052_v46  ;;  %v1087_v54 = vadd.f32 %v2113_v52, %v405_v43  ;;  %v1053_v55 = vadd.f32 %v800_v53, %v371_v44  ;;  %v928_v56 = vpop.f32.mrb[3].mxu1  ;;  %v412_v43 = vld [vmem:[#allocation2 + $0x150] sm:$0xff]  ;;  %v378_v44 = vld [vmem:[#allocation2 + $0x40] sm:$0xff] }
  0xeb   : > { %1149 = vst.msk [vmem:[#allocation2 + $0x100] sm:$0xff] %vm305_vm0, %v1084_v50  ;;  %1120 = vst.msk [vmem:[#allocation2 + $0x18] sm:$0xff] %vm305_vm0, %v1055_v51  ;;  %v1085_v57 = vadd.f32 %v928_v56, %v403_v49  ;;  %v410_v50 = vld [vmem:[#allocation2 + $0x140] sm:$0xff]  ;;  %v381_v51 = vld [vmem:[#allocation2 + $0x58] sm:$0xff] }
  0xec   : > { %1152 = vst.msk [vmem:[#allocation2 + $0x118] sm:$0xff] %vm305_vm0, %v1087_v54  ;;  %1118 = vst.msk [vmem:[#allocation2 + $0x8] sm:$0xff] %vm305_vm0, %v1053_v55 }
  0xed   : > { %1150 = vst.msk [vmem:[#allocation2 + $0x108] sm:$0xff] %vm305_vm0, %v1085_v57 }
  0xee   : > { %v2084_v62 = vpop.f32.mrb[4].mxu0 }
  0xef   : > { %v1058_v1 = vadd.f32 %v2084_v62, %v376_v58  ;;  %v2116_v2 = vpop.f32.mrb[4].mxu1  ;;  %v813_v3 = vpop.f32.mrb[5].mxu0  ;;  %v413_v58 = vld [vmem:[#allocation2 + $0x158] sm:$0xff] }
  0xf0   : > { %v1186_v6 = vld [vmem:[#allocation2 + $0x10] sm:$0xff]  ;;  %v1090_v8 = vadd.f32 %v2116_v2, %v408_v59  ;;  %v1056_v9 = vadd.f32 %v813_v3, %v374_v60  ;;  %v941_v10 = vpop.f32.mrb[5].mxu1  ;;  %v2085_v11 = vpop.f32.mrb[6].mxu0  ;;  %v379_v59 = vld [vmem:[#allocation2 + $0x48] sm:$0xff] }
  0xf1   : > { %v1257_v13 = vmul.f32 %v2507_v61, %v1186_v6  ;;  %v1218_v14 = vld [vmem:[#allocation2 + $0x110] sm:$0xff]  ;;  %v1184_v15 = vld [vmem:[#allocation2] sm:$0xff]  ;;  %1123 = vst.msk [vmem:[#allocation2 + $0x30] sm:$0xff] %vm305_vm0, %v1058_v1  ;;  %v1088_v16 = vadd.f32 %v941_v10, %v406_v63  ;;  %v1059_v17 = vadd.f32 %v2085_v11, %v377_v0  ;;  %v2117_v18 = vpop.f32.mrb[6].mxu1  ;;  %v816_v19 = vpop.f32.mrb[7].mxu0 }
  0xf2   : > { %v1289_v20 = vmul.f32 %v2507_v61, %v1218_v14  ;;  %v1255_v21 = vmul.f32 %v2507_v61, %v1184_v15  ;;  %v1216_v22 = vld [vmem:[#allocation2 + $0x100] sm:$0xff]  ;;  %v1187_v23 = vld [vmem:[#allocation2 + $0x18] sm:$0xff]  ;;  %1155 = vst.msk [vmem:[#allocation2 + $0x130] sm:$0xff] %vm305_vm0, %v1090_v8  ;;  %1121 = vst.msk [vmem:[#allocation2 + $0x20] sm:$0xff] %vm305_vm0, %v1056_v9  ;;  %v1091_v24 = vadd.f32 %v2117_v18, %v409_v4  ;;  %v944_v26 = vpop.f32.mrb[7].mxu1 }
  0xf3   : > { %v1057_v25 = vadd.f32 %v816_v19, %v375_v5  ;;  %v1328_v27 = vadd.f32 %v2512_v7, %v1257_v13  ;;  %v1287_v28 = vmul.f32 %v2507_v61, %v1216_v22  ;;  %v1258_v29 = vmul.f32 %v2507_v61, %v1187_v23  ;;  %v1219_v30 = vld [vmem:[#allocation2 + $0x118] sm:$0xff]  ;;  %v1185_v31 = vld [vmem:[#allocation2 + $0x8] sm:$0xff]  ;;  %1153 = vst.msk [vmem:[#allocation2 + $0x120] sm:$0xff] %vm305_vm0, %v1088_v16 }
  0xf4   : > { %1124 = vst.msk [vmem:[#allocation2 + $0x38] sm:$0xff] %vm305_vm0, %v1059_v17  ;;  %v1089_v32 = vadd.f32 %v944_v26, %v407_v12  ;;  %v1360_v33 = vadd.f32 %v2512_v7, %v1289_v20  ;;  %v1326_v34 = vadd.f32 %v2512_v7, %v1255_v21  ;;  %v1290_v35 = vmul.f32 %v2507_v61, %v1219_v30  ;;  %v1217_v37 = vld [vmem:[#allocation2 + $0x108] sm:$0xff] }
  0xf5   : > { %v1256_v36 = vmul.f32 %v2507_v61, %v1185_v31  ;;  %1156 = vst.msk [vmem:[#allocation2 + $0x138] sm:$0xff] %vm305_vm0, %v1091_v24  ;;  %1122 = vst.msk [vmem:[#allocation2 + $0x28] sm:$0xff] %vm305_vm0, %v1057_v25  ;;  %v1981_v39 = vpack.c.bf16 %v1328_v27, %v1328_v27  ;;  %v1358_v40 = vadd.f32 %v2512_v7, %v1287_v28  ;;  %v411_v4 = vld [vmem:[#allocation2 + $0x148] sm:$0xff] }
  0xf6   : > { %v1329_v41 = vadd.f32 %v2512_v7, %v1258_v29  ;;  %v1288_v42 = vmul.f32 %v2507_v61, %v1217_v37  ;;  %1154 = vst.msk [vmem:[#allocation2 + $0x128] sm:$0xff] %vm305_vm0, %v1089_v32  ;;  %v2013_v45 = vpack.c.bf16 %v1360_v33, %v1360_v33  ;;  %v1979_v46 = vpack.c.bf16 %v1326_v34, %v1326_v34  ;;  %v2088_v49 = vpop.f32.mrb[8].mxu0  ;;  %v384_v32 = vld [vmem:[#allocation2 + $0x70] sm:$0xff] }
  0xf7   : > { %v1361_v47 = vadd.f32 %v2512_v7, %v1290_v35  ;;  %v1327_v48 = vadd.f32 %v2512_v7, %v1256_v36  ;;  %1649 = vst.msk [vmem:[%s2530_s7 + $0x8] sm:$0xf] %vm1646_vm2, %v1981_v39  ;;  %v2011_v52 = vpack.c.bf16 %v1358_v40, %v1358_v40  ;;  %v1062_v55 = vadd.f32 %v2088_v49, %v380_v38  ;;  %v2120_v56 = vpop.f32.mrb[8].mxu1  ;;  %v829_v57 = vpop.f32.mrb[9].mxu0  ;;  %v416_v37 = vld [vmem:[#allocation2 + $0x170] sm:$0xff]  ;;  %v382_v38 = vld [vmem:[#allocation2 + $0x60] sm:$0xff] }
  0xf8   : > { %v1982_v53 = vpack.c.bf16 %v1329_v41, %v1329_v41  ;;  %v1359_v54 = vadd.f32 %v2512_v7, %v1288_v42  ;;  %1681 = vst.msk [vmem:[%s2530_s7 + $0x88] sm:$0xf] %vm1646_vm2, %v2013_v45  ;;  %1647 = vst.msk [vmem:[%s2530_s7] sm:$0xf] %vm1646_vm2, %v1979_v46  ;;  %v1190_v63 = vld [vmem:[#allocation2 + $0x30] sm:$0xff]  ;;  %v1094_v0 = vadd.f32 %v2120_v56, %v412_v43  ;;  %v957_v2 = vpop.f32.mrb[9].mxu1 }
  0xf9   : > { %v2014_v60 = vpack.c.bf16 %v1361_v47, %v1361_v47  ;;  %v1980_v62 = vpack.c.bf16 %v1327_v48, %v1327_v48  ;;  %v1060_v1 = vadd.f32 %v829_v57, %v378_v44  ;;  %v2089_v3 = vpop.f32.mrb[10].mxu0  ;;  %1679 = vst.msk [vmem:[%s2530_s7 + $0x80] sm:$0xf] %vm1646_vm2, %v2011_v52  ;;  %v1261_v6 = vmul.f32 %v2507_v61, %v1190_v63  ;;  %v1222_v8 = vld [vmem:[#allocation2 + $0x130] sm:$0xff]  ;;  %v1188_v9 = vld [vmem:[#allocation2 + $0x20] sm:$0xff]  ;;  %v2121_v12 = vpop.f32.mrb[10].mxu1 }
  0xfa   : > { %1650 = vst.msk [vmem:[%s2530_s7 + $0xc] sm:$0xf] %vm1646_vm2, %v1982_v53  ;;  %v2012_v5 = vpack.c.bf16 %v1359_v54, %v1359_v54  ;;  %v1092_v10 = vadd.f32 %v957_v2, %v410_v50  ;;  %v1063_v11 = vadd.f32 %v2089_v3, %v381_v51  ;;  %v832_v13 = vpop.f32.mrb[11].mxu0  ;;  %v1293_v14 = vmul.f32 %v2507_v61, %v1222_v8  ;;  %v1220_v16 = vld [vmem:[#allocation2 + $0x120] sm:$0xff]  ;;  %v960_v20 = vpop.f32.mrb[11].mxu1  ;;  %v385_v45 = vld [vmem:[#allocation2 + $0x78] sm:$0xff] }
  0xfb   : > { %1127 = vst.msk [vmem:[#allocation2 + $0x50] sm:$0xff] %vm305_vm0, %v1062_v55  ;;  %v1259_v15 = vmul.f32 %v2507_v61, %v1188_v9  ;;  %v1191_v17 = vld [vmem:[#allocation2 + $0x38] sm:$0xff]  ;;  %1159 = vst.msk [vmem:[#allocation2 + $0x150] sm:$0xff] %vm305_vm0, %v1094_v0  ;;  %v1095_v18 = vadd.f32 %v2121_v12, %v413_v58  ;;  %v1061_v19 = vadd.f32 %v832_v13, %v379_v59  ;;  %v414_v44 = vld [vmem:[#allocation2 + $0x160] sm:$0xff] }
  0xfc   : > { %1682 = vst.msk [vmem:[%s2530_s7 + $0x8c] sm:$0xf] %vm1646_vm2, %v2014_v60  ;;  %1648 = vst.msk [vmem:[%s2530_s7 + $0x4] sm:$0xf] %vm1646_vm2, %v1980_v62  ;;  %v1332_v21 = vadd.f32 %v2512_v7, %v1261_v6  ;;  %v1291_v22 = vmul.f32 %v2507_v61, %v1220_v16  ;;  %v1262_v23 = vmul.f32 %v2507_v61, %v1191_v17  ;;  %v1223_v24 = vld [vmem:[#allocation2 + $0x138] sm:$0xff]  ;;  %v1189_v25 = vld [vmem:[#allocation2 + $0x28] sm:$0xff] }
  0xfd   : > { %1125 = vst.msk [vmem:[#allocation2 + $0x40] sm:$0xff] %vm305_vm0, %v1060_v1  ;;  %1157 = vst.msk [vmem:[#allocation2 + $0x140] sm:$0xff] %vm305_vm0, %v1092_v10  ;;  %v1093_v26 = vadd.f32 %v960_v20, %v411_v4  ;;  %v1364_v27 = vadd.f32 %v2512_v7, %v1293_v14  ;;  %v1330_v28 = vadd.f32 %v2512_v7, %v1259_v15  ;;  %v1221_v31 = vld [vmem:[#allocation2 + $0x128] sm:$0xff]  ;;  %v417_v52 = vld [vmem:[#allocation2 + $0x178] sm:$0xff] }
  0xfe   : > { %1680 = vst.msk [vmem:[%s2530_s7 + $0x84] sm:$0xf] %vm1646_vm2, %v2012_v5  ;;  %v1294_v29 = vmul.f32 %v2507_v61, %v1223_v24  ;;  %v1260_v30 = vmul.f32 %v2507_v61, %v1189_v25  ;;  %v1985_v33 = vpack.c.bf16 %v1332_v21, %v1332_v21  ;;  %v1362_v34 = vadd.f32 %v2512_v7, %v1291_v22  ;;  %v2092_v43 = vpop.f32.mrb[12].mxu0  ;;  %v383_v53 = vld [vmem:[#allocation2 + $0x68] sm:$0xff] }
  0xff   : > { %1128 = vst.msk [vmem:[#allocation2 + $0x58] sm:$0xff] %vm305_vm0, %v1063_v11  ;;  %1160 = vst.msk [vmem:[#allocation2 + $0x158] sm:$0xff] %vm305_vm0, %v1095_v18  ;;  %v1333_v35 = vadd.f32 %v2512_v7, %v1262_v23  ;;  %v1292_v36 = vmul.f32 %v2507_v61, %v1221_v31  ;;  %v2017_v39 = vpack.c.bf16 %v1364_v27, %v1364_v27  ;;  %v2124_v50 = vpop.f32.mrb[12].mxu1  ;;  %v845_v51 = vpop.f32.mrb[13].mxu0  ;;  %v415_v62 = vld [vmem:[#allocation2 + $0x168] sm:$0xff]  ;;  %v420_v31 = vld [vmem:[#allocation2 + $0x190] sm:$0xff] }
 0x100   : > { %1126 = vst.msk [vmem:[#allocation2 + $0x48] sm:$0xff] %vm305_vm0, %v1061_v19  ;;  %1158 = vst.msk [vmem:[#allocation2 + $0x148] sm:$0xff] %vm305_vm0, %v1093_v26  ;;  %v1983_v40 = vpack.c.bf16 %v1330_v28, %v1330_v28  ;;  %v1365_v41 = vadd.f32 %v2512_v7, %v1294_v29  ;;  %v1331_v42 = vadd.f32 %v2512_v7, %v1260_v30  ;;  %v973_v59 = vpop.f32.mrb[13].mxu1  ;;  %v2093_v60 = vpop.f32.mrb[14].mxu0  ;;  %v388_v26 = vld [vmem:[#allocation2 + $0x90] sm:$0xff] }
 0x101   : > { %1653 = vst.msk [vmem:[%s2530_s7 + $0x18] sm:$0xf] %vm1646_vm2, %v1985_v33  ;;  %v2015_v46 = vpack.c.bf16 %v1362_v34, %v1362_v34  ;;  %v1986_v47 = vpack.c.bf16 %v1333_v35, %v1333_v35  ;;  %v1363_v48 = vadd.f32 %v2512_v7, %v1292_v36  ;;  %v1066_v49 = vadd.f32 %v2092_v43, %v384_v32  ;;  %v2125_v5 = vpop.f32.mrb[14].mxu1  ;;  %v848_v6 = vpop.f32.mrb[15].mxu0  ;;  %v386_v32 = vld [vmem:[#allocation2 + $0x80] sm:$0xff] }
 0x102   : > { %1685 = vst.msk [vmem:[%s2530_s7 + $0x98] sm:$0xf] %vm1646_vm2, %v2017_v39  ;;  %1651 = vst.msk [vmem:[%s2530_s7 + $0x10] sm:$0xf] %vm1646_vm2, %v1983_v40  ;;  %v2018_v54 = vpack.c.bf16 %v1365_v41, %v1365_v41  ;;  %v1984_v55 = vpack.c.bf16 %v1331_v42, %v1331_v42  ;;  %v1194_v56 = vld [vmem:[#allocation2 + $0x50] sm:$0xff]  ;;  %v1098_v57 = vadd.f32 %v2124_v50, %v416_v37  ;;  %v976_v14 = vpop.f32.mrb[15].mxu1 }
 0x103   : > { %v1064_v58 = vadd.f32 %v845_v51, %v382_v38  ;;  %1683 = vst.msk [vmem:[%s2530_s7 + $0x90] sm:$0xf] %vm1646_vm2, %v2015_v46  ;;  %1654 = vst.msk [vmem:[%s2530_s7 + $0x1c] sm:$0xf] %vm1646_vm2, %v1986_v47  ;;  %v2016_v63 = vpack.c.bf16 %v1363_v48, %v1363_v48  ;;  %v1265_v0 = vmul.f32 %v2507_v61, %v1194_v56  ;;  %v1226_v1 = vld [vmem:[#allocation2 + $0x150] sm:$0xff]  ;;  %v418_v38 = vld [vmem:[#allocation2 + $0x180] sm:$0xff] }
 0x104   : > { %v1192_v2 = vld [vmem:[#allocation2 + $0x40] sm:$0xff]  ;;  %1131 = vst.msk [vmem:[#allocation2 + $0x70] sm:$0xff] %vm305_vm0, %v1066_v49  ;;  %v1096_v3 = vadd.f32 %v973_v59, %v414_v44  ;;  %v1067_v4 = vadd.f32 %v2093_v60, %v385_v45  ;;  %v1297_v8 = vmul.f32 %v2507_v61, %v1226_v1  ;;  %1163 = vst.msk [vmem:[#allocation2 + $0x170] sm:$0xff] %vm305_vm0, %v1098_v57  ;;  %v389_v39 = vld [vmem:[#allocation2 + $0x98] sm:$0xff] }
 0x105   : > { %1686 = vst.msk [vmem:[%s2530_s7 + $0x9c] sm:$0xf] %vm1646_vm2, %v2018_v54  ;;  %1652 = vst.msk [vmem:[%s2530_s7 + $0x14] sm:$0xf] %vm1646_vm2, %v1984_v55  ;;  %v1263_v9 = vmul.f32 %v2507_v61, %v1192_v2  ;;  %v1224_v10 = vld [vmem:[#allocation2 + $0x140] sm:$0xff]  ;;  %v1099_v12 = vadd.f32 %v2125_v5, %v417_v52  ;;  %v1065_v13 = vadd.f32 %v848_v6, %v383_v53  ;;  %v421_v46 = vld [vmem:[#allocation2 + $0x198] sm:$0xff] }
 0x106   : > { %v1195_v11 = vld [vmem:[#allocation2 + $0x58] sm:$0xff]  ;;  %1129 = vst.msk [vmem:[#allocation2 + $0x60] sm:$0xff] %vm305_vm0, %v1064_v58  ;;  %v1336_v15 = vadd.f32 %v2512_v7, %v1265_v0  ;;  %v1295_v16 = vmul.f32 %v2507_v61, %v1224_v10  ;;  %1161 = vst.msk [vmem:[#allocation2 + $0x160] sm:$0xff] %vm305_vm0, %v1096_v3  ;;  %v1097_v20 = vadd.f32 %v976_v14, %v415_v62  ;;  %v2096_v37 = vpop.f32.mrb[16].mxu0  ;;  %v387_v47 = vld [vmem:[#allocation2 + $0x88] sm:$0xff] }
 0x107   : > { %1684 = vst.msk [vmem:[%s2530_s7 + $0x94] sm:$0xf] %vm1646_vm2, %v2016_v63  ;;  %v1266_v17 = vmul.f32 %v2507_v61, %v1195_v11  ;;  %v1227_v18 = vld [vmem:[#allocation2 + $0x158] sm:$0xff]  ;;  %v1193_v19 = vld [vmem:[#allocation2 + $0x48] sm:$0xff]  ;;  %v1368_v21 = vadd.f32 %v2512_v7, %v1297_v8  ;;  %v1334_v22 = vadd.f32 %v2512_v7, %v1263_v9  ;;  %v1070_v43 = vadd.f32 %v2096_v37, %v388_v26  ;;  %v2128_v44 = vpop.f32.mrb[16].mxu1  ;;  %v861_v45 = vpop.f32.mrb[17].mxu0 }
 0x108   : > { %1132 = vst.msk [vmem:[#allocation2 + $0x78] sm:$0xff] %vm305_vm0, %v1067_v4  ;;  %v1298_v23 = vmul.f32 %v2507_v61, %v1227_v18  ;;  %v1264_v24 = vmul.f32 %v2507_v61, %v1193_v19  ;;  %v1225_v25 = vld [vmem:[#allocation2 + $0x148] sm:$0xff]  ;;  %1164 = vst.msk [vmem:[#allocation2 + $0x178] sm:$0xff] %vm305_vm0, %v1099_v12  ;;  %v1989_v27 = vpack.c.bf16 %v1336_v15, %v1336_v15  ;;  %v989_v53 = vpop.f32.mrb[17].mxu1  ;;  %v2097_v54 = vpop.f32.mrb[18].mxu0  ;;  %v390_v26 = vld [vmem:[#allocation2 + $0xa0] sm:$0xff] }
 0x109   : > { %1130 = vst.msk [vmem:[#allocation2 + $0x68] sm:$0xff] %vm305_vm0, %v1065_v13  ;;  %v1366_v28 = vadd.f32 %v2512_v7, %v1295_v16  ;;  %v1337_v29 = vadd.f32 %v2512_v7, %v1266_v17  ;;  %v1296_v30 = vmul.f32 %v2507_v61, %v1225_v25  ;;  %1162 = vst.msk [vmem:[#allocation2 + $0x168] sm:$0xff] %vm305_vm0, %v1097_v20  ;;  %v419_v55 = vld [vmem:[#allocation2 + $0x188] sm:$0xff]  ;;  %v2129_v63 = vpop.f32.mrb[18].mxu1  ;;  %v864_v0 = vpop.f32.mrb[19].mxu0  ;;  %v392_v20 = vld [vmem:[#allocation2 + $0xb0] sm:$0xff] }
 0x10a   : > { %v2021_v33 = vpack.c.bf16 %v1368_v21, %v1368_v21  ;;  %v1987_v34 = vpack.c.bf16 %v1334_v22, %v1334_v22  ;;  %v1369_v35 = vadd.f32 %v2512_v7, %v1298_v23  ;;  %v1335_v36 = vadd.f32 %v2512_v7, %v1264_v24  ;;  %1657 = vst.msk [vmem:[%s2530_s7 + $0x28] sm:$0xf] %vm1646_vm2, %v1989_v27  ;;  %v992_v8 = vpop.f32.mrb[19].mxu1  ;;  %v424_v25 = vld [vmem:[#allocation2 + $0x1b0] sm:$0xff] }
 0x10b   : > { %v2019_v40 = vpack.c.bf16 %v1366_v28, %v1366_v28  ;;  %v1990_v41 = vpack.c.bf16 %v1337_v29, %v1337_v29  ;;  %v1367_v42 = vadd.f32 %v2512_v7, %v1296_v30  ;;  %v1198_v50 = vld [vmem:[#allocation2 + $0x70] sm:$0xff]  ;;  %v1102_v51 = vadd.f32 %v2128_v44, %v420_v31  ;;  %1135 = vst.msk [vmem:[#allocation2 + $0x90] sm:$0xff] %vm305_vm0, %v1070_v43 }
 0x10c   : > { %1689 = vst.msk [vmem:[%s2530_s7 + $0xa8] sm:$0xf] %vm1646_vm2, %v2021_v33  ;;  %1655 = vst.msk [vmem:[%s2530_s7 + $0x20] sm:$0xf] %vm1646_vm2, %v1987_v34  ;;  %v2022_v48 = vpack.c.bf16 %v1369_v35, %v1369_v35  ;;  %v1988_v49 = vpack.c.bf16 %v1335_v36, %v1335_v36  ;;  %v1068_v52 = vadd.f32 %v861_v45, %v386_v32  ;;  %v1230_v58 = vld [vmem:[#allocation2 + $0x170] sm:$0xff]  ;;  %v422_v32 = vld [vmem:[#allocation2 + $0x1a0] sm:$0xff] }
 0x10d   : > { %1687 = vst.msk [vmem:[%s2530_s7 + $0xa0] sm:$0xf] %vm1646_vm2, %v2019_v40  ;;  %1658 = vst.msk [vmem:[%s2530_s7 + $0x2c] sm:$0xf] %vm1646_vm2, %v1990_v41  ;;  %v2020_v56 = vpack.c.bf16 %v1367_v42, %v1367_v42  ;;  %v1269_v57 = vmul.f32 %v2507_v61, %v1198_v50  ;;  %v1196_v59 = vld [vmem:[#allocation2 + $0x60] sm:$0xff]  ;;  %v1100_v60 = vadd.f32 %v989_v53, %v418_v38  ;;  %v393_v33 = vld [vmem:[#allocation2 + $0xb8] sm:$0xff] }
 0x10e   : > { %v1071_v62 = vadd.f32 %v2097_v54, %v389_v39  ;;  %1690 = vst.msk [vmem:[%s2530_s7 + $0xac] sm:$0xf] %vm1646_vm2, %v2022_v48  ;;  %1656 = vst.msk [vmem:[%s2530_s7 + $0x24] sm:$0xf] %vm1646_vm2, %v1988_v49  ;;  %v1301_v1 = vmul.f32 %v2507_v61, %v1230_v58  ;;  %v1267_v2 = vmul.f32 %v2507_v61, %v1196_v59  ;;  %v1228_v3 = vld [vmem:[#allocation2 + $0x160] sm:$0xff]  ;;  %v2100_v31 = vpop.f32.mrb[20].mxu0 }
 0x10f   : > { %v1199_v4 = vld [vmem:[#allocation2 + $0x78] sm:$0xff]  ;;  %1167 = vst.msk [vmem:[#allocation2 + $0x190] sm:$0xff] %vm305_vm0, %v1102_v51  ;;  %1133 = vst.msk [vmem:[#allocation2 + $0x80] sm:$0xff] %vm305_vm0, %v1068_v52  ;;  %v1103_v5 = vadd.f32 %v2129_v63, %v421_v46  ;;  %v1069_v6 = vadd.f32 %v864_v0, %v387_v47  ;;  %v1340_v9 = vadd.f32 %v2512_v7, %v1269_v57  ;;  %v2132_v38 = vpop.f32.mrb[20].mxu1  ;;  %v877_v39 = vpop.f32.mrb[21].mxu0  ;;  %v391_v41 = vld [vmem:[#allocation2 + $0xa8] sm:$0xff] }
 0x110   : > { %1688 = vst.msk [vmem:[%s2530_s7 + $0xa4] sm:$0xf] %vm1646_vm2, %v2020_v56  ;;  %v1299_v10 = vmul.f32 %v2507_v61, %v1228_v3  ;;  %v1270_v11 = vmul.f32 %v2507_v61, %v1199_v4  ;;  %v1231_v12 = vld [vmem:[#allocation2 + $0x178] sm:$0xff]  ;;  %v1197_v13 = vld [vmem:[#allocation2 + $0x68] sm:$0xff]  ;;  %v1101_v14 = vadd.f32 %v992_v8, %v419_v55  ;;  %v1372_v15 = vadd.f32 %v2512_v7, %v1301_v1  ;;  %v1005_v47 = vpop.f32.mrb[21].mxu1  ;;  %v2101_v48 = vpop.f32.mrb[22].mxu0 }
 0x111   : > { %1165 = vst.msk [vmem:[#allocation2 + $0x180] sm:$0xff] %vm305_vm0, %v1100_v60  ;;  %1136 = vst.msk [vmem:[#allocation2 + $0x98] sm:$0xff] %vm305_vm0, %v1071_v62  ;;  %v1338_v16 = vadd.f32 %v2512_v7, %v1267_v2  ;;  %v1302_v17 = vmul.f32 %v2507_v61, %v1231_v12  ;;  %v1268_v18 = vmul.f32 %v2507_v61, %v1197_v13  ;;  %v1229_v19 = vld [vmem:[#allocation2 + $0x168] sm:$0xff]  ;;  %v425_v40 = vld [vmem:[#allocation2 + $0x1b8] sm:$0xff]  ;;  %v2133_v56 = vpop.f32.mrb[22].mxu1  ;;  %v880_v57 = vpop.f32.mrb[23].mxu0 }
 0x112   : > { %1168 = vst.msk [vmem:[#allocation2 + $0x198] sm:$0xff] %vm305_vm0, %v1103_v5  ;;  %1134 = vst.msk [vmem:[#allocation2 + $0x88] sm:$0xff] %vm305_vm0, %v1069_v6  ;;  %v1993_v21 = vpack.c.bf16 %v1340_v9, %v1340_v9  ;;  %v1370_v22 = vadd.f32 %v2512_v7, %v1299_v10  ;;  %v1341_v23 = vadd.f32 %v2512_v7, %v1270_v11  ;;  %v1202_v44 = vld [vmem:[#allocation2 + $0x90] sm:$0xff]  ;;  %v423_v49 = vld [vmem:[#allocation2 + $0x1a8] sm:$0xff]  ;;  %v1008_v1 = vpop.f32.mrb[23].mxu1 }
 0x113   : > { %v1300_v24 = vmul.f32 %v2507_v61, %v1229_v19  ;;  %1166 = vst.msk [vmem:[#allocation2 + $0x188] sm:$0xff] %vm305_vm0, %v1101_v14  ;;  %v2025_v27 = vpack.c.bf16 %v1372_v15, %v1372_v15  ;;  %v1991_v28 = vpack.c.bf16 %v1338_v16, %v1338_v16  ;;  %v1373_v29 = vadd.f32 %v2512_v7, %v1302_v17  ;;  %v396_v14 = vld [vmem:[#allocation2 + $0xd0] sm:$0xff] }
 0x114   : > { %v1339_v30 = vadd.f32 %v2512_v7, %v1268_v18  ;;  %1661 = vst.msk [vmem:[%s2530_s7 + $0x38] sm:$0xf] %vm1646_vm2, %v1993_v21  ;;  %v2023_v34 = vpack.c.bf16 %v1370_v22, %v1370_v22  ;;  %v1994_v35 = vpack.c.bf16 %v1341_v23, %v1341_v23  ;;  %v1074_v37 = vadd.f32 %v2100_v31, %v392_v20  ;;  %v428_v19 = vld [vmem:[#allocation2 + $0x1d0] sm:$0xff]  ;;  %v394_v20 = vld [vmem:[#allocation2 + $0xc0] sm:$0xff] }
 0x115   : > { %v1371_v36 = vadd.f32 %v2512_v7, %v1300_v24  ;;  %1693 = vst.msk [vmem:[%s2530_s7 + $0xb8] sm:$0xf] %vm1646_vm2, %v2025_v27  ;;  %1659 = vst.msk [vmem:[%s2530_s7 + $0x30] sm:$0xf] %vm1646_vm2, %v1991_v28  ;;  %v2026_v42 = vpack.c.bf16 %v1373_v29, %v1373_v29  ;;  %v1106_v45 = vadd.f32 %v2132_v38, %v424_v25  ;;  %v397_v27 = vld [vmem:[#allocation2 + $0xd8] sm:$0xff] }
 0x116   : > { %v1992_v43 = vpack.c.bf16 %v1339_v30, %v1339_v30  ;;  %v1072_v46 = vadd.f32 %v877_v39, %v390_v26  ;;  %1691 = vst.msk [vmem:[%s2530_s7 + $0xb0] sm:$0xf] %vm1646_vm2, %v2023_v34  ;;  %1662 = vst.msk [vmem:[%s2530_s7 + $0x3c] sm:$0xf] %vm1646_vm2, %v1994_v35  ;;  %v1273_v51 = vmul.f32 %v2507_v61, %v1202_v44  ;;  %v1234_v52 = vld [vmem:[#allocation2 + $0x190] sm:$0xff]  ;;  %v1200_v53 = vld [vmem:[#allocation2 + $0x80] sm:$0xff] }
 0x117   : > { %v2024_v50 = vpack.c.bf16 %v1371_v36, %v1371_v36  ;;  %1139 = vst.msk [vmem:[#allocation2 + $0xb0] sm:$0xff] %vm305_vm0, %v1074_v37  ;;  %v1104_v54 = vadd.f32 %v1005_v47, %v422_v32  ;;  %v1075_v55 = vadd.f32 %v2101_v48, %v393_v33  ;;  %v1305_v58 = vmul.f32 %v2507_v61, %v1234_v52  ;;  %v2104_v25 = vpop.f32.mrb[24].mxu0  ;;  %v426_v26 = vld [vmem:[#allocation2 + $0x1c0] sm:$0xff]  ;;  %v2136_v32 = vpop.f32.mrb[24].mxu1  ;;  %v429_v34 = vld [vmem:[#allocation2 + $0x1d8] sm:$0xff]  ;;  %v395_v35 = vld [vmem:[#allocation2 + $0xc8] sm:$0xff] }
 0x118   : > { %1694 = vst.msk [vmem:[%s2530_s7 + $0xbc] sm:$0xf] %vm1646_vm2, %v2026_v42  ;;  %1660 = vst.msk [vmem:[%s2530_s7 + $0x34] sm:$0xf] %vm1646_vm2, %v1992_v43  ;;  %v1271_v59 = vmul.f32 %v2507_v61, %v1200_v53  ;;  %v1232_v60 = vld [vmem:[#allocation2 + $0x180] sm:$0xff]  ;;  %v1203_v62 = vld [vmem:[#allocation2 + $0x98] sm:$0xff]  ;;  %v1107_v63 = vadd.f32 %v2133_v56, %v425_v40  ;;  %v1073_v0 = vadd.f32 %v880_v57, %v391_v41 }
 0x119   : > { %1171 = vst.msk [vmem:[#allocation2 + $0x1b0] sm:$0xff] %vm305_vm0, %v1106_v45  ;;  %1137 = vst.msk [vmem:[#allocation2 + $0xa0] sm:$0xff] %vm305_vm0, %v1072_v46  ;;  %v1344_v2 = vadd.f32 %v2512_v7, %v1273_v51  ;;  %v1303_v3 = vmul.f32 %v2507_v61, %v1232_v60  ;;  %v1274_v4 = vmul.f32 %v2507_v61, %v1203_v62  ;;  %v1235_v5 = vld [vmem:[#allocation2 + $0x198] sm:$0xff]  ;;  %v1201_v6 = vld [vmem:[#allocation2 + $0x88] sm:$0xff]  ;;  %v893_v33 = vpop.f32.mrb[25].mxu0  ;;  %v1021_v41 = vpop.f32.mrb[25].mxu1 }
 0x11a   : > { %1692 = vst.msk [vmem:[%s2530_s7 + $0xb4] sm:$0xf] %vm1646_vm2, %v2024_v50  ;;  %v1105_v8 = vadd.f32 %v1008_v1, %v423_v49  ;;  %v1376_v9 = vadd.f32 %v2512_v7, %v1305_v58  ;;  %v1342_v10 = vadd.f32 %v2512_v7, %v1271_v59  ;;  %v1306_v11 = vmul.f32 %v2507_v61, %v1235_v5  ;;  %v1233_v13 = vld [vmem:[#allocation2 + $0x188] sm:$0xff]  ;;  %v2105_v42 = vpop.f32.mrb[26].mxu0  ;;  %v2137_v50 = vpop.f32.mrb[26].mxu1 }
 0x11b   : > { %1169 = vst.msk [vmem:[#allocation2 + $0x1a0] sm:$0xff] %vm305_vm0, %v1104_v54  ;;  %1140 = vst.msk [vmem:[#allocation2 + $0xb8] sm:$0xff] %vm305_vm0, %v1075_v55  ;;  %v1272_v12 = vmul.f32 %v2507_v61, %v1201_v6  ;;  %v1997_v15 = vpack.c.bf16 %v1344_v2, %v1344_v2  ;;  %v1374_v16 = vadd.f32 %v2512_v7, %v1303_v3  ;;  %v427_v43 = vld [vmem:[#allocation2 + $0x1c8] sm:$0xff]  ;;  %v896_v51 = vpop.f32.mrb[27].mxu0  ;;  %v1024_v58 = vpop.f32.mrb[27].mxu1 }
 0x11c   : > { %1172 = vst.msk [vmem:[#allocation2 + $0x1b8] sm:$0xff] %vm305_vm0, %v1107_v63  ;;  %1138 = vst.msk [vmem:[#allocation2 + $0xa8] sm:$0xff] %vm305_vm0, %v1073_v0  ;;  %v1345_v17 = vadd.f32 %v2512_v7, %v1274_v4  ;;  %v1304_v18 = vmul.f32 %v2507_v61, %v1233_v13  ;;  %v2029_v21 = vpack.c.bf16 %v1376_v9, %v1376_v9  ;;  %v432_v13 = vld [vmem:[#allocation2 + $0x1f0] sm:$0xff] }
 0x11d   : > { %1170 = vst.msk [vmem:[#allocation2 + $0x1a8] sm:$0xff] %vm305_vm0, %v1105_v8  ;;  %v1995_v22 = vpack.c.bf16 %v1342_v10, %v1342_v10  ;;  %v1377_v23 = vadd.f32 %v2512_v7, %v1306_v11  ;;  %v1343_v24 = vadd.f32 %v2512_v7, %v1272_v12  ;;  %v2027_v28 = vpack.c.bf16 %v1374_v16, %v1374_v16  ;;  %v400_v8 = vld [vmem:[#allocation2 + $0xf0] sm:$0xff] }
 0x11e   : > { %1665 = vst.msk [vmem:[%s2530_s7 + $0x48] sm:$0xf] %vm1646_vm2, %v1997_v15  ;;  %v1998_v29 = vpack.c.bf16 %v1345_v17, %v1345_v17  ;;  %v1375_v30 = vadd.f32 %v2512_v7, %v1304_v18  ;;  %v1078_v31 = vadd.f32 %v2104_v25, %v396_v14  ;;  %1697 = vst.msk [vmem:[%s2530_s7 + $0xc8] sm:$0xf] %vm1646_vm2, %v2029_v21  ;;  %v1206_v38 = vld [vmem:[#allocation2 + $0xb0] sm:$0xff]  ;;  %v398_v14 = vld [vmem:[#allocation2 + $0xe0] sm:$0xff] }
 0x11f   : > { %1663 = vst.msk [vmem:[%s2530_s7 + $0x40] sm:$0xf] %vm1646_vm2, %v1995_v22  ;;  %v2030_v36 = vpack.c.bf16 %v1377_v23, %v1377_v23  ;;  %v1996_v37 = vpack.c.bf16 %v1343_v24, %v1343_v24  ;;  %v1110_v39 = vadd.f32 %v2136_v32, %v428_v19  ;;  %v1076_v40 = vadd.f32 %v893_v33, %v394_v20  ;;  %v2108_v19 = vpop.f32.mrb[28].mxu0  ;;  %v430_v20 = vld [vmem:[#allocation2 + $0x1e0] sm:$0xff]  ;;  %v401_v21 = vld [vmem:[#allocation2 + $0xf8] sm:$0xff] }
 0x120   : > { %1695 = vst.msk [vmem:[%s2530_s7 + $0xc0] sm:$0xf] %vm1646_vm2, %v2027_v28  ;;  %1666 = vst.msk [vmem:[%s2530_s7 + $0x4c] sm:$0xf] %vm1646_vm2, %v1998_v29  ;;  %v2028_v44 = vpack.c.bf16 %v1375_v30, %v1375_v30  ;;  %v1277_v45 = vmul.f32 %v2507_v61, %v1206_v38  ;;  %v1238_v46 = vld [vmem:[#allocation2 + $0x1b0] sm:$0xff]  ;;  %v1204_v47 = vld [vmem:[#allocation2 + $0xa0] sm:$0xff]  ;;  %v1108_v48 = vadd.f32 %v1021_v41, %v426_v26 }
 0x121   : > { %1143 = vst.msk [vmem:[#allocation2 + $0xd0] sm:$0xff] %vm305_vm0, %v1078_v31  ;;  %v1079_v49 = vadd.f32 %v2105_v42, %v397_v27  ;;  %v1309_v52 = vmul.f32 %v2507_v61, %v1238_v46  ;;  %v1275_v53 = vmul.f32 %v2507_v61, %v1204_v47  ;;  %1175 = vst.msk [vmem:[#allocation2 + $0x1d0] sm:$0xff] %vm305_vm0, %v1110_v39  ;;  %v2140_v26 = vpop.f32.mrb[28].mxu1  ;;  %v909_v27 = vpop.f32.mrb[29].mxu0  ;;  %v433_v28 = vld [vmem:[#allocation2 + $0x1f8] sm:$0xff]  ;;  %v399_v29 = vld [vmem:[#allocation2 + $0xe8] sm:$0xff] }
 0x122   : > { %1698 = vst.msk [vmem:[%s2530_s7 + $0xcc] sm:$0xf] %vm1646_vm2, %v2030_v36  ;;  %1664 = vst.msk [vmem:[%s2530_s7 + $0x44] sm:$0xf] %vm1646_vm2, %v1996_v37  ;;  %v1236_v54 = vld [vmem:[#allocation2 + $0x1a0] sm:$0xff]  ;;  %v1207_v55 = vld [vmem:[#allocation2 + $0xb8] sm:$0xff]  ;;  %v1111_v56 = vadd.f32 %v2137_v50, %v429_v34  ;;  %v1077_v57 = vadd.f32 %v896_v51, %v395_v35  ;;  %v1348_v59 = vadd.f32 %v2512_v7, %v1277_v45 }
 0x123   : > { %1141 = vst.msk [vmem:[#allocation2 + $0xc0] sm:$0xff] %vm305_vm0, %v1076_v40  ;;  %v1307_v60 = vmul.f32 %v2507_v61, %v1236_v54  ;;  %v1278_v62 = vmul.f32 %v2507_v61, %v1207_v55  ;;  %v1239_v63 = vld [vmem:[#allocation2 + $0x1b8] sm:$0xff]  ;;  %v1205_v0 = vld [vmem:[#allocation2 + $0xa8] sm:$0xff]  ;;  %1173 = vst.msk [vmem:[#allocation2 + $0x1c0] sm:$0xff] %vm305_vm0, %v1108_v48  ;;  %v1109_v1 = vadd.f32 %v1024_v58, %v427_v43  ;;  %v1037_v35 = vpop.f32.mrb[29].mxu1  ;;  %v2109_v36 = vpop.f32.mrb[30].mxu0 }
 0x124   : > { %1696 = vst.msk [vmem:[%s2530_s7 + $0xc4] sm:$0xf] %vm1646_vm2, %v2028_v44  ;;  %v1380_v2 = vadd.f32 %v2512_v7, %v1309_v52  ;;  %v1346_v3 = vadd.f32 %v2512_v7, %v1275_v53  ;;  %v1310_v4 = vmul.f32 %v2507_v61, %v1239_v63  ;;  %v1276_v5 = vmul.f32 %v2507_v61, %v1205_v0  ;;  %v1237_v6 = vld [vmem:[#allocation2 + $0x1a8] sm:$0xff]  ;;  %v2141_v44 = vpop.f32.mrb[30].mxu1  ;;  %v912_v45 = vpop.f32.mrb[31].mxu0 }
 0x125   : > { %1144 = vst.msk [vmem:[#allocation2 + $0xd8] sm:$0xff] %vm305_vm0, %v1079_v49  ;;  %1176 = vst.msk [vmem:[#allocation2 + $0x1d8] sm:$0xff] %vm305_vm0, %v1111_v56  ;;  %v2001_v9 = vpack.c.bf16 %v1348_v59, %v1348_v59  ;;  %v1378_v10 = vadd.f32 %v2512_v7, %v1307_v60  ;;  %v1349_v11 = vadd.f32 %v2512_v7, %v1278_v62  ;;  %v431_v37 = vld [vmem:[#allocation2 + $0x1e8] sm:$0xff]  ;;  %v1040_v52 = vpop.f32.mrb[31].mxu1 }
 0x126   : > { %1142 = vst.msk [vmem:[#allocation2 + $0xc8] sm:$0xff] %vm305_vm0, %v1077_v57  ;;  %v1308_v12 = vmul.f32 %v2507_v61, %v1237_v6  ;;  %1174 = vst.msk [vmem:[#allocation2 + $0x1c8] sm:$0xff] %vm305_vm0, %v1109_v1  ;;  %v2033_v15 = vpack.c.bf16 %v1380_v2, %v1380_v2  ;;  %v1999_v16 = vpack.c.bf16 %v1346_v3, %v1346_v3 }
 0x127   : > { %v1381_v17 = vadd.f32 %v2512_v7, %v1310_v4  ;;  %v1347_v18 = vadd.f32 %v2512_v7, %v1276_v5  ;;  %1669 = vst.msk [vmem:[%s2530_s7 + $0x58] sm:$0xf] %vm1646_vm2, %v2001_v9  ;;  %v2031_v22 = vpack.c.bf16 %v1378_v10, %v1378_v10  ;;  %v2002_v23 = vpack.c.bf16 %v1349_v11, %v1349_v11 }
 0x128   : > { %v1379_v24 = vadd.f32 %v2512_v7, %v1308_v12  ;;  %v1082_v25 = vadd.f32 %v2108_v19, %v400_v8  ;;  %1701 = vst.msk [vmem:[%s2530_s7 + $0xd8] sm:$0xf] %vm1646_vm2, %v2033_v15  ;;  %1667 = vst.msk [vmem:[%s2530_s7 + $0x50] sm:$0xf] %vm1646_vm2, %v1999_v16  ;;  %v1210_v32 = vld [vmem:[#allocation2 + $0xd0] sm:$0xff]  ;;  %v1114_v33 = vadd.f32 %v2140_v26, %v432_v13 }
 0x129   : > { %v2034_v30 = vpack.c.bf16 %v1381_v17, %v1381_v17  ;;  %v2000_v31 = vpack.c.bf16 %v1347_v18, %v1347_v18  ;;  %v1080_v34 = vadd.f32 %v909_v27, %v398_v14  ;;  %1699 = vst.msk [vmem:[%s2530_s7 + $0xd0] sm:$0xf] %vm1646_vm2, %v2031_v22  ;;  %1670 = vst.msk [vmem:[%s2530_s7 + $0x5c] sm:$0xf] %vm1646_vm2, %v2002_v23  ;;  %v1242_v40 = vld [vmem:[#allocation2 + $0x1d0] sm:$0xff] }
 0x12a   : > { %v2032_v38 = vpack.c.bf16 %v1379_v24, %v1379_v24  ;;  %v1281_v39 = vmul.f32 %v2507_v61, %v1210_v32  ;;  %v1208_v41 = vld [vmem:[#allocation2 + $0xc0] sm:$0xff]  ;;  %1147 = vst.msk [vmem:[#allocation2 + $0xf0] sm:$0xff] %vm305_vm0, %v1082_v25  ;;  %v1112_v42 = vadd.f32 %v1037_v35, %v430_v20  ;;  %v1083_v43 = vadd.f32 %v2109_v36, %v401_v21 }
 0x12b   : > { %1702 = vst.msk [vmem:[%s2530_s7 + $0xdc] sm:$0xf] %vm1646_vm2, %v2034_v30  ;;  %1668 = vst.msk [vmem:[%s2530_s7 + $0x54] sm:$0xf] %vm1646_vm2, %v2000_v31  ;;  %v1313_v46 = vmul.f32 %v2507_v61, %v1242_v40  ;;  %v1279_v47 = vmul.f32 %v2507_v61, %v1208_v41  ;;  %v1240_v48 = vld [vmem:[#allocation2 + $0x1c0] sm:$0xff]  ;;  %v1115_v50 = vadd.f32 %v2141_v44, %v433_v28 }
 0x12c   : > { %v1211_v49 = vld [vmem:[#allocation2 + $0xd8] sm:$0xff]  ;;  %1179 = vst.msk [vmem:[#allocation2 + $0x1f0] sm:$0xff] %vm305_vm0, %v1114_v33  ;;  %1145 = vst.msk [vmem:[#allocation2 + $0xe0] sm:$0xff] %vm305_vm0, %v1080_v34  ;;  %v1081_v51 = vadd.f32 %v912_v45, %v399_v29  ;;  %v1352_v53 = vadd.f32 %v2512_v7, %v1281_v39  ;;  %v1311_v54 = vmul.f32 %v2507_v61, %v1240_v48  ;;  %v2202_v25 = vld [vmem:[%s2840_s2] ss:$0 sm:$0xff] }
 0x12d   : > { %1700 = vst.msk [vmem:[%s2530_s7 + $0xd4] sm:$0xf] %vm1646_vm2, %v2032_v38  ;;  %v1282_v55 = vmul.f32 %v2507_v61, %v1211_v49  ;;  %v1243_v56 = vld [vmem:[#allocation2 + $0x1d8] sm:$0xff]  ;;  %v1209_v57 = vld [vmem:[#allocation2 + $0xc8] sm:$0xff]  ;;  %v1113_v58 = vadd.f32 %v1040_v52, %v431_v37  ;;  %v1384_v59 = vadd.f32 %v2512_v7, %v1313_v46  ;;  %v1350_v60 = vadd.f32 %v2512_v7, %v1279_v47  ;;  %v2203_v35 = vld [vmem:[%s2841_s3] ss:$0 sm:$0xff] }
 0x12e   : > { %1177 = vst.msk [vmem:[#allocation2 + $0x1e0] sm:$0xff] %vm305_vm0, %v1112_v42  ;;  %1148 = vst.msk [vmem:[#allocation2 + $0xf8] sm:$0xff] %vm305_vm0, %v1083_v43  ;;  %v1314_v62 = vmul.f32 %v2507_v61, %v1243_v56  ;;  %v1280_v63 = vmul.f32 %v2507_v61, %v1209_v57  ;;  %v1241_v0 = vld [vmem:[#allocation2 + $0x1c8] sm:$0xff]  ;;  %v2005_v1 = vpack.c.bf16 %v1352_v53, %v1352_v53 }
 0x12f   : > { %1180 = vst.msk [vmem:[#allocation2 + $0x1f8] sm:$0xff] %vm305_vm0, %v1115_v50  ;;  %1146 = vst.msk [vmem:[#allocation2 + $0xe8] sm:$0xff] %vm305_vm0, %v1081_v51  ;;  %v1382_v2 = vadd.f32 %v2512_v7, %v1311_v54  ;;  %v1353_v3 = vadd.f32 %v2512_v7, %v1282_v55  ;;  %v1312_v4 = vmul.f32 %v2507_v61, %v1241_v0 }
 0x130   : > { %1178 = vst.msk [vmem:[#allocation2 + $0x1e8] sm:$0xff] %vm305_vm0, %v1113_v58  ;;  %v2037_v5 = vpack.c.bf16 %v1384_v59, %v1384_v59  ;;  %v2003_v6 = vpack.c.bf16 %v1350_v60, %v1350_v60  ;;  %v1385_v8 = vadd.f32 %v2512_v7, %v1314_v62  ;;  %v1351_v9 = vadd.f32 %v2512_v7, %v1280_v63 }
 0x131   : > { %1673 = vst.msk [vmem:[%s2530_s7 + $0x68] sm:$0xf] %vm1646_vm2, %v2005_v1  ;;  %v2035_v10 = vpack.c.bf16 %v1382_v2, %v1382_v2  ;;  %v2006_v11 = vpack.c.bf16 %v1353_v3, %v1353_v3  ;;  %v1383_v12 = vadd.f32 %v2512_v7, %v1312_v4  ;;  %v1214_v15 = vld [vmem:[#allocation2 + $0xf0] sm:$0xff] }
 0x132   : > { %1705 = vst.msk [vmem:[%s2530_s7 + $0xe8] sm:$0xf] %vm1646_vm2, %v2037_v5  ;;  %1671 = vst.msk [vmem:[%s2530_s7 + $0x60] sm:$0xf] %vm1646_vm2, %v2003_v6  ;;  %v2038_v13 = vpack.c.bf16 %v1385_v8, %v1385_v8  ;;  %v2004_v14 = vpack.c.bf16 %v1351_v9, %v1351_v9  ;;  %v1285_v17 = vmul.f32 %v2507_v61, %v1214_v15 }
 0x133   : > { %1703 = vst.msk [vmem:[%s2530_s7 + $0xe0] sm:$0xf] %vm1646_vm2, %v2035_v10  ;;  %1674 = vst.msk [vmem:[%s2530_s7 + $0x6c] sm:$0xf] %vm1646_vm2, %v2006_v11  ;;  %v2036_v16 = vpack.c.bf16 %v1383_v12, %v1383_v12  ;;  %v1246_v18 = vld [vmem:[#allocation2 + $0x1f0] sm:$0xff]  ;;  %v1212_v19 = vld [vmem:[#allocation2 + $0xe0] sm:$0xff] }
 0x134   : > { %1706 = vst.msk [vmem:[%s2530_s7 + $0xec] sm:$0xf] %vm1646_vm2, %v2038_v13  ;;  %1672 = vst.msk [vmem:[%s2530_s7 + $0x64] sm:$0xf] %vm1646_vm2, %v2004_v14  ;;  %v1317_v20 = vmul.f32 %v2507_v61, %v1246_v18  ;;  %v1283_v21 = vmul.f32 %v2507_v61, %v1212_v19  ;;  %v1356_v24 = vadd.f32 %v2512_v7, %v1285_v17 }
 0x135   : > { %v1244_v22 = vld [vmem:[#allocation2 + $0x1e0] sm:$0xff]  ;;  %v1215_v23 = vld [vmem:[#allocation2 + $0xf8] sm:$0xff]  ;;  %1704 = vst.msk [vmem:[%s2530_s7 + $0xe4] sm:$0xf] %vm1646_vm2, %v2036_v16 }
 0x136   : > { %v1315_v26 = vmul.f32 %v2202_v25, %v1244_v22  ;;  %v1286_v27 = vmul.f32 %v2202_v25, %v1215_v23  ;;  %v1247_v28 = vld [vmem:[#allocation2 + $0x1f8] sm:$0xff]  ;;  %v1213_v29 = vld [vmem:[#allocation2 + $0xe8] sm:$0xff]  ;;  %v1388_v30 = vadd.f32 %v2512_v7, %v1317_v20  ;;  %v1354_v31 = vadd.f32 %v2512_v7, %v1283_v21 }
 0x137   : > { %v1318_v61 = vmul.f32 %v2202_v25, %v1247_v28  ;;  %v1284_v32 = vmul.f32 %v2202_v25, %v1213_v29  ;;  %v1245_v33 = vld [vmem:[#allocation2 + $0x1e8] sm:$0xff]  ;;  %v2009_v34 = vpack.c.bf16 %v1356_v24, %v1356_v24 }
 0x138   : > { %v1386_v36 = vadd.f32 %v2203_v35, %v1315_v26  ;;  %v1357_v37 = vadd.f32 %v2203_v35, %v1286_v27  ;;  %v1316_v38 = vmul.f32 %v2202_v25, %v1245_v33  ;;  %v2041_v39 = vpack.c.bf16 %v1388_v30, %v1388_v30 }
 0x139   : > { %v2007_v40 = vpack.c.bf16 %v1354_v31, %v1354_v31  ;;  %v1389_v7 = vadd.f32 %v2203_v35, %v1318_v61  ;;  %v1355_v41 = vadd.f32 %v2203_v35, %v1284_v32  ;;  %1677 = vst.msk [vmem:[%s2530_s7 + $0x78] sm:$0xf] %vm1646_vm2, %v2009_v34 }
 0x13a   : > { %v2039_v42 = vpack.c.bf16 %v1386_v36, %v1386_v36  ;;  %v2010_v43 = vpack.c.bf16 %v1357_v37, %v1357_v37  ;;  %v1387_v44 = vadd.f32 %v2203_v35, %v1316_v38  ;;  %1709 = vst.msk [vmem:[%s2530_s7 + $0xf8] sm:$0xf] %vm1646_vm2, %v2041_v39 }
 0x13b   : > { %1675 = vst.msk [vmem:[%s2530_s7 + $0x70] sm:$0xf] %vm1646_vm2, %v2007_v40  ;;  %v2042_v45 = vpack.c.bf16 %v1389_v7, %v1389_v7  ;;  %v2008_v46 = vpack.c.bf16 %v1355_v41, %v1355_v41 }
 0x13c   : > { %1707 = vst.msk [vmem:[%s2530_s7 + $0xf0] sm:$0xf] %vm1646_vm2, %v2039_v42  ;;  %1678 = vst.msk [vmem:[%s2530_s7 + $0x7c] sm:$0xf] %vm1646_vm2, %v2010_v43  ;;  %v2040_v47 = vpack.c.bf16 %v1387_v44, %v1387_v44 }
 0x13d   : > { %1710 = vst.msk [vmem:[%s2530_s7 + $0xfc] sm:$0xf] %vm1646_vm2, %v2042_v45  ;;  %1676 = vst.msk [vmem:[%s2530_s7 + $0x74] sm:$0xf] %vm1646_vm2, %v2008_v46 }
 0x13e   : > { %1708 = vst.msk [vmem:[%s2530_s7 + $0xf4] sm:$0xf] %vm1646_vm2, %v2040_v47 }
 0x13f PF: > { %s14_s17 = sadd.s32 1, %s2226_s17   ;;  %s2844_s15 = smov %s2222_s16 }
 0x140   : > { %p11_p5 = scmp.ge.s32.totalorder %s14_s17, 10   ;;  %s2845_s16 = smov %s2847_s18 }
 0x142   :  { %13 = sbr.rel (!%p11_p5) target bundleno = 2 (0x2), region = 83 }

// kernel: decoder_bottleneck_forward.14
= control target key start
LH: loop header
LB: loop body
LE: loop exit
PB: predicated region body
PF: predicated region fallthrough
CT: control target
= control target key end

     0   :  { %s5471_s15 = smov 0   ;;  %s5473_s16 = smov 0   ;;  %s7125_s0 = inlined_call_operand.vmem [shape: bf16[2,8,256,8], index: 0, kind: input, shape index: {}]   ;;  %s7126_s1 = inlined_call_operand.vmem [shape: bf16[3,3,3,8,8], index: 1, kind: input, shape index: {}]   ;;  %s7127_s2 = inlined_call_operand.vmem [shape: f32[1,8], index: 2, kind: input, shape index: {}]   ;;  %s7128_s3 = inlined_call_operand.vmem [shape: f32[1,8], index: 3, kind: input, shape index: {}]   ;;  %s7129_s4 = inlined_call_operand.vmem [shape: bf16[2,8,256,8], index: 4, kind: output, shape index: {}]  }
   0x1   :  { %s5475_s17 = smov 0   ;;  %s5477_s18 = smov 0  }
   0x2   :  { %s5479_s19 = smov 0   ;;  %s5481_s20 = smov 0  }
   0x3   :  { %s5483_s21 = smov 0  }
   0x4 LB: > { %s26_s22 = sadd.s32 1, %s5429_s18  ;;  %s29_s23 = sadd.s32 1, %s5433_s19  ;;  %s5441_s21 = sphi %s5483_s21, %s14_s21   ;;  %s5437_s20 = sphi %s5481_s20, %s7788_s20   ;;  %s5433_s19 = sphi %s5479_s19, %s7787_s19   ;;  %s5429_s18 = sphi %s5477_s18, %s7786_s18   ;;  %s5425_s17 = sphi %s5475_s17, %s7785_s17   ;;  %s5421_s16 = sphi %s5473_s16, %s7784_s16   ;;  %s5417_s15 = sphi %s5471_s15, %s7783_s15  }
   0x5   : > { %p27_p0 = scmp.ge.s32.totalorder %s26_s22, 3  ;;  %p4262_p1 = scmp.ge.s32.totalorder %s5441_s21, 1 }
   0x6   : > { %p223_p2 = scmp.lt.s32.totalorder %s5441_s21, 49  ;;  %s33_s24 = sadd.s32 1, %s5437_s20 }
   0x7   : > { %s7790_s22 = smov (%p27_p0, %s26_s22), 0  ;;  %s7792_s23 = smov (!%p27_p0, %s29_s23), %s5433_s19 }
   0x8   : > { %p224_p3 = pnand %p4262_p1, %p223_p2  ;;  %p31_p4 = scmp.ge.s32.totalorder %s7792_s23, 8 }
   0x9   : > { %s268_s25 = sadd.s32 (!%p224_p3), %s5417_s15, %s5421_s16  ;;  %p274_p6 = scmp.lt.s32.totalorder (!%p224_p3), %s5425_s17, 1 }
   0xa   : > { %s7794_s23 = smov (%p31_p4, %s7792_s23), 0  ;;  %s7796_s24 = smov (!%p31_p4, %s33_s24), %s5437_s20 }
   0xb   : > { %7292 = sst [smem:[#allocation3_spill]] %s7794_s23  ;;  %p35_p5 = scmp.ge.s32.totalorder %s7796_s24, 2 }
   0xc   : > { %227 = sbr.rel (%p224_p3) target bundleno = 625 (0x271), region = 36  ;;  %s5519_s26 = sadd.s32 (!%p224_p3), 4294967295, %s268_s25 }
   0xd   : > { %s7798_s24 = smov (%p35_p5, %s7796_s24), 0  ;;  %p270_p7 = scmp.gt.s32.totalorder (!%p224_p3), %s5519_s26, 0 }
   0xe   : > { %7293 = sst [smem:[#allocation4_spill]] %s7798_s24  ;;  %p4264_p8 = scmp.lt.s32.totalorder (!%p224_p3), %s5519_s26, 7 }
   0xf   : > { %p289_p9 = scmp.lt.s32.totalorder (!%p224_p3), %s5417_s15, 2  ;;  %p296_p11 = scmp.lt.s32.totalorder (!%p224_p3), %s5421_s16, 7 }
  0x10   : > { %p4276_p12 = scmp.ne.s32.totalorder (!%p224_p3), %s5417_s15, 0 }
  0x13   : > { %s271_s27 = scalar_select %p270_p7, %s5519_s26, 0 }
  0x14   : > { %s7800_s17 = smov (!%p274_p6, %s5425_s17), 1  ;;  %s7806_s16 = smov (!%p296_p11, %s5421_s16), 7 }
  0x15   : > { %s7802_s27 = smov (!%p4264_p8, %s271_s27), 7  ;;  %s4270_s29 = sshll.u32 %s7800_s17, 8  ;;  %vm310_vm0 = vcmask (!%p4276_p12), 64512   ;;  %v5443_v0 = vmov (!%p4276_p12), 0.0  }
  0x16   : > { %s290_s28 = scalar_select %p289_p9, %s5417_s15, 2 }
  0x17   : > { %p276_p10 = scmp.lt.s32.totalorder %s7802_s27, 7  ;;  %s4273_s14 = sshll.u32 %s7806_s16, 5  ;;  %311 = vst.msk [vmem:[#allocation2] sm:$0xff] (!%p4276_p12), %vm310_vm0, %v5443_v0  ;;  %312 = vst.msk [vmem:[#allocation2 + $0x8] sm:$0xff] (!%p4276_p12), %vm310_vm0, %v5443_v0 }
  0x18   : > { %s5293_s30 = smul.u32 36, %s290_s28  ;;  %s300_s25 = sadd.s32 %s4273_s14, %s4270_s29  ;;  %313 = vst.msk [vmem:[#allocation2 + $0x10] sm:$0xff] (!%p4276_p12), %vm310_vm0, %v5443_v0  ;;  %314 = vst.msk [vmem:[#allocation2 + $0x18] sm:$0xff] (!%p4276_p12), %vm310_vm0, %v5443_v0 }
  0x19   : > { %s7804_s27 = smov (!%p276_p10, %s7802_s27), 7  ;;  %s4275_s17 = sshll.u32 %s300_s25, 2  ;;  %315 = vst.msk [vmem:[#allocation2 + $0x20] sm:$0xff] (!%p4276_p12), %vm310_vm0, %v5443_v0  ;;  %316 = vst.msk [vmem:[#allocation2 + $0x28] sm:$0xff] (!%p4276_p12), %vm310_vm0, %v5443_v0 }
  0x1a   : > { %s5529_s7 = scalar_lea.vmem %s7126_s1, %s5293_s30  ;;  %s4269_s8 = sshll.u32 %s7804_s27, 5  ;;  %317 = vst.msk [vmem:[#allocation2 + $0x30] sm:$0xff] (!%p4276_p12), %vm310_vm0, %v5443_v0  ;;  %318 = vst.msk [vmem:[#allocation2 + $0x38] sm:$0xff] (!%p4276_p12), %vm310_vm0, %v5443_v0 }
  0x1b   : > { %s280_s9 = sadd.s32 %s4270_s29, %s4269_s8  ;;  %s5541_s23 = scalar_lea.vmem %s7129_s4, %s4275_s17  ;;  %319 = vst.msk [vmem:[#allocation2 + $0x40] sm:$0xff] (!%p4276_p12), %vm310_vm0, %v5443_v0  ;;  %320 = vst.msk [vmem:[#allocation2 + $0x48] sm:$0xff] (!%p4276_p12), %vm310_vm0, %v5443_v0 }
  0x1c   : > { %s4271_s10 = sshll.u32 %s280_s9, 2  ;;  %309 = sbr.rel (%p4276_p12) target bundleno = 39 (0x27), region = 40  ;;  %321 = vst.msk [vmem:[#allocation2 + $0x50] sm:$0xff] (!%p4276_p12), %vm310_vm0, %v5443_v0  ;;  %322 = vst.msk [vmem:[#allocation2 + $0x58] sm:$0xff] (!%p4276_p12), %vm310_vm0, %v5443_v0 }
  0x1d   : > { %s5535_s13 = scalar_lea.vmem %s7125_s0, %s4271_s10  ;;  %323 = vst.msk [vmem:[#allocation2 + $0x60] sm:$0xff] (!%p4276_p12), %vm310_vm0, %v5443_v0  ;;  %324 = vst.msk [vmem:[#allocation2 + $0x68] sm:$0xff] (!%p4276_p12), %vm310_vm0, %v5443_v0 }
  0x1e   : > { %325 = vst.msk [vmem:[#allocation2 + $0x70] sm:$0xff] (!%p4276_p12), %vm310_vm0, %v5443_v0  ;;  %326 = vst.msk [vmem:[#allocation2 + $0x78] sm:$0xff] (!%p4276_p12), %vm310_vm0, %v5443_v0 }
  0x1f   : > { %327 = vst.msk [vmem:[#allocation2 + $0x80] sm:$0xff] (!%p4276_p12), %vm310_vm0, %v5443_v0  ;;  %328 = vst.msk [vmem:[#allocation2 + $0x88] sm:$0xff] (!%p4276_p12), %vm310_vm0, %v5443_v0 }
  0x20   : > { %329 = vst.msk [vmem:[#allocation2 + $0x90] sm:$0xff] (!%p4276_p12), %vm310_vm0, %v5443_v0  ;;  %330 = vst.msk [vmem:[#allocation2 + $0x98] sm:$0xff] (!%p4276_p12), %vm310_vm0, %v5443_v0 }
  0x21   : > { %331 = vst.msk [vmem:[#allocation2 + $0xa0] sm:$0xff] (!%p4276_p12), %vm310_vm0, %v5443_v0  ;;  %332 = vst.msk [vmem:[#allocation2 + $0xa8] sm:$0xff] (!%p4276_p12), %vm310_vm0, %v5443_v0 }
  0x22   : > { %333 = vst.msk [vmem:[#allocation2 + $0xb0] sm:$0xff] (!%p4276_p12), %vm310_vm0, %v5443_v0  ;;  %334 = vst.msk [vmem:[#allocation2 + $0xb8] sm:$0xff] (!%p4276_p12), %vm310_vm0, %v5443_v0 }
  0x23   : > { %335 = vst.msk [vmem:[#allocation2 + $0xc0] sm:$0xff] %vm310_vm0, %v5443_v0  ;;  %336 = vst.msk [vmem:[#allocation2 + $0xc8] sm:$0xff] %vm310_vm0, %v5443_v0 }
  0x24   : > { %337 = vst.msk [vmem:[#allocation2 + $0xd0] sm:$0xff] %vm310_vm0, %v5443_v0  ;;  %338 = vst.msk [vmem:[#allocation2 + $0xd8] sm:$0xff] %vm310_vm0, %v5443_v0 }
  0x25   : > { %339 = vst.msk [vmem:[#allocation2 + $0xe0] sm:$0xff] %vm310_vm0, %v5443_v0  ;;  %340 = vst.msk [vmem:[#allocation2 + $0xe8] sm:$0xff] %vm310_vm0, %v5443_v0 }
  0x26   : > { %341 = vst.msk [vmem:[#allocation2 + $0xf0] sm:$0xff] %vm310_vm0, %v5443_v0  ;;  %342 = vst.msk [vmem:[#allocation2 + $0xf8] sm:$0xff] %vm310_vm0, %v5443_v0 }
  0x27 PF: > { %p345_p13 = scmp.ge.s32.totalorder %s5519_s26, 0  ;;  %p346_p0 = scmp.lt.s32.totalorder %s5519_s26, 8 }
  0x29   : > { %p347_p1 = pnand %p346_p0, %p345_p13 }
  0x2b   : > { %350 = sbr.rel (%p347_p1) target bundleno = 584 (0x248), region = 44 }
  0x32   : > { %v4308_v1 = vld [vmem:[%s5529_s7 + $0x4] sm:$0xf]  ;;  %vm7171_vm1 = vcmask 1043456   ;;  %v4392_v2 = vld [vmem:[%s5529_s7 + $0x10] sm:$0xf]  ;;  %v383_v3 = vlaneseq  ;;  %vm7172_vm2 = vcmask 64512  }
  0x33   : > { %5283 = vmatprep.subr.msk.bf16.mxu1 %vm7171_vm1, %v4308_v1  ;;  %5287 = vmatprep.subr.msk.bf16.mxu0 %vm7171_vm1, %v4392_v2  ;;  %v1219_v4 = vsel %vm7171_vm1, %v4308_v1, 0  ;;  %v5584_v5 = vsel %vm7171_vm1, %v4392_v2, 0  ;;  %v351_v6 = vld [vmem:[%s5535_s13] sm:$0xf]  ;;  %v352_v7 = vld [vmem:[%s5535_s13 + $0x4] sm:$0xf] }
  0x34   : > { %7294 = vst [vmem:[#allocation5_spill] sm:$0xff] %v5584_v5  ;;  %4720 = vmatpush3.bf16.msra.mxu1 %v1219_v4  ;;  %4856 = vmatpush3.bf16.msra.mxu0 %v5584_v5  ;;  %v353_v8 = vld [vmem:[%s5535_s13 + $0x8] sm:$0xf]  ;;  %v354_v9 = vld [vmem:[%s5535_s13 + $0xc] sm:$0xf]  ;;  %v5591_v10 = vcombine.low %v351_v6, %v352_v7  ;;  %v5593_v11 = vshrl.u32 %v383_v3, 7 }
  0x35   : > { %v7142_v12 = vmov 0   ;;  %v5596_v13 = vcombine.low %v353_v8, %v354_v9  ;;  %v5598_v14 = vcombine.low %v352_v7, %v353_v8  ;;  %v1180_v15 = vld [vmem:[%s5529_s7] sm:$0xf]  ;;  %v4409_v16 = vld [vmem:[%s5529_s7 + $0x14] sm:$0xf]  ;;  %vm5445_vm3 = vmmov 0  }
  0x36   : > { %4721 = vmatprep.mubr.bf16.mxu1 %v7142_v12  ;;  %v355_v17 = vld [vmem:[%s5535_s13 + $0x10] sm:$0xf]  ;;  %4857 = vmatprep.mubr.msk.bf16.mxu0 %vm7172_vm2, %v5591_v10  ;;  %v1428_v18 = vsel %vm7171_vm1, %v1180_v15, 0  ;;  %v2640_v19 = vsel %vm7171_vm1, %v4409_v16, 0  ;;  %v356_v20 = vld [vmem:[%s5535_s13 + $0x14] sm:$0xf]  ;;  %vm1046_vm4 = vmpackc.low %vm5445_vm3, %vm5445_vm3 }
  0x37   : > { %7295 = vst [vmem:[#allocation6_spill] sm:$0xff] %v5596_v13  ;;  %5284 = vmatprep.subr.msk.bf16.mxu1 %vm7171_vm1, %v1180_v15  ;;  %v357_v21 = vld [vmem:[%s5535_s13 + $0x18] sm:$0xf]  ;;  %v5610_v22 = vcombine.low %v354_v9, %v355_v17  ;;  %4722 = vmatmul.mubr.msk.bf16.vlgmr.msra.gmra.mrb[0].mxu1 %vm7172_vm2, %v5591_v10  ;;  %v5616_v23 = vcombine.low %v355_v17, %v356_v20  ;;  %v358_v24 = vld [vmem:[%s5535_s13 + $0x1c] sm:$0xf]  ;;  %v385_v40 = vadd.s32 8, %v5593_v11 }
  0x38   : > { %4858 = vmatmul.mubr.msk.bf16.vlgmr.msra.gmra.mrb[0].mxu0 %vm7172_vm2, %v5596_v13  ;;  %v5619_v25 = vcombine.low %v356_v20, %v357_v21  ;;  %v359_v26 = vld [vmem:[%s5535_s13 + $0x20] sm:$0xf]  ;;  %v360_v27 = vld [vmem:[%s5535_s13 + $0x24] sm:$0xf]  ;;  %5289 = vmatprep.subr.msk.bf16.mxu0 %vm7171_vm1, %v4409_v16  ;;  %v361_v28 = vld [vmem:[%s5535_s13 + $0x28] sm:$0xf]  ;;  %v5644_v36 = vcombine.low %v357_v21, %v358_v24 }
  0x39   : > { %7296 = vst [vmem:[#allocation7_spill] sm:$0xff] %v5616_v23  ;;  %4754 = vmatpush3.bf16.msra.mxu1 %v1428_v18  ;;  %v5626_v29 = vld [vmem:[%s5535_s13 + $0x2c] sm:$0xf]  ;;  %v5628_v30 = vcombine.low %v358_v24, %v359_v26  ;;  %4890 = vmatpush3.bf16.msra.mxu0 %v2640_v19  ;;  %v5635_v33 = vld [vmem:[%s5535_s13 + $0x30] sm:$0xf]  ;;  %v5640_v35 = vcombine.low %v360_v27, %v361_v28  ;;  %v387_v41 = vadd.s32 24, %v5593_v11 }
  0x3a   : > { %4725 = vmatprep.mubr.msk.bf16.mxu1 %vm7172_vm2, %v5596_v13  ;;  %v5638_v34 = vld [vmem:[%s5535_s13 + $0x34] sm:$0xf]  ;;  %4861 = vmatprep.mubr.msk.bf16.mxu0 %vm7172_vm2, %v5616_v23  ;;  %7297 = vst [vmem:[#allocation8_spill] sm:$0xff] %v5644_v36  ;;  %v5646_v37 = vcombine.low %v359_v26, %v360_v27  ;;  %v5649_v38 = vld [vmem:[%s5535_s13 + $0x38] sm:$0xf]  ;;  %v5657_v42 = vcombine.low %v361_v28, %v5626_v29  ;;  %v877_v43 = vshrl.u32 %v5591_v10, 16 }
  0x3b   : > { %v5652_v39 = vld [vmem:[%s5535_s13 + $0x3c] sm:$0xf]  ;;  %v7139_v44 = vshll.u32 %v5591_v10, 16  ;;  %v7135_v45 = vshll.u32 %v5596_v13, 16  ;;  %v427_v46 = vand.u32 15, %v385_v40  ;;  %v441_v47 = vand.u32 15, %v387_v41 }
  0x3c   : > { %7298 = vst [vmem:[#allocation9_spill] sm:$0xff] %v5646_v37  ;;  %7299 = vst [vmem:[#allocation10_spill] sm:$0xff] %v5657_v42  ;;  %v7136_v48 = vshrl.u32 %v5596_v13, 16  ;;  %v5664_v49 = vld [vmem:[%s5535_s13 + $0x40] sm:$0xf]  ;;  %v5668_v50 = vcombine.low %v5635_v33, %v5638_v34  ;;  %v5672_v51 = vcombine.low %v5649_v38, %v5652_v39  ;;  %v5685_v56 = vsel %vm1046_vm4, 65537, %v7142_v12 }
  0x3d   : > { %v5676_v52 = vrot.slane %v7139_v44, 1  ;;  %v1597_v53 = vrot.slane %v7135_v45, 1  ;;  %v5681_v54 = vld [vmem:[%s5535_s13 + $0x44] sm:$0xf]  ;;  %v4442_v55 = vld [vmem:[%s5529_s7 + $0x18] sm:$0xf] }
  0x3e   : > { %7300 = vst [vmem:[#allocation11_spill] sm:$0xff] %v5668_v50  ;;  %7301 = vst [vmem:[#allocation12_spill] sm:$0xff] %v5672_v51  ;;  %vm5687_vm5 = vcmp.eq.s32.totalorder %v427_v46, 15  ;;  %vm5691_vm6 = vcmp.eq.s32.totalorder %v441_v47, 15  ;;  %v7133_v59 = vshll.u32 %v5616_v23, 16  ;;  %5290 = vmatprep.subr.msk.bf16.mxu0 %vm7171_vm1, %v4442_v55  ;;  %v5701_v60 = vrot.slane %v877_v43, 7 }
  0x3f   : > { %7302 = vst [vmem:[#allocation13_spill] sm:$0xff] %v5676_v52  ;;  %4726 = vmatmul.mubr.msk.bf16.gmra.mrb[4].mxu1 %vm7172_vm2, %v5616_v23  ;;  %vm7165_vm7 = vsmask.f32 7424  ;;  %v1596_v61 = vor.u32 %v5676_v52, %v877_v43  ;;  %vm1696_vm8 = vmpackc.low %vm5687_vm5, %vm5687_vm5  ;;  %v389_v62 = vadd.s32 40, %v5593_v11  ;;  %v1599_v63 = vor.u32 %v1597_v53, %v7136_v48  ;;  %v5723_v2 = vld [vmem:[%s5535_s13 + $0x48] sm:$0xf] }
  0x40   : > { %4862 = vmatmul.mubr.msk.bf16.gmra.mrb[4].mxu0 %vm7172_vm2, %v5644_v36  ;;  %4729 = vmatprep.mubr.msk.bf16.mxu1 %vm7172_vm2, %v5644_v36  ;;  %vm1698_vm9 = vmpackc.low %vm5691_vm6, %vm5691_vm6  ;;  %v1728_v0 = vsel %vm1696_vm8, 65537, %v7142_v12  ;;  %v5720_v1 = vcombine.low %v5664_v49, %v5681_v54  ;;  %v7134_v3 = vshrl.u32 %v5616_v23, 16  ;;  %v1600_v7 = vrot.slane %v7133_v59, 1  ;;  %v5731_v8 = vld [vmem:[%s5535_s13 + $0x4c] sm:$0xf] }
  0x41   : > { %4865 = vmatprep.mubr.msk.bf16.mxu0 %vm7172_vm2, %v5646_v37  ;;  %v1730_v4 = vsel %vm1698_vm9, 65537, %v7142_v12  ;;  %v4340_v6 = vcombine.low %v5685_v56, %v1728_v0  ;;  %7307 = vst [vmem:[#allocation14_spill] sm:$0xff] %v5731_v8  ;;  %v455_v9 = vand.u32 15, %v389_v62  ;;  %v5734_v15 = vsel %vm7165_vm7, %v1596_v61, %v1597_v53  ;;  %v5742_v19 = vld [vmem:[%s5535_s13 + $0x50] sm:$0xf] }
  0x42   : > { %7308 = vst [vmem:[#allocation15_spill] sm:$0xff] %v5734_v15  ;;  %v4341_v16 = vcombine.low %v5685_v56, %v1730_v4  ;;  %v5738_v17 = vsel %vm7171_vm1, %v4442_v55, 0  ;;  %v7131_v18 = vshll.u32 %v5644_v36, 16  ;;  %v7309_v20 = vmov 0  ;;  %v5751_v24 = vld [vmem:[%s5535_s13 + $0x54] sm:$0xf] }
  0x43   : > { %vm5744_vm10 = vcmp.ne.s16.totalorder %v4340_v6, 0  ;;  %v1602_v21 = vor.u32 %v1600_v7, %v7134_v3  ;;  %vm1668_vm11 = vcmp.eq.s32.totalorder %v455_v9, 15  ;;  %7312 = vst [vmem:[#allocation17_spill] sm:$0xff] %v5751_v24  ;;  %v391_v26 = vadd.s32 56, %v5593_v11  ;;  %v5773_v55 = vld [vmem:[%s5535_s13 + $0x58] sm:$0xf] }
  0x44   : > { %v7310_v20 = vsel %vm5744_vm10, 4294967295, %v7309_v20  ;;  %vm5754_vm12 = vcmp.ne.s16.totalorder %v4341_v16, 0  ;;  %v7313_v27 = vmov 0  ;;  %v5760_v28 = vcombine.low %v5723_v2, %v5731_v8  ;;  %vm1700_vm13 = vmpackc.low %vm1668_vm11, %vm1668_vm11  ;;  %7317 = vst [vmem:[#allocation20_spill] sm:$0xff] %v5773_v55  ;;  %v5788_v0 = vld [vmem:[%s5529_s7 + $0x8] sm:$0xf] }
  0x45   : > { %7311 = vst [vmem:[#allocation16_spill] sm:$0xff] %v7310_v20  ;;  %v7314_v27 = vsel %vm5754_vm12, 4294967295, %v7313_v27  ;;  %v1603_v40 = vrot.slane %v7131_v18, 1  ;;  %v7132_v41 = vshrl.u32 %v5644_v36, 16  ;;  %v5769_v46 = vsel %vm7165_vm7, %v1599_v63, %v1600_v7  ;;  %v5785_v63 = vld [vmem:[%s5535_s13 + $0x5c] sm:$0xf]  ;;  %5285 = vmatprep.subr.msk.bf16.mxu1 %vm7171_vm1, %v5788_v0 }
  0x46   : > { %7315 = vst [vmem:[#allocation18_spill] sm:$0xff] %v7314_v27  ;;  %7316 = vst [vmem:[#allocation19_spill] sm:$0xff] %v5769_v46  ;;  %v1732_v47 = vsel %vm1700_vm13, 65537, %v7142_v12  ;;  %v469_v53 = vand.u32 15, %v391_v26  ;;  %v2573_v57 = vsel %vm5744_vm10, 0, %v5734_v15  ;;  %v5781_v61 = vcombine.low %v5742_v19, %v5751_v24 }
  0x47   : > { %v4342_v58 = vcombine.low %v5685_v56, %v1732_v47  ;;  %v7130_v62 = vshll.u32 %v5646_v37, 16  ;;  %7319 = vst [vmem:[#allocation22_spill] sm:$0xff] %v5785_v63  ;;  %4730 = vmatmul.mubr.msk.bf16.gmra.mrb[8].mxu1 %vm7172_vm2, %v5646_v37  ;;  %v5795_v4 = vsel %vm7165_vm7, %v1602_v21, %v1603_v40  ;;  %v1605_v6 = vor.u32 %v1603_v40, %v7132_v41  ;;  %v5813_v40 = vld [vmem:[%s5535_s13 + $0x60] sm:$0xf]  ;;  %v5824_v32 = vld [vmem:[%s5535_s13 + $0x64] sm:$0xf] }
  0x48   : > { %7318 = vst [vmem:[#allocation21_spill] sm:$0xff] %v5781_v61  ;;  %4866 = vmatmul.mubr.msk.bf16.gmra.mrb[8].mxu0 %vm7172_vm2, %v5657_v42  ;;  %7320 = vst [vmem:[#allocation23_spill] sm:$0xff] %v5795_v4  ;;  %vm1670_vm14 = vcmp.eq.s32.totalorder %v469_v53, 15  ;;  %v393_v7 = vadd.s32 72, %v5593_v11  ;;  %4733 = vmatprep.mubr.msk.bf16.mxu1 %vm7172_vm2, %v5657_v42  ;;  %v7321_v9 = vmov 0  ;;  %v7137_v21 = vshrl.u32 %v5646_v37, 16 }
  0x49   : > { %4869 = vmatprep.mubr.msk.bf16.mxu0 %vm7172_vm2, %v5668_v50  ;;  %vm5804_vm15 = vcmp.ne.s16.totalorder %v4342_v58, 0  ;;  %v1606_v16 = vrot.slane %v7130_v62, 1  ;;  %vm1702_vm0 = vmpackc.low %vm1670_vm14, %vm1670_vm14  ;;  %v7138_v26 = vshll.u32 %v5657_v42, 16  ;;  %7324 = vst [vmem:[#allocation25_spill] sm:$0xff] %v5813_v40  ;;  %v5821_v58 = vcombine.low %v5773_v55, %v5785_v63  ;;  %v5837_v59 = vld [vmem:[%s5535_s13 + $0x68] sm:$0xf] }
  0x4a   : > { %v7322_v9 = vsel %vm5804_vm15, 4294967295, %v7321_v9  ;;  %v1734_v53 = vsel %vm1702_vm0, 65537, %v7142_v12  ;;  %v483_v43 = vand.u32 15, %v393_v7  ;;  %7326 = vst [vmem:[#allocation27_spill] sm:$0xff] %v5824_v32  ;;  %7327 = vst [vmem:[#allocation28_spill] sm:$0xff] %v5837_v59  ;;  %v395_v3 = vadd.s32 88, %v5593_v11 }
  0x4b   : > { %7323 = vst [vmem:[#allocation24_spill] sm:$0xff] %v7322_v9  ;;  %7325 = vst [vmem:[#allocation26_spill] sm:$0xff] %v5821_v58  ;;  %v4343_v62 = vcombine.low %v5685_v56, %v1734_v53  ;;  %v1608_v18 = vor.u32 %v1606_v16, %v7137_v21  ;;  %v1609_v41 = vrot.slane %v7138_v26, 1  ;;  %v5840_v7 = vld [vmem:[%s5535_s13 + $0x6c] sm:$0xf]  ;;  %v7145_v45 = vshrl.u32 %v5657_v42, 16 }
  0x4c   : > { %7328 = vst [vmem:[#allocation29_spill] sm:$0xff] %v5840_v7  ;;  %vm1672_vm3 = vcmp.eq.s32.totalorder %v483_v43, 15  ;;  %v5846_v53 = vsel %vm7165_vm7, %v1605_v6, %v1606_v16  ;;  %v7330_v21 = vmov 0  ;;  %v5854_v26 = vcombine.low %v5813_v40, %v5824_v32  ;;  %v5869_v16 = vld [vmem:[%s5535_s13 + $0x74] sm:$0xf] }
  0x4d   : > { %7329 = vst [vmem:[#allocation30_spill] sm:$0xff] %v5846_v53  ;;  %vm5848_vm4 = vcmp.ne.s16.totalorder %v4343_v62, 0  ;;  %vm1704_vm5 = vmpackc.low %vm1672_vm3, %vm1672_vm3  ;;  %v397_v43 = vadd.s32 104, %v5593_v11  ;;  %v5858_v31 = vsel %vm7165_vm7, %v1608_v18, %v1609_v41  ;;  %v497_v47 = vand.u32 15, %v395_v3  ;;  %v5866_v62 = vld [vmem:[%s5535_s13 + $0x70] sm:$0xf] }
  0x4e   : > { %v7331_v21 = vsel %vm5848_vm4, 4294967295, %v7330_v21  ;;  %7333 = vst [vmem:[#allocation32_spill] sm:$0xff] %v5858_v31  ;;  %v1736_v44 = vsel %vm1704_vm5, 65537, %v7142_v12  ;;  %v5863_v6 = vcombine.low %v5837_v59, %v5840_v7  ;;  %7334 = vst [vmem:[#allocation33_spill] sm:$0xff] %v5866_v62  ;;  %v1611_v5 = vor.u32 %v1609_v41, %v7145_v45 }
  0x4f   : > { %7332 = vst [vmem:[#allocation31_spill] sm:$0xff] %v7331_v21  ;;  %7335 = vst [vmem:[#allocation34_spill] sm:$0xff] %v5869_v16  ;;  %v4344_v48 = vcombine.low %v5685_v56, %v1736_v44  ;;  %v511_v15 = vand.u32 15, %v397_v43  ;;  %v7152_v18 = vshrl.u32 %v5668_v50, 16  ;;  %4734 = vmatmul.mubr.msk.bf16.gmra.mrb[12].mxu1 %vm7172_vm2, %v5668_v50  ;;  %v7336_v3 = vshll.u32 %v5668_v50, 16 }
  0x50   : > { %4870 = vmatmul.mubr.msk.bf16.gmra.mrb[12].mxu0 %vm7172_vm2, %v5672_v51  ;;  %vm1674_vm6 = vcmp.eq.s32.totalorder %v497_v47, 15  ;;  %v399_v44 = vadd.s32 120, %v5593_v11  ;;  %4737 = vmatprep.mubr.msk.bf16.mxu1 %vm7172_vm2, %v5672_v51  ;;  %v7337_v43 = vmov 0  ;;  %v5895_v47 = vcombine.low %v5866_v62, %v5869_v16 }
  0x51   : > { %v1612_v12 = vrot.slane %v7336_v3, 1  ;;  %4891 = vmatprep.mubr.msk.bf16.mxu0 %vm7172_vm2, %v2573_v57  ;;  %vm5889_vm8 = vcmp.ne.s16.totalorder %v4344_v48, 0  ;;  %vm1706_vm9 = vmpackc.low %vm1674_vm6, %vm1674_vm6  ;;  %vm1676_vm11 = vcmp.eq.s32.totalorder %v511_v15, 15  ;;  %v7340_v3 = vmov 0  }
  0x52   : > { %v7338_v43 = vsel %vm5889_vm8, 4294967295, %v7337_v43  ;;  %v1738_v45 = vsel %vm1706_vm9, 65537, %v7340_v3  ;;  %v7341_v57 = vshll.u32 %v5672_v51, 16  ;;  %vm1708_vm13 = vmpackc.low %vm1676_vm11, %vm1676_vm11  ;;  %v525_v41 = vand.u32 15, %v399_v44 }
  0x53   : > { %7339 = vst [vmem:[#allocation35_spill] sm:$0xff] %v7338_v43  ;;  %v1614_v7 = vor.u32 %v1612_v12, %v7152_v18  ;;  %v4345_v48 = vcombine.low %v5685_v56, %v1738_v45  ;;  %v1740_v59 = vsel %vm1708_vm13, 65537, %v7340_v3  ;;  %v7154_v15 = vshrl.u32 %v5672_v51, 16 }
  0x54   : > { %v1615_v32 = vrot.slane %v7341_v57, 1  ;;  %v7155_v20 = vshll.u32 %v5720_v1, 16  ;;  %v5907_v16 = vsel %vm7165_vm7, %v1611_v5, %v1612_v12  ;;  %v4346_v62 = vcombine.low %v5685_v56, %v1740_v59  ;;  %v5937_v5 = vld [vmem:[%s5529_s7 + $0x1c] sm:$0xf] }
  0x55   : > { %7342 = vst [vmem:[#allocation36_spill] sm:$0xff] %v5907_v16  ;;  %vm1678_vm14 = vcmp.eq.s32.totalorder %v525_v41, 15  ;;  %v401_v18 = vadd.s32 136, %v5593_v11  ;;  %vm5919_vm3 = vcmp.ne.s16.totalorder %v4345_v48, 0  ;;  %v7343_v12 = vmov 0 }
  0x56   : > { %v1617_v45 = vor.u32 %v1615_v32, %v7154_v15  ;;  %v1618_v57 = vrot.slane %v7155_v20, 1  ;;  %vm1710_vm0 = vmpackc.low %vm1678_vm14, %vm1678_vm14  ;;  %v7344_v12 = vsel %vm5919_vm3, 4294967295, %v7343_v12  ;;  %v5924_v59 = vsel %vm7165_vm7, %v1614_v7, %v1615_v32 }
  0x57   : > { %7345 = vst [vmem:[#allocation37_spill] sm:$0xff] %v7344_v12  ;;  %7346 = vst [vmem:[#allocation38_spill] sm:$0xff] %v5924_v59  ;;  %v1742_v41 = vsel %vm1710_vm0, 65537, %v7340_v3  ;;  %v539_v63 = vand.u32 15, %v401_v18  ;;  %vm5927_vm5 = vcmp.ne.s16.totalorder %v4346_v62, 0  ;;  %v7347_v44 = vmov 0  ;;  %4738 = vmatmul.mubr.msk.bf16.gmra.mrb[16].mxu1 %vm7172_vm2, %v5720_v1 }
  0x58   : > { %v7348_v44 = vsel %vm5927_vm5, 4294967295, %v7347_v44  ;;  %v5932_v15 = vsel %vm7165_vm7, %v1617_v45, %v1618_v57  ;;  %v4347_v20 = vcombine.low %v5685_v56, %v1742_v41  ;;  %v7156_v48 = vshll.u32 %v5760_v28, 16  ;;  %4741 = vmatprep.mubr.msk.bf16.mxu1 %vm7172_vm2, %v5760_v28 }
  0x59   : > { %7349 = vst [vmem:[#allocation39_spill] sm:$0xff] %v7348_v44  ;;  %7350 = vst [vmem:[#allocation40_spill] sm:$0xff] %v5932_v15  ;;  %v7351_v32 = vsel %vm5754_vm12, 0, %v5769_v46  ;;  %v7352_v7 = vshrl.u32 %v5720_v1, 16  ;;  %vm1680_vm6 = vcmp.eq.s32.totalorder %v539_v63, 15  ;;  %v386_v18 = vadd.s32 16, %v5593_v11 }
  0x5a   : > { %4892 = vmatmul.mubr.msk.bf16.vlgmr.msra.gmra.mrb[0].mxu0 %vm7172_vm2, %v7351_v32  ;;  %vm7167_vm9 = vsmask.f32 256  ;;  %vm5952_vm11 = vcmp.ne.s16.totalorder %v4347_v20, 0  ;;  %v7353_v45 = vmov 0  ;;  %v1621_v41 = vrot.slane %v7156_v48, 1  ;;  %vm1712_vm13 = vmpackc.low %vm1680_vm6, %vm1680_vm6 }
  0x5b   : > { %v1620_v62 = vor.u32 %v1618_v57, %v7352_v7  ;;  %4924 = vmatpush3.bf16.msra.mxu0 %v5738_v17  ;;  %v7354_v45 = vsel %vm5952_vm11, 4294967295, %v7353_v45  ;;  %v7356_v57 = vshll.u32 %v5591_v10, 16  ;;  %vm1010_vm14 = vcmask 1040384  }
  0x5c   : > { %7355 = vst [vmem:[#allocation41_spill] sm:$0xff] %v7354_v45  ;;  %v7357_v17 = vsel %vm5804_vm15, 0, %v5795_v4  ;;  %v1744_v32 = vsel %vm1712_vm13, 65537, %v7340_v3  ;;  %v434_v7 = vand.u32 15, %v386_v18  ;;  %vm5971_vm0 = vmand %vm1010_vm14, %vm7167_vm9  ;;  %v7358_v48 = vmov 0  ;;  %5291 = vmatprep.subr.msk.bf16.mxu0 %vm7171_vm1, %v5937_v5 }
  0x5d   : > { %v882_v63 = vor.u32 %v7356_v57, %v5701_v60  ;;  %4895 = vmatprep.mubr.msk.bf16.mxu0 %vm7172_vm2, %v7357_v17  ;;  %v7359_v48 = vsel %vm5971_vm0, 4294967295, %v7358_v48  ;;  %v403_v10 = vadd.s32 152, %v5593_v11  ;;  %v4348_v18 = vcombine.low %v5685_v56, %v1744_v32 }
  0x5e   : > { %7360 = vst [vmem:[#allocation42_spill] sm:$0xff] %v7359_v48  ;;  %v5987_v4 = vsel %vm7165_vm7, %v1620_v62, %v1621_v41  ;;  %vm1015_vm6 = vcmp.eq.s32.totalorder %v434_v7, 0  ;;  %v7170_v9 = vshll.u32 %v5781_v61, 16  ;;  %v7362_v46 = vmov 0 }
  0x5f   : > { %7361 = vst [vmem:[#allocation43_spill] sm:$0xff] %v5987_v4  ;;  %v553_v27 = vand.u32 15, %v403_v10  ;;  %vm5990_vm13 = vcmp.ne.s16.totalorder %v4348_v18, 0  ;;  %v5996_v57 = vsel %vm5971_vm0, 0, %v882_v63  ;;  %vm1045_vm14 = vmpackc.low %vm1015_vm6, %vm1015_vm6  ;;  %v388_v32 = vadd.s32 32, %v5593_v11  ;;  %4742 = vmatmul.mubr.msk.bf16.gmra.mrb[20].mxu1 %vm7172_vm2, %v5781_v61 }
  0x60   : > { %v7363_v46 = vsel %vm5990_vm13, 4294967295, %v7362_v46  ;;  %7365 = vst [vmem:[#allocation45_spill] sm:$0xff] %v5996_v57  ;;  %v7366_v17 = vshrl.u32 %v5596_v13, 16  ;;  %v1075_v62 = vsel %vm1045_vm14, 65537, %v7340_v3  ;;  %v7367_v7 = vshrl.u32 %v5760_v28, 16  ;;  %4745 = vmatprep.mubr.msk.bf16.mxu1 %vm7172_vm2, %v5821_v58 }
  0x61   : > { %7364 = vst [vmem:[#allocation44_spill] sm:$0xff] %v7363_v46  ;;  %v1624_v18 = vrot.slane %v7170_v9, 1  ;;  %vm1682_vm7 = vcmp.eq.s32.totalorder %v553_v27, 15  ;;  %v4293_v48 = vcombine.low %v1075_v62, %v5685_v56  ;;  %v448_v63 = vand.u32 15, %v388_v32 }
  0x62   : > { %v6001_v20 = vrot.slane %v7366_v17, 7  ;;  %v1623_v10 = vor.u32 %v1621_v41, %v7367_v7  ;;  %vm1714_vm9 = vmpackc.low %vm1682_vm7, %vm1682_vm7  ;;  %v7368_v40 = vshll.u32 %v5596_v13, 16  ;;  %v405_v17 = vadd.s32 168, %v5593_v11 }
  0x63   : > { %v7369_v41 = vsel %vm5848_vm4, 0, %v5846_v53  ;;  %v1746_v27 = vsel %vm1714_vm9, 65537, %v7340_v3  ;;  %v6023_v32 = vsel %vm7171_vm1, %v5788_v0, 0  ;;  %v7370_v7 = vsel %vm5889_vm8, 0, %v5858_v31 }
  0x64   : > { %v889_v52 = vor.u32 %v7368_v40, %v6001_v20  ;;  %4896 = vmatmul.mubr.msk.bf16.gmra.mrb[4].mxu0 %vm7172_vm2, %v7369_v41  ;;  %vm6034_vm7 = vcmp.ne.s16.totalorder %v4293_v48, 0  ;;  %v7371_v41 = vmov 0  ;;  %v4349_v0 = vcombine.low %v5685_v56, %v1746_v27 }
  0x65   : > { %4899 = vmatprep.mubr.msk.bf16.mxu0 %vm7172_vm2, %v7370_v7  ;;  %v7372_v41 = vsel %vm6034_vm7, 4294967295, %v7371_v41  ;;  %vm7374_vm9 = vsmask.f32 256  ;;  %vm1017_vm6 = vcmp.eq.s32.totalorder %v448_v63, 0  ;;  %vm7376_vm14 = vsmask.f32 7424 }
  0x66   : > { %7373 = vst [vmem:[#allocation46_spill] sm:$0xff] %v7372_v41  ;;  %v6041_v9 = vsel %vm7374_vm9, %v5701_v60, %v889_v52  ;;  %v6047_v62 = vsel %vm7376_vm14, %v1623_v10, %v1624_v18  ;;  %vm1047_vm1 = vmpackc.low %vm1017_vm6, %vm1017_vm6  ;;  %v567_v7 = vand.u32 15, %v405_v17  ;;  %vm6052_vm2 = vcmp.ne.s16.totalorder %v4349_v0, 0 }
  0x67   : > { %7375 = vst [vmem:[#allocation47_spill] sm:$0xff] %v6041_v9  ;;  %v7377_v27 = vmov 0  ;;  %v1077_v52 = vsel %vm1047_vm1, 65537, %v7340_v3  ;;  %v7380_v60 = vshrl.u32 %v5781_v61, 16  ;;  %v390_v40 = vadd.s32 48, %v5593_v11 }
  0x68   : > { %v7378_v27 = vsel %vm6052_vm2, 4294967295, %v7377_v27  ;;  %v4294_v10 = vcombine.low %v1077_v52, %v5685_v56  ;;  %v7381_v13 = vshll.u32 %v5821_v58, 16  ;;  %vm1684_vm9 = vcmp.eq.s32.totalorder %v567_v7, 15 }
  0x69   : > { %7379 = vst [vmem:[#allocation48_spill] sm:$0xff] %v7378_v27  ;;  %v1626_v63 = vor.u32 %v1624_v18, %v7380_v60  ;;  %v7382_v48 = vshrl.u32 %v5616_v23, 16  ;;  %vm1716_vm6 = vmpackc.low %vm1684_vm9, %vm1684_vm9  ;;  %v462_v43 = vand.u32 15, %v390_v40  ;;  %v407_v53 = vadd.s32 184, %v5593_v11 }
  0x6a   : > { %v1627_v31 = vrot.slane %v7381_v13, 1  ;;  %v7185_v18 = vshrl.u32 %v5821_v58, 16  ;;  %vm6070_vm1 = vcmp.ne.s16.totalorder %v4294_v10, 0  ;;  %v7383_v60 = vmov 0 }
  0x6b   : > { %v894_v17 = vrot.slane %v7382_v48, 7  ;;  %v7384_v60 = vsel %vm6070_vm1, 4294967295, %v7383_v60  ;;  %v1748_v13 = vsel %vm1716_vm6, 65537, %v7340_v3  ;;  %v7385_v7 = vshll.u32 %v5616_v23, 16 }
  0x6c   : > { %v4350_v40 = vcombine.low %v5685_v56, %v1748_v13  ;;  %vm1019_vm14 = vcmp.eq.s32.totalorder %v462_v43, 0  ;;  %v581_v21 = vand.u32 15, %v407_v53  ;;  %vm7386_vm9 = vcmask 64512  }
  0x6d   : > { %v897_v52 = vor.u32 %v7385_v7, %v894_v17  ;;  %4746 = vmatmul.mubr.msk.bf16.gmra.mrb[24].mxu1 %vm7386_vm9, %v5854_v26  ;;  %v7387_v10 = vsel %vm5919_vm3, 0, %v5907_v16  ;;  %vm7388_vm6 = vmmov %vm7386_vm9  ;;  %vm7389_vm0 = vsmask.f32 7424  ;;  %v1629_v53 = vor.u32 %v1627_v31, %v7185_v18 }
  0x6e   : > { %4900 = vmatmul.mubr.msk.bf16.gmra.mrb[8].mxu0 %vm7388_vm6, %v7387_v10  ;;  %v6093_v48 = vsel %vm7389_vm0, %v1626_v63, %v1627_v31  ;;  %vm1049_vm8 = vmpackc.low %vm1019_vm14, %vm1019_vm14  ;;  %v392_v43 = vadd.s32 64, %v5593_v11  ;;  %v7392_v13 = vsel %vm5927_vm5, 0, %v5924_v59  ;;  %v7393_v63 = vshll.u32 %v5854_v26, 16 }
  0x6f   : > { %7390 = vst [vmem:[#allocation49_spill] sm:$0xff] %v6093_v48  ;;  %vm7391_vm9 = vmmov %vm7388_vm6  ;;  %4903 = vmatprep.mubr.msk.bf16.mxu0 %vm7388_vm6, %v7392_v13  ;;  %v1079_v10 = vsel %vm1049_vm8, 65537, %v7340_v3  ;;  %vm1686_vm0 = vcmp.eq.s32.totalorder %v581_v21, 15  ;;  %v7394_v0 = vshrl.u32 %v5644_v36, 16  ;;  %vm6110_vm14 = vcmp.ne.s16.totalorder %v4350_v40, 0 }
  0x70   : > { %4749 = vmatprep.mubr.msk.bf16.mxu1 %vm7391_vm9, %v5863_v6  ;;  %v1630_v7 = vrot.slane %v7393_v63, 1  ;;  %v7395_v18 = vmov 0  ;;  %vm7398_vm9 = vsmask.f32 256  ;;  %v4295_v59 = vcombine.low %v1079_v10, %v5685_v56  ;;  %vm1718_vm6 = vmpackc.low %vm1686_vm0, %vm1686_vm0 }
  0x71   : > { %v902_v31 = vrot.slane %v7394_v0, 7  ;;  %v7396_v18 = vsel %vm6110_vm14, 4294967295, %v7395_v18  ;;  %v6116_v23 = vsel %vm7398_vm9, %v6001_v20, %v897_v52  ;;  %v476_v13 = vand.u32 15, %v392_v43 }
  0x72   : > { %7397 = vst [vmem:[#allocation50_spill] sm:$0xff] %v7396_v18  ;;  %7399 = vst [vmem:[#allocation51_spill] sm:$0xff] %v6116_v23  ;;  %v1750_v44 = vsel %vm1718_vm6, 65537, %v7340_v3  ;;  %v7400_v63 = vshll.u32 %v5644_v36, 16  ;;  %v409_v16 = vadd.s32 200, %v5593_v11  ;;  %vm6124_vm8 = vcmp.ne.s16.totalorder %v4295_v59, 0 }
  0x73   : > { %v7401_v40 = vmov 0  ;;  %v4351_v20 = vcombine.low %v5685_v56, %v1750_v44  ;;  %vm1021_vm9 = vcmp.eq.s32.totalorder %v476_v13, 0  ;;  %vm7403_vm0 = vsmask.f32 7424 }
  0x74   : > { %v905_v21 = vor.u32 %v7400_v63, %v902_v31  ;;  %v7402_v40 = vsel %vm6124_vm8, 4294967295, %v7401_v40  ;;  %v6137_v63 = vsel %vm7403_vm0, %v1629_v53, %v1630_v7  ;;  %vm1051_vm6 = vmpackc.low %vm1021_vm9, %vm1021_vm9  ;;  %v595_v59 = vand.u32 15, %v409_v16 }
  0x75   : > { %7404 = vst [vmem:[#allocation52_spill] sm:$0xff] %v6137_v63  ;;  %vm6139_vm5 = vcmp.ne.s16.totalorder %v4351_v20, 0  ;;  %v7405_v0 = vmov 0  ;;  %v1081_v44 = vsel %vm1051_vm6, 65537, %v7340_v3  ;;  %v7408_v13 = vshrl.u32 %v5854_v26, 16 }
  0x76   : > { %v7406_v0 = vsel %vm6139_vm5, 4294967295, %v7405_v0  ;;  %v394_v43 = vadd.s32 80, %v5593_v11  ;;  %v4296_v36 = vcombine.low %v1081_v44, %v5685_v56  ;;  %v7409_v10 = vshll.u32 %v5863_v6, 16 }
  0x77   : > { %7407 = vst [vmem:[#allocation53_spill] sm:$0xff] %v7406_v0  ;;  %v1632_v52 = vor.u32 %v1630_v7, %v7408_v13  ;;  %vm1688_vm0 = vcmp.eq.s32.totalorder %v595_v59, 15  ;;  %v7410_v53 = vshrl.u32 %v5646_v37, 16  ;;  %vm7411_vm9 = vcmask 64512  }
  0x78   : > { %v1633_v12 = vrot.slane %v7409_v10, 1  ;;  %4750 = vmatmul.mubr.msk.bf16.gmra.mrb[28].mxu1 %vm7411_vm9, %v5895_v47  ;;  %v7412_v20 = vsel %vm5952_vm11, 0, %v5932_v15  ;;  %vm7413_vm6 = vmmov %vm7411_vm9  ;;  %vm7414_vm3 = vsmask.f32 256  ;;  %v490_v44 = vand.u32 15, %v394_v43 }
  0x79   : > { %v910_v16 = vrot.slane %v7410_v53, 7  ;;  %4904 = vmatmul.mubr.msk.bf16.gmra.mrb[12].mxu0 %vm7413_vm6, %v7412_v20  ;;  %v6160_v7 = vsel %vm7414_vm3, %v894_v17, %v905_v21  ;;  %vm1720_vm4 = vmpackc.low %vm1688_vm0, %vm1688_vm0  ;;  %v411_v10 = vadd.s32 216, %v5593_v11  ;;  %4755 = vmatprep.mubr.bf16.mxu1 %v7340_v3  ;;  %v7416_v13 = vsel %vm5990_vm13, 0, %v5987_v4 }
  0x7a   : > { %7415 = vst [vmem:[#allocation54_spill] sm:$0xff] %v6160_v7  ;;  %vm7417_vm9 = vmmov %vm7413_vm6  ;;  %v1752_v21 = vsel %vm1720_vm4, 65537, %v7340_v3  ;;  %v7418_v43 = vshll.u32 %v5646_v37, 16  ;;  %v7213_v20 = vshll.u32 %v5895_v47, 16  ;;  %vm6177_vm3 = vcmp.ne.s16.totalorder %v4296_v36, 0 }
  0x7b   : > { %4907 = vmatprep.mubr.msk.bf16.mxu0 %vm7417_vm9, %v7416_v13  ;;  %v7419_v59 = vmov 0  ;;  %v4352_v4 = vcombine.low %v5685_v56, %v1752_v21  ;;  %vm1023_vm0 = vcmp.eq.s32.totalorder %v490_v44, 0  ;;  %v609_v13 = vand.u32 15, %v411_v10  ;;  %v6191_v36 = vld [vmem:[%s5535_s13 + $0x78] sm:$0xf] }
  0x7c   : > { %v913_v53 = vor.u32 %v7418_v43, %v910_v16  ;;  %v7420_v59 = vsel %vm6177_vm3, 4294967295, %v7419_v59  ;;  %vm7421_vm6 = vsmask.f32 7424  ;;  %vm1053_vm9 = vmpackc.low %vm1023_vm0, %vm1023_vm0  ;;  %v7423_v17 = vshrl.u32 %v5863_v6, 16  ;;  %v6201_v21 = vld [vmem:[%s5535_s13 + $0x7c] sm:$0xf] }
  0x7d   : > { %v6183_v46 = vsel %vm7421_vm6, %v1632_v52, %v1633_v12  ;;  %v1636_v43 = vrot.slane %v7213_v20, 1  ;;  %v396_v37 = vadd.s32 96, %v5593_v11  ;;  %vm6193_vm4 = vcmp.ne.s16.totalorder %v4352_v4, 0 }
  0x7e   : > { %7422 = vst [vmem:[#allocation55_spill] sm:$0xff] %v6183_v46  ;;  %v1635_v15 = vor.u32 %v1633_v12, %v7423_v17  ;;  %v7424_v45 = vmov 0  ;;  %v1083_v44 = vsel %vm1053_vm9, 65537, %v7340_v3  ;;  %vm1690_vm13 = vcmp.eq.s32.totalorder %v609_v13, 15 }
  0x7f   : > { %v7425_v45 = vsel %vm6193_vm4, 4294967295, %v7424_v45  ;;  %v7427_v52 = vshrl.u32 %v5657_v42, 16  ;;  %v1168_v12 = vsel %vm6177_vm3, 0, %v6160_v7  ;;  %vm7428_vm0 = vsmask.f32 256  ;;  %vm1722_vm6 = vmpackc.low %vm1690_vm13, %vm1690_vm13 }
  0x80   : > { %7426 = vst [vmem:[#allocation56_spill] sm:$0xff] %v7425_v45  ;;  %v6207_v17 = vsel %vm7428_vm0, %v902_v31, %v913_v53  ;;  %v4297_v4 = vcombine.low %v1083_v44, %v5685_v56  ;;  %v504_v20 = vand.u32 15, %v396_v37  ;;  %v1754_v24 = vsel %vm1722_vm6, 65537, %v7340_v3  ;;  %v6224_v37 = vld [vmem:[%s5529_s7 + $0xc] sm:$0xf] }
  0x81   : > { %v918_v10 = vrot.slane %v7427_v52, 7  ;;  %7429 = vst [vmem:[#allocation57_spill] sm:$0xff] %v6207_v17  ;;  %v7430_v13 = vshll.u32 %v5657_v42, 16  ;;  %v413_v52 = vadd.s32 232, %v5593_v11  ;;  %v2585_v7 = vsel %vm6193_vm4, 0, %v6183_v46 }
  0x82   : > { %v4353_v31 = vcombine.low %v5685_v56, %v1754_v24  ;;  %vm1025_vm9 = vcmp.eq.s32.totalorder %v504_v20, 0  ;;  %v6221_v53 = vcombine.low %v6191_v36, %v6201_v21  ;;  %v7431_v44 = vsel %vm6034_vm7, 0, %v5996_v57 }
  0x83   : > { %v921_v55 = vor.u32 %v7430_v13, %v918_v10  ;;  %vm7432_vm13 = vcmask 64512   ;;  %v7433_v13 = vsel %vm6052_vm2, 0, %v6047_v62  ;;  %vm6236_vm6 = vcmp.ne.s16.totalorder %v4297_v4, 0  ;;  %vm1055_vm12 = vmpackc.low %vm1025_vm9, %vm1025_vm9 }
  0x84   : > { %4756 = vmatmul.mubr.msk.bf16.vlgmr.msra.gmra.mrb[0].mxu1 %vm7432_vm13, %v7431_v44  ;;  %vm7434_vm0 = vmmov %vm7432_vm13  ;;  %v7435_v24 = vmov 0  ;;  %vm7437_vm4 = vsmask.f32 7424  ;;  %vm7439_vm11 = vsmask.f32 256  ;;  %v623_v57 = vand.u32 15, %v413_v52 }
  0x85   : > { %4908 = vmatmul.mubr.msk.bf16.gmra.mrb[16].mxu0 %vm7434_vm0, %v7433_v13  ;;  %v7436_v24 = vsel %vm6236_vm6, 4294967295, %v7435_v24  ;;  %v6241_v20 = vsel %vm7437_vm4, %v1635_v15, %v1636_v43  ;;  %v6244_v8 = vsel %vm7439_vm11, %v910_v16, %v921_v55  ;;  %4788 = vmatpush3.bf16.msra.mxu1 %v6023_v32  ;;  %v7441_v44 = vsel %vm6070_vm1, 0, %v6041_v9  ;;  %vm7442_vm13 = vmmov %vm7434_vm0 }
  0x86   : > { %7438 = vst [vmem:[#allocation58_spill] sm:$0xff] %v6241_v20  ;;  %7440 = vst [vmem:[#allocation59_spill] sm:$0xff] %v6244_v8  ;;  %4759 = vmatprep.mubr.msk.bf16.mxu1 %vm7442_vm13, %v7441_v44  ;;  %v1085_v4 = vsel %vm1055_vm12, 65537, %v7340_v3  ;;  %v7443_v13 = vshrl.u32 %v5895_v47, 16  ;;  %v7231_v15 = vshll.u32 %v6221_v53, 16  ;;  %v398_v55 = vadd.s32 112, %v5593_v11 }
  0x87   : > { %v7445_v32 = vsel %vm6110_vm14, 0, %v6093_v48  ;;  %vm7446_vm11 = vmmov %vm7434_vm0  ;;  %vm6264_vm4 = vcmp.ne.s16.totalorder %v4353_v31, 0  ;;  %v7447_v16 = vmov 0  ;;  %v4298_v52 = vcombine.low %v1085_v4, %v5685_v56 }
  0x88   : > { %v6255_v46 = vor.u32 %v1636_v43, %v7443_v13  ;;  %4911 = vmatprep.mubr.msk.bf16.mxu0 %vm7446_vm11, %v7445_v32  ;;  %v7448_v16 = vsel %vm6264_vm4, 4294967295, %v7447_v16  ;;  %vm1692_vm12 = vcmp.eq.s32.totalorder %v623_v57, 15  ;;  %v7450_v43 = vshrl.u32 %v5668_v50, 16 }
  0x89   : > { %7449 = vst [vmem:[#allocation61_spill] sm:$0xff] %v7448_v16  ;;  %vm7451_vm9 = vcmask 1043456   ;;  %vm1724_vm0 = vmpackc.low %vm1692_vm12, %vm1692_vm12  ;;  %v2567_v13 = vrot.slane %v7231_v15, 1  ;;  %v518_v9 = vand.u32 15, %v398_v55  ;;  %v415_v32 = vadd.s32 248, %v5593_v11 }
  0x8a   : > { %7444 = vst [vmem:[#allocation60_spill] sm:$0xff] %v6255_v46  ;;  %v926_v44 = vrot.slane %v7450_v43, 7  ;;  %5286 = vmatprep.subr.msk.bf16.mxu1 %vm7451_vm9, %v6224_v37  ;;  %vm1660_vm13 = vcmask 1047552   ;;  %vm6276_vm11 = vcmp.ne.s16.totalorder %v4298_v52, 0  ;;  %v1756_v57 = vsel %vm1724_vm0, 65537, %v7340_v3 }
  0x8b   : > { %v7454_v4 = vshll.u32 %v5668_v50, 16  ;;  %v1169_v45 = vsel %vm6236_vm6, 0, %v6207_v17  ;;  %v4354_v55 = vcombine.low %v5685_v56, %v1756_v57  ;;  %vm7455_vm12 = vsmask.f32 7424 }
  0x8c   : > { %v6290_v15 = vsel %vm7455_vm12, %v6255_v46, %v2567_v13  ;;  %vm1027_vm9 = vcmp.eq.s32.totalorder %v518_v9, 0  ;;  %vm7457_vm14 = vmmov %vm7455_vm12  ;;  %v1170_v42 = vsel %vm6276_vm11, 0, %v6244_v8  ;;  %v637_v57 = vand.u32 15, %v415_v32 }
  0x8d   : > { %v929_v43 = vor.u32 %v7454_v4, %v926_v44  ;;  %7456 = vst [vmem:[#allocation62_spill] sm:$0xff] %v6290_v15  ;;  %vm6293_vm2 = vmand %vm1660_vm13, %vm7457_vm14  ;;  %v2586_v4 = vsel %vm6264_vm4, 0, %v6241_v20  ;;  %v7460_v17 = vshrl.u32 %v6221_v53, 16  ;;  %vm6305_vm12 = vcmp.ne.s16.totalorder %v4354_v55, 0 }
  0x8e   : > { %vm1057_vm0 = vmpackc.low %vm1027_vm9, %vm1027_vm9  ;;  %v7461_v9 = vmov 0  ;;  %v400_v48 = vadd.s32 128, %v5593_v11  ;;  %v7464_v16 = vshrl.u32 %v5672_v51, 16  ;;  %v7465_v8 = vsel %vm6124_vm8, 0, %v6116_v23 }
  0x8f   : > { %v2569_v46 = vor.u32 %v2567_v13, %v7460_v17  ;;  %v7462_v9 = vsel %vm6305_vm12, 4294967295, %v7461_v9  ;;  %v1087_v50 = vsel %vm1057_vm0, 65537, %v7340_v3  ;;  %vm7466_vm14 = vcmask 64512  }
  0x90   : > { %7463 = vst [vmem:[#allocation63_spill] sm:$0xff] %v7462_v9  ;;  %v934_v20 = vrot.slane %v7464_v16, 7  ;;  %4760 = vmatmul.mubr.msk.bf16.gmra.mrb[4].mxu1 %vm7466_vm14, %v7465_v8  ;;  %v7467_v17 = vsel %vm6139_vm5, 0, %v6137_v63  ;;  %vm7468_vm13 = vmmov %vm7466_vm14  ;;  %v2587_v13 = vsel %vm6305_vm12, 0, %v6290_v15  ;;  %vm7469_vm9 = vsmask.f32 256 }
  0x91   : > { %4912 = vmatmul.mubr.msk.bf16.gmra.mrb[20].mxu0 %vm7468_vm13, %v7467_v17  ;;  %v6327_v32 = vsel %vm7469_vm9, %v918_v10, %v929_v43  ;;  %v4299_v16 = vcombine.low %v1087_v50, %v5685_v56  ;;  %vm1694_vm0 = vcmp.eq.s32.totalorder %v637_v57, 15  ;;  %vm7470_vm4 = vmmov %vm7468_vm13  ;;  %v6334_v8 = vsel %vm6293_vm2, %v2569_v46, 0 }
  0x92   : > { %4763 = vmatprep.mubr.msk.bf16.mxu1 %vm7470_vm4, %v1168_v12  ;;  %vm7471_vm15 = vmmov %vm7470_vm4  ;;  %7472 = vst [vmem:[#allocation64_spill] sm:$0xff] %v6334_v8  ;;  %v532_v55 = vand.u32 15, %v400_v48  ;;  %v7473_v17 = vshll.u32 %v5672_v51, 16  ;;  %v420_v15 = vand.u32 15, %v5593_v11  ;;  %v2853_v12 = vshrl.u32 %v5598_v14, 16 }
  0x93   : > { %4915 = vmatprep.mubr.msk.bf16.mxu0 %vm7471_vm15, %v2585_v7  ;;  %vm1726_vm14 = vmpackc.low %vm1694_vm0, %vm1694_vm0  ;;  %vm6339_vm13 = vcmp.ne.s16.totalorder %v4299_v16, 0  ;;  %v2856_v7 = vshll.u32 %v5598_v14, 16  ;;  %vm7266_vm4 = vsmask.f32 4352  ;;  %v2861_v16 = vshrl.u32 %v5610_v22, 16 }
  0x94   : > { %v937_v23 = vor.u32 %v7473_v17, %v934_v20  ;;  %v1758_v50 = vsel %vm1726_vm14, 65537, %v7340_v3  ;;  %v1171_v46 = vsel %vm6339_vm13, 0, %v6327_v32  ;;  %vm1029_vm15 = vcmp.eq.s32.totalorder %v532_v55, 0 }
  0x95   : > { %v4355_v48 = vcombine.low %v5685_v56, %v1758_v50  ;;  %vm1059_vm9 = vmpackc.low %vm1029_vm15, %vm1029_vm15  ;;  %vm1013_vm0 = vcmp.eq.s32.totalorder %v420_v15, 0  ;;  %v2855_v43 = vrot.slane %v2853_v12, 3  ;;  %v2858_v57 = vrot.slane %v2856_v7, 4 }
  0x96   : > { %vm7476_vm12 = vsmask.f32 256  ;;  %v1089_v51 = vsel %vm1059_vm9, 65537, %v7340_v3  ;;  %vm2097_vm14 = vmpackc.low %vm1013_vm0, %vm1013_vm0  ;;  %v2864_v14 = vshll.u32 %v5610_v22, 16  ;;  %v402_v9 = vadd.s32 144, %v5593_v11 }
  0x97   : > { %v6352_v17 = vsel %vm7476_vm12, %v926_v44, %v937_v23  ;;  %vm6357_vm5 = vcmp.ne.s16.totalorder %v4355_v48, 0  ;;  %v7477_v50 = vmov 0  ;;  %v4300_v15 = vcombine.low %v1089_v51, %v5685_v56 }
  0x98   : > { %v7478_v50 = vsel %vm6357_vm5, 4294967295, %v7477_v50  ;;  %v2099_v55 = vsel %vm2097_vm14, 65537, %v7340_v3  ;;  %v2859_v12 = vor.u32 %v2858_v57, %v2855_v43  ;;  %v2863_v23 = vrot.slane %v2861_v16, 3 }
  0x99   : > { %v4374_v7 = vcombine.low %v2099_v55, %v5685_v56  ;;  %v2866_v44 = vrot.slane %v2864_v14, 4  ;;  %v546_v63 = vand.u32 15, %v402_v9  ;;  %vm7479_vm12 = vcmask 64512  }
  0x9a   : > { %4764 = vmatmul.mubr.msk.bf16.gmra.mrb[8].mxu1 %vm7479_vm12, %v1169_v45  ;;  %vm7480_vm15 = vmmov %vm7479_vm12  ;;  %vm6366_vm9 = vcmp.ne.s16.totalorder %v4300_v15, 0  ;;  %v7483_v48 = vshrl.u32 %v5720_v1, 16  ;;  %v7484_v51 = vshrl.u32 %v5619_v25, 16  ;;  %v7485_v43 = vshll.u32 %v5619_v25, 16 }
  0x9b   : > { %4916 = vmatmul.mubr.msk.bf16.gmra.mrb[24].mxu0 %vm7480_vm15, %v2586_v4  ;;  %vm7486_vm0 = vmmov %vm7479_vm12  ;;  %v2588_v45 = vsel %vm6357_vm5, 0, %v6334_v8  ;;  %v1172_v4 = vsel %vm6366_vm9, 0, %v6352_v17  ;;  %v2867_v9 = vor.u32 %v2866_v44, %v2863_v23  ;;  %vm1031_vm12 = vcmp.eq.s32.totalorder %v546_v63, 0 }
  0x9c   : > { %v942_v0 = vrot.slane %v7483_v48, 7  ;;  %v2872_v18 = vrot.slane %v7484_v51, 3  ;;  %v2875_v57 = vrot.slane %v7485_v43, 4  ;;  %4767 = vmatprep.mubr.msk.bf16.mxu1 %vm7486_vm0, %v1170_v42  ;;  %vm7487_vm14 = vmmov %vm7486_vm0  ;;  %vm6384_vm15 = vcmp.ne.s16.totalorder %v4374_v7, 0 }
  0x9d   : > { %4919 = vmatprep.mubr.msk.bf16.mxu0 %vm7487_vm14, %v2587_v13  ;;  %v7488_v16 = vmov 0  ;;  %v7490_v25 = vshll.u32 %v5720_v1, 16  ;;  %vm1061_vm0 = vmpackc.low %vm1031_vm12, %vm1031_vm12  ;;  %v404_v13 = vadd.s32 160, %v5593_v11  ;;  %v2868_v15 = vsel %vm7266_vm4, %v2859_v12, %v2867_v9 }
  0x9e   : > { %v7489_v16 = vsel %vm6384_vm15, 4294967295, %v7488_v16  ;;  %v2876_v42 = vor.u32 %v2875_v57, %v2872_v18  ;;  %v1091_v55 = vsel %vm1061_vm0, 65537, %v7340_v3  ;;  %v7491_v48 = vshrl.u32 %v5760_v28, 16 }
  0x9f   : > { %v945_v14 = vor.u32 %v7490_v25, %v942_v0  ;;  %v2879_v63 = vshrl.u32 %v5628_v30, 16  ;;  %vm7492_vm14 = vsmask.f32 256  ;;  %v4301_v23 = vcombine.low %v1091_v55, %v5685_v56 }
  0xa0   : > { %v950_v51 = vrot.slane %v7491_v48, 7  ;;  %v2877_v44 = vsel %vm7266_vm4, %v2867_v9, %v2876_v42  ;;  %vm7493_vm12 = vcmask 1043456   ;;  %v3012_v12 = vsel %vm6384_vm15, 0, %v2868_v15 }
  0xa1   : > { %v6397_v7 = vsel %vm7492_vm14, %v934_v20, %v945_v14  ;;  %v3277_v18 = vsel %vm7493_vm12, %v5937_v5, 0  ;;  %v560_v43 = vand.u32 15, %v404_v13  ;;  %v7494_v57 = vshll.u32 %v5760_v28, 16 }
  0xa2   : > { %v2881_v48 = vrot.slane %v2879_v63, 3  ;;  %vm6407_vm0 = vcmp.ne.s16.totalorder %v4301_v23, 0  ;;  %v7495_v8 = vmov 0  ;;  %v2882_v20 = vshll.u32 %v5628_v30, 16 }
  0xa3   : > { %v953_v25 = vor.u32 %v7494_v57, %v950_v51  ;;  %v7496_v8 = vsel %vm6407_vm0, 4294967295, %v7495_v8  ;;  %v406_v14 = vadd.s32 176, %v5593_v11  ;;  %v7497_v9 = vshrl.u32 %v5781_v61, 16 }
  0xa4   : > { %v1173_v5 = vsel %vm6407_vm0, 0, %v6397_v7  ;;  %v3013_v13 = vsel %vm6034_vm7, 0, %v2877_v44  ;;  %vm1033_vm14 = vcmp.eq.s32.totalorder %v560_v43, 0  ;;  %v2888_v15 = vshrl.u32 %v5640_v35, 16 }
  0xa5   : > { %v958_v55 = vrot.slane %v7497_v9, 7  ;;  %vm7498_vm12 = vcmask 64512   ;;  %vm1063_vm15 = vmpackc.low %vm1033_vm14, %vm1033_vm14  ;;  %v2884_v30 = vrot.slane %v2882_v20, 4  ;;  %v574_v63 = vand.u32 15, %v406_v14 }
  0xa6   : > { %4768 = vmatmul.mubr.msk.bf16.gmra.mrb[12].mxu1 %vm7498_vm12, %v1171_v46  ;;  %vm7499_vm4 = vmmov %vm7498_vm12  ;;  %v7500_v23 = vshll.u32 %v5781_v61, 16  ;;  %v2891_v9 = vshll.u32 %v5640_v35, 16  ;;  %v1093_v44 = vsel %vm1063_vm15, 65537, %v7340_v3  ;;  %v2890_v43 = vrot.slane %v2888_v15, 3 }
  0xa7   : > { %4920 = vmatmul.mubr.msk.bf16.gmra.mrb[28].mxu0 %vm7499_vm4, %v2588_v45  ;;  %vm7501_vm5 = vmmov %vm7499_vm4  ;;  %v408_v41 = vadd.s32 192, %v5593_v11  ;;  %v7503_v46 = vshrl.u32 %v5821_v58, 16  ;;  %v4302_v14 = vcombine.low %v1093_v44, %v5685_v56  ;;  %vm1035_vm14 = vcmp.eq.s32.totalorder %v574_v63, 0 }
  0xa8   : > { %v961_v57 = vor.u32 %v7500_v23, %v958_v55  ;;  %4771 = vmatprep.mubr.msk.bf16.mxu1 %vm7501_vm5, %v1172_v4  ;;  %vm7502_vm0 = vmmov %vm7499_vm4  ;;  %vm7504_vm4 = vsmask.f32 256  ;;  %v2885_v23 = vor.u32 %v2884_v30, %v2881_v48  ;;  %v2893_v35 = vrot.slane %v2891_v9, 4 }
  0xa9   : > { %4925 = vmatprep.mubr.msk.bf16.mxu0 %vm7502_vm0, %v3012_v12  ;;  %v6432_v45 = vrot.slane %v7503_v46, 7  ;;  %v6435_v20 = vsel %vm7504_vm4, %v942_v0, %v953_v25  ;;  %vm1065_vm12 = vmpackc.low %vm1035_vm14, %vm1035_vm14  ;;  %v588_v4 = vand.u32 15, %v408_v41  ;;  %v7505_v12 = vshll.u32 %v5821_v58, 16  ;;  %v6467_v58 = vld [vmem:[%s5529_s7 + $0x20] sm:$0xf] }
  0xaa   : > { %v4431_v61 = vcombine.low %v5626_v29, %v5635_v33  ;;  %vm6443_vm5 = vcmp.ne.s16.totalorder %v4302_v14, 0  ;;  %v7506_v46 = vmov 0  ;;  %vm7508_vm15 = vsmask.f32 4352  ;;  %vm7509_vm0 = vmmov %vm7504_vm4 }
  0xab   : > { %v969_v15 = vor.u32 %v7505_v12, %v6432_v45  ;;  %v7507_v46 = vsel %vm6443_vm5, 4294967295, %v7506_v46  ;;  %v2886_v0 = vsel %vm7508_vm15, %v2876_v42, %v2885_v23  ;;  %v1095_v25 = vsel %vm1065_vm12, 65537, %v7340_v3  ;;  %vm7512_vm12 = vmmov %vm7508_vm15 }
  0xac   : > { %v410_v48 = vadd.s32 208, %v5593_v11  ;;  %v1174_v41 = vsel %vm6443_vm5, 0, %v6435_v20  ;;  %v6454_v30 = vsel %vm7509_vm0, %v950_v51, %v961_v57  ;;  %v4303_v29 = vcombine.low %v1095_v25, %v5685_v56 }
  0xad   : > { %v2894_v33 = vor.u32 %v2893_v35, %v2890_v43  ;;  %v3014_v63 = vsel %vm6070_vm1, 0, %v2886_v0  ;;  %vm1037_vm4 = vcmp.eq.s32.totalorder %v588_v4, 0  ;;  %v2897_v42 = vshrl.u32 %v4431_v61, 16 }
  0xae   : > { %v2900_v9 = vshll.u32 %v4431_v61, 16  ;;  %vm6459_vm14 = vcmp.ne.s16.totalorder %v4303_v29, 0  ;;  %v7510_v44 = vmov 0  ;;  %vm1067_vm15 = vmpackc.low %vm1037_vm4, %vm1037_vm4  ;;  %v602_v12 = vand.u32 15, %v410_v48 }
  0xaf   : > { %v7511_v44 = vsel %vm6459_vm14, 4294967295, %v7510_v44  ;;  %v2895_v14 = vsel %vm7512_vm12, %v2885_v23, %v2894_v33  ;;  %v7513_v51 = vshrl.u32 %v5854_v26, 16  ;;  %vm7514_vm0 = vcmask 64512  }
  0xb0   : > { %4772 = vmatmul.mubr.msk.bf16.gmra.mrb[16].mxu1 %vm7514_vm0, %v1173_v5  ;;  %vm7515_vm7 = vmmov %vm7514_vm0  ;;  %vm7516_vm1 = vsmask.f32 256  ;;  %v1097_v61 = vsel %vm1067_vm15, 65537, %v7340_v3  ;;  %v2899_v35 = vrot.slane %v2897_v42, 3  ;;  %v1175_v23 = vsel %vm6459_vm14, 0, %v6454_v30 }
  0xb1   : > { %v974_v57 = vrot.slane %v7513_v51, 7  ;;  %4926 = vmatmul.mubr.msk.bf16.vlgmr.msra.gmra.mrb[0].mxu0 %vm7515_vm7, %v3013_v13  ;;  %v6472_v43 = vsel %vm7516_vm1, %v958_v55, %v969_v15  ;;  %vm7517_vm5 = vmmov %vm7514_vm0  ;;  %v4304_v4 = vcombine.low %v1097_v61, %v5685_v56  ;;  %v2902_v0 = vrot.slane %v2900_v9, 4 }
  0xb2   : > { %4958 = vmatpush3.bf16.msra.mxu0 %v3277_v18  ;;  %4775 = vmatprep.mubr.msk.bf16.mxu1 %vm7517_vm5, %v1174_v41  ;;  %vm1039_vm4 = vcmp.eq.s32.totalorder %v602_v12, 0  ;;  %vm7518_vm12 = vmmov %vm7514_vm0  ;;  %v4432_v55 = vcombine.low %v5638_v34, %v5649_v38  ;;  %v412_v5 = vadd.s32 224, %v5593_v11  ;;  %v7519_v18 = vshrl.u32 %v5863_v6, 16 }
  0xb3   : > { %4929 = vmatprep.mubr.msk.bf16.mxu0 %vm7518_vm12, %v3014_v63  ;;  %vm1069_vm7 = vmpackc.low %vm1039_vm4, %vm1039_vm4  ;;  %v4433_v15 = vcombine.low %v5652_v39, %v5664_v49  ;;  %vm7520_vm1 = vcmask 1043456   ;;  %vm6492_vm5 = vcmp.ne.s16.totalorder %v4304_v4, 0  ;;  %v7521_v25 = vmov 0 }
  0xb4   : > { %v6486_v13 = vrot.slane %v7519_v18, 7  ;;  %5292 = vmatprep.subr.msk.bf16.mxu0 %vm7520_vm1, %v6467_v58  ;;  %v7522_v25 = vsel %vm6492_vm5, 4294967295, %v7521_v25  ;;  %v2903_v48 = vor.u32 %v2902_v0, %v2899_v35  ;;  %v7523_v41 = vshll.u32 %v5854_v26, 16 }
  0xb5   : > { %v1099_v38 = vsel %vm1069_vm7, 65537, %v7340_v3  ;;  %v3015_v29 = vsel %vm6124_vm8, 0, %v2895_v14  ;;  %v2906_v42 = vshrl.u32 %v4432_v55, 16  ;;  %v2909_v39 = vshll.u32 %v4432_v55, 16 }
  0xb6   : > { %v977_v34 = vor.u32 %v7523_v41, %v974_v57  ;;  %v4305_v63 = vcombine.low %v1099_v38, %v5685_v56  ;;  %vm7524_vm15 = vsmask.f32 4352  ;;  %v616_v9 = vand.u32 15, %v412_v5 }
  0xb7   : > { %v2904_v49 = vsel %vm7524_vm15, %v2894_v33, %v2903_v48  ;;  %v7525_v12 = vshll.u32 %v5863_v6, 16  ;;  %v2915_v61 = vshrl.u32 %v4433_v15, 16  ;;  %v1176_v35 = vsel %vm6492_vm5, 0, %v6472_v43 }
  0xb8   : > { %v3016_v4 = vsel %vm6177_vm3, 0, %v2904_v49  ;;  %v2908_v14 = vrot.slane %v2906_v42, 3  ;;  %v2911_v0 = vrot.slane %v2909_v39, 4  ;;  %vm7526_vm0 = vsmask.f32 256 }
  0xb9   : > { %v985_v51 = vor.u32 %v7525_v12, %v6486_v13  ;;  %v6513_v55 = vsel %vm7526_vm0, %v6432_v45, %v977_v34  ;;  %vm6515_vm4 = vcmp.ne.s16.totalorder %v4305_v63, 0  ;;  %v7527_v33 = vmov 0  ;;  %vm7529_vm12 = vmmov %vm7526_vm0 }
  0xba   : > { %v7528_v33 = vsel %vm6515_vm4, 4294967295, %v7527_v33  ;;  %vm1041_vm7 = vcmp.eq.s32.totalorder %v616_v9, 0  ;;  %vm7530_vm1 = vcmask 64512   ;;  %v2912_v18 = vor.u32 %v2911_v0, %v2908_v14 }
  0xbb   : > { %v6520_v5 = vsel %vm7529_vm12, %v974_v57, %v985_v51  ;;  %4776 = vmatmul.mubr.msk.bf16.gmra.mrb[20].mxu1 %vm7530_vm1, %v1175_v23  ;;  %vm7531_vm15 = vmmov %vm7530_vm1  ;;  %v2917_v41 = vrot.slane %v2915_v61, 3  ;;  %v2918_v38 = vshll.u32 %v4433_v15, 16  ;;  %v414_v42 = vadd.s32 240, %v5593_v11 }
  0xbc   : > { %4930 = vmatmul.mubr.msk.bf16.gmra.mrb[4].mxu0 %vm7531_vm15, %v3015_v29  ;;  %vm1071_vm3 = vmpackc.low %vm1041_vm7, %vm1041_vm7  ;;  %v7534_v57 = vshrl.u32 %v5895_v47, 16  ;;  %v4434_v23 = vcombine.low %v5681_v54, %v5723_v2  ;;  %v7535_v29 = vld [vmem:[#allocation14_spill] sm:$0xff]  ;;  %vm7536_vm12 = vsmask.f32 4352  ;;  %v1177_v9 = vsel %vm6515_vm4, 0, %v6513_v55 }
  0xbd   : > { %vm7532_vm0 = vmmov %vm7530_vm1  ;;  %v1101_v45 = vsel %vm1071_vm3, 65537, %v7340_v3  ;;  %v4435_v63 = vcombine.low %v7535_v29, %v5742_v19  ;;  %v2913_v15 = vsel %vm7536_vm12, %v2903_v48, %v2912_v18  ;;  %v2920_v39 = vrot.slane %v2918_v38, 4  ;;  %v7541_v29 = vld [vmem:[#allocation20_spill] sm:$0xff] }
  0xbe   : > { %4779 = vmatprep.mubr.msk.bf16.mxu1 %vm7532_vm0, %v1176_v35  ;;  %vm7533_vm8 = vmmov %vm7532_vm0  ;;  %v6530_v34 = vrot.slane %v7534_v57, 7  ;;  %v4306_v11 = vcombine.low %v1101_v45, %v5685_v56  ;;  %v630_v49 = vand.u32 15, %v414_v42  ;;  %v2924_v12 = vshrl.u32 %v4434_v23, 16 }
  0xbf   : > { %4933 = vmatprep.mubr.msk.bf16.mxu0 %vm7533_vm8, %v3016_v4  ;;  %v2927_v51 = vshll.u32 %v4434_v23, 16  ;;  %v3017_v61 = vsel %vm6236_vm6, 0, %v2913_v15  ;;  %v7537_v54 = vmov 0  ;;  %v2921_v2 = vor.u32 %v2920_v39, %v2917_v41  ;;  %vm7540_vm1 = vmmov %vm7536_vm12  ;;  %v7542_v15 = vld [vmem:[#allocation17_spill] sm:$0xff] }
  0xc0   : > { %vm6543_vm8 = vcmp.ne.s16.totalorder %v4306_v11, 0  ;;  %vm1043_vm3 = vcmp.eq.s32.totalorder %v630_v49, 0  ;;  %v7539_v48 = vshll.u32 %v5895_v47, 16  ;;  %v2926_v4 = vrot.slane %v2924_v12, 3  ;;  %vm7543_vm15 = vmmov %vm7532_vm0  ;;  %v7544_v39 = vld [vmem:[#allocation13_spill] sm:$0xff] }
  0xc1   : > { %v7538_v54 = vsel %vm6543_vm8, 4294967295, %v7537_v54  ;;  %v1178_v19 = vsel %vm6543_vm8, 0, %v6520_v5  ;;  %vm1073_vm7 = vmpackc.low %vm1043_vm3, %vm1043_vm3  ;;  %v2929_v14 = vrot.slane %v2927_v51, 4  ;;  %v2922_v0 = vsel %vm7540_vm1, %v2912_v18, %v2921_v2 }
  0xc2   : > { %v993_v35 = vor.u32 %v7539_v48, %v6530_v34  ;;  %v1103_v38 = vsel %vm1073_vm7, 65537, %v7340_v3  ;;  %v2933_v42 = vshrl.u32 %v4435_v63, 16  ;;  %v2936_v45 = vshll.u32 %v4435_v63, 16  ;;  %vm7545_vm12 = vmmov %vm7532_vm0  ;;  %v7551_v48 = vld [vmem:[#allocation25_spill] sm:$0xff] }
  0xc3   : > { %v3018_v41 = vsel %vm6276_vm11, 0, %v2922_v0  ;;  %v4307_v57 = vcombine.low %v1103_v38, %v5685_v56  ;;  %v2930_v23 = vor.u32 %v2929_v14, %v2926_v4  ;;  %v4436_v11 = vcombine.low %v7542_v15, %v7541_v29  ;;  %4780 = vmatmul.mubr.msk.bf16.gmra.mrb[24].mxu1 %vm7543_vm15, %v1177_v9  ;;  %vm7546_vm3 = vmmov %vm7532_vm0  ;;  %v7552_v4 = vld [vmem:[#allocation22_spill] sm:$0xff]  ;;  %v7553_v0 = vld [vmem:[#allocation16_spill] sm:$0xff] }
  0xc4   : > { %4934 = vmatmul.mubr.msk.bf16.gmra.mrb[8].mxu0 %vm7532_vm0, %v3017_v61  ;;  %v1662_v18 = vsel %vm6293_vm2, 0, %v7544_v39  ;;  %v2935_v49 = vrot.slane %v2933_v42, 3  ;;  %v2938_v12 = vrot.slane %v2936_v45, 4  ;;  %4783 = vmatprep.mubr.msk.bf16.mxu1 %vm7545_vm12, %v1178_v19  ;;  %vm7547_vm7 = vsmask.f32 256  ;;  %v7554_v45 = vld [vmem:[#allocation28_spill] sm:$0xff]  ;;  %vm7559_vm12 = vmmov %vm7532_vm0 }
  0xc5   : > { %4937 = vmatprep.mubr.msk.bf16.mxu0 %vm7546_vm3, %v3018_v41  ;;  %v6569_v56 = vsel %vm7547_vm7, %v6486_v13, %v993_v35  ;;  %vm6571_vm1 = vcmp.ne.s16.totalorder %v4307_v57, 0  ;;  %v7548_v63 = vmov 0  ;;  %v2942_v9 = vshrl.u32 %v4436_v11, 16  ;;  %v7555_v13 = vld [vmem:[#allocation27_spill] sm:$0xff]  ;;  %vm7560_vm3 = vmmov %vm7532_vm0 }
  0xc6   : > { %v7549_v63 = vsel %vm6571_vm1, 4294967295, %v7548_v63  ;;  %v2945_v51 = vshll.u32 %v4436_v11, 16  ;;  %vm7550_vm15 = vsmask.f32 4352  ;;  %v2939_v52 = vor.u32 %v2938_v12, %v2935_v49  ;;  %vm7561_vm7 = vmmov %vm7532_vm0 }
  0xc7   : > { %v2931_v61 = vsel %vm7550_vm15, %v2921_v2, %v2930_v23  ;;  %v4437_v14 = vcombine.low %v7552_v4, %v7551_v48  ;;  %v1823_v19 = vsel %vm5744_vm10, 0, %v1662_v18  ;;  %v2944_v38 = vrot.slane %v2942_v9, 3  ;;  %vm7556_vm2 = vmmov %vm7550_vm15  ;;  %v7558_v48 = vld [vmem:[#allocation29_spill] sm:$0xff] }
  0xc8   : > { %v2947_v42 = vrot.slane %v2945_v51, 4  ;;  %v4438_v35 = vcombine.low %v7555_v13, %v7554_v45  ;;  %v1179_v41 = vsel %vm6571_vm1, 0, %v6569_v56  ;;  %v2940_v57 = vsel %vm7556_vm2, %v2930_v23, %v2939_v52  ;;  %v7557_v51 = vld [vmem:[#allocation33_spill] sm:$0xff]  ;;  %vm7562_vm15 = vmmov %vm7556_vm2  ;;  %v7563_v13 = vld [vmem:[#allocation34_spill] sm:$0xff] }
  0xc9   : > { %v2951_v29 = vshrl.u32 %v4437_v14, 16  ;;  %v2954_v2 = vshll.u32 %v4437_v14, 16  ;;  %v3019_v15 = vsel %vm6339_vm13, 0, %v2931_v61  ;;  %v3020_v11 = vsel %vm6366_vm9, 0, %v2940_v57 }
  0xca   : > { %v2948_v39 = vor.u32 %v2947_v42, %v2944_v38  ;;  %v2960_v18 = vshrl.u32 %v4438_v35, 16  ;;  %v2963_v9 = vshll.u32 %v4438_v35, 16  ;;  %v4439_v4 = vcombine.low %v7558_v48, %v7557_v51 }
  0xcb   : > { %v2953_v49 = vrot.slane %v2951_v29, 3  ;;  %v2956_v12 = vrot.slane %v2954_v2, 4  ;;  %4784 = vmatmul.mubr.msk.bf16.gmra.mrb[28].mxu1 %vm7532_vm0, %v1179_v41  ;;  %v4440_v35 = vcombine.low %v7563_v13, %v6191_v36  ;;  %v4441_v41 = vcombine.low %v6201_v21, %v6201_v21 }
  0xcc   : > { %4938 = vmatmul.mubr.msk.bf16.gmra.mrb[12].mxu0 %vm7559_vm12, %v3019_v15  ;;  %v2969_v14 = vshrl.u32 %v4439_v4, 16  ;;  %v2972_v45 = vshll.u32 %v4439_v4, 16  ;;  %4789 = vmatprep.mubr.msk.bf16.mxu1 %vm7560_vm3, %v1823_v19  ;;  %v2949_v61 = vsel %vm7562_vm15, %v2939_v52, %v2948_v39  ;;  %v2962_v38 = vrot.slane %v2960_v18, 3  ;;  %v7567_v52 = vld [vmem:[#allocation24_spill] sm:$0xff]  ;;  %v7570_v4 = vld [vmem:[#allocation18_spill] sm:$0xff] }
  0xcd   : > { %v2957_v23 = vor.u32 %v2956_v12, %v2953_v49  ;;  %4941 = vmatprep.mubr.msk.bf16.mxu0 %vm7561_vm7, %v3020_v11  ;;  %v2965_v42 = vrot.slane %v2963_v9, 4  ;;  %vm7564_vm0 = vnez %v7496_v8  ;;  %vm7565_vm12 = vcmask 1043456   ;;  %v7566_v11 = vld [vmem:[#allocation19_spill] sm:$0xff] }
  0xce   : > { %v2971_v57 = vrot.slane %v2969_v14, 3  ;;  %v2974_v29 = vrot.slane %v2972_v45, 4  ;;  %v3021_v15 = vsel %vm7564_vm0, 0, %v2949_v61  ;;  %v2172_v19 = vsel %vm7565_vm12, %v6224_v37, 0  ;;  %v7572_v14 = vld [vmem:[#allocation15_spill] sm:$0xff] }
  0xcf   : > { %v2958_v2 = vsel %vm7556_vm2, %v2948_v39, %v2957_v23  ;;  %vm7568_vm3 = vnez %v7567_v52  ;;  %v2966_v49 = vor.u32 %v2965_v42, %v2962_v38  ;;  %v2978_v12 = vshrl.u32 %v4440_v35, 16  ;;  %v5386_v42 = vld [vmem:[%s5529_s7 + $0x10] sm:$0xf] }
  0xd0   : > { %v1825_v18 = vsel %vm7568_vm3, 0, %v7566_v11  ;;  %v2981_v9 = vshll.u32 %v4440_v35, 16  ;;  %vm7569_vm7 = vnez %v7507_v46  ;;  %v2975_v21 = vor.u32 %v2974_v29, %v2971_v57 }
  0xd1   : > { %v3022_v51 = vsel %vm7569_vm7, 0, %v2958_v2  ;;  %v2987_v48 = vshrl.u32 %v4441_v41, 16  ;;  %v2990_v39 = vshll.u32 %v4441_v41, 16  ;;  %vm7571_vm15 = vnez %v7570_v4  ;;  %v7582_v2 = vld [vmem:[#allocation23_spill] sm:$0xff] }
  0xd2   : > { %v7573_v45 = vsel %vm7571_vm15, 0, %v7572_v14  ;;  %vm7574_vm2 = vcmask 64512   ;;  %vm7578_vm6 = vsmask.f32 4352  ;;  %v2980_v61 = vrot.slane %v2978_v12, 3  ;;  %v7598_v14 = vld [vmem:[#allocation37_spill] sm:$0xff] }
  0xd3   : > { %4790 = vmatmul.mubr.msk.bf16.vlgmr.msra.gmra.mrb[0].mxu1 %vm7574_vm2, %v7573_v45  ;;  %vm7575_vm12 = vmmov %vm7574_vm2  ;;  %v2967_v37 = vsel %vm7578_vm6, %v2957_v23, %v2966_v49  ;;  %v2983_v38 = vrot.slane %v2981_v9, 4  ;;  %vm7579_vm1 = vcmask 1043456   ;;  %v7580_v13 = vshrl.u32 %v6221_v53, 16  ;;  %v7585_v9 = vld [vmem:[#allocation30_spill] sm:$0xff]  ;;  %v7633_v23 = vld [vmem:[#allocation56_spill] sm:$0xff] }
  0xd4   : > { %4942 = vmatmul.mubr.msk.bf16.gmra.mrb[16].mxu0 %vm7575_vm12, %v3021_v15  ;;  %4822 = vmatpush3.bf16.msra.mxu1 %v2172_v19  ;;  %vm7576_vm3 = vmmov %vm7574_vm2  ;;  %v2989_v29 = vrot.slane %v2987_v48, 3  ;;  %v2992_v41 = vrot.slane %v2990_v39, 4  ;;  %v7583_v15 = vld [vmem:[#allocation31_spill] sm:$0xff]  ;;  %vm7593_vm12 = vsmask.f32 4352  ;;  %v7689_v31 = vsel %vm6366_vm9, 0, %v6397_v7 }
  0xd5   : > { %4793 = vmatprep.mubr.msk.bf16.mxu1 %vm7576_vm3, %v1825_v18  ;;  %vm7577_vm10 = vmmov %vm7574_vm2  ;;  %5288 = vmatprep.subr.msk.bf16.mxu1 %vm7579_vm1, %v5386_v42  ;;  %v2091_v35 = vrot.slane %v7580_v13, 7  ;;  %vm7584_vm2 = vnez %v7583_v15  ;;  %v2984_v42 = vor.u32 %v2983_v38, %v2980_v61  ;;  %v7590_v61 = vshll.u32 %v6221_v53, 16  ;;  %v7742_v15 = vld [vmem:[#allocation61_spill] sm:$0xff] }
  0xd6   : > { %4945 = vmatprep.mubr.msk.bf16.mxu0 %vm7577_vm10, %v3022_v51  ;;  %vm7581_vm15 = vmmov %vm7578_vm6  ;;  %v1826_v19 = vsel %vm7584_vm2, 0, %v7582_v2  ;;  %v7586_v51 = vld [vmem:[#allocation35_spill] sm:$0xff]  ;;  %v2993_v12 = vor.u32 %v2992_v41, %v2989_v29  ;;  %v7696_v22 = vsel %vm7569_vm7, 0, %v6454_v30  ;;  %vm7703_vm7 = vnez %v7522_v25 }
  0xd7   : > { %v2976_v57 = vsel %vm7581_vm15, %v2966_v49, %v2975_v21  ;;  %v3023_v49 = vsel %vm6459_vm14, 0, %v2967_v37  ;;  %vm7587_vm10 = vnez %v7586_v51  ;;  %vm7588_vm6 = vmmov %vm7576_vm3  ;;  %v2094_v38 = vor.u32 %v7590_v61, %v2091_v35  ;;  %v7601_v61 = vld [vmem:[#allocation39_spill] sm:$0xff]  ;;  %v7612_v37 = vld [vmem:[#allocation40_spill] sm:$0xff] }
  0xd8   : > { %v1827_v48 = vsel %vm7587_vm10, 0, %v7585_v9  ;;  %v3024_v45 = vsel %vm6492_vm5, 0, %v2976_v57  ;;  %vm7589_vm1 = vmmov %vm7576_vm3  ;;  %v2985_v57 = vsel %vm7593_vm12, %v2975_v21, %v2984_v42  ;;  %vm7594_vm5 = vsmask.f32 256  ;;  %v7744_v51 = vld [vmem:[#allocation64_spill] sm:$0xff] }
  0xd9   : > { %vm7591_vm3 = vmmov %vm7589_vm1  ;;  %v6671_v41 = vsel %vm7594_vm5, %v6530_v34, %v2094_v38  ;;  %v7609_v38 = vld [vmem:[#allocation38_spill] sm:$0xff]  ;;  %v7704_v46 = vsel %vm7703_vm7, 0, %v6513_v55 }
  0xda   : > { %vm7592_vm15 = vmmov %vm7589_vm1 }
  0xdb   : > { %4794 = vmatmul.mubr.msk.bf16.gmra.mrb[4].mxu1 %vm7588_vm6, %v1826_v19  ;;  %vm7595_vm14 = vmmov %vm7593_vm12  ;;  %vm7596_vm6 = vnez %v7549_v63 }
  0xdc   : > { %4946 = vmatmul.mubr.msk.bf16.gmra.mrb[20].mxu0 %vm7589_vm1, %v3023_v49  ;;  %4797 = vmatprep.mubr.msk.bf16.mxu1 %vm7591_vm3, %v1827_v48  ;;  %v2994_v39 = vsel %vm7595_vm14, %v2984_v42, %v2993_v12  ;;  %v7597_v49 = vld [vmem:[#allocation32_spill] sm:$0xff]  ;;  %vm7599_vm1 = vnez %v7598_v14  ;;  %v3025_v48 = vsel %vm6515_vm4, 0, %v2985_v57  ;;  %vm7602_vm3 = vnez %v7601_v61  ;;  %vm7603_vm5 = vmmov %vm7592_vm15  ;;  %v7607_v12 = vld [vmem:[#allocation42_spill] sm:$0xff] }
  0xdd   : > { %4949 = vmatprep.mubr.msk.bf16.mxu0 %vm7592_vm15, %v3024_v45  ;;  %v1828_v35 = vsel %vm7599_vm1, 0, %v7597_v49  ;;  %v7600_v45 = vld [vmem:[#allocation36_spill] sm:$0xff]  ;;  %v3026_v34 = vsel %vm6543_vm8, 0, %v2994_v39  ;;  %vm7604_vm14 = vmmov %vm7603_vm5  ;;  %vm7608_vm1 = vnez %v7607_v12  ;;  %v7610_v57 = vld [vmem:[#allocation41_spill] sm:$0xff]  ;;  %v3475_v7 = vsel %vm7584_vm2, 0, %v7597_v49 }
  0xde   : > { %v1829_v21 = vsel %vm7602_vm3, 0, %v7600_v45  ;;  %vm7605_vm15 = vmmov %vm7603_vm5  ;;  %v3011_v42 = vsel %vm7608_vm1, %v2989_v29, 0  ;;  %vm7611_vm4 = vnez %v7610_v57  ;;  %v7613_v39 = vld [vmem:[#allocation44_spill] sm:$0xff]  ;;  %v7619_v29 = vld [vmem:[#allocation43_spill] sm:$0xff]  ;;  %vm7620_vm1 = vnez %v7378_v27 }
  0xdf   : > { %vm7606_vm12 = vmmov %vm7603_vm5  ;;  %v1830_v19 = vsel %vm7611_vm4, 0, %v7609_v38  ;;  %v3027_v13 = vsel %vm7596_vm6, 0, %v3011_v42  ;;  %vm7614_vm8 = vnez %v7613_v39  ;;  %vm7621_vm4 = vcmask 1043456   ;;  %v7622_v12 = vld [vmem:[#allocation50_spill] sm:$0xff] }
  0xe0   : > { %vm7623_vm6 = vnez %v7622_v12  ;;  %v3476_v8 = vsel %vm7587_vm10, 0, %v7600_v45  ;;  %vm7707_vm2 = vnez %v7598_v14  ;;  %vm7708_vm10 = vnez %v7528_v33 }
  0xe1   : > { %v1833_v42 = vsel %vm7623_vm6, 0, %v6047_v62  ;;  %vm7646_vm6 = vmmov %vm7603_vm5  ;;  %v3477_v30 = vsel %vm7707_vm2, 0, %v7609_v38 }
  0xe3   : > { %4798 = vmatmul.mubr.msk.bf16.gmra.mrb[8].mxu1 %vm7603_vm5, %v1828_v35  ;;  %v1831_v35 = vsel %vm7614_vm8, 0, %v7612_v37  ;;  %vm7624_vm8 = vmmov %vm7603_vm5 }
  0xe4   : > { %4950 = vmatmul.mubr.msk.bf16.gmra.mrb[24].mxu0 %vm7604_vm14, %v3025_v48  ;;  %4801 = vmatprep.mubr.msk.bf16.mxu1 %vm7605_vm15, %v1829_v21  ;;  %vm7615_vm14 = vmmov %vm7603_vm5  ;;  %v7617_v48 = vld [vmem:[#allocation6_spill] sm:$0xff]  ;;  %v1832_v21 = vsel %vm7620_vm1, 0, %v7619_v29 }
  0xe5   : > { %4953 = vmatprep.mubr.msk.bf16.mxu0 %vm7606_vm12, %v3026_v34  ;;  %vm7616_vm15 = vmmov %vm7603_vm5  ;;  %v3535_v34 = vsel %vm7621_vm4, %v6467_v58, 0  ;;  %v7632_v58 = vld [vmem:[#allocation52_spill] sm:$0xff]  ;;  %vm7634_vm4 = vnez %v7633_v23  ;;  %v7643_v23 = vld [vmem:[#allocation58_spill] sm:$0xff] }
  0xe6   : > { %vm7618_vm12 = vmmov %vm7603_vm5  ;;  %v1835_v12 = vsel %vm7634_vm4, 0, %v7632_v58  ;;  %v7644_v58 = vld [vmem:[#allocation63_spill] sm:$0xff] }
  0xe7   : > { %vm7645_vm4 = vnez %v7644_v58  ;;  %vm7656_vm1 = vmmov %vm7603_vm5 }
  0xe8   : > { %vm7697_vm9 = vmmov %vm7656_vm1 }
  0xeb   : > { %4802 = vmatmul.mubr.msk.bf16.gmra.mrb[12].mxu1 %vm7603_vm5, %v1830_v19  ;;  %v7625_v19 = vld [vmem:[#allocation7_spill] sm:$0xff] }
  0xec   : > { %4954 = vmatmul.mubr.msk.bf16.gmra.mrb[28].mxu0 %vm7615_vm14, %v3027_v13  ;;  %4805 = vmatprep.mubr.msk.bf16.mxu1 %vm7616_vm15, %v1831_v35  ;;  %vm7626_vm14 = vmmov %vm7603_vm5  ;;  %v7627_v13 = vld [vmem:[#allocation8_spill] sm:$0xff]  ;;  %v7629_v35 = vld [vmem:[#allocation49_spill] sm:$0xff] }
  0xed   : > { %4959 = vmatprep.mubr.msk.bf16.mxu0 %vm7618_vm12, %v7617_v48  ;;  %vm7628_vm15 = vmmov %vm7603_vm5  ;;  %v7630_v48 = vld [vmem:[#allocation53_spill] sm:$0xff] }
  0xee   : > { %vm7631_vm12 = vnez %v7630_v48  ;;  %v7641_v48 = vld [vmem:[#allocation61_spill] sm:$0xff] }
  0xef   : > { %v1834_v18 = vsel %vm7631_vm12, 0, %v7629_v35  ;;  %vm7642_vm12 = vnez %v7641_v48  ;;  %v1837_v35 = vsel %vm7645_vm4, 0, %v7643_v23  ;;  %v7654_v48 = vld [vmem:[#allocation45_spill] sm:$0xff]  ;;  %vm7655_vm4 = vnez %v7489_v16 }
  0xf0   : > { %v7667_v16 = vld [vmem:[#allocation21_spill] sm:$0xff] }
  0xf3   : > { %4806 = vmatmul.mubr.msk.bf16.gmra.mrb[16].mxu1 %vm7624_vm8, %v1832_v21  ;;  %v4339_v21 = vcombine.low %v6191_v36, %v6191_v36  ;;  %vm7635_vm8 = vmmov %vm7603_vm5 }
  0xf4   : > { %4960 = vmatmul.mubr.msk.bf16.vlgmr.msra.gmra.mrb[0].mxu0 %vm7603_vm5, %v7625_v19  ;;  %4809 = vmatprep.mubr.msk.bf16.mxu1 %vm7626_vm14, %v1833_v42  ;;  %v7636_v19 = vld [vmem:[#allocation9_spill] sm:$0xff]  ;;  %vm7637_vm14 = vmmov %vm7603_vm5 }
  0xf5   : > { %4992 = vmatpush3.bf16.msra.mxu0 %v3535_v34  ;;  %4963 = vmatprep.mubr.msk.bf16.mxu0 %vm7628_vm15, %v7627_v13  ;;  %v7638_v34 = vld [vmem:[#allocation10_spill] sm:$0xff]  ;;  %vm7639_vm15 = vmmov %vm7603_vm5  ;;  %v1640_v42 = vshll.u32 %v4339_v21, 16  ;;  %v7640_v13 = vld [vmem:[#allocation55_spill] sm:$0xff] }
  0xf6   : > { %v1836_v27 = vsel %vm7642_vm12, 0, %v7640_v13  ;;  %v7651_v21 = vld [vmem:[#allocation60_spill] sm:$0xff]  ;;  %vm7653_vm12 = vnez %v7478_v50  ;;  %v7662_v50 = vld [vmem:[#allocation46_spill] sm:$0xff] }
  0xf7   : > { %v1642_v36 = vrot.slane %v1640_v42, 1  ;;  %v2105_v42 = vsel %vm7655_vm4, 0, %v7654_v48  ;;  %v7668_v48 = vld [vmem:[#allocation5_spill] sm:$0xff]  ;;  %vm7669_vm4 = vmmov %vm7656_vm1 }
  0xfb   : > { %4810 = vmatmul.mubr.msk.bf16.gmra.mrb[20].mxu1 %vm7635_vm8, %v1834_v18  ;;  %v7647_v18 = vld [vmem:[#allocation11_spill] sm:$0xff]  ;;  %vm7648_vm8 = vmmov %vm7603_vm5 }
  0xfc   : > { %4964 = vmatmul.mubr.msk.bf16.gmra.mrb[4].mxu0 %vm7603_vm5, %v7636_v19  ;;  %4813 = vmatprep.mubr.msk.bf16.mxu1 %vm7637_vm14, %v1835_v12  ;;  %v7649_v12 = vld [vmem:[#allocation12_spill] sm:$0xff]  ;;  %vm7650_vm14 = vmmov %vm7603_vm5 }
  0xfd   : > { %4967 = vmatprep.mubr.msk.bf16.mxu0 %vm7639_vm15, %v7638_v34  ;;  %vm7652_vm15 = vsmask.f32 7424 }
  0xfe   : > { %v1643_v19 = vsel %vm7652_vm15, %v7651_v21, %v1642_v36  ;;  %v7664_v36 = vld [vmem:[#allocation47_spill] sm:$0xff]  ;;  %vm7666_vm15 = vmmov %vm7656_vm1  ;;  %v7672_v21 = vld [vmem:[#allocation54_spill] sm:$0xff] }
  0xff   : > { %v1838_v34 = vsel %vm7653_vm12, 0, %v1643_v19  ;;  %vm7663_vm12 = vnez %v7662_v50  ;;  %v7674_v19 = vld [vmem:[#allocation57_spill] sm:$0xff] }
 0x103   : > { %4814 = vmatmul.mubr.msk.bf16.gmra.mrb[24].mxu1 %vm7646_vm6, %v1836_v27  ;;  %vm7657_vm6 = vmmov %vm7656_vm1  ;;  %v7660_v27 = vld [vmem:[#allocation51_spill] sm:$0xff] }
 0x104   : > { %4968 = vmatmul.mubr.msk.bf16.gmra.mrb[8].mxu0 %vm7648_vm8, %v7647_v18  ;;  %4817 = vmatprep.mubr.msk.bf16.mxu1 %vm7603_vm5, %v1837_v35  ;;  %vm7658_vm8 = vmmov %vm7656_vm1  ;;  %v7665_v18 = vsel %vm7663_vm12, 0, %v7664_v36 }
 0x105   : > { %4971 = vmatprep.mubr.msk.bf16.mxu0 %vm7650_vm14, %v7649_v12  ;;  %vm7659_vm5 = vmmov %vm7656_vm1  ;;  %vm7661_vm14 = vnez %v7384_v60  ;;  %v7670_v12 = vld [vmem:[#allocation26_spill] sm:$0xff] }
 0x106   : > { %v2107_v35 = vsel %vm7661_vm14, 0, %v7660_v27  ;;  %vm7676_vm14 = vmmov %vm7656_vm1 }
 0x107   : > { %vm7677_vm12 = vmmov %vm7656_vm1 }
 0x10b   : > { %4818 = vmatmul.mubr.msk.bf16.gmra.mrb[28].mxu1 %vm7656_vm1, %v1838_v34 }
 0x10c   : > { %4972 = vmatmul.mubr.msk.bf16.gmra.mrb[12].mxu0 %vm7657_vm6, %v5720_v1  ;;  %4823 = vmatprep.mubr.msk.bf16.mxu1 %vm7658_vm8, %v2105_v42  ;;  %vm7671_vm6 = vmmov %vm7656_vm1  ;;  %vm7673_vm8 = vnez %v7402_v40  ;;  %v7679_v42 = vld [vmem:[#allocation59_spill] sm:$0xff]  ;;  %v7683_v40 = vsel %vm6276_vm11, 0, %v6327_v32 }
 0x10d   : > { %4975 = vmatprep.mubr.msk.bf16.mxu0 %vm7659_vm5, %v5760_v28  ;;  %v2108_v60 = vsel %vm7673_vm8, 0, %v7672_v21  ;;  %vm7675_vm5 = vnez %v7420_v59  ;;  %vm7682_vm8 = vmmov %vm7656_vm1 }
 0x10e   : > { %v2109_v34 = vsel %vm7675_vm5, 0, %v7674_v19  ;;  %vm7684_vm5 = vmmov %vm7656_vm1 }
 0x10f   : > { %vm7690_vm11 = vmmov %vm7656_vm1 }
 0x113   : > { %4824 = vmatmul.mubr.msk.bf16.vlgmr.msra.gmra.mrb[0].mxu1 %vm7666_vm15, %v7665_v18  ;;  %vm7678_vm15 = vmmov %vm7656_vm1  ;;  %v3730_v18 = vld [vmem:[#allocation2] sm:$0xff] }
 0x114   : > { %4976 = vmatmul.mubr.msk.bf16.gmra.mrb[16].mxu0 %vm7656_vm1, %v7667_v16  ;;  %5026 = vmatpush3.bf16.msra.mxu1 %v7668_v48 }
 0x115   : > { %4827 = vmatprep.mubr.msk.bf16.mxu1 %vm7669_vm4, %v2107_v35  ;;  %4979 = vmatprep.mubr.msk.bf16.mxu0 %vm7671_vm6, %v7670_v12  ;;  %vm7680_vm4 = vnez %v7436_v24  ;;  %vm7681_vm6 = vmmov %vm7656_vm1  ;;  %v7687_v24 = vsel %vm6339_vm13, 0, %v6352_v17  ;;  %v7693_v17 = vsel %vm7564_vm0, 0, %v6435_v20  ;;  %vm7699_vm0 = vnez %v7511_v44  ;;  %v3732_v35 = vld [vmem:[#allocation2 + $0x10] sm:$0xff] }
 0x116   : > { %v2110_v27 = vsel %vm7680_vm4, 0, %v7679_v42  ;;  %vm7691_vm4 = vnez %v7570_v4  ;;  %vm7694_vm13 = vmmov %vm7656_vm1  ;;  %v7700_v20 = vsel %vm7699_vm0, 0, %v6472_v43  ;;  %v3478_v44 = vsel %vm7602_vm3, 0, %v7612_v37  ;;  %v7735_v4 = vld [vmem:[#allocation56_spill] sm:$0xff] }
 0x117   : > { %v3473_v32 = vsel %vm7691_vm4, 0, %v7582_v2  ;;  %v7709_v43 = vsel %vm7708_vm10, 0, %v6520_v5  ;;  %vm7710_vm4 = vmmov %vm7656_vm1  ;;  %vm7716_vm3 = vnez %v7613_v39 }
 0x118   : > { %v3480_v33 = vsel %vm7716_vm3, 0, %v6047_v62  ;;  %vm7719_vm0 = vmmov %vm7656_vm1 }
 0x119   : > { %vm7722_vm7 = vmmov %vm7719_vm0 }
 0x11a   : > { %vm7729_vm2 = vmmov %vm7719_vm0 }
 0x11b   : > { %4828 = vmatmul.mubr.msk.bf16.gmra.mrb[4].mxu1 %vm7676_vm14, %v2108_v60  ;;  %vm7685_vm14 = vmmov %vm7656_vm1 }
 0x11c   : > { %4980 = vmatmul.mubr.msk.bf16.gmra.mrb[20].mxu0 %vm7677_vm12, %v5854_v26  ;;  %4831 = vmatprep.mubr.msk.bf16.mxu1 %vm7678_vm15, %v2109_v34  ;;  %vm7686_vm12 = vnez %v7553_v0  ;;  %vm7688_vm15 = vmmov %vm7656_vm1  ;;  %v3731_v34 = vld [vmem:[#allocation2 + $0x8] sm:$0xff] }
 0x11d   : > { %4983 = vmatprep.mubr.msk.bf16.mxu0 %vm7656_vm1, %v5863_v6  ;;  %v3472_v59 = vsel %vm7686_vm12, 0, %v7566_v11  ;;  %vm7702_vm12 = vmmov %vm7656_vm1  ;;  %v7726_v11 = vld [vmem:[#allocation52_spill] sm:$0xff] }
 0x11e   : > { %vm7730_vm10 = vmmov %vm7719_vm0 }
 0x11f   : > { %vm7739_vm3 = vmmov %vm7719_vm0 }
 0x123   : > { %4832 = vmatmul.mubr.msk.bf16.gmra.mrb[8].mxu1 %vm7681_vm6, %v2110_v27  ;;  %vm7692_vm6 = vnez %v7567_v52  ;;  %v7727_v52 = vld [vmem:[#allocation50_spill] sm:$0xff] }
 0x124   : > { %4984 = vmatmul.mubr.msk.bf16.gmra.mrb[24].mxu0 %vm7682_vm8, %v5895_v47  ;;  %4835 = vmatprep.mubr.msk.bf16.mxu1 %vm7684_vm5, %v7683_v40  ;;  %v3474_v10 = vsel %vm7692_vm6, 0, %v7585_v9  ;;  %vm7695_vm8 = vmmov %vm7656_vm1  ;;  %vm7711_vm6 = vnez %v7538_v54  ;;  %v7723_v54 = vld [vmem:[#allocation49_spill] sm:$0xff] }
 0x125   : > { %4987 = vmatprep.mubr.msk.bf16.mxu0 %vm7685_vm14, %v6221_v53  ;;  %vm7698_vm5 = vmmov %vm7656_vm1  ;;  %v7712_v25 = vsel %vm7711_vm6, 0, %v6569_v56  ;;  %v7724_v56 = vld [vmem:[#allocation48_spill] sm:$0xff] }
 0x126   : > { %vm7701_vm14 = vmmov %vm7656_vm1 }
 0x12b   : > { %4836 = vmatmul.mubr.msk.bf16.gmra.mrb[12].mxu1 %vm7688_vm15, %v7687_v24  ;;  %vm7705_vm15 = vmmov %vm7656_vm1 }
 0x12c   : > { %4988 = vmatmul.mubr.bf16.gmra.mrb[28].mxu0 %v7340_v3  ;;  %4839 = vmatprep.mubr.msk.bf16.mxu1 %vm7690_vm11, %v7689_v31  ;;  %vm7706_vm11 = vmmov %vm7656_vm1  ;;  %v3736_v31 = vld [vmem:[#allocation2 + $0x30] sm:$0xff] }
 0x12d   : > { %4993 = vmatprep.mubr.msk.bf16.mxu0 %vm7656_vm1, %v3472_v59 }
 0x133   : > { %4840 = vmatmul.mubr.msk.bf16.gmra.mrb[16].mxu1 %vm7694_vm13, %v7693_v17  ;;  %vm7713_vm13 = vmmov %vm7656_vm1  ;;  %v3734_v17 = vld [vmem:[#allocation2 + $0x20] sm:$0xff] }
 0x134   : > { %4994 = vmatmul.mubr.msk.bf16.vlgmr.msra.gmra.mrb[0].mxu0 %vm7695_vm8, %v3473_v32  ;;  %4843 = vmatprep.mubr.msk.bf16.mxu1 %vm7697_vm9, %v7696_v22  ;;  %vm7714_vm8 = vmmov %vm7656_vm1  ;;  %vm7715_vm9 = vnez %v7610_v57 }
 0x135   : > { %4997 = vmatprep.mubr.msk.bf16.mxu0 %vm7698_vm5, %v3474_v10  ;;  %v3479_v55 = vsel %vm7715_vm9, 0, %v7619_v29  ;;  %vm7717_vm5 = vnez %v7549_v63  ;;  %vm7738_vm9 = vmmov %vm7719_vm0 }
 0x136   : > { %v7718_v5 = vsel %vm7717_vm5, 0, %v6671_v41  ;;  %vm7740_vm5 = vmmov %vm7719_vm0 }
 0x13b   : > { %4844 = vmatmul.mubr.msk.bf16.gmra.mrb[20].mxu1 %vm7701_vm14, %v7700_v20  ;;  %vm7720_vm14 = vmmov %vm7719_vm0 }
 0x13c   : > { %4998 = vmatmul.mubr.msk.bf16.gmra.mrb[4].mxu0 %vm7702_vm12, %v3475_v7  ;;  %4847 = vmatprep.mubr.msk.bf16.mxu1 %vm7705_vm15, %v7704_v46  ;;  %vm7721_vm12 = vmmov %vm7719_vm0  ;;  %vm7725_vm15 = vnez %v7724_v56 }
 0x13d   : > { %5001 = vmatprep.mubr.msk.bf16.mxu0 %vm7706_vm11, %v3476_v8  ;;  %v3481_v0 = vsel %vm7725_vm15, 0, %v7723_v54  ;;  %vm7728_vm11 = vnez %v7727_v52  ;;  %v3737_v8 = vld [vmem:[#allocation2 + $0x38] sm:$0xff]  ;;  %v3740_v54 = vld [vmem:[#allocation2 + $0x50] sm:$0xff] }
 0x13e   : > { %v3482_v62 = vsel %vm7728_vm11, 0, %v7726_v11  ;;  %v3738_v11 = vld [vmem:[#allocation2 + $0x40] sm:$0xff] }
 0x143   : > { %4848 = vmatmul.mubr.msk.bf16.gmra.mrb[24].mxu1 %vm7656_vm1, %v7709_v43  ;;  %vm7731_vm1 = vmmov %vm7719_vm0 }
 0x144   : > { %5002 = vmatmul.mubr.msk.bf16.gmra.mrb[8].mxu0 %vm7710_vm4, %v3477_v30  ;;  %4851 = vmatprep.mubr.msk.bf16.mxu1 %vm7713_vm13, %v7712_v25  ;;  %vm7732_vm4 = vmmov %vm7719_vm0  ;;  %vm7736_vm13 = vnez %v7735_v4 }
 0x145   : > { %5005 = vmatprep.mubr.msk.bf16.mxu0 %vm7714_vm8, %v3478_v44  ;;  %v3484_v2 = vsel %vm7736_vm13, 0, %v7643_v23  ;;  %vm7737_vm8 = vmmov %vm7719_vm0  ;;  %v3735_v44 = vld [vmem:[#allocation2 + $0x28] sm:$0xff] }
 0x146   : > { %vm7748_vm15 = vmmov %vm7731_vm1 }
 0x147   : > { %vm7749_vm11 = vmmov %vm7731_vm1 }
 0x148   : > { %vm7754_vm13 = vmmov %vm7731_vm1 }
 0x14b   : > { %4852 = vmatmul.mubr.msk.bf16.gmra.mrb[28].mxu1 %vm7719_vm0, %v7718_v5  ;;  %vm7743_vm0 = vnez %v7742_v15 }
 0x14c   : > { %5006 = vmatmul.mubr.msk.bf16.gmra.mrb[12].mxu0 %vm7720_vm14, %v3479_v55  ;;  %4873 = vmatprep.mubr.msk.bf16.mxu1 %vm7721_vm12, %v5720_v1  ;;  %v7733_v1 = vld [vmem:[#allocation53_spill] sm:$0xff]  ;;  %vm7745_vm14 = vnez %v7644_v58  ;;  %vm7746_vm12 = vmmov %vm7731_vm1 }
 0x14d   : > { %5009 = vmatprep.mubr.msk.bf16.mxu0 %vm7722_vm7, %v3480_v33  ;;  %vm7734_vm6 = vnez %v7733_v1  ;;  %v3486_v14 = vsel %vm7745_vm14, 0, %v7744_v51  ;;  %vm7747_vm7 = vmmov %vm7731_vm1  ;;  %v3741_v1 = vld [vmem:[#allocation2 + $0x58] sm:$0xff] }
 0x14e   : > { %v3483_v63 = vsel %vm7734_vm6, 0, %v7640_v13  ;;  %vm7753_vm6 = vmmov %vm7731_vm1 }
 0x153   : > { %4874 = vmatmul.mubr.msk.bf16.vlgmr.msra.gmra.mrb[16].mxu1 %vm7729_vm2, %v5760_v28  ;;  %v7741_v28 = vld [vmem:[#allocation62_spill] sm:$0xff]  ;;  %vm7750_vm2 = vmmov %vm7731_vm1 }
 0x154   : > { %5010 = vmatmul.mubr.msk.bf16.gmra.mrb[16].mxu0 %vm7730_vm10, %v3481_v0  ;;  %4877 = vmatprep.mubr.msk.bf16.mxu1 %vm7731_vm1, %v7667_v16  ;;  %v3485_v9 = vsel %vm7743_vm0, 0, %v7741_v28  ;;  %vm7751_vm10 = vmmov %vm7731_vm1  ;;  %v3739_v28 = vld [vmem:[#allocation2 + $0x48] sm:$0xff] }
 0x155   : > { %5013 = vmatprep.mubr.msk.bf16.mxu0 %vm7732_vm4, %v3482_v62  ;;  %vm7752_vm4 = vmmov %vm7731_vm1 }
 0x156   : > { %vm7759_vm0 = vmmov %vm7731_vm1 }
 0x157   : > { %vm7760_vm14 = vmmov %vm7759_vm0 }
 0x15b   : > { %4878 = vmatmul.mubr.msk.bf16.gmra.mrb[20].mxu1 %vm7737_vm8, %v7670_v12  ;;  %v3733_v12 = vld [vmem:[#allocation2 + $0x18] sm:$0xff]  ;;  %vm7755_vm8 = vmmov %vm7731_vm1 }
 0x15c   : > { %5014 = vmatmul.mubr.msk.bf16.gmra.mrb[20].mxu0 %vm7738_vm9, %v3483_v63  ;;  %4881 = vmatprep.mubr.msk.bf16.mxu1 %vm7739_vm3, %v5854_v26  ;;  %vm7756_vm9 = vmmov %vm7731_vm1 }
 0x15d   : > { %5017 = vmatprep.mubr.msk.bf16.mxu0 %vm7740_vm5, %v3484_v2  ;;  %vm7757_vm3 = vmmov %vm7731_vm1 }
 0x15e   : > { %vm7758_vm5 = vmmov %vm7731_vm1 }
 0x163   : > { %4882 = vmatmul.mubr.msk.bf16.gmra.mrb[24].mxu1 %vm7746_vm12, %v5863_v6  ;;  %vm7761_vm12 = vmmov %vm7759_vm0 }
 0x164   : > { %5018 = vmatmul.mubr.msk.bf16.gmra.mrb[24].mxu0 %vm7747_vm7, %v3485_v9  ;;  %4885 = vmatprep.mubr.msk.bf16.mxu1 %vm7748_vm15, %v5895_v47  ;;  %vm7762_vm7 = vmmov %vm7759_vm0 }
 0x165   : > { %5021 = vmatprep.mubr.msk.bf16.mxu0 %vm7749_vm11, %v3486_v14  ;;  %vm7763_vm15 = vmmov %vm7759_vm0 }
 0x166   : > { %vm7764_vm11 = vmmov %vm7759_vm0 }
 0x16b   : > { %4886 = vmatmul.mubr.msk.bf16.gmra.mrb[28].mxu1 %vm7750_vm2, %v6221_v53  ;;  %vm7765_vm2 = vmmov %vm7759_vm0 }
 0x16c   : > { %5022 = vmatmul.mubr.bf16.gmra.mrb[28].mxu0 %v7340_v3 }
 0x1e6   : > { %v4825_v26 = vpop.f32.mrb[0].mxu1 }
 0x1e7   : > { %v2208_v23 = vpop.f32.mrb[1].mxu1 }
 0x1e8   : > { %v4826_v37 = vpop.f32.mrb[2].mxu1 }
 0x1e9   : > { %v2211_v41 = vpop.f32.mrb[3].mxu1 }
 0x1ee   : > { %v4829_v49 = vpop.f32.mrb[4].mxu1 }
 0x1ef   : > { %v2224_v45 = vpop.f32.mrb[5].mxu1 }
 0x1f0   : > { %v4830_v61 = vpop.f32.mrb[6].mxu1 }
 0x1f1   : > { %v2227_v6 = vpop.f32.mrb[7].mxu1 }
 0x1f6   : > { %v4833_v38 = vpop.f32.mrb[8].mxu1 }
 0x1f7   : > { %v2240_v57 = vpop.f32.mrb[9].mxu1 }
 0x1f8   : > { %v4834_v39 = vpop.f32.mrb[10].mxu1 }
 0x1f9   : > { %v2243_v29 = vpop.f32.mrb[11].mxu1 }
 0x1fe   : > { %v6921_v47 = vpop.f32.mrb[12].mxu1 }
 0x1ff   : > { %v6923_v58 = vpop.f32.mrb[13].mxu1 }
 0x200   : > { %v6925_v13 = vpop.f32.mrb[14].mxu1 }
 0x201   : > { %v6927_v53 = vpop.f32.mrb[15].mxu1 }
 0x207   : > { %v4995_v3 = vpop.f32.mrb[0].mxu0 }
 0x208   : > { %v5027_v50 = vadd.f32 %v4995_v3, %v4825_v26  ;;  %v3571_v36 = vpop.f32.mrb[1].mxu0 }
 0x209   : > { %v5028_v16 = vadd.f32 %v3571_v36, %v2208_v23  ;;  %v4996_v48 = vpop.f32.mrb[2].mxu0  ;;  %v3744_v23 = vld [vmem:[#allocation2 + $0x70] sm:$0xff] }
 0x20a   : > { %v3764_v21 = vadd.f32 %v5027_v50, %v3732_v35  ;;  %v5029_v60 = vadd.f32 %v4996_v48, %v4826_v37  ;;  %v3574_v19 = vpop.f32.mrb[3].mxu0 }
 0x20b   : > { %v3762_v42 = vadd.f32 %v5028_v16, %v3730_v18  ;;  %v5030_v27 = vadd.f32 %v3574_v19, %v2211_v41  ;;  %v3748_v18 = vld [vmem:[#allocation2 + $0x90] sm:$0xff]  ;;  %v3749_v19 = vld [vmem:[#allocation2 + $0x98] sm:$0xff] }
 0x20c   : > { %3796 = vst.msk [vmem:[#allocation2 + $0x10] sm:$0xff] %vm7751_vm10, %v3764_v21  ;;  %v3765_v40 = vadd.f32 %v5029_v60, %v3733_v12  ;;  %v3746_v12 = vld [vmem:[#allocation2 + $0x80] sm:$0xff]  ;;  %vm7766_vm10 = vmmov %vm7759_vm0 }
 0x20d   : > { %3794 = vst.msk [vmem:[#allocation2] sm:$0xff] %vm7731_vm1, %v3762_v42  ;;  %v3763_v59 = vadd.f32 %v5030_v27, %v3731_v34  ;;  %vm7767_vm1 = vmmov %vm7759_vm0 }
 0x20e   : > { %3797 = vst.msk [vmem:[#allocation2 + $0x18] sm:$0xff] %vm7752_vm4, %v3765_v40  ;;  %vm7768_vm4 = vmmov %vm7759_vm0 }
 0x20f   : > { %3795 = vst.msk [vmem:[#allocation2 + $0x8] sm:$0xff] %vm7753_vm6, %v3763_v59  ;;  %v4999_v24 = vpop.f32.mrb[4].mxu0  ;;  %v3747_v59 = vld [vmem:[#allocation2 + $0x88] sm:$0xff]  ;;  %vm7769_vm6 = vmmov %vm7759_vm0 }
 0x210   : > { %v5031_v32 = vadd.f32 %v4999_v24, %v4829_v49  ;;  %v3587_v10 = vpop.f32.mrb[5].mxu0  ;;  %v3742_v49 = vld [vmem:[#allocation2 + $0x60] sm:$0xff] }
 0x211   : > { %v5032_v22 = vadd.f32 %v3587_v10, %v2224_v45  ;;  %v5000_v7 = vpop.f32.mrb[6].mxu0 }
 0x212   : > { %v3768_v20 = vadd.f32 %v5031_v32, %v3736_v31  ;;  %v5033_v46 = vadd.f32 %v5000_v7, %v4830_v61  ;;  %v3590_v30 = vpop.f32.mrb[7].mxu0  ;;  %v3752_v7 = vld [vmem:[#allocation2 + $0xb0] sm:$0xff] }
 0x213   : > { %v3766_v43 = vadd.f32 %v5032_v22, %v3734_v17  ;;  %v5034_v25 = vadd.f32 %v3590_v30, %v2227_v6  ;;  %v3745_v6 = vld [vmem:[#allocation2 + $0x78] sm:$0xff]  ;;  %v3750_v30 = vld [vmem:[#allocation2 + $0xa0] sm:$0xff] }
 0x214   : > { %3800 = vst.msk [vmem:[#allocation2 + $0x30] sm:$0xff] %vm7754_vm13, %v3768_v20  ;;  %v3769_v55 = vadd.f32 %v5033_v46, %v3737_v8  ;;  %vm7770_vm13 = vmmov %vm7759_vm0 }
 0x215   : > { %3798 = vst.msk [vmem:[#allocation2 + $0x20] sm:$0xff] %vm7755_vm8, %v3766_v43  ;;  %v3767_v33 = vadd.f32 %v5034_v25, %v3735_v44  ;;  %vm7771_vm8 = vmmov %vm7759_vm0 }
 0x216   : > { %3801 = vst.msk [vmem:[#allocation2 + $0x38] sm:$0xff] %vm7756_vm9, %v3769_v55  ;;  %v3753_v55 = vld [vmem:[#allocation2 + $0xb8] sm:$0xff]  ;;  %vm7772_vm9 = vmmov %vm7759_vm0 }
 0x217   : > { %3799 = vst.msk [vmem:[#allocation2 + $0x28] sm:$0xff] %vm7757_vm3, %v3767_v33  ;;  %v5003_v5 = vpop.f32.mrb[8].mxu0  ;;  %vm7773_vm3 = vmmov %vm7759_vm0 }
 0x218   : > { %v5035_v56 = vadd.f32 %v5003_v5, %v4833_v38  ;;  %v3603_v0 = vpop.f32.mrb[9].mxu0 }
 0x219   : > { %v5036_v52 = vadd.f32 %v3603_v0, %v2240_v57  ;;  %v5004_v62 = vpop.f32.mrb[10].mxu0  ;;  %v3751_v0 = vld [vmem:[#allocation2 + $0xa8] sm:$0xff] }
 0x21a   : > { %v3772_v63 = vadd.f32 %v5035_v56, %v3740_v54  ;;  %v5037_v4 = vadd.f32 %v5004_v62, %v4834_v39  ;;  %v3606_v2 = vpop.f32.mrb[11].mxu0 }
 0x21b   : > { %v3770_v15 = vadd.f32 %v5036_v52, %v3738_v11  ;;  %v5038_v9 = vadd.f32 %v3606_v2, %v2243_v29  ;;  %v3743_v29 = vld [vmem:[#allocation2 + $0x68] sm:$0xff]  ;;  %v3756_v2 = vld [vmem:[#allocation2 + $0xd0] sm:$0xff] }
 0x21c   : > { %3804 = vst.msk [vmem:[#allocation2 + $0x50] sm:$0xff] %vm7758_vm5, %v3772_v63  ;;  %v3773_v51 = vadd.f32 %v5037_v4, %v3741_v1  ;;  %vm7774_vm5 = vmmov %vm7759_vm0 }
 0x21d   : > { %3802 = vst.msk [vmem:[#allocation2 + $0x40] sm:$0xff] %vm7759_vm0, %v3770_v15  ;;  %v3771_v14 = vadd.f32 %v5038_v9, %v3739_v28 }
 0x21e   : > { %3805 = vst.msk [vmem:[#allocation2 + $0x58] sm:$0xff] %vm7760_vm14, %v3773_v51  ;;  %v3754_v51 = vld [vmem:[#allocation2 + $0xc0] sm:$0xff]  ;;  %vm7775_vm14 = vmmov %vm7759_vm0 }
 0x21f   : > { %3803 = vst.msk [vmem:[#allocation2 + $0x48] sm:$0xff] %vm7761_vm12, %v3771_v14  ;;  %v5007_v26 = vpop.f32.mrb[12].mxu0  ;;  %vm7776_vm12 = vmmov %vm7759_vm0 }
 0x220   : > { %v5039_v37 = vadd.f32 %v5007_v26, %v6921_v47  ;;  %v3619_v41 = vpop.f32.mrb[13].mxu0 }
 0x221   : > { %v5040_v45 = vadd.f32 %v3619_v41, %v6923_v58  ;;  %v5008_v61 = vpop.f32.mrb[14].mxu0 }
 0x222   : > { %v3776_v38 = vadd.f32 %v5039_v37, %v3744_v23  ;;  %v5041_v57 = vadd.f32 %v5008_v61, %v6925_v13  ;;  %v3622_v39 = vpop.f32.mrb[15].mxu0  ;;  %v3757_v37 = vld [vmem:[#allocation2 + $0xd8] sm:$0xff] }
 0x223   : > { %v3774_v3 = vadd.f32 %v5040_v45, %v3742_v49  ;;  %v5042_v35 = vadd.f32 %v3622_v39, %v6927_v53 }
 0x224   : > { %3808 = vst.msk [vmem:[#allocation2 + $0x70] sm:$0xff] %vm7762_vm7, %v3776_v38  ;;  %v3777_v50 = vadd.f32 %v5041_v57, %v3745_v6  ;;  %v3755_v6 = vld [vmem:[#allocation2 + $0xc8] sm:$0xff]  ;;  %vm7777_vm7 = vmmov %vm7759_vm0 }
 0x225   : > { %3806 = vst.msk [vmem:[#allocation2 + $0x60] sm:$0xff] %vm7763_vm15, %v3774_v3  ;;  %v3775_v47 = vadd.f32 %v5042_v35, %v3743_v29  ;;  %vm7778_vm15 = vmmov %vm7759_vm0 }
 0x226   : > { %3809 = vst.msk [vmem:[#allocation2 + $0x78] sm:$0xff] %vm7764_vm11, %v3777_v50  ;;  %v4875_v58 = vpop.f32.mrb[16].mxu1  ;;  %v3760_v50 = vld [vmem:[#allocation2 + $0xf0] sm:$0xff]  ;;  %vm7779_vm11 = vmmov %vm7759_vm0 }
 0x227   : > { %3807 = vst.msk [vmem:[#allocation2 + $0x68] sm:$0xff] %vm7765_vm2, %v3775_v47  ;;  %v5011_v36 = vpop.f32.mrb[16].mxu0  ;;  %v2472_v13 = vpop.f32.mrb[17].mxu1  ;;  %vm7780_vm2 = vmmov %vm7759_vm0 }
 0x228   : > { %v5043_v16 = vadd.f32 %v5011_v36, %v4875_v58  ;;  %v3635_v48 = vpop.f32.mrb[17].mxu0  ;;  %v4876_v60 = vpop.f32.mrb[18].mxu1 }
 0x229   : > { %v5044_v21 = vadd.f32 %v3635_v48, %v2472_v13  ;;  %v5012_v53 = vpop.f32.mrb[18].mxu0  ;;  %v2475_v27 = vpop.f32.mrb[19].mxu1 }
 0x22a   : > { %v3780_v34 = vadd.f32 %v5043_v16, %v3748_v18  ;;  %v5045_v42 = vadd.f32 %v5012_v53, %v4876_v60  ;;  %v3638_v40 = vpop.f32.mrb[19].mxu0  ;;  %v3758_v18 = vld [vmem:[#allocation2 + $0xe0] sm:$0xff] }
 0x22b   : > { %v3778_v24 = vadd.f32 %v5044_v21, %v3746_v12  ;;  %v5046_v31 = vadd.f32 %v3638_v40, %v2475_v27  ;;  %v3761_v12 = vld [vmem:[#allocation2 + $0xf8] sm:$0xff] }
 0x22c   : > { %3812 = vst.msk [vmem:[#allocation2 + $0x90] sm:$0xff] %vm7766_vm10, %v3780_v34  ;;  %v3781_v32 = vadd.f32 %v5045_v42, %v3749_v19  ;;  %v3759_v34 = vld [vmem:[#allocation2 + $0xe8] sm:$0xff] }
 0x22d   : > { %3810 = vst.msk [vmem:[#allocation2 + $0x80] sm:$0xff] %vm7767_vm1, %v3778_v24  ;;  %v3779_v10 = vadd.f32 %v5046_v31, %v3747_v59 }
 0x22e   : > { %3813 = vst.msk [vmem:[#allocation2 + $0x98] sm:$0xff] %vm7768_vm4, %v3781_v32  ;;  %v4879_v17 = vpop.f32.mrb[20].mxu1 }
 0x22f   : > { %3811 = vst.msk [vmem:[#allocation2 + $0x88] sm:$0xff] %vm7769_vm6, %v3779_v10  ;;  %v5015_v22 = vpop.f32.mrb[20].mxu0  ;;  %v2488_v20 = vpop.f32.mrb[21].mxu1 }
 0x230   : > { %v5047_v8 = vadd.f32 %v5015_v22, %v4879_v17  ;;  %v3651_v46 = vpop.f32.mrb[21].mxu0  ;;  %v4880_v43 = vpop.f32.mrb[22].mxu1 }
 0x231   : > { %v5048_v44 = vadd.f32 %v3651_v46, %v2488_v20  ;;  %v5016_v25 = vpop.f32.mrb[22].mxu0  ;;  %v2491_v54 = vpop.f32.mrb[23].mxu1 }
 0x232   : > { %v3784_v33 = vadd.f32 %v5047_v8, %v3752_v7  ;;  %v5049_v5 = vadd.f32 %v5016_v25, %v4880_v43  ;;  %v3654_v56 = vpop.f32.mrb[23].mxu0 }
 0x233   : > { %v3782_v11 = vadd.f32 %v5048_v44, %v3750_v30  ;;  %v5050_v52 = vadd.f32 %v3654_v56, %v2491_v54 }
 0x234   : > { %3816 = vst.msk [vmem:[#allocation2 + $0xb0] sm:$0xff] %vm7770_vm13, %v3784_v33  ;;  %v3785_v62 = vadd.f32 %v5049_v5, %v3753_v55 }
 0x235   : > { %3814 = vst.msk [vmem:[#allocation2 + $0xa0] sm:$0xff] %vm7771_vm8, %v3782_v11  ;;  %v3783_v1 = vadd.f32 %v5050_v52, %v3751_v0 }
 0x236   : > { %3817 = vst.msk [vmem:[#allocation2 + $0xb8] sm:$0xff] %vm7772_vm9, %v3785_v62  ;;  %v4883_v63 = vpop.f32.mrb[24].mxu1 }
 0x237   : > { %3815 = vst.msk [vmem:[#allocation2 + $0xa8] sm:$0xff] %vm7773_vm3, %v3783_v1  ;;  %v5019_v4 = vpop.f32.mrb[24].mxu0  ;;  %v2504_v15 = vpop.f32.mrb[25].mxu1 }
 0x238   : > { %v5051_v28 = vadd.f32 %v5019_v4, %v4883_v63  ;;  %v3667_v9 = vpop.f32.mrb[25].mxu0  ;;  %v4884_v26 = vpop.f32.mrb[26].mxu1 }
 0x239   : > { %v5052_v14 = vadd.f32 %v3667_v9, %v2504_v15  ;;  %v5020_v23 = vpop.f32.mrb[26].mxu0  ;;  %v2507_v45 = vpop.f32.mrb[27].mxu1 }
 0x23a   : > { %v3788_v41 = vadd.f32 %v5051_v28, %v3756_v2  ;;  %v5053_v49 = vadd.f32 %v5020_v23, %v4884_v26  ;;  %v3670_v61 = vpop.f32.mrb[27].mxu0 }
 0x23b   : > { %v3786_v38 = vadd.f32 %v5052_v14, %v3754_v51  ;;  %v5054_v57 = vadd.f32 %v3670_v61, %v2507_v45 }
 0x23c   : > { %3820 = vst.msk [vmem:[#allocation2 + $0xd0] sm:$0xff] %vm7774_vm5, %v3788_v41  ;;  %v3789_v39 = vadd.f32 %v5053_v49, %v3757_v37 }
 0x23d   : > { %3818 = vst.msk [vmem:[#allocation2 + $0xc0] sm:$0xff] %vm7759_vm0, %v3786_v38  ;;  %v3787_v29 = vadd.f32 %v5054_v57, %v3755_v6 }
 0x23e   : > { %3821 = vst.msk [vmem:[#allocation2 + $0xd8] sm:$0xff] %vm7775_vm14, %v3789_v39  ;;  %v4887_v3 = vpop.f32.mrb[28].mxu1 }
 0x23f   : > { %3819 = vst.msk [vmem:[#allocation2 + $0xc8] sm:$0xff] %vm7776_vm12, %v3787_v29  ;;  %v5023_v35 = vpop.f32.mrb[28].mxu0  ;;  %v2520_v58 = vpop.f32.mrb[29].mxu1 }
 0x240   : > { %v5055_v47 = vadd.f32 %v5023_v35, %v4887_v3  ;;  %v3683_v36 = vpop.f32.mrb[29].mxu0  ;;  %v4888_v13 = vpop.f32.mrb[30].mxu1 }
 0x241   : > { %v5056_v16 = vadd.f32 %v3683_v36, %v2520_v58  ;;  %v5024_v48 = vpop.f32.mrb[30].mxu0  ;;  %v2523_v53 = vpop.f32.mrb[31].mxu1 }
 0x242   : > { %v3792_v21 = vadd.f32 %v5055_v47, %v3760_v50  ;;  %v5057_v60 = vadd.f32 %v5024_v48, %v4888_v13  ;;  %v3686_v19 = vpop.f32.mrb[31].mxu0 }
 0x243   : > { %v3790_v42 = vadd.f32 %v5056_v16, %v3758_v18  ;;  %v5058_v27 = vadd.f32 %v3686_v19, %v2523_v53 }
 0x244   : > { %3824 = vst.msk [vmem:[#allocation2 + $0xf0] sm:$0xff] %vm7777_vm7, %v3792_v21  ;;  %v3793_v40 = vadd.f32 %v5057_v60, %v3761_v12 }
 0x245   : > { %3822 = vst.msk [vmem:[#allocation2 + $0xe0] sm:$0xff] %vm7778_vm15, %v3790_v42  ;;  %v3791_v59 = vadd.f32 %v5058_v27, %v3759_v34 }
 0x246   : > { %3825 = vst.msk [vmem:[#allocation2 + $0xf8] sm:$0xff] %vm7779_vm11, %v3793_v40 }
 0x247   : > { %3823 = vst.msk [vmem:[#allocation2 + $0xe8] sm:$0xff] %vm7780_vm2, %v3791_v59 }
 0x248 PF: > { %p4491_p2 = scmp.ne.s32.totalorder %s5417_s15, 2 }
 0x249   : > { %v3830_v24 = vld [vmem:[#allocation2] sm:$0xff] (!%p4491_p2)  ;;  %v3831_v17 = vld [vmem:[#allocation2 + $0x8] sm:$0xff] (!%p4491_p2)  ;;  %v3832_v22 = vld [vmem:[#allocation2 + $0x10] sm:$0xff] (!%p4491_p2)  ;;  %vm4100_vm10 = vcmask (!%p4491_p2), 60416  }
 0x24a   : > { %3829 = sbr.rel (%p4491_p2) target bundleno = 625 (0x271), region = 48  ;;  %v6969_v31 = vld [vmem:[%s7127_s2] ss:$0 sm:$0xff] (!%p4491_p2)  ;;  %v3833_v7 = vld [vmem:[#allocation2 + $0x18] sm:$0xff] (!%p4491_p2)  ;;  %v3835_v44 = vld [vmem:[#allocation2 + $0x28] sm:$0xff] (!%p4491_p2) }
 0x24b   : > { %v6974_v32 = vld [vmem:[%s7128_s3] ss:$0 sm:$0xff] (!%p4491_p2)  ;;  %v3869_v10 = vmul.f32 (!%p4491_p2), %v6969_v31, %v3830_v24  ;;  %v3870_v8 = vmul.f32 (!%p4491_p2), %v6969_v31, %v3831_v17  ;;  %v3871_v20 = vmul.f32 (!%p4491_p2), %v6969_v31, %v3832_v22  ;;  %v3872_v46 = vmul.f32 (!%p4491_p2), %v6969_v31, %v3833_v7  ;;  %v3836_v43 = vld [vmem:[#allocation2 + $0x30] sm:$0xff] (!%p4491_p2)  ;;  %v3837_v54 = vld [vmem:[#allocation2 + $0x38] sm:$0xff] (!%p4491_p2) }
 0x24c   : > { %v3834_v30 = vld [vmem:[#allocation2 + $0x20] sm:$0xff] (!%p4491_p2)  ;;  %v3874_v33 = vmul.f32 (!%p4491_p2), %v6969_v31, %v3835_v44  ;;  %v3875_v5 = vmul.f32 (!%p4491_p2), %v6969_v31, %v3836_v43  ;;  %v3876_v52 = vmul.f32 (!%p4491_p2), %v6969_v31, %v3837_v54  ;;  %v3839_v41 = vld [vmem:[#allocation2 + $0x48] sm:$0xff] (!%p4491_p2)  ;;  %v3840_v49 = vld [vmem:[#allocation2 + $0x50] sm:$0xff] (!%p4491_p2) }
 0x24d   : > { %v3908_v25 = vadd.f32 (!%p4491_p2), %v6974_v32, %v3869_v10  ;;  %v3873_v55 = vmul.f32 (!%p4491_p2), %v6969_v31, %v3834_v30  ;;  %v3909_v56 = vadd.f32 (!%p4491_p2), %v6974_v32, %v3870_v8  ;;  %v3910_v0 = vadd.f32 (!%p4491_p2), %v6974_v32, %v3871_v20  ;;  %v3838_v51 = vld [vmem:[#allocation2 + $0x40] sm:$0xff] (!%p4491_p2)  ;;  %v3841_v45 = vld [vmem:[#allocation2 + $0x58] sm:$0xff] (!%p4491_p2)  ;;  %v3843_v29 = vld [vmem:[#allocation2 + $0x68] sm:$0xff] (!%p4491_p2) }
 0x24e   : > { %v3911_v11 = vadd.f32 (!%p4491_p2), %v6974_v32, %v3872_v46  ;;  %v3913_v63 = vadd.f32 (!%p4491_p2), %v6974_v32, %v3874_v33  ;;  %v3914_v4 = vadd.f32 (!%p4491_p2), %v6974_v32, %v3875_v5  ;;  %v3915_v9 = vadd.f32 (!%p4491_p2), %v6974_v32, %v3876_v52  ;;  %v3842_v39 = vld [vmem:[#allocation2 + $0x60] sm:$0xff] (!%p4491_p2)  ;;  %v3844_v3 = vld [vmem:[#allocation2 + $0x70] sm:$0xff] (!%p4491_p2)  ;;  %v3845_v36 = vld [vmem:[#allocation2 + $0x78] sm:$0xff] (!%p4491_p2) }
 0x24f   : > { %v3940_v62 = vmax.f32 (!%p4491_p2), %v3908_v25, 0.0  ;;  %v3912_v1 = vadd.f32 (!%p4491_p2), %v6974_v32, %v3873_v55  ;;  %v3941_v2 = vmax.f32 (!%p4491_p2), %v3909_v56, 0.0  ;;  %v3942_v28 = vmax.f32 (!%p4491_p2), %v3910_v0, 0.0  ;;  %v3846_v20 = vld [vmem:[#allocation2 + $0x80] sm:$0xff] (!%p4491_p2)  ;;  %v3847_v25 = vld [vmem:[#allocation2 + $0x88] sm:$0xff] (!%p4491_p2)  ;;  %v3848_v55 = vld [vmem:[#allocation2 + $0x90] sm:$0xff] (!%p4491_p2) }
 0x250   : > { %v3943_v15 = vmax.f32 (!%p4491_p2), %v3911_v11, 0.0  ;;  %v3945_v23 = vmax.f32 (!%p4491_p2), %v3913_v63, 0.0  ;;  %v3946_v37 = vmax.f32 (!%p4491_p2), %v3914_v4, 0.0  ;;  %v3947_v57 = vmax.f32 (!%p4491_p2), %v3915_v9, 0.0  ;;  %v3849_v33 = vld [vmem:[#allocation2 + $0x98] sm:$0xff] (!%p4491_p2)  ;;  %v3850_v11 = vld [vmem:[#allocation2 + $0xa0] sm:$0xff] (!%p4491_p2) }
 0x251   : > { %v4534_v14 = vpack.c.bf16 %v3940_v62, %v3940_v62  ;;  %v3944_v26 = vmax.f32 %v3912_v1, 0.0  ;;  %v4535_v61 = vpack.c.bf16 %v3941_v2, %v3941_v2  ;;  %v4536_v6 = vpack.c.bf16 %v3942_v28, %v3942_v28  ;;  %v3851_v52 = vld [vmem:[#allocation2 + $0xa8] sm:$0xff]  ;;  %v3852_v62 = vld [vmem:[#allocation2 + $0xb0] sm:$0xff]  ;;  %v3853_v28 = vld [vmem:[#allocation2 + $0xb8] sm:$0xff] }
 0x252   : > { %v4537_v38 = vpack.c.bf16 %v3943_v15, %v3943_v15  ;;  %v4539_v50 = vpack.c.bf16 %v3945_v23, %v3945_v23  ;;  %v4540_v47 = vpack.c.bf16 %v3946_v37, %v3946_v37  ;;  %v3877_v58 = vmul.f32 %v6969_v31, %v3838_v51 }
 0x253   : > { %4101 = vst.msk [vmem:[%s5541_s23] sm:$0xf] %vm4100_vm10, %v4534_v14  ;;  %v4538_v35 = vpack.c.bf16 %v3944_v26, %v3944_v26  ;;  %4102 = vst.msk [vmem:[%s5541_s23 + $0x4] sm:$0xf] %vm4100_vm10, %v4535_v61  ;;  %v4541_v18 = vpack.c.bf16 %v3947_v57, %v3947_v57  ;;  %v3878_v16 = vmul.f32 %v6969_v31, %v3839_v41 }
 0x254   : > { %4103 = vst.msk [vmem:[%s5541_s23 + $0x8] sm:$0xf] %vm4100_vm10, %v4536_v6  ;;  %4104 = vst.msk [vmem:[%s5541_s23 + $0xc] sm:$0xf] %vm4100_vm10, %v4537_v38  ;;  %v3879_v13 = vmul.f32 %v6969_v31, %v3840_v49  ;;  %v3880_v48 = vmul.f32 %v6969_v31, %v3841_v45  ;;  %v3916_v12 = vadd.f32 %v6974_v32, %v3877_v58  ;;  %v3854_v58 = vld [vmem:[#allocation2 + $0xc0] sm:$0xff] }
 0x255   : > { %4105 = vst.msk [vmem:[%s5541_s23 + $0x10] sm:$0xf] %vm4100_vm10, %v4538_v35  ;;  %4106 = vst.msk [vmem:[%s5541_s23 + $0x14] sm:$0xf] %vm4100_vm10, %v4539_v50  ;;  %v3881_v21 = vmul.f32 %v6969_v31, %v3842_v39  ;;  %v3882_v60 = vmul.f32 %v6969_v31, %v3843_v29  ;;  %v3883_v53 = vmul.f32 %v6969_v31, %v3844_v3 }
 0x256   : > { %4107 = vst.msk [vmem:[%s5541_s23 + $0x18] sm:$0xf] %vm4100_vm10, %v4540_v47  ;;  %4108 = vst.msk [vmem:[%s5541_s23 + $0x1c] sm:$0xf] %vm4100_vm10, %v4541_v18  ;;  %v3917_v19 = vadd.f32 %v6974_v32, %v3878_v16  ;;  %v3918_v34 = vadd.f32 %v6974_v32, %v3879_v13  ;;  %v3919_v42 = vadd.f32 %v6974_v32, %v3880_v48  ;;  %v3948_v40 = vmax.f32 %v3916_v12, 0.0  ;;  %v3855_v48 = vld [vmem:[#allocation2 + $0xc8] sm:$0xff] }
 0x257   : > { %v3884_v27 = vmul.f32 %v6969_v31, %v3845_v36  ;;  %v3920_v59 = vadd.f32 %v6974_v32, %v3881_v21  ;;  %v3921_v24 = vadd.f32 %v6974_v32, %v3882_v60  ;;  %v3922_v10 = vadd.f32 %v6974_v32, %v3883_v53  ;;  %v3856_v12 = vld [vmem:[#allocation2 + $0xd0] sm:$0xff]  ;;  %v3857_v21 = vld [vmem:[#allocation2 + $0xd8] sm:$0xff] }
 0x258   : > { %v3949_v17 = vmax.f32 %v3917_v19, 0.0  ;;  %v3950_v22 = vmax.f32 %v3918_v34, 0.0  ;;  %v3951_v7 = vmax.f32 %v3919_v42, 0.0  ;;  %v4542_v46 = vpack.c.bf16 %v3948_v40, %v3948_v40  ;;  %v3858_v42 = vld [vmem:[#allocation2 + $0xe0] sm:$0xff]  ;;  %v3860_v40 = vld [vmem:[#allocation2 + $0xf0] sm:$0xff] }
 0x259   : > { %v3923_v8 = vadd.f32 %v6974_v32, %v3884_v27  ;;  %v3952_v30 = vmax.f32 %v3920_v59, 0.0  ;;  %v3953_v44 = vmax.f32 %v3921_v24, 0.0  ;;  %v3954_v43 = vmax.f32 %v3922_v10, 0.0  ;;  %v3859_v27 = vld [vmem:[#allocation2 + $0xe8] sm:$0xff] }
 0x25a   : > { %v4543_v5 = vpack.c.bf16 %v3949_v17, %v3949_v17  ;;  %v4544_v54 = vpack.c.bf16 %v3950_v22, %v3950_v22  ;;  %v4545_v56 = vpack.c.bf16 %v3951_v7, %v3951_v7  ;;  %4109 = vst.msk [vmem:[%s5541_s23 + $0x20] sm:$0xf] %vm4100_vm10, %v4542_v46  ;;  %v3885_v2 = vmul.f32 %v6969_v31, %v3846_v20  ;;  %v3861_v22 = vld [vmem:[#allocation2 + $0xf8] sm:$0xff] }
 0x25b   : > { %v3955_v0 = vmax.f32 %v3923_v8, 0.0  ;;  %v4546_v1 = vpack.c.bf16 %v3952_v30, %v3952_v30  ;;  %v4547_v63 = vpack.c.bf16 %v3953_v44, %v3953_v44  ;;  %v4548_v4 = vpack.c.bf16 %v3954_v43, %v3954_v43 }
 0x25c   : > { %4110 = vst.msk [vmem:[%s5541_s23 + $0x24] sm:$0xf] %vm4100_vm10, %v4543_v5  ;;  %4111 = vst.msk [vmem:[%s5541_s23 + $0x28] sm:$0xf] %vm4100_vm10, %v4544_v54  ;;  %v3886_v9 = vmul.f32 %v6969_v31, %v3847_v25  ;;  %v3887_v51 = vmul.f32 %v6969_v31, %v3848_v55  ;;  %v3888_v14 = vmul.f32 %v6969_v31, %v3849_v33 }
 0x25d   : > { %4112 = vst.msk [vmem:[%s5541_s23 + $0x2c] sm:$0xf] %vm4100_vm10, %v4545_v56  ;;  %v4549_v15 = vpack.c.bf16 %v3955_v0, %v3955_v0  ;;  %4113 = vst.msk [vmem:[%s5541_s23 + $0x30] sm:$0xf] %vm4100_vm10, %v4546_v1  ;;  %v3924_v26 = vadd.f32 %v6974_v32, %v3885_v2  ;;  %v3889_v23 = vmul.f32 %v6969_v31, %v3850_v11 }
 0x25e   : > { %4114 = vst.msk [vmem:[%s5541_s23 + $0x34] sm:$0xf] %vm4100_vm10, %v4547_v63  ;;  %4115 = vst.msk [vmem:[%s5541_s23 + $0x38] sm:$0xf] %vm4100_vm10, %v4548_v4  ;;  %v3890_v37 = vmul.f32 %v6969_v31, %v3851_v52  ;;  %v3891_v41 = vmul.f32 %v6969_v31, %v3852_v62  ;;  %v3925_v49 = vadd.f32 %v6974_v32, %v3886_v9 }
 0x25f   : > { %4116 = vst.msk [vmem:[%s5541_s23 + $0x3c] sm:$0xf] %vm4100_vm10, %v4549_v15  ;;  %v3926_v45 = vadd.f32 %v6974_v32, %v3887_v51  ;;  %v3927_v61 = vadd.f32 %v6974_v32, %v3888_v14  ;;  %v3892_v6 = vmul.f32 %v6969_v31, %v3853_v28  ;;  %v3956_v38 = vmax.f32 %v3924_v26, 0.0 }
 0x260   : > { %v3928_v57 = vadd.f32 %v6974_v32, %v3889_v23  ;;  %v3929_v39 = vadd.f32 %v6974_v32, %v3890_v37  ;;  %v3930_v29 = vadd.f32 %v6974_v32, %v3891_v41  ;;  %v3957_v3 = vmax.f32 %v3925_v49, 0.0 }
 0x261   : > { %v3958_v35 = vmax.f32 %v3926_v45, 0.0  ;;  %v3959_v50 = vmax.f32 %v3927_v61, 0.0  ;;  %v3931_v47 = vadd.f32 %v6974_v32, %v3892_v6  ;;  %v4550_v36 = vpack.c.bf16 %v3956_v38, %v3956_v38 }
 0x262   : > { %v3960_v18 = vmax.f32 %v3928_v57, 0.0  ;;  %v3961_v16 = vmax.f32 %v3929_v39, 0.0  ;;  %v3962_v13 = vmax.f32 %v3930_v29, 0.0  ;;  %v4551_v60 = vpack.c.bf16 %v3957_v3, %v3957_v3 }
 0x263   : > { %v4552_v53 = vpack.c.bf16 %v3958_v35, %v3958_v35  ;;  %v4553_v19 = vpack.c.bf16 %v3959_v50, %v3959_v50  ;;  %v3963_v34 = vmax.f32 %v3931_v47, 0.0  ;;  %4117 = vst.msk [vmem:[%s5541_s23 + $0x40] sm:$0xf] %vm4100_vm10, %v4550_v36  ;;  %v3893_v17 = vmul.f32 %v6969_v31, %v3854_v58 }
 0x264   : > { %v4554_v59 = vpack.c.bf16 %v3960_v18, %v3960_v18  ;;  %v4555_v24 = vpack.c.bf16 %v3961_v16, %v3961_v16  ;;  %v4556_v10 = vpack.c.bf16 %v3962_v13, %v3962_v13  ;;  %4118 = vst.msk [vmem:[%s5541_s23 + $0x44] sm:$0xf] %vm4100_vm10, %v4551_v60  ;;  %v3894_v8 = vmul.f32 %v6969_v31, %v3855_v48 }
 0x265   : > { %4119 = vst.msk [vmem:[%s5541_s23 + $0x48] sm:$0xf] %vm4100_vm10, %v4552_v53  ;;  %4120 = vst.msk [vmem:[%s5541_s23 + $0x4c] sm:$0xf] %vm4100_vm10, %v4553_v19  ;;  %v4557_v7 = vpack.c.bf16 %v3963_v34, %v3963_v34  ;;  %v3895_v20 = vmul.f32 %v6969_v31, %v3856_v12  ;;  %v3896_v46 = vmul.f32 %v6969_v31, %v3857_v21 }
 0x266   : > { %4121 = vst.msk [vmem:[%s5541_s23 + $0x50] sm:$0xf] %vm4100_vm10, %v4554_v59  ;;  %4122 = vst.msk [vmem:[%s5541_s23 + $0x54] sm:$0xf] %vm4100_vm10, %v4555_v24  ;;  %v3932_v30 = vadd.f32 %v6974_v32, %v3893_v17  ;;  %v3897_v44 = vmul.f32 %v6969_v31, %v3858_v42  ;;  %v3898_v43 = vmul.f32 %v6969_v31, %v3859_v27 }
 0x267   : > { %4123 = vst.msk [vmem:[%s5541_s23 + $0x58] sm:$0xf] %vm4100_vm10, %v4556_v10  ;;  %v3899_v25 = vmul.f32 %v6969_v31, %v3860_v40  ;;  %4124 = vst.msk [vmem:[%s5541_s23 + $0x5c] sm:$0xf] %vm4100_vm10, %v4557_v7  ;;  %v3933_v55 = vadd.f32 %v6974_v32, %v3894_v8  ;;  %v3934_v33 = vadd.f32 %v6974_v32, %v3895_v20 }
 0x268   : > { %v3935_v5 = vadd.f32 %v6974_v32, %v3896_v46  ;;  %v3900_v54 = vmul.f32 %v6969_v31, %v3861_v22  ;;  %v3964_v56 = vmax.f32 %v3932_v30, 0.0  ;;  %v3936_v0 = vadd.f32 %v6974_v32, %v3897_v44 }
 0x269   : > { %v3937_v11 = vadd.f32 %v6974_v32, %v3898_v43  ;;  %v3938_v52 = vadd.f32 %v6974_v32, %v3899_v25  ;;  %v3965_v62 = vmax.f32 %v3933_v55, 0.0  ;;  %v3966_v1 = vmax.f32 %v3934_v33, 0.0 }
 0x26a   : > { %v3967_v63 = vmax.f32 %v3935_v5, 0.0  ;;  %v3939_v4 = vadd.f32 %v6974_v32, %v3900_v54  ;;  %v4558_v2 = vpack.c.bf16 %v3964_v56, %v3964_v56  ;;  %v3968_v28 = vmax.f32 %v3936_v0, 0.0 }
 0x26b   : > { %v3969_v31 = vmax.f32 %v3937_v11, 0.0  ;;  %v3970_v15 = vmax.f32 %v3938_v52, 0.0  ;;  %v4559_v9 = vpack.c.bf16 %v3965_v62, %v3965_v62  ;;  %v4560_v51 = vpack.c.bf16 %v3966_v1, %v3966_v1 }
 0x26c   : > { %v4561_v14 = vpack.c.bf16 %v3967_v63, %v3967_v63  ;;  %v3971_v26 = vmax.f32 %v3939_v4, 0.0  ;;  %4125 = vst.msk [vmem:[%s5541_s23 + $0x60] sm:$0xf] %vm4100_vm10, %v4558_v2  ;;  %v4562_v23 = vpack.c.bf16 %v3968_v28, %v3968_v28 }
 0x26d   : > { %v4563_v37 = vpack.c.bf16 %v3969_v31, %v3969_v31  ;;  %v4564_v41 = vpack.c.bf16 %v3970_v15, %v3970_v15  ;;  %4126 = vst.msk [vmem:[%s5541_s23 + $0x64] sm:$0xf] %vm4100_vm10, %v4559_v9  ;;  %4127 = vst.msk [vmem:[%s5541_s23 + $0x68] sm:$0xf] %vm4100_vm10, %v4560_v51 }
 0x26e   : > { %4128 = vst.msk [vmem:[%s5541_s23 + $0x6c] sm:$0xf] %vm4100_vm10, %v4561_v14  ;;  %v4565_v32 = vpack.c.bf16 %v3971_v26, %v3971_v26  ;;  %4129 = vst.msk [vmem:[%s5541_s23 + $0x70] sm:$0xf] %vm4100_vm10, %v4562_v23 }
 0x26f   : > { %4130 = vst.msk [vmem:[%s5541_s23 + $0x74] sm:$0xf] %vm4100_vm10, %v4563_v37  ;;  %4131 = vst.msk [vmem:[%s5541_s23 + $0x78] sm:$0xf] %vm4100_vm10, %v4564_v41 }
 0x270   : > { %4132 = vst.msk [vmem:[%s5541_s23 + $0x7c] sm:$0xf] %vm4100_vm10, %v4565_v32 }
 0x271 PF: > { %s14_s21 = sadd.s32 1, %s5441_s21   ;;  %s7781_s29 = sld [smem:[#allocation3_spill]] }
 0x272   : > { %p11_p3 = scmp.ge.s32.totalorder %s14_s21, 50   ;;  %s7782_s30 = sld [smem:[#allocation4_spill]] }
 0x273   : > { %s7783_s15 = smov %s5429_s18  ;;  %s7784_s16 = smov %s5433_s19 }
 0x274   : > { %s7785_s17 = smov %s5437_s20  ;;  %s7786_s18 = smov %s7790_s22 }
 0x275   :  { %13 = sbr.rel (!%p11_p3) target bundleno = 4 (0x4), region = 89 }
 0x277   : > { %s7787_s19 = smov %s7781_s29 }
 0x278   : > { %s7788_s20 = smov %s7782_s30 }

// kernel: decoder_bottleneck_forward.19
= control target key start
LH: loop header
LB: loop body
LE: loop exit
PB: predicated region body
PF: predicated region fallthrough
CT: control target
= control target key end

     0   :  { %10 = vsyncpa [#allocation4], 0  ;;  %s3524_s0 = inlined_call_operand.vmem [shape: bf16[4096,8], index: 0, kind: input, shape index: {}]   ;;  %s3525_s1 = inlined_call_operand.vmem [shape: bf16[8,32], index: 1, kind: input, shape index: {}]   ;;  %s3526_s2 = inlined_call_operand.vmem [shape: f32[1,32], index: 2, kind: input, shape index: {}]   ;;  %s3527_s3 = inlined_call_operand.vmem [shape: f32[1,32], index: 3, kind: input, shape index: {}]   ;;  %s3528_s4 = inlined_call_operand.vmem [shape: bf16[4096,32], index: 4, kind: input, shape index: {}]   ;;  %s3529_s5 = inlined_call_operand.hbm [shape: f32[4096,32], index: 5, kind: output, shape index: {}]  }
   0x1   :  { %12 = vsyncpa [#allocation4 + $0x1], 0  ;;  %s2457_s18 = smov 0   ;;  %s2459_s19 = smov 0  }
   0x2   :  { %s2461_s20 = smov 0   ;;  %s2463_s21 = smov 0  }
   0x3   :  { %s2465_s22 = smov 0   ;;  %s2467_s23 = smov 0  }
   0x4 LB: > { %s1904_s24 = sadd.s32 4294967295, %s2421_s23   ;;  %s1905_s25 = sadd.s32 4294967294, %s2421_s23   ;;  %s2421_s23 = sphi %s2467_s23, %s18_s23   ;;  %s2417_s22 = sphi %s2465_s22, %s3551_s22   ;;  %s2413_s21 = sphi %s2463_s21, %s3550_s21   ;;  %s2409_s20 = sphi %s2461_s20, %s3549_s20   ;;  %s2405_s19 = sphi %s2459_s19, %s3548_s19   ;;  %s2401_s18 = sphi %s2457_s18, %s3547_s18  }
   0x5   : > { %s37_s26 = sadd.s32 1, %s2417_s22  ;;  %s182_s27 = sadd.s32 1, %s2409_s20 }
   0x6   : > { %p39_p0 = scmp.ge.s32.totalorder %s37_s26, 8  ;;  %p192_p1 = scmp.ne.s32.totalorder %s2409_s20, %s2405_s19 }
   0x7   : > { %p193_p2 = scmp.eq.s32.totalorder %s1904_s24, 7  ;;  %p198_p3 = scmp.ne.s32.totalorder %s2405_s19, %s2401_s18 }
   0x8   : > { %s3553_s26 = smov (%p39_p0, %s37_s26), 0  ;;  %p199_p5 = scmp.eq.s32.totalorder %s1905_s25, 7 }
   0x9   : > { %p2497_p4 = por %p193_p2, %p192_p1  ;;  %s177_s29 = ssub.s32 %s2417_s22, %s3553_s26 }
   0xa   : > { %p1911_p6 = scmp.ge.s32.totalorder %s2421_s23, 1  ;;  %p180_p7 = scmp.eq.s32.totalorder %s177_s29, 0 }
   0xb   : > { %p2504_p8 = por %p199_p5, %p198_p3  ;;  %p263_p9 = scmp.lt.s32.totalorder %s2421_s23, 9 }
   0xc   : > { %s2510_s6 = scalar_select %p180_p7, %s2409_s20, %s182_s27  }
   0xd   : > { %p264_p10 = pnand %p1911_p6, %p263_p9 }
   0xe   : > { %v545_v0 = vld [vmem:[%s3525_s1] sm:$0xf] (!%p264_p10)  ;;  %vm803_vm0 = vcmask (!%p264_p10), 1043456   ;;  %s1913_s9 = sshll.u32 (!%p264_p10), %s2413_s21, 6  ;;  %vm352_vm1 = vcmask (!%p264_p10), 261120   ;;  %v2423_v2 = vmov (!%p264_p10), 0.0  }
   0xf   : > { %267 = sbr.rel (%p264_p10) target bundleno = 361 (0x169), region = 40  ;;  %2249 = vmatprep.subr.msk.bf16.mxu0 (!%p264_p10), %vm803_vm0, %v545_v0  ;;  %2250 = vmatprep.subr.msk.bf16.mxu1 (!%p264_p10), %vm803_vm0, %v545_v0  ;;  %v805_v1 = vsel (!%p264_p10), %vm803_vm0, %v545_v0, 0  ;;  %p2518_p11 = scmp.lt.s32.totalorder (!%p264_p10), %s1913_s9, 511  ;;  %355 = vst.msk [vmem:[#allocation2 + $0x10] sm:$0xff] (!%p264_p10), %vm352_vm1, %v2423_v2  ;;  %353 = vst.msk [vmem:[#allocation2] sm:$0xff] (!%p264_p10), %vm352_vm1, %v2423_v2  ;;  %vm706_vm2 = vcmask (!%p264_p10), 64512  }
  0x10   : > { %2182 = vmatpush3.bf16.msra.mxu0 (!%p264_p10), %v805_v1  ;;  %2248 = vmatpush3.bf16.msra.mxu1 (!%p264_p10), %v805_v1  ;;  %354 = vst.msk [vmem:[#allocation2 + $0x8] sm:$0xff] (!%p264_p10), %vm352_vm1, %v2423_v2  ;;  %356 = vst.msk [vmem:[#allocation2 + $0x18] sm:$0xff] (!%p264_p10), %vm352_vm1, %v2423_v2  ;;  %s312_s27 = sand.u32 (!%p264_p10), 1, %s2405_s19   ;;  %s2424_s29 = smov (!%p264_p10), [#allocation3]  }
  0x11   : > { %357 = vst.msk [vmem:[#allocation2 + $0x20] sm:$0xff] (!%p264_p10), %vm352_vm1, %v2423_v2  ;;  %358 = vst.msk [vmem:[#allocation2 + $0x28] sm:$0xff] (!%p264_p10), %vm352_vm1, %v2423_v2  ;;  %s2846_s8 = sshll.u32 (!%p264_p10), %s312_s27, 9  ;;  %s3478_s24 = scalar_lea.sflag (!%p264_p10), [#allocation4], %s312_s27 }
  0x12   : > { %359 = vst.msk [vmem:[#allocation2 + $0x30] sm:$0xff] (!%p264_p10), %vm352_vm1, %v2423_v2  ;;  %360 = vst.msk [vmem:[#allocation2 + $0x38] sm:$0xff] (!%p264_p10), %vm352_vm1, %v2423_v2  ;;  %s2347_s7 = sshll.u32 (!%p264_p10), %s2424_s29, 4  ;;  %s2348_s7 = int_to_ptr.vmem [resolvable:$false] %s2347_s7 }
  0x13   : > { %361 = vst.msk [vmem:[#allocation2 + $0x40] sm:$0xff] (!%p264_p10), %vm352_vm1, %v2423_v2  ;;  %362 = vst.msk [vmem:[#allocation2 + $0x48] sm:$0xff] (!%p264_p10), %vm352_vm1, %v2423_v2 }
  0x14   : > { %363 = vst.msk [vmem:[#allocation2 + $0x50] sm:$0xff] (!%p264_p10), %vm352_vm1, %v2423_v2  ;;  %364 = vst.msk [vmem:[#allocation2 + $0x58] sm:$0xff] (!%p264_p10), %vm352_vm1, %v2423_v2 }
  0x15   : > { %365 = vst.msk [vmem:[#allocation2 + $0x60] sm:$0xff] (!%p264_p10), %vm352_vm1, %v2423_v2  ;;  %366 = vst.msk [vmem:[#allocation2 + $0x68] sm:$0xff] (!%p264_p10), %vm352_vm1, %v2423_v2 }
  0x16   : > { %367 = vst.msk [vmem:[#allocation2 + $0x70] sm:$0xff] %vm352_vm1, %v2423_v2  ;;  %368 = vst.msk [vmem:[#allocation2 + $0x78] sm:$0xff] %vm352_vm1, %v2423_v2  ;;  %s3555_s9 = smov (!%p2518_p11, %s1913_s9), 511  ;;  %v419_v38 = vld [vmem:[#allocation2 + $0x10] sm:$0xff]  ;;  %v417_v41 = vld [vmem:[#allocation2] sm:$0xff] }
  0x17   : > { %369 = vst.msk [vmem:[#allocation2 + $0x80] sm:$0xff] %vm352_vm1, %v2423_v2  ;;  %370 = vst.msk [vmem:[#allocation2 + $0x88] sm:$0xff] %vm352_vm1, %v2423_v2  ;;  %s1914_s11 = sshll.u32 %s3555_s9, 2  ;;  %v420_v43 = vld [vmem:[#allocation2 + $0x18] sm:$0xff]  ;;  %v418_v57 = vld [vmem:[#allocation2 + $0x8] sm:$0xff]  ;;  %s2891_s9 = scalar_lea.vmem [#allocation3], %s2846_s8 }
  0x18   : > { %371 = vst.msk [vmem:[#allocation2 + $0x90] sm:$0xff] %vm352_vm1, %v2423_v2  ;;  %372 = vst.msk [vmem:[#allocation2 + $0x98] sm:$0xff] %vm352_vm1, %v2423_v2  ;;  %s2662_s14 = scalar_lea.vmem %s3524_s0, %s1914_s11  ;;  %s2733_s17 = scalar_lea.vmem %s3528_s4, %s1914_s11 }
  0x19   : > { %373 = vst.msk [vmem:[#allocation2 + $0xa0] sm:$0xff] %vm352_vm1, %v2423_v2  ;;  %374 = vst.msk [vmem:[#allocation2 + $0xa8] sm:$0xff] %vm352_vm1, %v2423_v2  ;;  %v2309_v3 = vld [vmem:[%s2662_s14] sm:$0xff]   ;;  %v2311_v5 = vld [vmem:[%s2662_s14 + $0x8] sm:$0xff]   ;;  %s1769_s15 = sshll.u32 %s2891_s9, 4  ;;  %s2349_s8 = scalar_lea.vmem %s2348_s7, 16384  ;;  %s3460_s15 = int_to_ptr.vmem [resolvable:$true] %s1769_s15 }
  0x1a   : > { %375 = vst.msk [vmem:[#allocation2 + $0xb0] sm:$0xff] %vm352_vm1, %v2423_v2  ;;  %376 = vst.msk [vmem:[#allocation2 + $0xb8] sm:$0xff] %vm352_vm1, %v2423_v2  ;;  %v2310_v4 = vld [vmem:[%s2662_s14 + $0x80] sm:$0xff]   ;;  %2183 = vmatprep.mubr.msk.bf16.mxu0 %vm706_vm2, %v2309_v3  ;;  %v2312_v6 = vld [vmem:[%s2662_s14 + $0x88] sm:$0xff]   ;;  %s2343_s25 = scalar_lea.vmem %s3460_s15, 8192  ;;  %p2350_p1 = scmp.lt.s32.totalorder %s3460_s15, %s2348_s7 }
  0x1b   : > { %377 = vst.msk [vmem:[#allocation2 + $0xc0] sm:$0xff] %vm352_vm1, %v2423_v2  ;;  %378 = vst.msk [vmem:[#allocation2 + $0xc8] sm:$0xff] %vm352_vm1, %v2423_v2  ;;  %2215 = vmatprep.mubr.msk.bf16.mxu1 %vm706_vm2, %v2310_v4  ;;  %2184 = vmatmul.mubr.msk.bf16.vlgmr.msra.gmra.mrb[0].mxu0 %vm706_vm2, %v2311_v5  ;;  %v2313_v7 = vld [vmem:[%s2662_s14 + $0x10] sm:$0xff]   ;;  %v2315_v9 = vld [vmem:[%s2662_s14 + $0x18] sm:$0xff]   ;;  %p2344_p12 = scmp.ne.s32.totalorder %s3460_s15, %s2343_s25  ;;  %p2351_p2 = scmp.lt.s32.totalorder %s2349_s8, %s2343_s25 }
  0x1c   : > { %379 = vst.msk [vmem:[#allocation2 + $0xd0] sm:$0xff] %vm352_vm1, %v2423_v2  ;;  %380 = vst.msk [vmem:[#allocation2 + $0xd8] sm:$0xff] %vm352_vm1, %v2423_v2  ;;  %2216 = vmatmul.mubr.msk.bf16.vlgmr.msra.gmra.mrb[0].mxu1 %vm706_vm2, %v2312_v6  ;;  %v2314_v8 = vld [vmem:[%s2662_s14 + $0x90] sm:$0xff]   ;;  %2187 = vmatprep.mubr.msk.bf16.mxu0 %vm706_vm2, %v2313_v7  ;;  %v2316_v10 = vld [vmem:[%s2662_s14 + $0x98] sm:$0xff]  }
  0x1d   : > { %381 = vst.msk [vmem:[#allocation2 + $0xe0] sm:$0xff] %vm352_vm1, %v2423_v2  ;;  %382 = vst.msk [vmem:[#allocation2 + $0xe8] sm:$0xff] %vm352_vm1, %v2423_v2  ;;  %2219 = vmatprep.mubr.msk.bf16.mxu1 %vm706_vm2, %v2314_v8  ;;  %v2317_v11 = vld [vmem:[%s2662_s14 + $0x20] sm:$0xff]   ;;  %v2319_v13 = vld [vmem:[%s2662_s14 + $0x28] sm:$0xff]   ;;  %p2345_p13 = pnand %p2344_p12, %p2497_p4  ;;  %p2352_p3 = por %p2351_p2, %p2350_p1 }
  0x1e   : > { %383 = vst.msk [vmem:[#allocation2 + $0xf0] sm:$0xff] %vm352_vm1, %v2423_v2  ;;  %384 = vst.msk [vmem:[#allocation2 + $0xf8] sm:$0xff] %vm352_vm1, %v2423_v2  ;;  %v2318_v12 = vld [vmem:[%s2662_s14 + $0xa0] sm:$0xff]   ;;  %v2320_v14 = vld [vmem:[%s2662_s14 + $0xa8] sm:$0xff]  }
  0x1f   : > { %385 = vst.msk [vmem:[#allocation2 + $0x100] sm:$0xff] %vm352_vm1, %v2423_v2  ;;  %386 = vst.msk [vmem:[#allocation2 + $0x108] sm:$0xff] %vm352_vm1, %v2423_v2  ;;  %v2321_v15 = vld [vmem:[%s2662_s14 + $0x30] sm:$0xff]   ;;  %v2323_v17 = vld [vmem:[%s2662_s14 + $0x38] sm:$0xff]   ;;  %p2346_p0 = pneg %p2345_p13 }
  0x20   : > { %387 = vst.msk [vmem:[#allocation2 + $0x110] sm:$0xff] %vm352_vm1, %v2423_v2  ;;  %388 = vst.msk [vmem:[#allocation2 + $0x118] sm:$0xff] %vm352_vm1, %v2423_v2  ;;  %v2322_v16 = vld [vmem:[%s2662_s14 + $0xb0] sm:$0xff]   ;;  %v2324_v18 = vld [vmem:[%s2662_s14 + $0xb8] sm:$0xff]  }
  0x21   : > { %389 = vst.msk [vmem:[#allocation2 + $0x120] sm:$0xff] %vm352_vm1, %v2423_v2  ;;  %390 = vst.msk [vmem:[#allocation2 + $0x128] sm:$0xff] %vm352_vm1, %v2423_v2  ;;  %v2325_v19 = vld [vmem:[%s2662_s14 + $0x40] sm:$0xff]   ;;  %v2327_v21 = vld [vmem:[%s2662_s14 + $0x48] sm:$0xff]   ;;  %p2353_p5 = pnand %p2352_p3, %p2346_p0 }
  0x22   : > { %391 = vst.msk [vmem:[#allocation2 + $0x130] sm:$0xff] %vm352_vm1, %v2423_v2  ;;  %392 = vst.msk [vmem:[#allocation2 + $0x138] sm:$0xff] %vm352_vm1, %v2423_v2  ;;  %v2326_v20 = vld [vmem:[%s2662_s14 + $0xc0] sm:$0xff]   ;;  %v2328_v22 = vld [vmem:[%s2662_s14 + $0xc8] sm:$0xff]  }
  0x23   : > { %393 = vst.msk [vmem:[#allocation2 + $0x140] sm:$0xff] %vm352_vm1, %v2423_v2  ;;  %394 = vst.msk [vmem:[#allocation2 + $0x148] sm:$0xff] %vm352_vm1, %v2423_v2  ;;  %2188 = vmatmul.mubr.msk.bf16.gmra.mrb[4].mxu0 %vm706_vm2, %v2315_v9  ;;  %v2329_v23 = vld [vmem:[%s2662_s14 + $0x50] sm:$0xff]   ;;  %v2331_v25 = vld [vmem:[%s2662_s14 + $0x58] sm:$0xff]  }
  0x24   : > { %395 = vst.msk [vmem:[#allocation2 + $0x150] sm:$0xff] %vm352_vm1, %v2423_v2  ;;  %396 = vst.msk [vmem:[#allocation2 + $0x158] sm:$0xff] %vm352_vm1, %v2423_v2  ;;  %2220 = vmatmul.mubr.msk.bf16.gmra.mrb[4].mxu1 %vm706_vm2, %v2316_v10  ;;  %2191 = vmatprep.mubr.msk.bf16.mxu0 %vm706_vm2, %v2317_v11  ;;  %v2330_v24 = vld [vmem:[%s2662_s14 + $0xd0] sm:$0xff]   ;;  %v2332_v26 = vld [vmem:[%s2662_s14 + $0xd8] sm:$0xff]  }
  0x25   : > { %397 = vst.msk [vmem:[#allocation2 + $0x160] sm:$0xff] %vm352_vm1, %v2423_v2  ;;  %398 = vst.msk [vmem:[#allocation2 + $0x168] sm:$0xff] %vm352_vm1, %v2423_v2  ;;  %2223 = vmatprep.mubr.msk.bf16.mxu1 %vm706_vm2, %v2318_v12  ;;  %v2333_v27 = vld [vmem:[%s2662_s14 + $0x60] sm:$0xff]   ;;  %v2335_v29 = vld [vmem:[%s2662_s14 + $0x68] sm:$0xff]  }
  0x26   : > { %399 = vst.msk [vmem:[#allocation2 + $0x170] sm:$0xff] %vm352_vm1, %v2423_v2  ;;  %400 = vst.msk [vmem:[#allocation2 + $0x178] sm:$0xff] %vm352_vm1, %v2423_v2  ;;  %v2334_v28 = vld [vmem:[%s2662_s14 + $0xe0] sm:$0xff]   ;;  %v2336_v30 = vld [vmem:[%s2662_s14 + $0xe8] sm:$0xff]  }
  0x27   : > { %401 = vst.msk [vmem:[#allocation2 + $0x180] sm:$0xff] %vm352_vm1, %v2423_v2  ;;  %402 = vst.msk [vmem:[#allocation2 + $0x188] sm:$0xff] %vm352_vm1, %v2423_v2  ;;  %v2337_v31 = vld [vmem:[%s2662_s14 + $0x70] sm:$0xff]   ;;  %v2339_v33 = vld [vmem:[%s2662_s14 + $0x78] sm:$0xff]  }
  0x28   : > { %403 = vst.msk [vmem:[#allocation2 + $0x190] sm:$0xff] %vm352_vm1, %v2423_v2  ;;  %404 = vst.msk [vmem:[#allocation2 + $0x198] sm:$0xff] %vm352_vm1, %v2423_v2  ;;  %v2338_v32 = vld [vmem:[%s2662_s14 + $0xf0] sm:$0xff]   ;;  %v2340_v34 = vld [vmem:[%s2662_s14 + $0xf8] sm:$0xff]   ;;  %s1988_s14 = sshll.u32 %s2413_s21, 13 }
  0x29   : > { %405 = vst.msk [vmem:[#allocation2 + $0x1a0] sm:$0xff] %vm352_vm1, %v2423_v2  ;;  %406 = vst.msk [vmem:[#allocation2 + $0x1a8] sm:$0xff] %vm352_vm1, %v2423_v2  ;;  %v2736_v35 = vld [vmem:[%s2733_s17 + $0x8] sm:$0xff]   ;;  %v2742_v37 = vld [vmem:[%s2733_s17] sm:$0xff]  }
  0x2a   : > { %407 = vst.msk [vmem:[#allocation2 + $0x1b0] sm:$0xff] %vm352_vm1, %v2423_v2  ;;  %408 = vst.msk [vmem:[#allocation2 + $0x1b8] sm:$0xff] %vm352_vm1, %v2423_v2  ;;  %v2739_v36 = vld [vmem:[%s2733_s17 + $0x88] sm:$0xff]   ;;  %v451_v39 = vld [vmem:[#allocation2 + $0x110] sm:$0xff]  ;;  %v1995_v45 = vunpack.c.l.bf16 %v2736_v35  ;;  %v1991_v47 = vunpack.c.l.bf16 %v2742_v37  ;;  %v1996_v55 = vunpack.c.h.bf16 %v2736_v35  ;;  %v1992_v0 = vunpack.c.h.bf16 %v2742_v37 }
  0x2b   : > { %409 = vst.msk [vmem:[#allocation2 + $0x1c0] sm:$0xff] %vm352_vm1, %v2423_v2  ;;  %410 = vst.msk [vmem:[#allocation2 + $0x1c8] sm:$0xff] %vm352_vm1, %v2423_v2  ;;  %2192 = vmatmul.mubr.msk.bf16.gmra.mrb[8].mxu0 %vm706_vm2, %v2319_v13  ;;  %v2745_v40 = vld [vmem:[%s2733_s17 + $0x80] sm:$0xff]   ;;  %v2059_v46 = vunpack.c.l.bf16 %v2739_v36  ;;  %v452_v48 = vld [vmem:[#allocation2 + $0x118] sm:$0xff]  ;;  %v2060_v56 = vunpack.c.h.bf16 %v2739_v36 }
  0x2c   : > { %411 = vst.msk [vmem:[#allocation2 + $0x1d0] sm:$0xff] %vm352_vm1, %v2423_v2  ;;  %412 = vst.msk [vmem:[#allocation2 + $0x1d8] sm:$0xff] %vm352_vm1, %v2423_v2  ;;  %2224 = vmatmul.mubr.msk.bf16.gmra.mrb[8].mxu1 %vm706_vm2, %v2320_v14  ;;  %2195 = vmatprep.mubr.msk.bf16.mxu0 %vm706_vm2, %v2321_v15  ;;  %v449_v42 = vld [vmem:[#allocation2 + $0x100] sm:$0xff]  ;;  %v2751_v49 = vld [vmem:[%s2733_s17 + $0x18] sm:$0xff]   ;;  %v2055_v54 = vunpack.c.l.bf16 %v2745_v40 }
  0x2d   : > { %413 = vst.msk [vmem:[#allocation2 + $0x1e0] sm:$0xff] %vm352_vm1, %v2423_v2  ;;  %414 = vst.msk [vmem:[#allocation2 + $0x1e8] sm:$0xff] %vm352_vm1, %v2423_v2  ;;  %2227 = vmatprep.mubr.msk.bf16.mxu1 %vm706_vm2, %v2322_v16  ;;  %v2754_v50 = vld [vmem:[%s2733_s17 + $0x98] sm:$0xff]   ;;  %v2760_v58 = vld [vmem:[%s2733_s17 + $0x10] sm:$0xff]   ;;  %v2003_v7 = vunpack.c.l.bf16 %v2751_v49 }
  0x2e   : > { %415 = vst.msk [vmem:[#allocation2 + $0x1f0] sm:$0xff] %vm352_vm1, %v2423_v2  ;;  %416 = vst.msk [vmem:[#allocation2 + $0x1f8] sm:$0xff] %vm352_vm1, %v2423_v2  ;;  %v2763_v59 = vld [vmem:[%s2733_s17 + $0x90] sm:$0xff]   ;;  %v450_v1 = vld [vmem:[#allocation2 + $0x108] sm:$0xff]  ;;  %v2056_v2 = vunpack.c.h.bf16 %v2745_v40  ;;  %v2067_v8 = vunpack.c.l.bf16 %v2754_v50  ;;  %v1999_v15 = vunpack.c.l.bf16 %v2760_v58 }
  0x2f   : > { %v2771_v9 = vld [vmem:[%s2733_s17 + $0x28] sm:$0xff]   ;;  %v2777_v11 = vld [vmem:[%s2733_s17 + $0x20] sm:$0xff]   ;;  %v2063_v16 = vunpack.c.l.bf16 %v2763_v59 }
  0x30   : > { %v2774_v10 = vld [vmem:[%s2733_s17 + $0xa8] sm:$0xff]  }
  0x33   : > { %2196 = vmatmul.mubr.msk.bf16.gmra.mrb[12].mxu0 %vm706_vm2, %v2323_v17  ;;  %v2784_v17 = vld [vmem:[%s2733_s17 + $0xa0] sm:$0xff]  }
  0x34   : > { %2228 = vmatmul.mubr.msk.bf16.gmra.mrb[12].mxu1 %vm706_vm2, %v2324_v18  ;;  %2199 = vmatprep.mubr.msk.bf16.mxu0 %vm706_vm2, %v2325_v19  ;;  %v2004_v19 = vunpack.c.h.bf16 %v2751_v49  ;;  %v431_v49 = vld [vmem:[#allocation2 + $0x70] sm:$0xff] }
  0x35   : > { %2231 = vmatprep.mubr.msk.bf16.mxu1 %vm706_vm2, %v2326_v20  ;;  %v2068_v20 = vunpack.c.h.bf16 %v2754_v50 }
  0x3b   : > { %2200 = vmatmul.mubr.msk.bf16.gmra.mrb[16].mxu0 %vm706_vm2, %v2327_v21  ;;  %v2000_v21 = vunpack.c.h.bf16 %v2760_v58 }
  0x3c   : > { %2232 = vmatmul.mubr.msk.bf16.gmra.mrb[16].mxu1 %vm706_vm2, %v2328_v22  ;;  %2203 = vmatprep.mubr.msk.bf16.mxu0 %vm706_vm2, %v2329_v23  ;;  %v2792_v22 = vld [vmem:[%s2733_s17 + $0x38] sm:$0xff]  }
  0x3d   : > { %2235 = vmatprep.mubr.msk.bf16.mxu1 %vm706_vm2, %v2330_v24  ;;  %v2795_v23 = vld [vmem:[%s2733_s17 + $0xb8] sm:$0xff]   ;;  %v2798_v24 = vld [vmem:[%s2733_s17 + $0x30] sm:$0xff]  }
  0x43   : > { %2204 = vmatmul.mubr.msk.bf16.gmra.mrb[20].mxu0 %vm706_vm2, %v2331_v25  ;;  %v423_v25 = vld [vmem:[#allocation2 + $0x30] sm:$0xff] }
  0x44   : > { %2236 = vmatmul.mubr.msk.bf16.gmra.mrb[20].mxu1 %vm706_vm2, %v2332_v26  ;;  %2207 = vmatprep.mubr.msk.bf16.mxu0 %vm706_vm2, %v2333_v27  ;;  %v2064_v26 = vunpack.c.h.bf16 %v2763_v59  ;;  %v2011_v27 = vunpack.c.l.bf16 %v2771_v9 }
  0x45   : > { %2239 = vmatprep.mubr.msk.bf16.mxu1 %vm706_vm2, %v2334_v28  ;;  %v2075_v28 = vunpack.c.l.bf16 %v2774_v10 }
  0x4b   : > { %2208 = vmatmul.mubr.msk.bf16.gmra.mrb[24].mxu0 %vm706_vm2, %v2335_v29  ;;  %v2007_v29 = vunpack.c.l.bf16 %v2777_v11 }
  0x4c   : > { %2240 = vmatmul.mubr.msk.bf16.gmra.mrb[24].mxu1 %vm706_vm2, %v2336_v30  ;;  %2211 = vmatprep.mubr.msk.bf16.mxu0 %vm706_vm2, %v2337_v31  ;;  %v2807_v30 = vld [vmem:[%s2733_s17 + $0xb0] sm:$0xff]   ;;  %v2812_v31 = vld [vmem:[%s3526_s2] ss:$0 sm:$0xff] }
  0x4d   : > { %2243 = vmatprep.mubr.msk.bf16.mxu1 %vm706_vm2, %v2338_v32  ;;  %v455_v32 = vld [vmem:[#allocation2 + $0x130] sm:$0xff] }
  0x53   : > { %2212 = vmatmul.mubr.msk.bf16.gmra.mrb[28].mxu0 %vm706_vm2, %v2339_v33  ;;  %v421_v33 = vld [vmem:[#allocation2 + $0x20] sm:$0xff] }
  0x54   : > { %2244 = vmatmul.mubr.msk.bf16.gmra.mrb[28].mxu1 %vm706_vm2, %v2340_v34  ;;  %v2071_v34 = vunpack.c.l.bf16 %v2784_v17 }
  0xee   : > { %v2185_v44 = vpop.f32.mrb[0].mxu0 }
  0xef   : > { %v1098_v51 = vadd.f32 %v2185_v44, %v419_v38  ;;  %v2217_v52 = vpop.f32.mrb[0].mxu1  ;;  %v841_v53 = vpop.f32.mrb[1].mxu0  ;;  %v424_v44 = vld [vmem:[#allocation2 + $0x38] sm:$0xff] }
  0xf0   : > { %v1130_v60 = vadd.f32 %v2217_v52, %v451_v39  ;;  %v1096_v61 = vadd.f32 %v841_v53, %v417_v41  ;;  %v969_v62 = vpop.f32.mrb[1].mxu1  ;;  %v2186_v63 = vpop.f32.mrb[2].mxu0 }
  0xf1   : > { %1163 = vst.msk [vmem:[#allocation2 + $0x10] sm:$0xff] %vm352_vm1, %v1098_v51  ;;  %v1128_v3 = vadd.f32 %v969_v62, %v449_v42  ;;  %v1099_v4 = vadd.f32 %v2186_v63, %v420_v43  ;;  %v2218_v5 = vpop.f32.mrb[2].mxu1  ;;  %v844_v6 = vpop.f32.mrb[3].mxu0  ;;  %v453_v43 = vld [vmem:[#allocation2 + $0x120] sm:$0xff]  ;;  %v456_v63 = vld [vmem:[#allocation2 + $0x138] sm:$0xff] }
  0xf2   : > { %1195 = vst.msk [vmem:[#allocation2 + $0x110] sm:$0xff] %vm352_vm1, %v1130_v60  ;;  %1161 = vst.msk [vmem:[#allocation2] sm:$0xff] %vm352_vm1, %v1096_v61  ;;  %v1131_v12 = vadd.f32 %v2218_v5, %v452_v48  ;;  %v1097_v13 = vadd.f32 %v844_v6, %v418_v57  ;;  %v972_v14 = vpop.f32.mrb[3].mxu1  ;;  %v2824_v57 = vld [vmem:[%s2733_s17 + $0x48] sm:$0xff]  }
  0xf3   : > { %1193 = vst.msk [vmem:[#allocation2 + $0x100] sm:$0xff] %vm352_vm1, %v1128_v3  ;;  %1164 = vst.msk [vmem:[#allocation2 + $0x18] sm:$0xff] %vm352_vm1, %v1099_v4  ;;  %v1129_v18 = vadd.f32 %v972_v14, %v450_v1  ;;  %v422_v1 = vld [vmem:[#allocation2 + $0x28] sm:$0xff] }
  0xf4   : > { %1196 = vst.msk [vmem:[#allocation2 + $0x118] sm:$0xff] %vm352_vm1, %v1131_v12  ;;  %1162 = vst.msk [vmem:[#allocation2 + $0x8] sm:$0xff] %vm352_vm1, %v1097_v13  ;;  %v2833_v12 = vld [vmem:[%s3527_s3] ss:$0 sm:$0xff] }
  0xf5   : > { %1194 = vst.msk [vmem:[#allocation2 + $0x108] sm:$0xff] %vm352_vm1, %v1129_v18 }
  0xf6   : > { %v2189_v42 = vpop.f32.mrb[4].mxu0 }
  0xf7   : > { %v1102_v60 = vadd.f32 %v2189_v42, %v423_v25  ;;  %v2221_v61 = vpop.f32.mrb[4].mxu1  ;;  %v857_v62 = vpop.f32.mrb[5].mxu0  ;;  %v454_v42 = vld [vmem:[#allocation2 + $0x128] sm:$0xff] }
  0xf8   : > { %v1230_v6 = vld [vmem:[#allocation2 + $0x10] sm:$0xff]  ;;  %v1134_v13 = vadd.f32 %v2221_v61, %v455_v32  ;;  %v1100_v14 = vadd.f32 %v857_v62, %v421_v33  ;;  %v985_v18 = vpop.f32.mrb[5].mxu1  ;;  %v2190_v25 = vpop.f32.mrb[6].mxu0  ;;  %v2027_v32 = vunpack.c.l.bf16 %v2824_v57 }
  0xf9   : > { %v1301_v3 = vmul.f32 %v2812_v31, %v1230_v6  ;;  %v1262_v4 = vld [vmem:[#allocation2 + $0x110] sm:$0xff]  ;;  %v1228_v51 = vld [vmem:[#allocation2] sm:$0xff]  ;;  %1167 = vst.msk [vmem:[#allocation2 + $0x30] sm:$0xff] %vm352_vm1, %v1102_v60  ;;  %v1132_v5 = vadd.f32 %v985_v18, %v453_v43  ;;  %v1103_v48 = vadd.f32 %v2190_v25, %v424_v44  ;;  %v2222_v41 = vpop.f32.mrb[6].mxu1  ;;  %v860_v39 = vpop.f32.mrb[7].mxu0 }
  0xfa   : > { %v1333_v33 = vmul.f32 %v2812_v31, %v1262_v4  ;;  %v1299_v61 = vmul.f32 %v2812_v31, %v1228_v51  ;;  %v1260_v62 = vld [vmem:[#allocation2 + $0x100] sm:$0xff]  ;;  %v1231_v53 = vld [vmem:[#allocation2 + $0x18] sm:$0xff]  ;;  %1199 = vst.msk [vmem:[#allocation2 + $0x130] sm:$0xff] %vm352_vm1, %v1134_v13  ;;  %1165 = vst.msk [vmem:[#allocation2 + $0x20] sm:$0xff] %vm352_vm1, %v1100_v14  ;;  %v1135_v6 = vadd.f32 %v2222_v41, %v456_v63  ;;  %v988_v38 = vpop.f32.mrb[7].mxu1 }
  0xfb   : > { %v1101_v52 = vadd.f32 %v860_v39, %v422_v1  ;;  %v1372_v43 = vadd.f32 %v2833_v12, %v1301_v3  ;;  %v1331_v44 = vmul.f32 %v2812_v31, %v1260_v62  ;;  %v1302_v60 = vmul.f32 %v2812_v31, %v1231_v53  ;;  %v1263_v4 = vld [vmem:[#allocation2 + $0x118] sm:$0xff]  ;;  %v1229_v51 = vld [vmem:[#allocation2 + $0x8] sm:$0xff]  ;;  %1197 = vst.msk [vmem:[#allocation2 + $0x120] sm:$0xff] %vm352_vm1, %v1132_v5 }
  0xfc   : > { %1168 = vst.msk [vmem:[#allocation2 + $0x38] sm:$0xff] %vm352_vm1, %v1103_v48  ;;  %v1133_v13 = vadd.f32 %v988_v38, %v454_v42  ;;  %v1404_v41 = vadd.f32 %v2833_v12, %v1333_v33  ;;  %v1370_v39 = vadd.f32 %v2833_v12, %v1299_v61  ;;  %v1334_v63 = vmul.f32 %v2812_v31, %v1263_v4  ;;  %v1261_v3 = vld [vmem:[#allocation2 + $0x108] sm:$0xff] }
  0xfd   : > { %v1300_v1 = vmul.f32 %v2812_v31, %v1229_v51  ;;  %1200 = vst.msk [vmem:[#allocation2 + $0x138] sm:$0xff] %vm352_vm1, %v1135_v6  ;;  %1166 = vst.msk [vmem:[#allocation2 + $0x28] sm:$0xff] %vm352_vm1, %v1101_v52  ;;  %v1564_v53 = vadd.f32 %v1995_v45, %v1372_v43  ;;  %v1402_v5 = vadd.f32 %v2833_v12, %v1331_v44 }
  0xfe   : > { %v1373_v38 = vadd.f32 %v2833_v12, %v1302_v60  ;;  %v1332_v48 = vmul.f32 %v2812_v31, %v1261_v3  ;;  %1198 = vst.msk [vmem:[#allocation2 + $0x128] sm:$0xff] %vm352_vm1, %v1133_v13  ;;  %v1596_v14 = vadd.f32 %v2059_v46, %v1404_v41  ;;  %v1562_v18 = vadd.f32 %v1991_v47, %v1370_v39  ;;  %v2871_v45 = vpop.f32.mrb[8].mxu0 }
  0xff   : > { %v1405_v25 = vadd.f32 %v2833_v12, %v1334_v63  ;;  %v1371_v52 = vadd.f32 %v2833_v12, %v1300_v1  ;;  %v1628_v42 = vmax.f32 %v1564_v53, 0.0  ;;  %v1594_v33 = vadd.f32 %v2055_v54, %v1402_v5  ;;  %v2878_v46 = vpop.f32.mrb[8].mxu1  ;;  %v2880_v6 = vpop.f32.mrb[9].mxu0 }
 0x100   : > { %v1565_v61 = vadd.f32 %v1996_v55, %v1373_v38  ;;  %v1403_v62 = vadd.f32 %v2833_v12, %v1332_v48  ;;  %v1660_v47 = vmax.f32 %v1596_v14, 0.0  ;;  %v1626_v43 = vmax.f32 %v1562_v18, 0.0  ;;  %v1234_v4 = vld [vmem:[#allocation2 + $0x30] sm:$0xff]  ;;  %v2886_v51 = vpop.f32.mrb[9].mxu1  ;;  %v2888_v54 = vpop.f32.mrb[10].mxu0 }
 0x101   : > { %v1597_v44 = vadd.f32 %v2060_v56, %v1405_v25  ;;  %v1563_v60 = vadd.f32 %v1992_v0, %v1371_v52  ;;  %1692 = vst.msk [vmem:[%s2891_s9 + $0x10] sm:$0xff] %vm352_vm1, %v1628_v42  ;;  %v1658_v35 = vmax.f32 %v1594_v33, 0.0  ;;  %v1305_v37 = vmul.f32 %v2812_v31, %v1234_v4  ;;  %v1266_v56 = vld [vmem:[#allocation2 + $0x130] sm:$0xff]  ;;  %v1232_v0 = vld [vmem:[#allocation2 + $0x20] sm:$0xff]  ;;  %v2898_v13 = vpop.f32.mrb[10].mxu1  ;;  %v2900_v41 = vpop.f32.mrb[11].mxu0 }
 0x102   : > { %v1629_v55 = vmax.f32 %v1565_v61, 0.0  ;;  %v1595_v36 = vadd.f32 %v2056_v2, %v1403_v62  ;;  %1724 = vst.msk [vmem:[%s2891_s9 + $0x110] sm:$0xff] %vm352_vm1, %v1660_v47  ;;  %1690 = vst.msk [vmem:[%s2891_s9] sm:$0xff] %vm352_vm1, %v1626_v43  ;;  %v1337_v40 = vmul.f32 %v2812_v31, %v1266_v56  ;;  %v1303_v2 = vmul.f32 %v2812_v31, %v1232_v0  ;;  %v1264_v1 = vld [vmem:[#allocation2 + $0x120] sm:$0xff]  ;;  %v2908_v53 = vpop.f32.mrb[11].mxu1  ;;  %v427_v4 = vld [vmem:[#allocation2 + $0x50] sm:$0xff] }
 0x103   : > { %v1661_v39 = vmax.f32 %v1597_v44, 0.0  ;;  %v1627_v63 = vmax.f32 %v1563_v60, 0.0  ;;  %v1235_v3 = vld [vmem:[#allocation2 + $0x38] sm:$0xff]  ;;  %1722 = vst.msk [vmem:[%s2891_s9 + $0x100] sm:$0xff] %vm352_vm1, %v1658_v35  ;;  %v1376_v38 = vadd.f32 %v2833_v12, %v1305_v37  ;;  %v1335_v48 = vmul.f32 %v2812_v31, %v1264_v1  ;;  %v459_v35 = vld [vmem:[#allocation2 + $0x150] sm:$0xff]  ;;  %v425_v0 = vld [vmem:[#allocation2 + $0x40] sm:$0xff] }
 0x104   : > { %1693 = vst.msk [vmem:[%s2891_s9 + $0x18] sm:$0xff] %vm352_vm1, %v1629_v55  ;;  %v1659_v5 = vmax.f32 %v1595_v36, 0.0  ;;  %v1306_v14 = vmul.f32 %v2812_v31, %v1235_v3  ;;  %v1267_v18 = vld [vmem:[#allocation2 + $0x138] sm:$0xff]  ;;  %v1233_v25 = vld [vmem:[#allocation2 + $0x28] sm:$0xff]  ;;  %v1408_v52 = vadd.f32 %v2833_v12, %v1337_v40  ;;  %v1374_v42 = vadd.f32 %v2833_v12, %v1303_v2 }
 0x105   : > { %1725 = vst.msk [vmem:[%s2891_s9 + $0x118] sm:$0xff] %vm352_vm1, %v1661_v39  ;;  %1691 = vst.msk [vmem:[%s2891_s9 + $0x8] sm:$0xff] %vm352_vm1, %v1627_v63  ;;  %v1338_v33 = vmul.f32 %v2812_v31, %v1267_v18  ;;  %v1304_v61 = vmul.f32 %v2812_v31, %v1233_v25  ;;  %v1265_v62 = vld [vmem:[#allocation2 + $0x128] sm:$0xff]  ;;  %v1568_v47 = vadd.f32 %v2003_v7, %v1376_v38  ;;  %v457_v7 = vld [vmem:[#allocation2 + $0x140] sm:$0xff] }
 0x106   : > { %1723 = vst.msk [vmem:[%s2891_s9 + $0x108] sm:$0xff] %vm352_vm1, %v1659_v5  ;;  %v1406_v43 = vadd.f32 %v2833_v12, %v1335_v48  ;;  %v1377_v44 = vadd.f32 %v2833_v12, %v1306_v14  ;;  %v1336_v60 = vmul.f32 %v2812_v31, %v1265_v62  ;;  %v1600_v55 = vadd.f32 %v2067_v8, %v1408_v52  ;;  %v428_v39 = vld [vmem:[#allocation2 + $0x58] sm:$0xff]  ;;  %v2197_v63 = vpop.f32.mrb[12].mxu0  ;;  %v458_v5 = vld [vmem:[#allocation2 + $0x148] sm:$0xff]  ;;  %v463_v52 = vld [vmem:[#allocation2 + $0x170] sm:$0xff] }
 0x107   : > { %v1566_v36 = vadd.f32 %v1999_v15, %v1374_v42  ;;  %v1409_v37 = vadd.f32 %v2833_v12, %v1338_v33  ;;  %v1375_v56 = vadd.f32 %v2833_v12, %v1304_v61  ;;  %v1632_v40 = vmax.f32 %v1568_v47, 0.0  ;;  %v460_v3 = vld [vmem:[#allocation2 + $0x158] sm:$0xff]  ;;  %v426_v15 = vld [vmem:[#allocation2 + $0x48] sm:$0xff]  ;;  %v2229_v38 = vpop.f32.mrb[12].mxu1  ;;  %v889_v48 = vpop.f32.mrb[13].mxu0  ;;  %v461_v47 = vld [vmem:[#allocation2 + $0x160] sm:$0xff] }
 0x108   : > { %v1598_v2 = vadd.f32 %v2063_v16, %v1406_v43  ;;  %v1569_v1 = vadd.f32 %v2004_v19, %v1377_v44  ;;  %v1407_v8 = vadd.f32 %v2833_v12, %v1336_v60  ;;  %v1664_v14 = vmax.f32 %v1600_v55, 0.0  ;;  %v1017_v19 = vpop.f32.mrb[13].mxu1  ;;  %v2198_v42 = vpop.f32.mrb[14].mxu0 }
 0x109   : > { %v1630_v18 = vmax.f32 %v1566_v36, 0.0  ;;  %v1601_v25 = vadd.f32 %v2068_v20, %v1409_v37  ;;  %v1567_v16 = vadd.f32 %v2000_v21, %v1375_v56  ;;  %1696 = vst.msk [vmem:[%s2891_s9 + $0x30] sm:$0xff] %vm352_vm1, %v1632_v40  ;;  %v1106_v50 = vadd.f32 %v2871_v45, %v427_v4  ;;  %v429_v20 = vld [vmem:[#allocation2 + $0x60] sm:$0xff]  ;;  %v2230_v58 = vpop.f32.mrb[14].mxu1  ;;  %v892_v43 = vpop.f32.mrb[15].mxu0  ;;  %v464_v45 = vld [vmem:[#allocation2 + $0x178] sm:$0xff] }
 0x10a   : > { %v1662_v33 = vmax.f32 %v1598_v2, 0.0  ;;  %v1633_v61 = vmax.f32 %v1569_v1, 0.0  ;;  %v1599_v62 = vadd.f32 %v2064_v26, %v1407_v8  ;;  %1728 = vst.msk [vmem:[%s2891_s9 + $0x130] sm:$0xff] %vm352_vm1, %v1664_v14  ;;  %v1138_v60 = vadd.f32 %v2878_v46, %v459_v35  ;;  %v432_v26 = vld [vmem:[#allocation2 + $0x78] sm:$0xff]  ;;  %v430_v4 = vld [vmem:[#allocation2 + $0x68] sm:$0xff]  ;;  %v1020_v55 = vpop.f32.mrb[15].mxu1 }
 0x10b   : > { %1694 = vst.msk [vmem:[%s2891_s9 + $0x20] sm:$0xff] %vm352_vm1, %v1630_v18  ;;  %v1665_v21 = vmax.f32 %v1601_v25, 0.0  ;;  %v1631_v44 = vmax.f32 %v1567_v16, 0.0  ;;  %v1104_v59 = vadd.f32 %v2880_v6, %v425_v0  ;;  %1171 = vst.msk [vmem:[#allocation2 + $0x50] sm:$0xff] %vm352_vm1, %v1106_v50  ;;  %v1136_v37 = vadd.f32 %v2886_v51, %v457_v7  ;;  %v462_v35 = vld [vmem:[#allocation2 + $0x168] sm:$0xff]  ;;  %v2970_v0 = vld [vmem:[%s2733_s17 + $0x40] sm:$0xff]  }
 0x10c   : > { %1726 = vst.msk [vmem:[%s2891_s9 + $0x120] sm:$0xff] %vm352_vm1, %v1662_v33  ;;  %1697 = vst.msk [vmem:[%s2891_s9 + $0x38] sm:$0xff] %vm352_vm1, %v1633_v61  ;;  %v1663_v36 = vmax.f32 %v1599_v62, 0.0  ;;  %v1107_v46 = vadd.f32 %v2888_v54, %v428_v39  ;;  %v1139_v6 = vadd.f32 %v2898_v13, %v460_v3  ;;  %v2967_v56 = vld [vmem:[%s2733_s17 + $0xc8] sm:$0xff]   ;;  %v1105_v51 = vadd.f32 %v2900_v41, %v426_v15  ;;  %v435_v13 = vld [vmem:[#allocation2 + $0x90] sm:$0xff] }
 0x10d   : > { %1729 = vst.msk [vmem:[%s2891_s9 + $0x138] sm:$0xff] %vm352_vm1, %v1665_v21  ;;  %1695 = vst.msk [vmem:[%s2891_s9 + $0x28] sm:$0xff] %vm352_vm1, %v1631_v44  ;;  %v1137_v54 = vadd.f32 %v2908_v53, %v458_v5  ;;  %v1110_v7 = vadd.f32 %v2197_v63, %v431_v49  ;;  %v1142_v39 = vadd.f32 %v2229_v38, %v463_v52  ;;  %v467_v40 = vld [vmem:[#allocation2 + $0x190] sm:$0xff]  ;;  %v2981_v2 = vld [vmem:[%s2733_s17 + $0xc0] sm:$0xff]   ;;  %v2023_v18 = vunpack.c.l.bf16 %v2970_v0 }
 0x10e   : > { %1203 = vst.msk [vmem:[#allocation2 + $0x150] sm:$0xff] %vm352_vm1, %v1138_v60  ;;  %1169 = vst.msk [vmem:[#allocation2 + $0x40] sm:$0xff] %vm352_vm1, %v1104_v59  ;;  %v1108_v1 = vadd.f32 %v889_v48, %v429_v20  ;;  %v1140_v8 = vadd.f32 %v1017_v19, %v461_v47  ;;  %v1111_v41 = vadd.f32 %v2198_v42, %v432_v26  ;;  %v433_v63 = vld [vmem:[#allocation2 + $0x80] sm:$0xff]  ;;  %v436_v15 = vld [vmem:[#allocation2 + $0x98] sm:$0xff]  ;;  %v2201_v14 = vpop.f32.mrb[16].mxu0  ;;  %v2091_v48 = vunpack.c.l.bf16 %v2967_v56 }
 0x10f   : > { %1727 = vst.msk [vmem:[%s2891_s9 + $0x128] sm:$0xff] %vm352_vm1, %v1663_v36  ;;  %1201 = vst.msk [vmem:[#allocation2 + $0x140] sm:$0xff] %vm352_vm1, %v1136_v37  ;;  %v1143_v53 = vadd.f32 %v2230_v58, %v464_v45  ;;  %v465_v3 = vld [vmem:[#allocation2 + $0x180] sm:$0xff]  ;;  %v1109_v5 = vadd.f32 %v892_v43, %v430_v4  ;;  %v1141_v38 = vadd.f32 %v1020_v55, %v462_v35  ;;  %v468_v25 = vld [vmem:[#allocation2 + $0x198] sm:$0xff]  ;;  %v2233_v19 = vpop.f32.mrb[16].mxu1  ;;  %v905_v42 = vpop.f32.mrb[17].mxu0  ;;  %v2087_v33 = vunpack.c.l.bf16 %v2981_v2 }
 0x110   : > { %1172 = vst.msk [vmem:[#allocation2 + $0x58] sm:$0xff] %vm352_vm1, %v1107_v46  ;;  %1204 = vst.msk [vmem:[#allocation2 + $0x158] sm:$0xff] %vm352_vm1, %v1139_v6  ;;  %v2995_v16 = vld [vmem:[%s2733_s17 + $0x58] sm:$0xff]   ;;  %v1114_v52 = vadd.f32 %v2201_v14, %v435_v13  ;;  %v2028_v61 = vunpack.c.h.bf16 %v2824_v57  ;;  %v2092_v62 = vunpack.c.h.bf16 %v2967_v56  ;;  %v434_v50 = vld [vmem:[#allocation2 + $0x88] sm:$0xff]  ;;  %v1146_v58 = vadd.f32 %v2233_v19, %v467_v40  ;;  %v1033_v21 = vpop.f32.mrb[17].mxu1  ;;  %v2202_v44 = vpop.f32.mrb[18].mxu0 }
 0x111   : > { %1170 = vst.msk [vmem:[#allocation2 + $0x48] sm:$0xff] %vm352_vm1, %v1105_v51  ;;  %1202 = vst.msk [vmem:[#allocation2 + $0x148] sm:$0xff] %vm352_vm1, %v1137_v54  ;;  %v2998_v49 = vld [vmem:[%s2733_s17 + $0xd8] sm:$0xff]   ;;  %v3008_v20 = vld [vmem:[%s2733_s17 + $0x50] sm:$0xff]   ;;  %v1112_v43 = vadd.f32 %v905_v42, %v433_v63  ;;  %v2024_v60 = vunpack.c.h.bf16 %v2970_v0  ;;  %v2088_v26 = vunpack.c.h.bf16 %v2981_v2  ;;  %v1144_v45 = vadd.f32 %v1033_v21, %v465_v3  ;;  %v2234_v55 = vpop.f32.mrb[18].mxu1  ;;  %v908_v36 = vpop.f32.mrb[19].mxu0 }
 0x112   : > { %1175 = vst.msk [vmem:[#allocation2 + $0x70] sm:$0xff] %vm352_vm1, %v1110_v7  ;;  %1207 = vst.msk [vmem:[#allocation2 + $0x170] sm:$0xff] %vm352_vm1, %v1142_v39  ;;  %v3011_v47 = vld [vmem:[%s2733_s17 + $0xd0] sm:$0xff]   ;;  %v466_v59 = vld [vmem:[#allocation2 + $0x188] sm:$0xff]  ;;  %v1115_v4 = vadd.f32 %v2202_v44, %v436_v15  ;;  %v2035_v37 = vunpack.c.l.bf16 %v2995_v16  ;;  %v2099_v46 = vunpack.c.l.bf16 %v2998_v49  ;;  %v1147_v35 = vadd.f32 %v2234_v55, %v468_v25  ;;  %v1036_v54 = vpop.f32.mrb[19].mxu1 }
 0x113   : > { %1173 = vst.msk [vmem:[#allocation2 + $0x60] sm:$0xff] %vm352_vm1, %v1108_v1  ;;  %1205 = vst.msk [vmem:[#allocation2 + $0x160] sm:$0xff] %vm352_vm1, %v1140_v8  ;;  %v1238_v6 = vld [vmem:[#allocation2 + $0x50] sm:$0xff]  ;;  %v1113_v51 = vadd.f32 %v908_v36, %v434_v50  ;;  %v2031_v7 = vunpack.c.l.bf16 %v3008_v20  ;;  %v2095_v39 = vunpack.c.l.bf16 %v3011_v47  ;;  %v1145_v8 = vadd.f32 %v1036_v54, %v466_v59  ;;  %v441_v56 = vld [vmem:[#allocation2 + $0xc0] sm:$0xff] }
 0x114   : > { %1176 = vst.msk [vmem:[#allocation2 + $0x78] sm:$0xff] %vm352_vm1, %v1111_v41  ;;  %1208 = vst.msk [vmem:[#allocation2 + $0x178] sm:$0xff] %vm352_vm1, %v1143_v53  ;;  %v1309_v13 = vmul.f32 %v2812_v31, %v1238_v6  ;;  %v2036_v41 = vunpack.c.h.bf16 %v2995_v16  ;;  %v2100_v53 = vunpack.c.h.bf16 %v2998_v49  ;;  %v3543_v25 = vunpack.c.h.bf16 %v2798_v24 }
 0x115   : > { %1174 = vst.msk [vmem:[#allocation2 + $0x68] sm:$0xff] %vm352_vm1, %v1109_v5  ;;  %1206 = vst.msk [vmem:[#allocation2 + $0x168] sm:$0xff] %vm352_vm1, %v1141_v38  ;;  %v1270_v40 = vld [vmem:[#allocation2 + $0x150] sm:$0xff]  ;;  %v1236_v1 = vld [vmem:[#allocation2 + $0x40] sm:$0xff] }
 0x116   : > { %1179 = vst.msk [vmem:[#allocation2 + $0x90] sm:$0xff] %vm352_vm1, %v1114_v52  ;;  %1211 = vst.msk [vmem:[#allocation2 + $0x190] sm:$0xff] %vm352_vm1, %v1146_v58  ;;  %v1341_v63 = vmul.f32 %v2812_v31, %v1270_v40  ;;  %v1307_v3 = vmul.f32 %v2812_v31, %v1236_v1  ;;  %v1268_v15 = vld [vmem:[#allocation2 + $0x140] sm:$0xff]  ;;  %v1380_v52 = vadd.f32 %v2833_v12, %v1309_v13 }
 0x117   : > { %1177 = vst.msk [vmem:[#allocation2 + $0x80] sm:$0xff] %vm352_vm1, %v1112_v43  ;;  %1209 = vst.msk [vmem:[#allocation2 + $0x180] sm:$0xff] %vm352_vm1, %v1144_v45  ;;  %v1239_v5 = vld [vmem:[#allocation2 + $0x58] sm:$0xff]  ;;  %v1339_v19 = vmul.f32 %v2812_v31, %v1268_v15 }
 0x118   : > { %1180 = vst.msk [vmem:[#allocation2 + $0x98] sm:$0xff] %vm352_vm1, %v1115_v4  ;;  %v1271_v38 = vld [vmem:[#allocation2 + $0x158] sm:$0xff]  ;;  %1212 = vst.msk [vmem:[#allocation2 + $0x198] sm:$0xff] %vm352_vm1, %v1147_v35  ;;  %v1310_v42 = vmul.f32 %v2812_v31, %v1239_v5  ;;  %v1237_v58 = vld [vmem:[#allocation2 + $0x48] sm:$0xff]  ;;  %v1412_v21 = vadd.f32 %v2833_v12, %v1341_v63  ;;  %v1378_v44 = vadd.f32 %v2833_v12, %v1307_v3  ;;  %v3044_v4 = vpop.f32.mrb[20].mxu0 }
 0x119   : > { %1178 = vst.msk [vmem:[#allocation2 + $0x88] sm:$0xff] %vm352_vm1, %v1113_v51  ;;  %v1342_v50 = vmul.f32 %v2812_v31, %v1271_v38  ;;  %v1269_v43 = vld [vmem:[#allocation2 + $0x148] sm:$0xff]  ;;  %1210 = vst.msk [vmem:[#allocation2 + $0x188] sm:$0xff] %vm352_vm1, %v1145_v8  ;;  %v1308_v59 = vmul.f32 %v2812_v31, %v1237_v58  ;;  %v1572_v55 = vadd.f32 %v2011_v27, %v1380_v52  ;;  %v3051_v51 = vpop.f32.mrb[20].mxu1  ;;  %v3053_v54 = vpop.f32.mrb[21].mxu0  ;;  %v1242_v8 = vld [vmem:[#allocation2 + $0x70] sm:$0xff]  ;;  %v3533_v38 = vunpack.c.h.bf16 %v2771_v9 }
 0x11a   : > { %v1340_v45 = vmul.f32 %v2812_v31, %v1269_v43  ;;  %v1410_v36 = vadd.f32 %v2833_v12, %v1339_v19  ;;  %v1381_v6 = vadd.f32 %v2833_v12, %v1310_v42  ;;  %v1604_v13 = vadd.f32 %v2075_v28, %v1412_v21  ;;  %v3061_v63 = vpop.f32.mrb[21].mxu1  ;;  %v3063_v3 = vpop.f32.mrb[22].mxu0  ;;  %v1274_v19 = vld [vmem:[#allocation2 + $0x170] sm:$0xff]  ;;  %v1240_v42 = vld [vmem:[#allocation2 + $0x60] sm:$0xff] }
 0x11b   : > { %v1413_v35 = vadd.f32 %v2833_v12, %v1342_v50  ;;  %v1570_v40 = vadd.f32 %v2007_v29, %v1378_v44  ;;  %v1379_v1 = vadd.f32 %v2833_v12, %v1308_v59  ;;  %v1636_v15 = vmax.f32 %v1572_v55, 0.0  ;;  %v3071_v50 = vpop.f32.mrb[22].mxu1  ;;  %v3073_v58 = vpop.f32.mrb[23].mxu0  ;;  %v1243_v55 = vld [vmem:[#allocation2 + $0x78] sm:$0xff] }
 0x11c   : > { %v1411_v27 = vadd.f32 %v2833_v12, %v1340_v45  ;;  %v1602_v5 = vadd.f32 %v2071_v34, %v1410_v36  ;;  %v1573_v28 = vadd.f32 %v3533_v38, %v1381_v6  ;;  %v3534_v52 = vunpack.c.h.bf16 %v2774_v10  ;;  %v1272_v45 = vld [vmem:[#allocation2 + $0x160] sm:$0xff]  ;;  %v1275_v10 = vld [vmem:[#allocation2 + $0x178] sm:$0xff]  ;;  %v3079_v36 = vpop.f32.mrb[23].mxu1 }
 0x11d   : > { %v1668_v43 = vmax.f32 %v1604_v13, 0.0  ;;  %v1634_v21 = vmax.f32 %v1570_v40, 0.0  ;;  %v3535_v44 = vunpack.c.h.bf16 %v2777_v11  ;;  %v3536_v34 = vunpack.c.h.bf16 %v2784_v17  ;;  %1700 = vst.msk [vmem:[%s2891_s9 + $0x50] sm:$0xff] %vm352_vm1, %v1636_v15  ;;  %v1241_v11 = vld [vmem:[#allocation2 + $0x68] sm:$0xff] }
 0x11e   : > { %v1605_v29 = vadd.f32 %v3534_v52, %v1413_v35  ;;  %v1666_v6 = vmax.f32 %v1602_v5, 0.0  ;;  %v1637_v35 = vmax.f32 %v1573_v28, 0.0  ;;  %v1313_v40 = vmul.f32 %v2812_v31, %v1242_v8  ;;  %v1273_v17 = vld [vmem:[#allocation2 + $0x168] sm:$0xff] }
 0x11f   : > { %v1571_v59 = vadd.f32 %v3535_v44, %v1379_v1  ;;  %v1603_v9 = vadd.f32 %v3536_v34, %v1411_v27  ;;  %1732 = vst.msk [vmem:[%s2891_s9 + $0x150] sm:$0xff] %vm352_vm1, %v1668_v43  ;;  %1698 = vst.msk [vmem:[%s2891_s9 + $0x40] sm:$0xff] %vm352_vm1, %v1634_v21  ;;  %v1345_v38 = vmul.f32 %v2812_v31, %v1274_v19  ;;  %v3108_v21 = vpop.f32.mrb[24].mxu0  ;;  %v3537_v44 = vunpack.c.l.bf16 %v2792_v22 }
 0x120   : > { %v1669_v13 = vmax.f32 %v1605_v29, 0.0  ;;  %v1311_v52 = vmul.f32 %v2812_v31, %v1240_v42  ;;  %1730 = vst.msk [vmem:[%s2891_s9 + $0x140] sm:$0xff] %vm352_vm1, %v1666_v6  ;;  %1701 = vst.msk [vmem:[%s2891_s9 + $0x58] sm:$0xff] %vm352_vm1, %v1637_v35  ;;  %v1384_v8 = vadd.f32 %v2833_v12, %v1313_v40  ;;  %v1343_v15 = vmul.f32 %v2812_v31, %v1272_v45 }
 0x121   : > { %v1635_v1 = vmax.f32 %v1571_v59, 0.0  ;;  %v1667_v27 = vmax.f32 %v1603_v9, 0.0  ;;  %v1314_v5 = vmul.f32 %v2812_v31, %v1243_v55  ;;  %v1346_v28 = vmul.f32 %v2812_v31, %v1275_v10  ;;  %v3115_v55 = vpop.f32.mrb[24].mxu1  ;;  %v3117_v10 = vpop.f32.mrb[25].mxu0 }
 0x122   : > { %1733 = vst.msk [vmem:[%s2891_s9 + $0x158] sm:$0xff] %vm352_vm1, %v1669_v13  ;;  %v1416_v29 = vadd.f32 %v2833_v12, %v1345_v38  ;;  %v1382_v19 = vadd.f32 %v2833_v12, %v1311_v52  ;;  %v1312_v42 = vmul.f32 %v2812_v31, %v1241_v11  ;;  %v1344_v43 = vmul.f32 %v2812_v31, %v1273_v17  ;;  %v3127_v38 = vpop.f32.mrb[26].mxu0 }
 0x123   : > { %1699 = vst.msk [vmem:[%s2891_s9 + $0x48] sm:$0xff] %vm352_vm1, %v1635_v1  ;;  %1731 = vst.msk [vmem:[%s2891_s9 + $0x148] sm:$0xff] %vm352_vm1, %v1667_v27  ;;  %v1576_v59 = vadd.f32 %v3537_v44, %v1384_v8  ;;  %v1414_v34 = vadd.f32 %v2833_v12, %v1343_v15  ;;  %v1385_v9 = vadd.f32 %v2833_v12, %v1314_v5  ;;  %v3538_v6 = vunpack.c.l.bf16 %v2795_v23  ;;  %v1246_v1 = vld [vmem:[#allocation2 + $0x90] sm:$0xff]  ;;  %v3125_v27 = vpop.f32.mrb[25].mxu1 }
 0x124   : > { %v1417_v45 = vadd.f32 %v2833_v12, %v1346_v28  ;;  %v3539_v13 = vunpack.c.l.bf16 %v2798_v24  ;;  %v1383_v11 = vadd.f32 %v2833_v12, %v1312_v42  ;;  %v1415_v17 = vadd.f32 %v2833_v12, %v1344_v43  ;;  %v1278_v44 = vld [vmem:[#allocation2 + $0x190] sm:$0xff]  ;;  %v1244_v42 = vld [vmem:[#allocation2 + $0x80] sm:$0xff]  ;;  %v3137_v43 = vpop.f32.mrb[27].mxu0  ;;  %v1245_v24 = vld [vmem:[#allocation2 + $0x88] sm:$0xff] }
 0x125   : > { %v1608_v35 = vadd.f32 %v3538_v6, %v1416_v29  ;;  %v1640_v52 = vmax.f32 %v1576_v59, 0.0  ;;  %v3540_v8 = vunpack.c.l.bf16 %v2807_v30  ;;  %v3541_v5 = vunpack.c.h.bf16 %v2792_v22  ;;  %v3135_v6 = vpop.f32.mrb[26].mxu1 }
 0x126   : > { %v1574_v40 = vadd.f32 %v3539_v13, %v1382_v19  ;;  %v3542_v29 = vunpack.c.h.bf16 %v2795_v23  ;;  %v1575_v14 = vadd.f32 %v3543_v25, %v1383_v11  ;;  %v1279_v23 = vld [vmem:[#allocation2 + $0x198] sm:$0xff] }
 0x127   : > { %v1606_v15 = vadd.f32 %v3540_v8, %v1414_v34  ;;  %v1577_v28 = vadd.f32 %v3541_v5, %v1385_v9  ;;  %v1672_v13 = vmax.f32 %v1608_v35, 0.0  ;;  %v3544_v34 = vunpack.c.h.bf16 %v2807_v30  ;;  %v1276_v9 = vld [vmem:[#allocation2 + $0x180] sm:$0xff]  ;;  %v1247_v8 = vld [vmem:[#allocation2 + $0x98] sm:$0xff]  ;;  %1704 = vst.msk [vmem:[%s2891_s9 + $0x70] sm:$0xff] %vm352_vm1, %v1640_v52  ;;  %v1277_v30 = vld [vmem:[#allocation2 + $0x188] sm:$0xff] }
 0x128   : > { %v1609_v19 = vadd.f32 %v3542_v29, %v1417_v45  ;;  %v1638_v59 = vmax.f32 %v1574_v40, 0.0  ;;  %v3143_v45 = vpop.f32.mrb[27].mxu1  ;;  %v1317_v40 = vmul.f32 %v2812_v31, %v1246_v1  ;;  %v1639_v25 = vmax.f32 %v1575_v14, 0.0 }
 0x129   : > { %v1607_v22 = vadd.f32 %v3544_v34, %v1415_v17  ;;  %v1670_v5 = vmax.f32 %v1606_v15, 0.0  ;;  %v1641_v35 = vmax.f32 %v1577_v28, 0.0  ;;  %1736 = vst.msk [vmem:[%s2891_s9 + $0x170] sm:$0xff] %vm352_vm1, %v1672_v13  ;;  %v1349_v17 = vmul.f32 %v2812_v31, %v1278_v44  ;;  %v3172_v13 = vpop.f32.mrb[28].mxu0 }
 0x12a   : > { %v1673_v29 = vmax.f32 %v1609_v19, 0.0  ;;  %1702 = vst.msk [vmem:[%s2891_s9 + $0x60] sm:$0xff] %vm352_vm1, %v1638_v59  ;;  %v1315_v34 = vmul.f32 %v2812_v31, %v1244_v42  ;;  %v1388_v1 = vadd.f32 %v2833_v12, %v1317_v40  ;;  %v1347_v52 = vmul.f32 %v2812_v31, %v1276_v9  ;;  %1703 = vst.msk [vmem:[%s2891_s9 + $0x68] sm:$0xff] %vm352_vm1, %v1639_v25  ;;  %v3181_v40 = vpop.f32.mrb[29].mxu0  ;;  %v469_v25 = vld [vmem:[#allocation2 + $0x1a0] sm:$0xff] }
 0x12b   : > { %v1671_v11 = vmax.f32 %v1607_v22, 0.0  ;;  %1734 = vst.msk [vmem:[%s2891_s9 + $0x160] sm:$0xff] %vm352_vm1, %v1670_v5  ;;  %1705 = vst.msk [vmem:[%s2891_s9 + $0x78] sm:$0xff] %vm352_vm1, %v1641_v35  ;;  %v1318_v15 = vmul.f32 %v2812_v31, %v1247_v8  ;;  %v1350_v28 = vmul.f32 %v2812_v31, %v1279_v23  ;;  %v1420_v14 = vadd.f32 %v2833_v12, %v1349_v17  ;;  %v439_v23 = vld [vmem:[#allocation2 + $0xb0] sm:$0xff]  ;;  %v437_v35 = vld [vmem:[#allocation2 + $0xa0] sm:$0xff] }
 0x12c   : > { %1737 = vst.msk [vmem:[%s2891_s9 + $0x178] sm:$0xff] %vm352_vm1, %v1673_v29  ;;  %v1386_v19 = vadd.f32 %v2833_v12, %v1315_v34  ;;  %v1316_v44 = vmul.f32 %v2812_v31, %v1245_v24  ;;  %v1348_v42 = vmul.f32 %v2812_v31, %v1277_v30  ;;  %v1580_v59 = vadd.f32 %v2027_v32, %v1388_v1  ;;  %v471_v5 = vld [vmem:[#allocation2 + $0x1b0] sm:$0xff]  ;;  %v3179_v29 = vpop.f32.mrb[28].mxu1  ;;  %v472_v17 = vld [vmem:[#allocation2 + $0x1b8] sm:$0xff]  ;;  %v3191_v1 = vpop.f32.mrb[30].mxu0 }
 0x12d   : > { %1735 = vst.msk [vmem:[%s2891_s9 + $0x168] sm:$0xff] %vm352_vm1, %v1671_v11  ;;  %v1418_v22 = vadd.f32 %v2833_v12, %v1347_v52  ;;  %v1389_v9 = vadd.f32 %v2833_v12, %v1318_v15  ;;  %v1421_v8 = vadd.f32 %v2833_v12, %v1350_v28  ;;  %v1612_v31 = vadd.f32 %v2091_v48, %v1420_v14  ;;  %v440_v11 = vld [vmem:[#allocation2 + $0xb8] sm:$0xff]  ;;  %v3189_v34 = vpop.f32.mrb[29].mxu1  ;;  %v438_v28 = vld [vmem:[#allocation2 + $0xa8] sm:$0xff]  ;;  %v443_v14 = vld [vmem:[#allocation2 + $0xd0] sm:$0xff] }
 0x12e   : > { %v1578_v24 = vadd.f32 %v2023_v18, %v1386_v19  ;;  %v1387_v32 = vadd.f32 %v2833_v12, %v1316_v44  ;;  %v1419_v30 = vadd.f32 %v2833_v12, %v1348_v42  ;;  %v1644_v52 = vmax.f32 %v1580_v59, 0.0  ;;  %v470_v12 = vld [vmem:[#allocation2 + $0x1a8] sm:$0xff]  ;;  %v3199_v19 = vpop.f32.mrb[30].mxu1  ;;  %v3201_v44 = vpop.f32.mrb[31].mxu0 }
 0x12f   : > { %v1610_v15 = vadd.f32 %v2087_v33, %v1418_v22  ;;  %v1581_v48 = vadd.f32 %v2028_v61, %v1389_v9  ;;  %v1613_v18 = vadd.f32 %v2092_v62, %v1421_v8  ;;  %v1676_v42 = vmax.f32 %v1612_v31, 0.0  ;;  %v475_v61 = vld [vmem:[#allocation2 + $0x1d0] sm:$0xff]  ;;  %v473_v62 = vld [vmem:[#allocation2 + $0x1c0] sm:$0xff]  ;;  %v3207_v22 = vpop.f32.mrb[31].mxu1 }
 0x130   : > { %v1642_v59 = vmax.f32 %v1578_v24, 0.0  ;;  %v1579_v33 = vadd.f32 %v2024_v60, %v1387_v32  ;;  %v1611_v57 = vadd.f32 %v2088_v26, %v1419_v30  ;;  %1708 = vst.msk [vmem:[%s2891_s9 + $0x90] sm:$0xff] %vm352_vm1, %v1644_v52  ;;  %v1118_v0 = vadd.f32 %v3044_v4, %v439_v23  ;;  %v444_v24 = vld [vmem:[#allocation2 + $0xd8] sm:$0xff]  ;;  %v442_v32 = vld [vmem:[#allocation2 + $0xc8] sm:$0xff] }
 0x131   : > { %v1674_v9 = vmax.f32 %v1610_v15, 0.0  ;;  %v1645_v8 = vmax.f32 %v1581_v48, 0.0  ;;  %v1677_v31 = vmax.f32 %v1613_v18, 0.0  ;;  %v476_v60 = vld [vmem:[#allocation2 + $0x1d8] sm:$0xff]  ;;  %1740 = vst.msk [vmem:[%s2891_s9 + $0x190] sm:$0xff] %vm352_vm1, %v1676_v42  ;;  %v1150_v30 = vadd.f32 %v3051_v51, %v471_v5  ;;  %v474_v15 = vld [vmem:[#allocation2 + $0x1c8] sm:$0xff] }
 0x132   : > { %1706 = vst.msk [vmem:[%s2891_s9 + $0x80] sm:$0xff] %vm352_vm1, %v1642_v59  ;;  %v1643_v2 = vmax.f32 %v1579_v33, 0.0  ;;  %v1675_v26 = vmax.f32 %v1611_v57, 0.0  ;;  %v1116_v52 = vadd.f32 %v3053_v54, %v437_v35  ;;  %v447_v48 = vld [vmem:[#allocation2 + $0xf0] sm:$0xff]  ;;  %1183 = vst.msk [vmem:[#allocation2 + $0xb0] sm:$0xff] %vm352_vm1, %v1118_v0  ;;  %v1148_v4 = vadd.f32 %v3061_v63, %v469_v25  ;;  %v445_v5 = vld [vmem:[#allocation2 + $0xe0] sm:$0xff] }
 0x133   : > { %v479_v18 = vld [vmem:[#allocation2 + $0x1f0] sm:$0xff]  ;;  %1738 = vst.msk [vmem:[%s2891_s9 + $0x180] sm:$0xff] %vm352_vm1, %v1674_v9  ;;  %1709 = vst.msk [vmem:[%s2891_s9 + $0x98] sm:$0xff] %vm352_vm1, %v1645_v8  ;;  %v1119_v23 = vadd.f32 %v3063_v3, %v440_v11  ;;  %v1151_v51 = vadd.f32 %v3071_v50, %v472_v17  ;;  %v1117_v54 = vadd.f32 %v3073_v58, %v438_v28  ;;  %v477_v35 = vld [vmem:[#allocation2 + $0x1e0] sm:$0xff] }
 0x134   : > { %1741 = vst.msk [vmem:[%s2891_s9 + $0x198] sm:$0xff] %vm352_vm1, %v1677_v31  ;;  %v448_v42 = vld [vmem:[#allocation2 + $0xf8] sm:$0xff]  ;;  %1707 = vst.msk [vmem:[%s2891_s9 + $0x88] sm:$0xff] %vm352_vm1, %v1643_v2  ;;  %v1149_v63 = vadd.f32 %v3079_v36, %v470_v12  ;;  %v1122_v3 = vadd.f32 %v3108_v21, %v443_v14  ;;  %v1154_v50 = vadd.f32 %v3115_v55, %v475_v61  ;;  %v446_v11 = vld [vmem:[#allocation2 + $0xe8] sm:$0xff] }
 0x135   : > { %1739 = vst.msk [vmem:[%s2891_s9 + $0x188] sm:$0xff] %vm352_vm1, %v1675_v26  ;;  %1215 = vst.msk [vmem:[#allocation2 + $0x1b0] sm:$0xff] %vm352_vm1, %v1150_v30  ;;  %v1120_v58 = vadd.f32 %v3117_v10, %v441_v56  ;;  %v480_v25 = vld [vmem:[#allocation2 + $0x1f8] sm:$0xff]  ;;  %v478_v17 = vld [vmem:[#allocation2 + $0x1e8] sm:$0xff]  ;;  %v1152_v55 = vadd.f32 %v3125_v27, %v473_v62  ;;  %v1123_v10 = vadd.f32 %v3127_v38, %v444_v24 }
 0x136   : > { %1181 = vst.msk [vmem:[#allocation2 + $0xa0] sm:$0xff] %vm352_vm1, %v1116_v52  ;;  %1213 = vst.msk [vmem:[#allocation2 + $0x1a0] sm:$0xff] %vm352_vm1, %v1148_v4  ;;  %v3244_v28 = vld [vmem:[%s2733_s17 + $0x68] sm:$0xff]   ;;  %v3250_v21 = vld [vmem:[%s2733_s17 + $0x60] sm:$0xff]   ;;  %v1155_v12 = vadd.f32 %v3135_v6, %v476_v60  ;;  %v1121_v14 = vadd.f32 %v3137_v43, %v442_v32  ;;  %v1153_v27 = vadd.f32 %v3143_v45, %v474_v15 }
 0x137   : > { %1184 = vst.msk [vmem:[#allocation2 + $0xb8] sm:$0xff] %vm352_vm1, %v1119_v23  ;;  %1216 = vst.msk [vmem:[#allocation2 + $0x1b8] sm:$0xff] %vm352_vm1, %v1151_v51  ;;  %v3247_v36 = vld [vmem:[%s2733_s17 + $0xe8] sm:$0xff]   ;;  %v3261_v59 = vld [vmem:[%s2733_s17 + $0xe0] sm:$0xff]   ;;  %v1126_v38 = vadd.f32 %v3172_v13, %v447_v48  ;;  %v1158_v6 = vadd.f32 %v3179_v29, %v479_v18  ;;  %v1124_v33 = vadd.f32 %v3181_v40, %v445_v5  ;;  %v2043_v56 = vunpack.c.l.bf16 %v3244_v28 }
 0x138   : > { %1182 = vst.msk [vmem:[#allocation2 + $0xa8] sm:$0xff] %vm352_vm1, %v1117_v54  ;;  %1214 = vst.msk [vmem:[#allocation2 + $0x1a8] sm:$0xff] %vm352_vm1, %v1149_v63  ;;  %v3272_v43 = vld [vmem:[%s2733_s17 + $0x78] sm:$0xff]   ;;  %v3278_v45 = vld [vmem:[%s2733_s17 + $0x70] sm:$0xff]   ;;  %v1156_v13 = vadd.f32 %v3189_v34, %v477_v35  ;;  %v1127_v29 = vadd.f32 %v3191_v1, %v448_v42  ;;  %v1159_v40 = vadd.f32 %v3199_v19, %v480_v25  ;;  %v2107_v62 = vunpack.c.l.bf16 %v3247_v36 }
 0x139   : > { %1187 = vst.msk [vmem:[#allocation2 + $0xd0] sm:$0xff] %vm352_vm1, %v1122_v3  ;;  %1219 = vst.msk [vmem:[#allocation2 + $0x1d0] sm:$0xff] %vm352_vm1, %v1154_v50  ;;  %v3275_v57 = vld [vmem:[%s2733_s17 + $0xf8] sm:$0xff]   ;;  %v1125_v61 = vadd.f32 %v3201_v44, %v446_v11  ;;  %v2039_v9 = vunpack.c.l.bf16 %v3250_v21  ;;  %v3292_v34 = vld [vmem:[%s2733_s17 + $0xf0] sm:$0xff]   ;;  %v1157_v1 = vadd.f32 %v3207_v22, %v478_v17  ;;  %v2103_v19 = vunpack.c.l.bf16 %v3261_v59  ;;  %s3458_s17 = scalar_lea.hbm %s3529_s5, %s1988_s14 }
 0x13a   : > { %1185 = vst.msk [vmem:[#allocation2 + $0xc0] sm:$0xff] %vm352_vm1, %v1120_v58  ;;  %1217 = vst.msk [vmem:[#allocation2 + $0x1c0] sm:$0xff] %vm352_vm1, %v1152_v55  ;;  %v2044_v44 = vunpack.c.h.bf16 %v3244_v28  ;;  %v2108_v8 = vunpack.c.h.bf16 %v3247_v36  ;;  %v2040_v31 = vunpack.c.h.bf16 %v3250_v21  ;;  %v1250_v0 = vld [vmem:[#allocation2 + $0xb0] sm:$0xff]  ;;  %v2104_v24 = vunpack.c.h.bf16 %v3261_v59  ;;  %v3311_v2 = vld [vmem:[%s3526_s2] ss:$0 sm:$0xff] }
 0x13b   : > { %1188 = vst.msk [vmem:[#allocation2 + $0xd8] sm:$0xff] %vm352_vm1, %v1123_v10  ;;  %1220 = vst.msk [vmem:[#allocation2 + $0x1d8] sm:$0xff] %vm352_vm1, %v1155_v12  ;;  %v2051_v22 = vunpack.c.l.bf16 %v3272_v43  ;;  %v2115_v60 = vunpack.c.l.bf16 %v3275_v57  ;;  %v2047_v32 = vunpack.c.l.bf16 %v3278_v45  ;;  %v1321_v26 = vmul.f32 %v3311_v2, %v1250_v0  ;;  %v3324_v63 = vld [vmem:[%s3527_s3] ss:$0 sm:$0xff] }
 0x13c   : > { %1186 = vst.msk [vmem:[#allocation2 + $0xc8] sm:$0xff] %vm352_vm1, %v1121_v14  ;;  %1218 = vst.msk [vmem:[#allocation2 + $0x1c8] sm:$0xff] %vm352_vm1, %v1153_v27  ;;  %v1282_v30 = vld [vmem:[#allocation2 + $0x1b0] sm:$0xff]  ;;  %v2111_v15 = vunpack.c.l.bf16 %v3292_v34  ;;  %v2052_v48 = vunpack.c.h.bf16 %v3272_v43  ;;  %v2116_v18 = vunpack.c.h.bf16 %v3275_v57  ;;  %v2048_v35 = vunpack.c.h.bf16 %v3278_v45 }
 0x13d   : > { %1191 = vst.msk [vmem:[#allocation2 + $0xf0] sm:$0xff] %vm352_vm1, %v1126_v38  ;;  %1223 = vst.msk [vmem:[#allocation2 + $0x1f0] sm:$0xff] %vm352_vm1, %v1158_v6  ;;  %v1248_v52 = vld [vmem:[#allocation2 + $0xa0] sm:$0xff]  ;;  %v1353_v4 = vmul.f32 %v3311_v2, %v1282_v30  ;;  %v2112_v42 = vunpack.c.h.bf16 %v3292_v34  ;;  %v1392_v3 = vadd.f32 %v3324_v63, %v1321_v26 }
 0x13e   : > { %1189 = vst.msk [vmem:[#allocation2 + $0xe0] sm:$0xff] %vm352_vm1, %v1124_v33  ;;  %1221 = vst.msk [vmem:[#allocation2 + $0x1e0] sm:$0xff] %vm352_vm1, %v1156_v13  ;;  %v1319_v23 = vmul.f32 %v3311_v2, %v1248_v52  ;;  %v1280_v51 = vld [vmem:[#allocation2 + $0x1a0] sm:$0xff]  ;;  %v1251_v54 = vld [vmem:[#allocation2 + $0xb8] sm:$0xff] }
 0x13f   : > { %1192 = vst.msk [vmem:[#allocation2 + $0xf8] sm:$0xff] %vm352_vm1, %v1127_v29  ;;  %1224 = vst.msk [vmem:[#allocation2 + $0x1f8] sm:$0xff] %vm352_vm1, %v1159_v40  ;;  %v1283_v5 = vld [vmem:[#allocation2 + $0x1b8] sm:$0xff]  ;;  %v1351_v50 = vmul.f32 %v3311_v2, %v1280_v51  ;;  %v1322_v58 = vmul.f32 %v3311_v2, %v1251_v54  ;;  %v1249_v11 = vld [vmem:[#allocation2 + $0xa8] sm:$0xff]  ;;  %v1424_v55 = vadd.f32 %v3324_v63, %v1353_v4  ;;  %v3546_v54 = vunpack.c.h.bf16 %v3011_v47 }
 0x140   : > { %1190 = vst.msk [vmem:[#allocation2 + $0xe8] sm:$0xff] %vm352_vm1, %v1125_v61  ;;  %1222 = vst.msk [vmem:[#allocation2 + $0x1e8] sm:$0xff] %vm352_vm1, %v1157_v1  ;;  %v1354_v25 = vmul.f32 %v3311_v2, %v1283_v5  ;;  %v1281_v17 = vld [vmem:[#allocation2 + $0x1a8] sm:$0xff]  ;;  %v1390_v10 = vadd.f32 %v3324_v63, %v1319_v23  ;;  %v1320_v12 = vmul.f32 %v3311_v2, %v1249_v11  ;;  %v1254_v1 = vld [vmem:[#allocation2 + $0xd0] sm:$0xff]  ;;  %v3545_v23 = vunpack.c.h.bf16 %v3008_v20 }
 0x141   : > { %v1352_v14 = vmul.f32 %v3311_v2, %v1281_v17  ;;  %v1584_v27 = vadd.f32 %v2035_v37, %v1392_v3  ;;  %v1422_v38 = vadd.f32 %v3324_v63, %v1351_v50  ;;  %v1393_v6 = vadd.f32 %v3324_v63, %v1322_v58  ;;  %v1252_v52 = vld [vmem:[#allocation2 + $0xc0] sm:$0xff] }
 0x142   : > { %v1425_v33 = vadd.f32 %v3324_v63, %v1354_v25  ;;  %v1616_v13 = vadd.f32 %v2099_v46, %v1424_v55  ;;  %v1582_v29 = vadd.f32 %v2031_v7, %v1390_v10  ;;  %v1391_v40 = vadd.f32 %v3324_v63, %v1320_v12  ;;  %v1286_v46 = vld [vmem:[#allocation2 + $0x1d0] sm:$0xff]  ;;  %v1284_v3 = vld [vmem:[#allocation2 + $0x1c0] sm:$0xff]  ;;  %v1287_v16 = vld [vmem:[#allocation2 + $0x1d8] sm:$0xff] }
 0x143   : > { %v1423_v61 = vadd.f32 %v3324_v63, %v1352_v14  ;;  %v1648_v0 = vmax.f32 %v1584_v27, 0.0  ;;  %v1614_v37 = vadd.f32 %v2095_v39, %v1422_v38  ;;  %v1585_v26 = vadd.f32 %v2036_v41, %v1393_v6  ;;  %v1255_v39 = vld [vmem:[#allocation2 + $0xd8] sm:$0xff]  ;;  %v1253_v58 = vld [vmem:[#allocation2 + $0xc8] sm:$0xff] }
 0x144   : > { %v1617_v30 = vadd.f32 %v2100_v53, %v1425_v33  ;;  %v1680_v7 = vmax.f32 %v1616_v13, 0.0  ;;  %v1646_v4 = vmax.f32 %v1582_v29, 0.0  ;;  %v1583_v51 = vadd.f32 %v3545_v23, %v1391_v40  ;;  %v1285_v20 = vld [vmem:[#allocation2 + $0x1c8] sm:$0xff] }
 0x145   : > { %v1615_v5 = vadd.f32 %v3546_v54, %v1423_v61  ;;  %1712 = vst.msk [vmem:[%s2891_s9 + $0xb0] sm:$0xff] %vm352_vm1, %v1648_v0  ;;  %v1678_v49 = vmax.f32 %v1614_v37, 0.0  ;;  %v1649_v41 = vmax.f32 %v1585_v26, 0.0  ;;  %v1325_v50 = vmul.f32 %v3311_v2, %v1254_v1 }
 0x146   : > { %v1681_v53 = vmax.f32 %v1617_v30, 0.0  ;;  %1744 = vst.msk [vmem:[%s2891_s9 + $0x1b0] sm:$0xff] %vm352_vm1, %v1680_v7  ;;  %1710 = vst.msk [vmem:[%s2891_s9 + $0xa0] sm:$0xff] %vm352_vm1, %v1646_v4  ;;  %v1647_v47 = vmax.f32 %v1583_v51, 0.0  ;;  %v1357_v11 = vmul.f32 %v3311_v2, %v1286_v46  ;;  %v1323_v17 = vmul.f32 %v3311_v2, %v1252_v52  ;;  %v1258_v30 = vld [vmem:[#allocation2 + $0xf0] sm:$0xff]  ;;  %v1256_v4 = vld [vmem:[#allocation2 + $0xe0] sm:$0xff] }
 0x147   : > { %v1679_v25 = vmax.f32 %v1615_v5, 0.0  ;;  %1742 = vst.msk [vmem:[%s2891_s9 + $0x1a0] sm:$0xff] %vm352_vm1, %v1678_v49  ;;  %1713 = vst.msk [vmem:[%s2891_s9 + $0xb8] sm:$0xff] %vm352_vm1, %v1649_v41  ;;  %v1396_v55 = vadd.f32 %v3324_v63, %v1325_v50  ;;  %v1355_v10 = vmul.f32 %v3311_v2, %v1284_v3  ;;  %v1326_v12 = vmul.f32 %v3311_v2, %v1255_v39  ;;  %v1288_v5 = vld [vmem:[#allocation2 + $0x1e0] sm:$0xff]  ;;  %v1291_v28 = vld [vmem:[#allocation2 + $0x1f8] sm:$0xff] }
 0x148   : > { %1745 = vst.msk [vmem:[%s2891_s9 + $0x1b8] sm:$0xff] %vm352_vm1, %v1681_v53  ;;  %v1358_v14 = vmul.f32 %v3311_v2, %v1287_v16  ;;  %1711 = vst.msk [vmem:[%s2891_s9 + $0xa8] sm:$0xff] %vm352_vm1, %v1647_v47  ;;  %v1428_v27 = vadd.f32 %v3324_v63, %v1357_v11  ;;  %v1394_v38 = vadd.f32 %v3324_v63, %v1323_v17  ;;  %v1257_v39 = vld [vmem:[#allocation2 + $0xe8] sm:$0xff] }
 0x149   : > { %1743 = vst.msk [vmem:[%s2891_s9 + $0x1a8] sm:$0xff] %vm352_vm1, %v1679_v25  ;;  %v1324_v6 = vmul.f32 %v3311_v2, %v1253_v58  ;;  %v1356_v33 = vmul.f32 %v3311_v2, %v1285_v20  ;;  %v1588_v13 = vadd.f32 %v2043_v56, %v1396_v55  ;;  %v1426_v29 = vadd.f32 %v3324_v63, %v1355_v10  ;;  %v1289_v21 = vld [vmem:[#allocation2 + $0x1e8] sm:$0xff] }
 0x14a   : > { %v1397_v40 = vadd.f32 %v3324_v63, %v1326_v12  ;;  %v1429_v61 = vadd.f32 %v3324_v63, %v1358_v14  ;;  %v1620_v1 = vadd.f32 %v2107_v62, %v1428_v27  ;;  %v1586_v0 = vadd.f32 %v2039_v9, %v1394_v38  ;;  %v1290_v62 = vld [vmem:[#allocation2 + $0x1f0] sm:$0xff] }
 0x14b   : > { %v1395_v37 = vadd.f32 %v3324_v63, %v1324_v6  ;;  %v1427_v26 = vadd.f32 %v3324_v63, %v1356_v33  ;;  %v1652_v46 = vmax.f32 %v1588_v13, 0.0  ;;  %v1618_v56 = vadd.f32 %v2103_v19, %v1426_v29  ;;  %v1259_v19 = vld [vmem:[#allocation2 + $0xf8] sm:$0xff] }
 0x14c   : > { %v1589_v52 = vadd.f32 %v2044_v44, %v1397_v40  ;;  %v1621_v7 = vadd.f32 %v2108_v8, %v1429_v61  ;;  %v1684_v9 = vmax.f32 %v1620_v1, 0.0  ;;  %v1650_v23 = vmax.f32 %v1586_v0, 0.0 }
 0x14d   : > { %v1587_v51 = vadd.f32 %v2040_v31, %v1395_v37  ;;  %v1619_v54 = vadd.f32 %v2104_v24, %v1427_v26  ;;  %1716 = vst.msk [vmem:[%s2891_s9 + $0xd0] sm:$0xff] %vm352_vm1, %v1652_v46  ;;  %v1682_v36 = vmax.f32 %v1618_v56, 0.0  ;;  %v1329_v3 = vmul.f32 %v3311_v2, %v1258_v30 }
 0x14e   : > { %v1653_v44 = vmax.f32 %v1589_v52, 0.0  ;;  %v1685_v8 = vmax.f32 %v1621_v7, 0.0  ;;  %1748 = vst.msk [vmem:[%s2891_s9 + $0x1d0] sm:$0xff] %vm352_vm1, %v1684_v9  ;;  %1714 = vst.msk [vmem:[%s2891_s9 + $0xc0] sm:$0xff] %vm352_vm1, %v1650_v23  ;;  %v1361_v24 = vmul.f32 %v3311_v2, %v1290_v62  ;;  %v1327_v16 = vmul.f32 %v3311_v2, %v1256_v4 }
 0x14f   : > { %v1651_v59 = vmax.f32 %v1587_v51, 0.0  ;;  %v1683_v31 = vmax.f32 %v1619_v54, 0.0  ;;  %1746 = vst.msk [vmem:[%s2891_s9 + $0x1c0] sm:$0xff] %vm352_vm1, %v1682_v36  ;;  %v1400_v49 = vadd.f32 %v3324_v63, %v1329_v3  ;;  %v1359_v41 = vmul.f32 %v3311_v2, %v1288_v5 }
 0x150   : > { %1717 = vst.msk [vmem:[%s2891_s9 + $0xd8] sm:$0xff] %vm352_vm1, %v1653_v44  ;;  %1749 = vst.msk [vmem:[%s2891_s9 + $0x1d8] sm:$0xff] %vm352_vm1, %v1685_v8  ;;  %v1330_v53 = vmul.f32 %v3311_v2, %v1259_v19  ;;  %v1362_v50 = vmul.f32 %v3311_v2, %v1291_v28  ;;  %v1432_v58 = vadd.f32 %v3324_v63, %v1361_v24 }
 0x151   : > { %1715 = vst.msk [vmem:[%s2891_s9 + $0xc8] sm:$0xff] %vm352_vm1, %v1651_v59  ;;  %1747 = vst.msk [vmem:[%s2891_s9 + $0x1c8] sm:$0xff] %vm352_vm1, %v1683_v31  ;;  %v1398_v20 = vadd.f32 %v3324_v63, %v1327_v16  ;;  %v1328_v47 = vmul.f32 %v3311_v2, %v1257_v39  ;;  %v1360_v25 = vmul.f32 %v3311_v2, %v1289_v21 }
 0x152   : > { %v1592_v11 = vadd.f32 %v2051_v22, %v1400_v49  ;;  %v1430_v17 = vadd.f32 %v3324_v63, %v1359_v41  ;;  %v1401_v55 = vadd.f32 %v3324_v63, %v1330_v53  ;;  %v1433_v10 = vadd.f32 %v3324_v63, %v1362_v50 }
 0x153   : > { %v1624_v12 = vadd.f32 %v2115_v60, %v1432_v58  ;;  %v1590_v14 = vadd.f32 %v2047_v32, %v1398_v20  ;;  %v1399_v27 = vadd.f32 %v3324_v63, %v1328_v47  ;;  %v1431_v2 = vadd.f32 %v3324_v63, %v1360_v25 }
 0x154   : > { %v1656_v22 = vmax.f32 %v1592_v11, 0.0  ;;  %v1622_v38 = vadd.f32 %v2111_v15, %v1430_v17  ;;  %v1593_v6 = vadd.f32 %v2052_v48, %v1401_v55  ;;  %v1625_v60 = vadd.f32 %v2116_v18, %v1433_v10 }
 0x155   : > { %v1688_v32 = vmax.f32 %v1624_v12, 0.0  ;;  %v1654_v33 = vmax.f32 %v1590_v14, 0.0  ;;  %v1591_v63 = vadd.f32 %v2048_v35, %v1399_v27  ;;  %v1623_v13 = vadd.f32 %v2112_v42, %v1431_v2 }
 0x156   : > { %1720 = vst.msk [vmem:[%s2891_s9 + $0xf0] sm:$0xff] %vm352_vm1, %v1656_v22  ;;  %v1686_v43 = vmax.f32 %v1622_v38, 0.0  ;;  %v1657_v15 = vmax.f32 %v1593_v6, 0.0  ;;  %v1689_v57 = vmax.f32 %v1625_v60, 0.0 }
 0x157   : > { %1752 = vst.msk [vmem:[%s2891_s9 + $0x1f0] sm:$0xff] %vm352_vm1, %v1688_v32  ;;  %1718 = vst.msk [vmem:[%s2891_s9 + $0xe0] sm:$0xff] %vm352_vm1, %v1654_v33  ;;  %v1655_v45 = vmax.f32 %v1591_v63, 0.0  ;;  %v1687_v34 = vmax.f32 %v1623_v13, 0.0 }
 0x158   : > { %1750 = vst.msk [vmem:[%s2891_s9 + $0x1e0] sm:$0xff] %vm352_vm1, %v1686_v43  ;;  %1721 = vst.msk [vmem:[%s2891_s9 + $0xf8] sm:$0xff] %vm352_vm1, %v1657_v15 }
 0x159   : > { %1753 = vst.msk [vmem:[%s2891_s9 + $0x1f8] sm:$0xff] %vm352_vm1, %v1689_v57  ;;  %1719 = vst.msk [vmem:[%s2891_s9 + $0xe8] sm:$0xff] %vm352_vm1, %v1655_v45 }
 0x15a   : > { %1751 = vst.msk [vmem:[%s2891_s9 + $0x1e8] sm:$0xff] %vm352_vm1, %v1687_v34 }
 0x15b   : > { %2356 = shalt.err (!%p2353_p5)
}
 0x15c   : > { %s2357_s27 = scalar_lea.hbm %s3458_s17, 8192  ;;  %s2361_s11 = scalar_lea.hbm %s3529_s5, 65536 }
 0x15d   : > { %p2358_p6 = scmp.ne.s32.totalorder %s3458_s17, %s2357_s27  ;;  %p2362_p10 = scmp.lt.u32.totalorder %s3458_s17, %s3529_s5 }
 0x15e   : > { %p2363_p11 = scmp.lt.u32.totalorder %s2361_s11, %s2357_s27  ;;  %p2365_p13 = scmp.lt.u32.totalorder %s2357_s27, %s3458_s17 }
 0x15f   : > { %p2359_p7 = pnand %p2358_p6, %p2497_p4 }
 0x160   : > { %p2364_p12 = por %p2363_p11, %p2362_p10 }
 0x161   : > { %p2360_p9 = pneg %p2359_p7 }
 0x162   : > { %p2366_p0 = por %p2365_p13, %p2364_p12 }
 0x164   : > { %p2367_p1 = pnand %p2366_p0, %p2360_p9 }
 0x166   : > { %2370 = shalt.err (!%p2367_p1)
}
 0x167   : > { %s2425_s14 = smov 128   ;;  %s2426_s21 = smov 8  }
 0x168   : > { %2251 = dma.vmem_to_hbm [thread:$0]  (%p2497_p4), %s3460_s15, 8192, %s3458_s17, %s3478_s24, %s2425_s14, %s2425_s14, %s2426_s21  }
 0x169 PF: > { %p2257_p2 = scmp.ge.s32.totalorder %s2421_s23, 2  ;;  %s1784_s16 = sand.u32 1, %s2401_s18  }
 0x16a   : > { %s1785_s25 = scalar_lea.sflag [#allocation4], %s1784_s16 }
 0x16b   : > { %p2254_p3 = pnand %p2257_p2, %p2504_p8 }
 0x16d   : > { %2396 = dma.done.wait (!%p2254_p3), %s1785_s25, 8192  }
 0x16e   : > { %2398 = vsyncadd (!%p2254_p3), %s1785_s25, 4294959104  ;;  %s18_s23 = sadd.s32 1, %s2421_s23   ;;  %s3547_s18 = smov %s2405_s19 }
 0x16f   : > { %p15_p5 = scmp.ge.s32.totalorder %s18_s23, 10   ;;  %s3548_s19 = smov %s2409_s20 }
 0x170   : > { %s3549_s20 = smov %s2510_s6  ;;  %s3550_s21 = smov %s2417_s22 }
 0x171   : > { %s3551_s22 = smov %s3553_s26  ;;  %17 = sbr.rel (!%p15_p5) target bundleno = 4 (0x4), region = 95 }
 0x178   :  { %1790 = vsyncpa [#allocation4], 1 }
 0x179   :  { %1792 = vsyncpa [#allocation4 + $0x1], 1 }

</bundles_post_ra>
